<compile_context>
chip_gen: v7x
topology: tpu7x:2x2x1
jax: 0.10.0
libtpu: 0.0.40
codegen_flags: <defaults>
</compile_context>

<pallas_src>
import jax
import jax.numpy as jnp
from jax.experimental import pallas as pl
from jax.experimental.pallas import tpu as pltpu


def _make_kernel(apply_sub_relu: bool):
    """Kernel body on a (Cb, H, W) block; softmax over axis=1 (the H axis)."""

    def kernel(x_ref, o_ref):
        x = x_ref[...]                                   # (Cb, H, W)
        m = jnp.max(x, axis=1, keepdims=True)            # (Cb, 1, W)
        e = jnp.exp(x - m)                               # (Cb, H, W)
        s = jnp.sum(e, axis=1, keepdims=True)            # (Cb, 1, W)
        sm = e * pl.reciprocal(s, approx=True)           # softmax over H
        if apply_sub_relu:
            sm = jnp.maximum(sm - 192.0, 0.0)
        o_ref[...] = sm.astype(o_ref.dtype)

    return kernel


def _num_tensorcores() -> int:
    """Best-effort count of TensorCores behind one JAX device (megacore)."""
    try:
        kind = jax.devices()[0].device_kind.lower()
    except Exception:
        return 1
    # v7x exposes 2 TensorCores per chip; v5e/v6e are single-TC.
    return 2 if "v7" in kind else 1


def _pick_num_blocks(C: int) -> int:
    n_tc = _num_tensorcores()
    if n_tc >= 2 and C % 2 == 0 and C >= 2:
        return 2   # even 2-way split -> balanced across the megacore
    return 1       # single TC: one big block, no per-step overhead


def _softmax_pipeline(x1: jax.Array, apply_sub_relu: bool = True) -> jax.Array:
    """relu(softmax(x1, dim=2) - 192).squeeze(0);  (1,C,H,W) -> (C,H,W)."""
    N, C, H, W = x1.shape
    assert N == 1, "torch.squeeze(v3, 0) semantics require batch dim == 1"

    # Free (metadata-only) reshape: (1,C,H,W) -> (C,H,W).  No transpose/pad.
    x = x1.reshape(C, H, W)

    n_blocks = _pick_num_blocks(C)
    cb = C // n_blocks

    out = pl.pallas_call(
        _make_kernel(apply_sub_relu),
        out_shape=jax.ShapeDtypeStruct((C, H, W), x1.dtype),
        grid_spec=pltpu.PrefetchScalarGridSpec(
            num_scalar_prefetch=0,
            grid=(n_blocks,),
            # Last two block dims equal the full array dims (H, W), so the
            # (8,128) divisibility constraint does not apply.
            in_specs=[pl.BlockSpec((cb, H, W), lambda i: (i, 0, 0))],
            out_specs=pl.BlockSpec((cb, H, W), lambda i: (i, 0, 0)),
        ),
        compiler_params=pltpu.CompilerParams(
            dimension_semantics=("parallel",),
        ),
    )(x)
    return out


def softmax_sub_relu(x1: jax.Array) -> jax.Array:
    return _softmax_pipeline(x1, apply_sub_relu=True)


if __name__ == "__main__":
    key = jax.random.PRNGKey(0)
    # Small shape consistent with the module's (1, 192, 35, 45) input; C=64 is
    # even so the 2-block megacore path is exercised on v7x, and H=35 / W=45
    # keep the non-lane-aligned layout of the real problem.
    x1 = jax.random.normal(key, (1, 64, 35, 45), dtype=jnp.float32)

    out = jax.block_until_ready(softmax_sub_relu(x1))

    # Full-pipeline reference (identically zero, but compare anyway).
    ref = jnp.maximum(jax.nn.softmax(x1, axis=2) - 192.0, 0.0)[0]
    assert out.shape == ref.shape == (64, 35, 45)
    assert jnp.allclose(out, ref, atol=1e-6), "mismatch vs full pipeline"

    # Validate the softmax itself (v1) so layout/axis bugs aren't masked by
    # the all-zero final output.  Looser tolerance: approx reciprocal on EUP.
    sm = jax.block_until_ready(_softmax_pipeline(x1, apply_sub_relu=False))
    sm_ref = jax.nn.softmax(x1, axis=2)[0]
    assert jnp.allclose(sm, sm_ref, atol=2e-3), "softmax mismatch vs reference"

    print("KERNEL_OK")
</pallas_src>

<mosaic_0001>
module attributes {stable_mosaic.version = 11 : i64} {
  func.func @kernel(%arg0: i32, %arg1: memref<64x35x45xf32, #tpu.memory_space<vmem>>, %arg2: memref<64x35x45xf32, #tpu.memory_space<vmem>>) attributes {dimension_semantics = [#tpu.dimension_semantics<parallel>], iteration_bounds = array<i64: 1>, scalar_prefetch = 0 : i64, scratch_operands = 0 : i64, tpu.core_type = #tpu.core_type<tc>, window_params = [{transform_indices = @transform_0, window_bounds = array<i64: 64, 35, 45>}, {transform_indices = @transform_1, window_bounds = array<i64: 64, 35, 45>}]} {
    %c0 = arith.constant 0 : index
    %c0_0 = arith.constant 0 : index
    %c0_1 = arith.constant 0 : index
    %0 = vector.load %arg1[%c0, %c0_0, %c0_1] : memref<64x35x45xf32, #tpu.memory_space<vmem>>, vector<64x35x45xf32>
    %cst = arith.constant dense<0xFF800000> : vector<64x45xf32>
    %1 = vector.multi_reduction <maximumf>, %0, %cst [1] : vector<64x35x45xf32> to vector<64x45xf32>
    %2 = vector.shape_cast %1 : vector<64x45xf32> to vector<64x1x45xf32>
    %3 = vector.broadcast %2 : vector<64x1x45xf32> to vector<64x35x45xf32>
    %4 = arith.subf %0, %3 : vector<64x35x45xf32>
    %5 = math.exp %4 : vector<64x35x45xf32>
    %cst_2 = arith.constant dense<0.000000e+00> : vector<64x45xf32>
    %6 = vector.multi_reduction <add>, %5, %cst_2 [1] : vector<64x35x45xf32> to vector<64x45xf32>
    %7 = vector.shape_cast %6 : vector<64x45xf32> to vector<64x1x45xf32>
    %8 = tpu.reciprocal %7 {approx = true} : vector<64x1x45xf32> -> vector<64x1x45xf32>
    %9 = vector.broadcast %8 : vector<64x1x45xf32> to vector<64x35x45xf32>
    %10 = arith.mulf %5, %9 : vector<64x35x45xf32>
    %cst_3 = arith.constant 1.920000e+02 : f32
    %11 = vector.broadcast %cst_3 : f32 to vector<64x35x45xf32>
    %12 = arith.subf %10, %11 : vector<64x35x45xf32>
    %cst_4 = arith.constant 0.000000e+00 : f32
    %13 = vector.broadcast %cst_4 : f32 to vector<64x35x45xf32>
    %14 = arith.maximumf %12, %13 : vector<64x35x45xf32>
    %c0_5 = arith.constant 0 : index
    %c0_6 = arith.constant 0 : index
    %c0_7 = arith.constant 0 : index
    %15 = vector.load %arg2[%c0_5, %c0_6, %c0_7] : memref<64x35x45xf32, #tpu.memory_space<vmem>>, vector<64x35x45xf32>
    tpu.vector_store %arg2[%c0_5, %c0_6, %c0_7], %14 {strides = array<i32>} : memref<64x35x45xf32, #tpu.memory_space<vmem>>, vector<64x35x45xf32>,
    return
  }
  func.func @transform_0(%arg0: i32) -> (i32, i32, i32) {
    %c0_i32 = arith.constant 0 : i32
    %c0_i32_0 = arith.constant 0 : i32
    %c0_i32_1 = arith.constant 0 : i32
    return %arg0, %c0_i32, %c0_i32_0 : i32, i32, i32
  }
  func.func @transform_1(%arg0: i32) -> (i32, i32, i32) {
    %c0_i32 = arith.constant 0 : i32
    %c0_i32_0 = arith.constant 0 : i32
    %c0_i32_1 = arith.constant 0 : i32
    return %arg0, %c0_i32, %c0_i32_0 : i32, i32, i32
  }
}

</mosaic_0001>

<bundles_post_ra>
// kernel: tpu_custom_call.1
= control target key start
LH: loop header
LB: loop body
LE: loop exit
PB: predicated region body
PF: predicated region fallthrough
CT: control target
= control target key end

     0   :  { %vm328_vm0 = vcmask 367616   ;;  %vm336_vm1 = vcmask 362496   ;;  %s11637_s0 = inlined_call_operand.vmem [shape: f32[64,35,45], index: 0, kind: input, shape index: {}]   ;;  %s11638_s1 = inlined_call_operand.vmem [shape: f32[64,35,45], index: 1, kind: output, shape index: {}]  }
   0x1   :  { %v5659_v0 = vld [vmem:[%s11637_s0] sm:$0xff]  ;;  %v5664_v1 = vld [vmem:[%s11637_s0 + $0x8] sm:$0xff]  ;;  %v5669_v2 = vld [vmem:[%s11637_s0 + $0x10] sm:$0xff] }
   0x2   :  { %v5674_v3 = vld [vmem:[%s11637_s0 + $0x18] sm:$0xff]  ;;  %v5679_v4 = vld [vmem:[%s11637_s0 + $0x20] sm:$0x7]  ;;  %v329_v5 = vsel %vm328_vm0, %v5659_v0, -inf  ;;  %v330_v6 = vsel %vm328_vm0, %v5664_v1, -inf  ;;  %v332_v7 = vsel %vm328_vm0, %v5669_v2, -inf }
   0x3   :  { %v331_v8 = vmax.f32 %v329_v5, %v330_v6  ;;  %v334_v9 = vsel %vm328_vm0, %v5674_v3, -inf  ;;  %v5692_v10 = vld [vmem:[%s11637_s0 + $0x28] sm:$0xff]  ;;  %v5697_v11 = vld [vmem:[%s11637_s0 + $0x30] sm:$0xff]  ;;  %v5702_v12 = vld [vmem:[%s11637_s0 + $0x38] sm:$0xff]  ;;  %v337_v19 = vsel %vm336_vm1, %v5679_v4, -inf }
   0x4   :  { %v5707_v13 = vld [vmem:[%s11637_s0 + $0x40] sm:$0xff]  ;;  %v5712_v14 = vld [vmem:[%s11637_s0 + $0x48] sm:$0x7]  ;;  %v345_v15 = vsel %vm328_vm0, %v5692_v10, -inf  ;;  %v346_v16 = vsel %vm328_vm0, %v5697_v11, -inf  ;;  %v348_v17 = vsel %vm328_vm0, %v5702_v12, -inf }
   0x5   :  { %v333_v18 = vmax.f32 %v331_v8, %v332_v7  ;;  %v347_v20 = vmax.f32 %v345_v15, %v346_v16  ;;  %v350_v21 = vsel %vm328_vm0, %v5707_v13, -inf  ;;  %v5727_v22 = vld [vmem:[%s11637_s0 + $0x50] sm:$0xff]  ;;  %v5732_v23 = vld [vmem:[%s11637_s0 + $0x58] sm:$0xff]  ;;  %v5737_v24 = vld [vmem:[%s11637_s0 + $0x60] sm:$0xff]  ;;  %v352_v32 = vsel %vm336_vm1, %v5712_v14, -inf }
   0x6   :  { %v5742_v25 = vld [vmem:[%s11637_s0 + $0x68] sm:$0xff]  ;;  %v5747_v26 = vld [vmem:[%s11637_s0 + $0x70] sm:$0x7]  ;;  %v360_v27 = vsel %vm328_vm0, %v5727_v22, -inf  ;;  %v361_v28 = vsel %vm328_vm0, %v5732_v23, -inf  ;;  %v363_v29 = vsel %vm328_vm0, %v5737_v24, -inf }
   0x7   :  { %v335_v30 = vmax.f32 %v333_v18, %v334_v9  ;;  %v349_v31 = vmax.f32 %v347_v20, %v348_v17  ;;  %v362_v33 = vmax.f32 %v360_v27, %v361_v28  ;;  %v5760_v34 = vld [vmem:[%s11637_s0 + $0x78] sm:$0xff]  ;;  %v5765_v35 = vld [vmem:[%s11637_s0 + $0x80] sm:$0xff]  ;;  %v5770_v36 = vld [vmem:[%s11637_s0 + $0x88] sm:$0xff]  ;;  %v365_v37 = vsel %vm328_vm0, %v5742_v25, -inf }
   0x8   :  { %v5777_v38 = vld [vmem:[%s11637_s0 + $0x90] sm:$0xff]  ;;  %v5782_v39 = vld [vmem:[%s11637_s0 + $0x98] sm:$0x7]  ;;  %v375_v40 = vsel %vm328_vm0, %v5760_v34, -inf  ;;  %v376_v41 = vsel %vm328_vm0, %v5765_v35, -inf  ;;  %v5791_v46 = vld [vmem:[%s11637_s0 + $0xa0] sm:$0xff] }
   0x9   :  { %v338_v42 = vmax.f32 %v335_v30, %v337_v19  ;;  %v351_v43 = vmax.f32 %v349_v31, %v350_v21  ;;  %v364_v44 = vmax.f32 %v362_v33, %v363_v29  ;;  %v377_v45 = vmax.f32 %v375_v40, %v376_v41  ;;  %v5796_v47 = vld [vmem:[%s11637_s0 + $0xa8] sm:$0xff]  ;;  %v5801_v48 = vld [vmem:[%s11637_s0 + $0xb0] sm:$0xff]  ;;  %v5814_v53 = vld [vmem:[%s11637_s0 + $0xb8] sm:$0xff] }
   0xa   :  { %v367_v49 = vsel %vm336_vm1, %v5747_v26, -inf  ;;  %v378_v50 = vsel %vm328_vm0, %v5770_v36, -inf  ;;  %v380_v51 = vsel %vm328_vm0, %v5777_v38, -inf  ;;  %v382_v52 = vsel %vm336_vm1, %v5782_v39, -inf  ;;  %v5819_v58 = vld [vmem:[%s11637_s0 + $0xc0] sm:$0x7] }
   0xb   :  { %v339_v54 = vrot.slane %v338_v42, 4  ;;  %v353_v55 = vmax.f32 %v351_v43, %v352_v32  ;;  %v366_v56 = vmax.f32 %v364_v44, %v365_v37  ;;  %v379_v57 = vmax.f32 %v377_v45, %v378_v50  ;;  %v5824_v59 = vld [vmem:[%s11637_s0 + $0xc8] sm:$0xff]  ;;  %v5829_v60 = vld [vmem:[%s11637_s0 + $0xd0] sm:$0xff]  ;;  %v5842_v15 = vld [vmem:[%s11637_s0 + $0xd8] sm:$0xff] }
   0xc   :  { %v390_v61 = vsel %vm328_vm0, %v5791_v46, -inf  ;;  %v391_v62 = vsel %vm328_vm0, %v5796_v47, -inf  ;;  %v393_v63 = vsel %vm328_vm0, %v5801_v48, -inf  ;;  %v395_v5 = vsel %vm328_vm0, %v5814_v53, -inf  ;;  %v5847_v16 = vld [vmem:[%s11637_s0 + $0xe0] sm:$0xff]  ;;  %v5863_v31 = vld [vmem:[%s11637_s0 + $0xf0] sm:$0xff] }
   0xd   :  { %v340_v6 = vmax.f32 %v338_v42, %v339_v54  ;;  %v354_v7 = vrot.slane %v353_v55, 4  ;;  %v368_v8 = vmax.f32 %v366_v56, %v367_v49  ;;  %v381_v9 = vmax.f32 %v379_v57, %v380_v51  ;;  %v5858_v30 = vld [vmem:[%s11637_s0 + $0xe8] sm:$0x7]  ;;  %v5872_v45 = vld [vmem:[%s11637_s0 + $0xf8] sm:$0xff]  ;;  %v5877_v49 = vld [vmem:[%s11637_s0 + $0x100] sm:$0xff] }
   0xe   :  { %v392_v17 = vmax.f32 %v390_v61, %v391_v62  ;;  %v397_v18 = vsel %vm336_vm1, %v5819_v58, -inf  ;;  %v405_v19 = vsel %vm328_vm0, %v5824_v59, -inf  ;;  %v406_v20 = vsel %vm328_vm0, %v5829_v60, -inf  ;;  %v5888_v62 = vld [vmem:[%s11637_s0 + $0x108] sm:$0xff] }
   0xf   :  { %v341_v21 = vrot.slane %v340_v6, 2  ;;  %v355_v27 = vmax.f32 %v353_v55, %v354_v7  ;;  %v369_v28 = vrot.slane %v368_v8, 4  ;;  %v383_v29 = vmax.f32 %v381_v9, %v382_v52 }
  0x10   :  { %v394_v32 = vmax.f32 %v392_v17, %v393_v63  ;;  %v407_v33 = vmax.f32 %v405_v19, %v406_v20  ;;  %v408_v37 = vsel %vm328_vm0, %v5842_v15, -inf  ;;  %v410_v40 = vsel %vm328_vm0, %v5847_v16, -inf }
  0x11   :  { %v342_v41 = vmax.f32 %v340_v6, %v341_v21  ;;  %v356_v42 = vrot.slane %v355_v27, 2  ;;  %v370_v43 = vmax.f32 %v368_v8, %v369_v28  ;;  %v384_v44 = vrot.slane %v383_v29, 4 }
  0x12   :  { %v396_v50 = vmax.f32 %v394_v32, %v395_v5  ;;  %v409_v51 = vmax.f32 %v407_v33, %v408_v37  ;;  %v412_v52 = vsel %vm336_vm1, %v5858_v30, -inf  ;;  %v5883_v54 = vsel %vm328_vm0, %v5863_v31, -inf }
  0x13   :  { %v343_v55 = vrot.slane %v342_v41, 1  ;;  %v357_v56 = vmax.f32 %v355_v27, %v356_v42  ;;  %v371_v57 = vrot.slane %v370_v43, 2  ;;  %v385_v61 = vmax.f32 %v383_v29, %v384_v44 }
  0x14   :  { %v398_v63 = vmax.f32 %v396_v50, %v397_v18  ;;  %v411_v6 = vmax.f32 %v409_v51, %v410_v40  ;;  %v421_v5 = vsel %vm328_vm0, %v5872_v45, -inf  ;;  %v423_v7 = vsel %vm328_vm0, %v5877_v49, -inf }
  0x15   :  { %v344_v8 = vmax.f32 %v342_v41, %v343_v55  ;;  %v358_v9 = vrot.slane %v357_v56, 1  ;;  %v372_v17 = vmax.f32 %v370_v43, %v371_v57  ;;  %v386_v19 = vrot.slane %v385_v61, 2 }
  0x16   :  { %v399_v20 = vrot.slane %v398_v63, 4  ;;  %v5894_v21 = vmax.f32 %v411_v6, %v412_v52  ;;  %v422_v27 = vmax.f32 %v5883_v54, %v421_v5  ;;  %v5899_v28 = vsel %vm328_vm0, %v5888_v62, -inf }
  0x17   :  { %v1290_v18 = vsub.f32 %v5659_v0, %v344_v8  ;;  %v1291_v29 = vsub.f32 %v5664_v1, %v344_v8  ;;  %v1292_v32 = vsub.f32 %v5669_v2, %v344_v8  ;;  %v1293_v33 = vsub.f32 %v5674_v3, %v344_v8 }
  0x18   :  { %v1294_v37 = vsub.f32 %v5679_v4, %v344_v8  ;;  %v359_v40 = vmax.f32 %v357_v56, %v358_v9  ;;  %v373_v41 = vrot.slane %v372_v17, 1  ;;  %v387_v42 = vmax.f32 %v385_v61, %v386_v19 }
  0x19   :  { %v1610_v43 = vmul.f32 1.442695, %v1290_v18  ;;  %v1612_v44 = vmul.f32 1.442695, %v1291_v29  ;;  %v1614_v50 = vmul.f32 1.442695, %v1292_v32  ;;  %v400_v51 = vmax.f32 %v398_v63, %v399_v20 }
  0x1a   :  { %v1616_v52 = vmul.f32 1.442695, %v1293_v33  ;;  %v1618_v54 = vmul.f32 1.442695, %v1294_v37  ;;  %v1295_v55 = vsub.f32 %v5692_v10, %v359_v40  ;;  %v1296_v0 = vsub.f32 %v5697_v11, %v359_v40 }
  0x1b   :  { %4878 = vpow2.f32 %v1610_v43  ;;  %v1297_v1 = vsub.f32 %v5702_v12, %v359_v40  ;;  %v1298_v2 = vsub.f32 %v5707_v13, %v359_v40  ;;  %v1299_v3 = vsub.f32 %v5712_v14, %v359_v40 }
  0x1c   :  { %4880 = vpow2.f32 %v1612_v44  ;;  %v1620_v4 = vmul.f32 1.442695, %v1295_v55  ;;  %v1622_v56 = vmul.f32 1.442695, %v1296_v0  ;;  %v374_v57 = vmax.f32 %v372_v17, %v373_v41 }
  0x1d   :  { %4882 = vpow2.f32 %v1614_v50  ;;  %v1624_v61 = vmul.f32 1.442695, %v1297_v1  ;;  %v1626_v63 = vmul.f32 1.442695, %v1298_v2  ;;  %v1628_v6 = vmul.f32 1.442695, %v1299_v3 }
  0x1e   :  { %4884 = vpow2.f32 %v1616_v52  ;;  %v1300_v10 = vsub.f32 %v5727_v22, %v374_v57  ;;  %v1301_v11 = vsub.f32 %v5732_v23, %v374_v57  ;;  %v1302_v5 = vsub.f32 %v5737_v24, %v374_v57  ;;  %v5938_v50 = vld [vmem:[%s11637_s0 + $0x110] sm:$0x7] }
  0x1f   :  { %4886 = vpow2.f32 %v1618_v54  ;;  %v1303_v12 = vsub.f32 %v5742_v25, %v374_v57  ;;  %v1304_v13 = vsub.f32 %v5747_v26, %v374_v57  ;;  %v388_v14 = vrot.slane %v387_v42, 1 }
  0x20   :  { %4888 = vpow2.f32 %v1620_v4  ;;  %v1630_v8 = vmul.f32 1.442695, %v1300_v10  ;;  %v1632_v9 = vmul.f32 1.442695, %v1301_v11  ;;  %v1634_v17 = vmul.f32 1.442695, %v1302_v5 }
  0x21   :  { %4890 = vpow2.f32 %v1622_v56  ;;  %v1636_v19 = vmul.f32 1.442695, %v1303_v12  ;;  %v1638_v20 = vmul.f32 1.442695, %v1304_v13  ;;  %v389_v18 = vmax.f32 %v387_v42, %v388_v14 }
  0x22   :  { %4892 = vpow2.f32 %v1624_v61  ;;  %v401_v22 = vrot.slane %v400_v51, 2  ;;  %v414_v23 = vrot.slane %v5894_v21, 4  ;;  %v5917_v29 = vmax.f32 %v422_v27, %v423_v7 }
  0x23   :  { %4894 = vpow2.f32 %v1626_v63  ;;  %v1305_v24 = vsub.f32 %v5760_v34, %v389_v18  ;;  %v1306_v25 = vsub.f32 %v5765_v35, %v389_v18  ;;  %v1307_v26 = vsub.f32 %v5770_v36, %v389_v18 }
  0x24   :  { %4896 = vpow2.f32 %v1628_v6  ;;  %v1308_v32 = vsub.f32 %v5777_v38, %v389_v18  ;;  %v1309_v33 = vsub.f32 %v5782_v39, %v389_v18  ;;  %v402_v37 = vmax.f32 %v400_v51, %v401_v22 }
  0x25   :  { %v5924_v40 = vpop.eup %4878  ;;  %4898 = vpow2.f32 %v1630_v8  ;;  %v1640_v41 = vmul.f32 1.442695, %v1305_v24  ;;  %v1642_v42 = vmul.f32 1.442695, %v1306_v25  ;;  %v1644_v7 = vmul.f32 1.442695, %v1307_v26 }
  0x26   :  { %v5926_v27 = vpop.eup %4880  ;;  %v2250_v34 = vsel %vm328_vm0, %v5924_v40, 0.0  ;;  %4900 = vpow2.f32 %v1632_v9  ;;  %v1646_v35 = vmul.f32 1.442695, %v1308_v32  ;;  %v1648_v36 = vmul.f32 1.442695, %v1309_v33 }
  0x27   :  { %v5930_v43 = vpop.eup %4882  ;;  %v2251_v38 = vsel %vm328_vm0, %v5926_v27, 0.0  ;;  %4902 = vpow2.f32 %v1634_v17  ;;  %v403_v39 = vrot.slane %v402_v37, 1  ;;  %v415_v44 = vmax.f32 %v5894_v21, %v414_v23 }
  0x28   :  { %v5940_v51 = vpop.eup %4884  ;;  %v2252_v52 = vadd.f32 %v2251_v38, %v2250_v34  ;;  %v2253_v54 = vsel %vm328_vm0, %v5930_v43, 0.0  ;;  %4904 = vpow2.f32 %v1636_v19  ;;  %v426_v55 = vmax.f32 %v5917_v29, %v5899_v28 }
  0x29   :  { %v5946_v0 = vpop.eup %4886  ;;  %v2255_v21 = vsel %vm328_vm0, %v5940_v51, 0.0  ;;  %4906 = vpow2.f32 %v1638_v20  ;;  %v404_v1 = vmax.f32 %v402_v37, %v403_v39  ;;  %v416_v2 = vrot.slane %v415_v44, 2 }
  0x2a   :  { %v5950_v3 = vpop.eup %4888  ;;  %v2254_v4 = vadd.f32 %v2253_v54, %v2252_v52  ;;  %v2257_v56 = vsel %vm336_vm1, %v5946_v0, 0.0  ;;  %4908 = vpow2.f32 %v1640_v41  ;;  %v427_v57 = vsel %vm336_vm1, %v5938_v50, -inf }
  0x2b   :  { %v5956_v61 = vpop.eup %4890  ;;  %v2265_v63 = vsel %vm328_vm0, %v5950_v3, 0.0  ;;  %4910 = vpow2.f32 %v1642_v42  ;;  %v1310_v6 = vsub.f32 %v5791_v46, %v404_v1  ;;  %v1311_v10 = vsub.f32 %v5796_v47, %v404_v1 }
  0x2c   :  { %v5962_v11 = vpop.eup %4892  ;;  %v2256_v5 = vadd.f32 %v2255_v21, %v2254_v4  ;;  %v2266_v12 = vsel %vm328_vm0, %v5956_v61, 0.0  ;;  %4912 = vpow2.f32 %v1644_v7  ;;  %v1312_v13 = vsub.f32 %v5801_v48, %v404_v1 }
  0x2d   :  { %v5967_v14 = vpop.eup %4894  ;;  %v2267_v8 = vadd.f32 %v2266_v12, %v2265_v63  ;;  %v2268_v9 = vsel %vm328_vm0, %v5962_v11, 0.0  ;;  %4914 = vpow2.f32 %v1646_v35  ;;  %v1313_v46 = vsub.f32 %v5814_v53, %v404_v1 }
  0x2e   :  { %v5972_v17 = vpop.eup %4896  ;;  %v2258_v47 = vadd.f32 %v2257_v56, %v2256_v5  ;;  %v2270_v19 = vsel %vm328_vm0, %v5967_v14, 0.0  ;;  %4916 = vpow2.f32 %v1648_v36  ;;  %v1314_v20 = vsub.f32 %v5819_v58, %v404_v1 }
  0x2f   :  { %v5977_v18 = vpop.eup %4898  ;;  %v2269_v48 = vadd.f32 %v2268_v9, %v2267_v8  ;;  %v2272_v22 = vsel %vm336_vm1, %v5972_v17, 0.0  ;;  %v1650_v23 = vmul.f32 1.442695, %v1310_v6  ;;  %v1652_v24 = vmul.f32 1.442695, %v1311_v10 }
  0x30   :  { %v5981_v25 = vpop.eup %4900  ;;  %v2259_v53 = vrot.slane %v2258_v47, 4  ;;  %v2280_v26 = vsel %vm328_vm0, %v5977_v18, 0.0  ;;  %v1654_v32 = vmul.f32 1.442695, %v1312_v13  ;;  %v1656_v33 = vmul.f32 1.442695, %v1313_v46 }
  0x31   :  { %v5985_v37 = vpop.eup %4902  ;;  %v2271_v41 = vadd.f32 %v2270_v19, %v2269_v48  ;;  %v2281_v58 = vsel %vm328_vm0, %v5981_v25, 0.0  ;;  %4918 = vpow2.f32 %v1650_v23  ;;  %v1658_v42 = vmul.f32 1.442695, %v1314_v20 }
  0x32   :  { %v5989_v7 = vpop.eup %4904  ;;  %v2260_v34 = vadd.f32 %v2259_v53, %v2258_v47  ;;  %v2282_v35 = vadd.f32 %v2281_v58, %v2280_v26  ;;  %v2283_v36 = vsel %vm328_vm0, %v5985_v37, 0.0  ;;  %4920 = vpow2.f32 %v1652_v24 }
  0x33   :  { %v5993_v38 = vpop.eup %4906  ;;  %v2273_v39 = vadd.f32 %v2272_v22, %v2271_v41  ;;  %v2285_v52 = vsel %vm328_vm0, %v5989_v7, 0.0  ;;  %4922 = vpow2.f32 %v1654_v32  ;;  %v417_v54 = vmax.f32 %v415_v44, %v416_v2 }
  0x34   :  { %v5997_v21 = vpop.eup %4908  ;;  %v2261_v1 = vrot.slane %v2260_v34, 2  ;;  %v2284_v4 = vadd.f32 %v2283_v36, %v2282_v35  ;;  %v2287_v56 = vsel %vm336_vm1, %v5993_v38, 0.0  ;;  %4924 = vpow2.f32 %v1656_v33 }
  0x35   :  { %v6001_v63 = vpop.eup %4910  ;;  %v2274_v6 = vrot.slane %v2273_v39, 4  ;;  %v2295_v10 = vsel %vm328_vm0, %v5997_v21, 0.0  ;;  %4926 = vpow2.f32 %v1658_v42  ;;  %v418_v5 = vrot.slane %v417_v54, 1 }
  0x36   :  { %v6005_v12 = vpop.eup %4912  ;;  %v2262_v13 = vadd.f32 %v2261_v1, %v2260_v34  ;;  %v2286_v44 = vadd.f32 %v2285_v52, %v2284_v4  ;;  %v2296_v2 = vsel %vm328_vm0, %v6001_v63, 0.0  ;;  %v428_v8 = vmax.f32 %v426_v55, %v427_v57 }
  0x37   :  { %v6012_v9 = vpop.eup %4914  ;;  %v2275_v46 = vadd.f32 %v2274_v6, %v2273_v39  ;;  %v2297_v47 = vadd.f32 %v2296_v2, %v2295_v10  ;;  %v2298_v19 = vsel %vm328_vm0, %v6005_v12, 0.0  ;;  %v419_v20 = vmax.f32 %v417_v54, %v418_v5 }
  0x38   :  { %v6016_v48 = vpop.eup %4916  ;;  %v2263_v22 = vrot.slane %v2262_v13, 1  ;;  %v2288_v23 = vadd.f32 %v2287_v56, %v2286_v44  ;;  %v2300_v24 = vsel %vm328_vm0, %v6012_v9, 0.0  ;;  %v429_v53 = vrot.slane %v428_v8, 4 }
  0x39   :  { %v2276_v26 = vrot.slane %v2275_v46, 2  ;;  %v2299_v32 = vadd.f32 %v2298_v19, %v2297_v47  ;;  %v2302_v28 = vsel %vm336_vm1, %v6016_v48, 0.0  ;;  %v1315_v29 = vsub.f32 %v5824_v59, %v419_v20 }
  0x3a   :  { %v2264_v55 = vadd.f32 %v2263_v22, %v2262_v13  ;;  %v2289_v57 = vrot.slane %v2288_v23, 4  ;;  %v1316_v33 = vsub.f32 %v5829_v60, %v419_v20  ;;  %v1317_v41 = vsub.f32 %v5842_v15, %v419_v20  ;;  %v6050_v22 = vld [vmem:[%s11637_s0 + $0x118] sm:$0xff] }
  0x3b   :  { %v6025_v58 = vpop.eup %4918  ;;  %v2277_v42 = vadd.f32 %v2276_v26, %v2275_v46  ;;  %v2301_v34 = vadd.f32 %v2300_v24, %v2299_v32  ;;  %v1318_v35 = vsub.f32 %v5847_v16, %v419_v20  ;;  %v1319_v36 = vsub.f32 %v5858_v30, %v419_v20 }
  0x3c   :  { %v6029_v39 = vpop.eup %4920  ;;  %4928 = vrcp.f32 %v2264_v55  ;;  %v2290_v52 = vadd.f32 %v2289_v57, %v2288_v23  ;;  %v2310_v59 = vsel %vm328_vm0, %v6025_v58, 0.0  ;;  %v1660_v54 = vmul.f32 1.442695, %v1315_v29  ;;  %v6055_v23 = vld [vmem:[%s11637_s0 + $0x120] sm:$0xff]  ;;  %v6060_v57 = vld [vmem:[%s11637_s0 + $0x128] sm:$0xff] }
  0x3d   :  { %v6033_v1 = vpop.eup %4922  ;;  %v2278_v60 = vrot.slane %v2277_v42, 1  ;;  %v2303_v15 = vadd.f32 %v2302_v28, %v2301_v34  ;;  %v2311_v4 = vsel %vm328_vm0, %v6029_v39, 0.0  ;;  %v1662_v56 = vmul.f32 1.442695, %v1316_v33  ;;  %v6065_v33 = vld [vmem:[%s11637_s0 + $0x130] sm:$0xff] }
  0x3e   :  { %v6037_v6 = vpop.eup %4924  ;;  %v2291_v16 = vrot.slane %v2290_v52, 2  ;;  %v2312_v30 = vadd.f32 %v2311_v4, %v2310_v59  ;;  %v2313_v10 = vsel %vm328_vm0, %v6033_v1, 0.0  ;;  %4930 = vpow2.f32 %v1660_v54 }
  0x3f   :  { %v6041_v5 = vpop.eup %4926  ;;  %v2279_v13 = vadd.f32 %v2278_v60, %v2277_v42  ;;  %v2304_v44 = vrot.slane %v2303_v15, 4  ;;  %v2315_v2 = vsel %vm328_vm0, %v6037_v6, 0.0  ;;  %4932 = vpow2.f32 %v1662_v56  ;;  %v6070_v42 = vld [vmem:[%s11637_s0 + $0x138] sm:$0x7] }
  0x40   :  { %v2292_v46 = vadd.f32 %v2291_v16, %v2290_v52  ;;  %v2314_v47 = vadd.f32 %v2313_v10, %v2312_v30  ;;  %v2317_v19 = vsel %vm336_vm1, %v6041_v5, 0.0  ;;  %v1664_v20 = vmul.f32 1.442695, %v1317_v41 }
  0x41   :  { %4934 = vrcp.f32 %v2279_v13  ;;  %v2305_v24 = vadd.f32 %v2304_v44, %v2303_v15  ;;  %v1666_v26 = vmul.f32 1.442695, %v1318_v35  ;;  %v1668_v32 = vmul.f32 1.442695, %v1319_v36 }
  0x42   :  { %v2293_v28 = vrot.slane %v2292_v46, 1  ;;  %v2316_v29 = vadd.f32 %v2315_v2, %v2314_v47  ;;  %4936 = vpow2.f32 %v1664_v20  ;;  %v430_v55 = vmax.f32 %v428_v8, %v429_v53 }
  0x43   :  { %v2306_v41 = vrot.slane %v2305_v24, 2  ;;  %4938 = vpow2.f32 %v1666_v26  ;;  %v6074_v8 = vsel %vm328_vm0, %v6050_v22, -inf  ;;  %v6078_v53 = vsel %vm328_vm0, %v6055_v23, -inf }
  0x44   :  { %v2294_v34 = vadd.f32 %v2293_v28, %v2292_v46  ;;  %v2318_v35 = vadd.f32 %v2317_v19, %v2316_v29  ;;  %4940 = vpow2.f32 %v1668_v32  ;;  %v431_v36 = vrot.slane %v430_v55, 2 }
  0x45   :  { %v2307_v52 = vadd.f32 %v2306_v41, %v2305_v24  ;;  %v437_v59 = vmax.f32 %v6074_v8, %v6078_v53  ;;  %v6084_v54 = vsel %vm328_vm0, %v6060_v57, -inf  ;;  %v6088_v60 = vsel %vm328_vm0, %v6065_v33, -inf }
  0x46   :  { %v4929_v15 = vpop.eup %4928  ;;  %4942 = vrcp.f32 %v2294_v34  ;;  %v2319_v4 = vrot.slane %v2318_v35, 4  ;;  %v6090_v56 = vmax.f32 %v430_v55, %v431_v36  ;;  %v6094_v16 = vsel %vm336_vm1, %v6070_v42, -inf }
  0x47   :  { %v3274_v30 = vmul.f32 %v4929_v15, %v5924_v40  ;;  %v3275_v10 = vmul.f32 %v4929_v15, %v5926_v27  ;;  %v3276_v13 = vmul.f32 %v4929_v15, %v5930_v43  ;;  %v3277_v44 = vmul.f32 %v4929_v15, %v5940_v51 }
  0x48   :  { %v6100_v2 = vpop.eup %4930  ;;  %v3278_v46 = vmul.f32 %v4929_v15, %v5946_v0  ;;  %v2308_v47 = vrot.slane %v2307_v52, 1  ;;  %v2320_v19 = vadd.f32 %v2319_v4, %v2318_v35  ;;  %v433_v20 = vrot.slane %v6090_v56, 1 }
  0x49   :  { %v6104_v24 = vpop.eup %4932  ;;  %v4558_v26 = vadd.f32 -192.0, %v3274_v30  ;;  %v4559_v32 = vadd.f32 -192.0, %v3275_v10  ;;  %v4560_v28 = vadd.f32 -192.0, %v3276_v13  ;;  %v4561_v40 = vadd.f32 -192.0, %v3277_v44 }
  0x4a   :  { %v4562_v29 = vadd.f32 -192.0, %v3278_v46  ;;  %v2309_v27 = vadd.f32 %v2308_v47, %v2307_v52  ;;  %v2321_v55 = vrot.slane %v2320_v19, 2  ;;  %v2325_v43 = vsel %vm328_vm0, %v6100_v2, 0.0 }
  0x4b   :  { %v4935_v51 = vpop.eup %4934  ;;  %v3914_v41 = vmax.f32 %v4558_v26, 0.0  ;;  %v3915_v34 = vmax.f32 %v4559_v32, 0.0  ;;  %v3916_v0 = vmax.f32 %v4560_v28, 0.0  ;;  %v3917_v36 = vmax.f32 %v4561_v40, 0.0 }
  0x4c   :  { %v6108_v35 = vpop.eup %4936  ;;  %v3918_v15 = vmax.f32 %v4562_v29, 0.0  ;;  %v3279_v4 = vmul.f32 %v4935_v51, %v5950_v3  ;;  %v3280_v30 = vmul.f32 %v4935_v51, %v5956_v61  ;;  %v3281_v10 = vmul.f32 %v4935_v51, %v5962_v11 }
  0x4d   :  { %v6113_v13 = vpop.eup %4938  ;;  %4234 = vst.msk [vmem:[%s11638_s1] sm:$0xff] %vm328_vm0, %v3914_v41  ;;  %4235 = vst.msk [vmem:[%s11638_s1 + $0x8] sm:$0xff] %vm328_vm0, %v3915_v34  ;;  %v3282_v3 = vmul.f32 %v4935_v51, %v5967_v14  ;;  %v3283_v61 = vmul.f32 %v4935_v51, %v5972_v17  ;;  %4944 = vrcp.f32 %v2309_v27  ;;  %v2322_v11 = vadd.f32 %v2321_v55, %v2320_v19 }
  0x4e   :  { %4236 = vst.msk [vmem:[%s11638_s1 + $0x10] sm:$0xff] %vm328_vm0, %v3916_v0  ;;  %4237 = vst.msk [vmem:[%s11638_s1 + $0x18] sm:$0xff] %vm328_vm0, %v3917_v36  ;;  %v6133_v52 = vpop.eup %4940  ;;  %v4563_v44 = vadd.f32 -192.0, %v3279_v4  ;;  %v4564_v46 = vadd.f32 -192.0, %v3280_v30  ;;  %v4565_v47 = vadd.f32 -192.0, %v3281_v10  ;;  %v2326_v26 = vsel %vm328_vm0, %v6104_v24, 0.0 }
  0x4f   :  { %4238 = vst.msk [vmem:[%s11638_s1 + $0x20] sm:$0x7] %vm336_vm1, %v3918_v15  ;;  %v4566_v32 = vadd.f32 -192.0, %v3282_v3  ;;  %v4567_v28 = vadd.f32 -192.0, %v3283_v61  ;;  %v2323_v14 = vrot.slane %v2322_v11, 1  ;;  %v2327_v40 = vadd.f32 %v2326_v26, %v2325_v43  ;;  %v6173_v3 = vld [vmem:[%s11637_s0 + $0x140] sm:$0xff] }
  0x50   :  { %v4943_v17 = vpop.eup %4942  ;;  %v3919_v29 = vmax.f32 %v4563_v44, 0.0  ;;  %v3920_v19 = vmax.f32 %v4564_v46, 0.0  ;;  %v3921_v27 = vmax.f32 %v4565_v47, 0.0  ;;  %v2328_v55 = vsel %vm328_vm0, %v6108_v35, 0.0  ;;  %v6178_v61 = vld [vmem:[%s11637_s0 + $0x148] sm:$0xff] }
  0x51   :  { %v3922_v51 = vmax.f32 %v4566_v32, 0.0  ;;  %v3923_v41 = vmax.f32 %v4567_v28, 0.0  ;;  %v3284_v34 = vmul.f32 %v4943_v17, %v5977_v18  ;;  %v3285_v0 = vmul.f32 %v4943_v17, %v5981_v25 }
  0x52   :  { %4239 = vst.msk [vmem:[%s11638_s1 + $0x28] sm:$0xff] %vm328_vm0, %v3919_v29  ;;  %4240 = vst.msk [vmem:[%s11638_s1 + $0x30] sm:$0xff] %vm328_vm0, %v3920_v19  ;;  %v3286_v43 = vmul.f32 %v4943_v17, %v5985_v37  ;;  %v3287_v18 = vmul.f32 %v4943_v17, %v5989_v7  ;;  %v3288_v25 = vmul.f32 %v4943_v17, %v5993_v38  ;;  %v2330_v37 = vsel %vm328_vm0, %v6113_v13, 0.0 }
  0x53   :  { %4241 = vst.msk [vmem:[%s11638_s1 + $0x38] sm:$0xff] %vm328_vm0, %v3921_v27  ;;  %v2324_v36 = vadd.f32 %v2323_v14, %v2322_v11  ;;  %4242 = vst.msk [vmem:[%s11638_s1 + $0x40] sm:$0xff] %vm328_vm0, %v3922_v51  ;;  %v4568_v15 = vadd.f32 -192.0, %v3284_v34  ;;  %v4569_v4 = vadd.f32 -192.0, %v3285_v0  ;;  %v2329_v30 = vadd.f32 %v2328_v55, %v2327_v40 }
  0x54   :  { %4243 = vst.msk [vmem:[%s11638_s1 + $0x48] sm:$0x7] %vm336_vm1, %v3923_v41  ;;  %v4570_v7 = vadd.f32 -192.0, %v3286_v43  ;;  %v4571_v10 = vadd.f32 -192.0, %v3287_v18  ;;  %v4572_v38 = vadd.f32 -192.0, %v3288_v25  ;;  %v2332_v47 = vsel %vm336_vm1, %v6133_v52, 0.0 }
  0x55   :  { %4946 = vrcp.f32 %v2324_v36  ;;  %v3924_v11 = vmax.f32 %v4568_v15, 0.0  ;;  %v3925_v44 = vmax.f32 %v4569_v4, 0.0  ;;  %v2331_v46 = vadd.f32 %v2330_v37, %v2329_v30 }
  0x56   :  { %v3926_v26 = vmax.f32 %v4570_v7, 0.0  ;;  %v3927_v32 = vmax.f32 %v4571_v10, 0.0  ;;  %v3928_v28 = vmax.f32 %v4572_v38, 0.0  ;;  %v434_v14 = vmax.f32 %v6090_v56, %v433_v20 }
  0x57   :  { %v4945_v40 = vpop.eup %4944  ;;  %4244 = vst.msk [vmem:[%s11638_s1 + $0x50] sm:$0xff] %vm328_vm0, %v3924_v11  ;;  %4245 = vst.msk [vmem:[%s11638_s1 + $0x58] sm:$0xff] %vm328_vm0, %v3925_v44  ;;  %v2333_v17 = vadd.f32 %v2332_v47, %v2331_v46  ;;  %v439_v29 = vmax.f32 %v437_v59, %v6084_v54  ;;  %v6199_v56 = vsel %vm328_vm0, %v6173_v3, -inf  ;;  %v6203_v20 = vsel %vm328_vm0, %v6178_v61, -inf }
  0x58   :  { %4246 = vst.msk [vmem:[%s11638_s1 + $0x60] sm:$0xff] %vm328_vm0, %v3926_v26  ;;  %4247 = vst.msk [vmem:[%s11638_s1 + $0x68] sm:$0xff] %vm328_vm0, %v3927_v32  ;;  %v3289_v8 = vmul.f32 %v4945_v40, %v5997_v21  ;;  %v3290_v53 = vmul.f32 %v4945_v40, %v6001_v63  ;;  %v3291_v59 = vmul.f32 %v4945_v40, %v6005_v12 }
  0x59   :  { %4248 = vst.msk [vmem:[%s11638_s1 + $0x70] sm:$0x7] %vm336_vm1, %v3928_v28  ;;  %v3292_v54 = vmul.f32 %v4945_v40, %v6012_v9  ;;  %v3293_v19 = vmul.f32 %v4945_v40, %v6016_v48  ;;  %v2334_v27 = vrot.slane %v2333_v17, 4  ;;  %v1320_v55 = vsub.f32 %v5863_v31, %v434_v14 }
  0x5a   :  { %v1321_v51 = vsub.f32 %v5872_v45, %v434_v14  ;;  %v4573_v41 = vadd.f32 -192.0, %v3289_v8  ;;  %v4574_v34 = vadd.f32 -192.0, %v3290_v53  ;;  %v4575_v0 = vadd.f32 -192.0, %v3291_v59 }
  0x5b   :  { %v4576_v43 = vadd.f32 -192.0, %v3292_v54  ;;  %v4577_v18 = vadd.f32 -192.0, %v3293_v19  ;;  %v2335_v25 = vadd.f32 %v2334_v27, %v2333_v17  ;;  %v1322_v21 = vsub.f32 %v5877_v49, %v434_v14  ;;  %v6277_v19 = vld [vmem:[%s11637_s0 + $0x170] sm:$0xff]  ;;  %v6282_v27 = vld [vmem:[%s11637_s0 + $0x178] sm:$0xff] }
  0x5c   :  { %v1323_v63 = vsub.f32 %v5888_v62, %v434_v14  ;;  %v3929_v12 = vmax.f32 %v4573_v41, 0.0  ;;  %v3930_v36 = vmax.f32 %v4574_v34, 0.0  ;;  %v3931_v9 = vmax.f32 %v4575_v0, 0.0  ;;  %v6309_v34 = vld [vmem:[%s11637_s0 + $0x180] sm:$0xff]  ;;  %v6314_v0 = vld [vmem:[%s11637_s0 + $0x188] sm:$0x7] }
  0x5d   :  { %v3932_v15 = vmax.f32 %v4576_v43, 0.0  ;;  %v3933_v48 = vmax.f32 %v4577_v18, 0.0  ;;  %v2336_v4 = vrot.slane %v2335_v25, 2  ;;  %v1324_v31 = vsub.f32 %v5938_v50, %v434_v14  ;;  %v6327_v18 = vld [vmem:[%s11637_s0 + $0x190] sm:$0xff] }
  0x5e   :  { %v1670_v30 = vmul.f32 1.442695, %v1320_v55  ;;  %4249 = vst.msk [vmem:[%s11638_s1 + $0x78] sm:$0xff] %vm328_vm0, %v3929_v12  ;;  %4250 = vst.msk [vmem:[%s11638_s1 + $0x80] sm:$0xff] %vm328_vm0, %v3930_v36  ;;  %v1672_v49 = vmul.f32 1.442695, %v1321_v51  ;;  %v441_v37 = vmax.f32 %v439_v29, %v6088_v60  ;;  %v452_v55 = vmax.f32 %v6199_v56, %v6203_v20 }
  0x5f   :  { %v4947_v45 = vpop.eup %4946  ;;  %4251 = vst.msk [vmem:[%s11638_s1 + $0x88] sm:$0xff] %vm328_vm0, %v3931_v9  ;;  %4252 = vst.msk [vmem:[%s11638_s1 + $0x90] sm:$0xff] %vm328_vm0, %v3932_v15  ;;  %v1674_v62 = vmul.f32 1.442695, %v1322_v21  ;;  %v1676_v50 = vmul.f32 1.442695, %v1323_v63  ;;  %v2337_v46 = vadd.f32 %v2336_v4, %v2335_v25 }
  0x60   :  { %4253 = vst.msk [vmem:[%s11638_s1 + $0x98] sm:$0x7] %vm336_vm1, %v3933_v48  ;;  %v3294_v7 = vmul.f32 %v4947_v45, %v6025_v58  ;;  %v3295_v10 = vmul.f32 %v4947_v45, %v6029_v39  ;;  %v3296_v38 = vmul.f32 %v4947_v45, %v6033_v1  ;;  %v3297_v11 = vmul.f32 %v4947_v45, %v6037_v6  ;;  %v6257_v39 = vld [vmem:[%s11637_s0 + $0x150] sm:$0xff]  ;;  %v6262_v1 = vld [vmem:[%s11637_s0 + $0x158] sm:$0xff]  ;;  %v6267_v6 = vld [vmem:[%s11637_s0 + $0x160] sm:$0x7] }
  0x61   :  { %v3298_v44 = vmul.f32 %v4947_v45, %v6041_v5  ;;  %4948 = vpow2.f32 %v1670_v30  ;;  %v1678_v47 = vmul.f32 1.442695, %v1324_v31  ;;  %v2338_v40 = vrot.slane %v2337_v46, 1  ;;  %v6332_v25 = vld [vmem:[%s11637_s0 + $0x198] sm:$0xff]  ;;  %v6337_v21 = vld [vmem:[%s11637_s0 + $0x1a0] sm:$0xff]  ;;  %v6346_v9 = vld [vmem:[%s11637_s0 + $0x1a8] sm:$0xff] }
  0x62   :  { %v4578_v26 = vadd.f32 -192.0, %v3294_v7  ;;  %v4579_v60 = vadd.f32 -192.0, %v3295_v10  ;;  %v4580_v32 = vadd.f32 -192.0, %v3296_v38  ;;  %v4581_v28 = vadd.f32 -192.0, %v3297_v11  ;;  %v6355_v30 = vld [vmem:[%s11637_s0 + $0x1b0] sm:$0x7] }
  0x63   :  { %v4582_v14 = vadd.f32 -192.0, %v3298_v44  ;;  %4950 = vpow2.f32 %v1672_v49  ;;  %v443_v58 = vmax.f32 %v441_v37, %v6094_v16  ;;  %v6272_v16 = vld [vmem:[%s11637_s0 + $0x168] sm:$0xff]  ;;  %v2339_v59 = vadd.f32 %v2338_v40, %v2337_v46  ;;  %v6360_v45 = vld [vmem:[%s11637_s0 + $0x1b8] sm:$0xff]  ;;  %v6371_v7 = vld [vmem:[%s11637_s0 + $0x1c0] sm:$0xff] }
  0x64   :  { %v3934_v5 = vmax.f32 %v4578_v26, 0.0  ;;  %v3935_v17 = vmax.f32 %v4579_v60, 0.0  ;;  %v3936_v29 = vmax.f32 %v4580_v32, 0.0  ;;  %v3937_v8 = vmax.f32 %v4581_v28, 0.0 }
  0x65   :  { %v3938_v53 = vmax.f32 %v4582_v14, 0.0  ;;  %4952 = vpow2.f32 %v1674_v62  ;;  %v444_v54 = vrot.slane %v443_v58, 4  ;;  %v453_v51 = vsel %vm328_vm0, %v6257_v39, -inf }
  0x66   :  { %4254 = vst.msk [vmem:[%s11638_s1 + $0xa0] sm:$0xff] %vm328_vm0, %v3934_v5  ;;  %4255 = vst.msk [vmem:[%s11638_s1 + $0xa8] sm:$0xff] %vm328_vm0, %v3935_v17  ;;  %4954 = vpow2.f32 %v1676_v50  ;;  %v455_v41 = vsel %vm328_vm0, %v6262_v1, -inf  ;;  %v457_v20 = vsel %vm336_vm1, %v6267_v6, -inf  ;;  %v465_v43 = vsel %vm328_vm0, %v6272_v16, -inf  ;;  %v6395_v17 = vld [vmem:[%s11637_s0 + $0x1d0] sm:$0xff] }
  0x67   :  { %4256 = vst.msk [vmem:[%s11638_s1 + $0xb0] sm:$0xff] %vm328_vm0, %v3936_v29  ;;  %4257 = vst.msk [vmem:[%s11638_s1 + $0xb8] sm:$0xff] %vm328_vm0, %v3937_v8  ;;  %4956 = vrcp.f32 %v2339_v59  ;;  %v445_v56 = vmax.f32 %v443_v58, %v444_v54  ;;  %v454_v63 = vmax.f32 %v452_v55, %v453_v51  ;;  %v466_v12 = vsel %vm328_vm0, %v6277_v19, -inf }
  0x68   :  { %4258 = vst.msk [vmem:[%s11638_s1 + $0xc0] sm:$0x7] %vm336_vm1, %v3938_v53  ;;  %4958 = vpow2.f32 %v1678_v47  ;;  %v468_v36 = vsel %vm328_vm0, %v6282_v27, -inf  ;;  %v467_v48 = vmax.f32 %v465_v43, %v466_v12  ;;  %v470_v4 = vsel %vm328_vm0, %v6309_v34, -inf  ;;  %v6382_v47 = vld [vmem:[%s11637_s0 + $0x1c8] sm:$0xff] }
  0x69   :  { %v446_v15 = vrot.slane %v445_v56, 2  ;;  %v472_v31 = vsel %vm336_vm1, %v6314_v0, -inf  ;;  %v456_v49 = vmax.f32 %v454_v63, %v455_v41  ;;  %v480_v62 = vsel %vm328_vm0, %v6327_v18, -inf }
  0x6a   :  { %v481_v50 = vsel %vm328_vm0, %v6332_v25, -inf  ;;  %v483_v37 = vsel %vm328_vm0, %v6337_v21, -inf  ;;  %v469_v11 = vmax.f32 %v467_v48, %v468_v36  ;;  %v6377_v46 = vsel %vm328_vm0, %v6346_v9, -inf }
  0x6b   :  { %v6373_v10 = vpop.eup %4948  ;;  %v447_v38 = vmax.f32 %v445_v56, %v446_v15  ;;  %v482_v44 = vmax.f32 %v480_v62, %v481_v50  ;;  %v458_v60 = vmax.f32 %v456_v49, %v457_v20  ;;  %v487_v32 = vsel %vm336_vm1, %v6355_v30, -inf }
  0x6c   :  { %v2340_v26 = vsel %vm328_vm0, %v6373_v10, 0.0  ;;  %v495_v28 = vsel %vm328_vm0, %v6360_v45, -inf  ;;  %v471_v58 = vmax.f32 %v469_v11, %v470_v4  ;;  %v496_v29 = vsel %vm328_vm0, %v6371_v7, -inf }
  0x6d   :  { %v6390_v14 = vpop.eup %4950  ;;  %v448_v40 = vrot.slane %v447_v38, 1  ;;  %v484_v5 = vmax.f32 %v482_v44, %v483_v37  ;;  %v459_v53 = vrot.slane %v458_v60, 4  ;;  %v497_v59 = vmax.f32 %v495_v28, %v496_v29 }
  0x6e   :  { %v2341_v8 = vsel %vm328_vm0, %v6390_v14, 0.0  ;;  %v498_v54 = vsel %vm328_vm0, %v6382_v47, -inf  ;;  %v473_v56 = vmax.f32 %v471_v58, %v472_v31  ;;  %v500_v15 = vsel %vm328_vm0, %v6395_v17, -inf }
  0x6f   :  { %v6403_v55 = vpop.eup %4952  ;;  %v2342_v51 = vadd.f32 %v2341_v8, %v2340_v26  ;;  %v449_v41 = vmax.f32 %v447_v38, %v448_v40  ;;  %v486_v20 = vmax.f32 %v484_v5, %v6377_v46  ;;  %v460_v12 = vmax.f32 %v458_v60, %v459_v53  ;;  %v6431_v53 = vld [vmem:[%s11637_s0 + $0x1d8] sm:$0x7] }
  0x70   :  { %v6406_v43 = vpop.eup %4954  ;;  %v2343_v63 = vsel %vm328_vm0, %v6403_v55, 0.0  ;;  %v499_v36 = vmax.f32 %v497_v59, %v498_v54 }
  0x71   :  { %v4957_v48 = vpop.eup %4956  ;;  %v2344_v4 = vadd.f32 %v2343_v63, %v2342_v51  ;;  %v2345_v49 = vsel %vm328_vm0, %v6406_v43, 0.0  ;;  %v1325_v62 = vsub.f32 %v6050_v22, %v449_v41  ;;  %v1326_v31 = vsub.f32 %v6055_v23, %v449_v41 }
  0x72   :  { %v6416_v50 = vpop.eup %4958  ;;  %v3299_v37 = vmul.f32 %v4957_v48, %v6100_v2  ;;  %v3300_v38 = vmul.f32 %v4957_v48, %v6104_v24  ;;  %v3301_v11 = vmul.f32 %v4957_v48, %v6108_v35  ;;  %v3302_v44 = vmul.f32 %v4957_v48, %v6113_v13 }
  0x73   :  { %v3303_v46 = vmul.f32 %v4957_v48, %v6133_v52  ;;  %v2346_v26 = vadd.f32 %v2345_v49, %v2344_v4  ;;  %v2347_v60 = vsel %vm336_vm1, %v6416_v50, 0.0  ;;  %v1327_v22 = vsub.f32 %v6060_v57, %v449_v41 }
  0x74   :  { %v4583_v28 = vadd.f32 -192.0, %v3299_v37  ;;  %v4584_v23 = vadd.f32 -192.0, %v3300_v38  ;;  %v4585_v40 = vadd.f32 -192.0, %v3301_v11  ;;  %v4586_v58 = vadd.f32 -192.0, %v3302_v44  ;;  %v6463_v44 = vld [vmem:[%s11637_s0 + $0x1e8] sm:$0xff] }
  0x75   :  { %v4587_v5 = vadd.f32 -192.0, %v3303_v46  ;;  %v2348_v2 = vadd.f32 %v2347_v60, %v2346_v26  ;;  %v1328_v24 = vsub.f32 %v6065_v33, %v449_v41  ;;  %v1329_v35 = vsub.f32 %v6070_v42, %v449_v41  ;;  %v6468_v60 = vld [vmem:[%s11637_s0 + $0x1f0] sm:$0xff] }
  0x76   :  { %v3939_v29 = vmax.f32 %v4583_v28, 0.0  ;;  %v3940_v13 = vmax.f32 %v4584_v23, 0.0  ;;  %v3941_v8 = vmax.f32 %v4585_v40, 0.0  ;;  %v3942_v52 = vmax.f32 %v4586_v58, 0.0 }
  0x77   :  { %v3943_v57 = vmax.f32 %v4587_v5, 0.0  ;;  %v2349_v59 = vrot.slane %v2348_v2, 4  ;;  %v1680_v54 = vmul.f32 1.442695, %v1325_v62  ;;  %v1682_v51 = vmul.f32 1.442695, %v1326_v31 }
  0x78   :  { %4259 = vst.msk [vmem:[%s11638_s1 + $0xc8] sm:$0xff] %vm328_vm0, %v3939_v29  ;;  %4260 = vst.msk [vmem:[%s11638_s1 + $0xd0] sm:$0xff] %vm328_vm0, %v3940_v13  ;;  %v1684_v33 = vmul.f32 1.442695, %v1327_v22  ;;  %v1686_v42 = vmul.f32 1.442695, %v1328_v24  ;;  %v488_v63 = vmax.f32 %v486_v20, %v487_v32  ;;  %v501_v37 = vmax.f32 %v499_v36, %v500_v15 }
  0x79   :  { %4261 = vst.msk [vmem:[%s11638_s1 + $0xd8] sm:$0xff] %vm328_vm0, %v3941_v8  ;;  %4262 = vst.msk [vmem:[%s11638_s1 + $0xe0] sm:$0xff] %vm328_vm0, %v3942_v52  ;;  %v1688_v41 = vmul.f32 1.442695, %v1329_v35  ;;  %v2350_v48 = vadd.f32 %v2349_v59, %v2348_v2  ;;  %4960 = vpow2.f32 %v1680_v54  ;;  %v461_v4 = vrot.slane %v460_v12, 2  ;;  %v6456_v62 = vld [vmem:[%s11637_s0 + $0x1e0] sm:$0xff] }
  0x7a   :  { %4263 = vst.msk [vmem:[%s11638_s1 + $0xe8] sm:$0x7] %vm336_vm1, %v3943_v57  ;;  %v474_v49 = vrot.slane %v473_v56, 4  ;;  %4962 = vpow2.f32 %v1682_v51  ;;  %v489_v31 = vrot.slane %v488_v63, 4  ;;  %v502_v32 = vsel %vm336_vm1, %v6431_v53, -inf  ;;  %v6477_v22 = vld [vmem:[%s11637_s0 + $0x1f8] sm:$0xff] }
  0x7b   :  { %v2351_v20 = vrot.slane %v2350_v48, 2  ;;  %4964 = vpow2.f32 %v1684_v33  ;;  %v462_v38 = vmax.f32 %v460_v12, %v461_v4  ;;  %v503_v26 = vmax.f32 %v501_v37, %v502_v32  ;;  %v6501_v51 = vld [vmem:[%s11637_s0 + $0x200] sm:$0x7] }
  0x7c   :  { %v475_v11 = vmax.f32 %v473_v56, %v474_v49  ;;  %4966 = vpow2.f32 %v1686_v42  ;;  %v490_v46 = vmax.f32 %v488_v63, %v489_v31  ;;  %v6472_v36 = vsel %vm328_vm0, %v6456_v62, -inf }
  0x7d   :  { %v2352_v15 = vadd.f32 %v2351_v20, %v2350_v48  ;;  %4968 = vpow2.f32 %v1688_v41  ;;  %v463_v56 = vrot.slane %v462_v38, 1  ;;  %v504_v23 = vrot.slane %v503_v26, 4 }
  0x7e   :  { %v476_v12 = vrot.slane %v475_v11, 2  ;;  %v491_v28 = vrot.slane %v490_v46, 2  ;;  %v6481_v40 = vsel %vm328_vm0, %v6463_v44, -inf  ;;  %v6485_v24 = vsel %vm328_vm0, %v6468_v60, -inf }
  0x7f   :  { %v2353_v58 = vrot.slane %v2352_v15, 1  ;;  %v464_v5 = vmax.f32 %v462_v38, %v463_v56  ;;  %v6487_v29 = vmax.f32 %v503_v26, %v504_v23  ;;  %v512_v13 = vmax.f32 %v6472_v36, %v6481_v40  ;;  %v6617_v40 = vld [vmem:[%s11637_s0 + $0x210] sm:$0xff] }
  0x80   :  { %v477_v2 = vmax.f32 %v475_v11, %v476_v12  ;;  %v492_v35 = vmax.f32 %v490_v46, %v491_v28  ;;  %v6493_v8 = vsel %vm328_vm0, %v6477_v22, -inf }
  0x81   :  { %v2354_v52 = vadd.f32 %v2353_v58, %v2352_v15  ;;  %v1330_v57 = vsub.f32 %v6173_v3, %v464_v5  ;;  %v1331_v59 = vsub.f32 %v6178_v61, %v464_v5  ;;  %v1332_v54 = vsub.f32 %v6257_v39, %v464_v5 }
  0x82   :  { %v1333_v33 = vsub.f32 %v6262_v1, %v464_v5  ;;  %v1334_v42 = vsub.f32 %v6267_v6, %v464_v5  ;;  %v478_v41 = vrot.slane %v477_v2, 1  ;;  %v493_v63 = vrot.slane %v492_v35, 1 }
  0x83   :  { %v6505_v48 = vpop.eup %4960  ;;  %4970 = vrcp.f32 %v2354_v52  ;;  %v1690_v4 = vmul.f32 1.442695, %v1330_v57  ;;  %v1692_v3 = vmul.f32 1.442695, %v1331_v59  ;;  %v1694_v49 = vmul.f32 1.442695, %v1332_v54 }
  0x84   :  { %v6507_v61 = vpop.eup %4962  ;;  %v2355_v39 = vsel %vm328_vm0, %v6505_v48, 0.0  ;;  %v1696_v31 = vmul.f32 1.442695, %v1333_v33  ;;  %v479_v37 = vmax.f32 %v477_v2, %v478_v41  ;;  %v6513_v1 = vsel %vm336_vm1, %v6501_v51, -inf }
  0x85   :  { %v6515_v6 = vpop.eup %4964  ;;  %v2356_v32 = vsel %vm328_vm0, %v6507_v61, 0.0  ;;  %4972 = vpow2.f32 %v1690_v4  ;;  %v1698_v20 = vmul.f32 1.442695, %v1334_v42  ;;  %v6519_v38 = vmax.f32 %v492_v35, %v493_v63 }
  0x86   :  { %v6521_v11 = vpop.eup %4966  ;;  %v2357_v46 = vadd.f32 %v2356_v32, %v2355_v39  ;;  %v2358_v26 = vsel %vm328_vm0, %v6515_v6, 0.0  ;;  %4974 = vpow2.f32 %v1692_v3  ;;  %v1335_v15 = vsub.f32 %v6272_v16, %v479_v37 }
  0x87   :  { %v6526_v56 = vpop.eup %4968  ;;  %v2360_v12 = vsel %vm328_vm0, %v6521_v11, 0.0  ;;  %4976 = vpow2.f32 %v1694_v49  ;;  %v1336_v28 = vsub.f32 %v6277_v19, %v479_v37  ;;  %v1337_v23 = vsub.f32 %v6282_v27, %v479_v37 }
  0x88   :  { %v2359_v58 = vadd.f32 %v2358_v26, %v2357_v46  ;;  %v2362_v5 = vsel %vm336_vm1, %v6526_v56, 0.0  ;;  %4978 = vpow2.f32 %v1696_v31  ;;  %v1338_v2 = vsub.f32 %v6309_v34, %v479_v37 }
  0x89   :  { %4980 = vpow2.f32 %v1698_v20  ;;  %v1339_v16 = vsub.f32 %v6314_v0, %v479_v37  ;;  %v1700_v35 = vmul.f32 1.442695, %v1335_v15  ;;  %v1702_v52 = vmul.f32 1.442695, %v1336_v28 }
  0x8a   :  { %v2361_v57 = vadd.f32 %v2360_v12, %v2359_v58  ;;  %v1704_v59 = vmul.f32 1.442695, %v1337_v23  ;;  %v1340_v54 = vsub.f32 %v6327_v18, %v6519_v38  ;;  %v506_v19 = vrot.slane %v6487_v29, 2 }
  0x8b   :  { %4982 = vpow2.f32 %v1700_v35  ;;  %v1706_v27 = vmul.f32 1.442695, %v1338_v2  ;;  %v1341_v33 = vsub.f32 %v6332_v25, %v6519_v38  ;;  %v1342_v34 = vsub.f32 %v6337_v21, %v6519_v38 }
  0x8c   :  { %v2363_v42 = vadd.f32 %v2362_v5, %v2361_v57  ;;  %4984 = vpow2.f32 %v1702_v52  ;;  %v1708_v0 = vmul.f32 1.442695, %v1339_v16  ;;  %v1343_v41 = vsub.f32 %v6346_v9, %v6519_v38 }
  0x8d   :  { %v4971_v63 = vpop.eup %4970  ;;  %4986 = vpow2.f32 %v1704_v59  ;;  %v1344_v18 = vsub.f32 %v6355_v30, %v6519_v38  ;;  %v1710_v4 = vmul.f32 1.442695, %v1340_v54  ;;  %v1712_v3 = vmul.f32 1.442695, %v1341_v33 }
  0x8e   :  { %v3304_v49 = vmul.f32 %v4971_v63, %v6373_v10  ;;  %v3305_v25 = vmul.f32 %v4971_v63, %v6390_v14  ;;  %v3306_v39 = vmul.f32 %v4971_v63, %v6403_v55  ;;  %v3307_v21 = vmul.f32 %v4971_v63, %v6406_v43 }
  0x8f   :  { %v6551_v31 = vpop.eup %4972  ;;  %v3308_v37 = vmul.f32 %v4971_v63, %v6416_v50  ;;  %v2364_v9 = vrot.slane %v2363_v42, 4  ;;  %4988 = vpow2.f32 %v1706_v27  ;;  %v1714_v32 = vmul.f32 1.442695, %v1342_v34 }
  0x90   :  { %v6554_v20 = vpop.eup %4974  ;;  %v4588_v30 = vadd.f32 -192.0, %v3304_v49  ;;  %v4589_v38 = vadd.f32 -192.0, %v3305_v25  ;;  %v4590_v46 = vadd.f32 -192.0, %v3306_v39  ;;  %v4591_v26 = vadd.f32 -192.0, %v3307_v21 }
  0x91   :  { %v6556_v10 = vpop.eup %4976  ;;  %v4592_v14 = vadd.f32 -192.0, %v3308_v37  ;;  %v2365_v15 = vadd.f32 %v2364_v9, %v2363_v42  ;;  %v2370_v55 = vsel %vm328_vm0, %v6551_v31, 0.0  ;;  %v2371_v43 = vsel %vm328_vm0, %v6554_v20, 0.0 }
  0x92   :  { %v6562_v50 = vpop.eup %4978  ;;  %v3944_v12 = vmax.f32 %v4588_v30, 0.0  ;;  %v3945_v28 = vmax.f32 %v4589_v38, 0.0  ;;  %v3946_v23 = vmax.f32 %v4590_v46, 0.0  ;;  %v3947_v58 = vmax.f32 %v4591_v26, 0.0 }
  0x93   :  { %v6564_v5 = vpop.eup %4980  ;;  %v3948_v2 = vmax.f32 %v4592_v14, 0.0  ;;  %v2366_v16 = vrot.slane %v2365_v15, 2  ;;  %v2372_v35 = vadd.f32 %v2371_v43, %v2370_v55  ;;  %v2373_v52 = vsel %vm328_vm0, %v6556_v10, 0.0 }
  0x94   :  { %4264 = vst.msk [vmem:[%s11638_s1 + $0xf0] sm:$0xff] %vm328_vm0, %v3944_v12  ;;  %4265 = vst.msk [vmem:[%s11638_s1 + $0xf8] sm:$0xff] %vm328_vm0, %v3945_v28  ;;  %v2375_v57 = vsel %vm328_vm0, %v6562_v50, 0.0  ;;  %4990 = vpow2.f32 %v1708_v0  ;;  %v1716_v59 = vmul.f32 1.442695, %v1343_v41  ;;  %v507_v42 = vmax.f32 %v6487_v29, %v506_v19  ;;  %v6610_v19 = vld [vmem:[%s11637_s0 + $0x208] sm:$0xff] }
  0x95   :  { %4266 = vst.msk [vmem:[%s11638_s1 + $0x100] sm:$0xff] %vm328_vm0, %v3946_v23  ;;  %4267 = vst.msk [vmem:[%s11638_s1 + $0x108] sm:$0xff] %vm328_vm0, %v3947_v58  ;;  %v1718_v54 = vmul.f32 1.442695, %v1344_v18  ;;  %v6586_v27 = vpop.eup %4982  ;;  %v2367_v33 = vadd.f32 %v2366_v16, %v2365_v15  ;;  %v2374_v34 = vadd.f32 %v2373_v52, %v2372_v35  ;;  %4992 = vpow2.f32 %v1710_v4 }
  0x96   :  { %4268 = vst.msk [vmem:[%s11638_s1 + $0x110] sm:$0x7] %vm336_vm1, %v3948_v2  ;;  %v6593_v63 = vpop.eup %4984  ;;  %v2377_v49 = vsel %vm336_vm1, %v6564_v5, 0.0  ;;  %v2385_v0 = vsel %vm328_vm0, %v6586_v27, 0.0  ;;  %4994 = vpow2.f32 %v1712_v3  ;;  %v514_v41 = vmax.f32 %v512_v13, %v6485_v24 }
  0x97   :  { %v6603_v18 = vpop.eup %4986  ;;  %v2368_v25 = vrot.slane %v2367_v33, 1  ;;  %v2376_v4 = vadd.f32 %v2375_v57, %v2374_v34  ;;  %v2386_v29 = vsel %vm328_vm0, %v6593_v63, 0.0  ;;  %4996 = vpow2.f32 %v1714_v32 }
  0x98   :  { %v2387_v39 = vadd.f32 %v2386_v29, %v2385_v0  ;;  %v2388_v3 = vsel %vm328_vm0, %v6603_v18, 0.0  ;;  %4998 = vpow2.f32 %v1716_v59  ;;  %v508_v36 = vrot.slane %v507_v42, 1 }
  0x99   :  { %v6619_v24 = vpop.eup %4988  ;;  %v2369_v13 = vadd.f32 %v2368_v25, %v2367_v33  ;;  %v2378_v21 = vadd.f32 %v2377_v49, %v2376_v4  ;;  %5000 = vpow2.f32 %v1718_v54  ;;  %v516_v37 = vmax.f32 %v514_v41, %v6493_v8 }
  0x9a   :  { %v2389_v9 = vadd.f32 %v2388_v3, %v2387_v39  ;;  %v2390_v32 = vsel %vm328_vm0, %v6619_v24, 0.0  ;;  %v509_v30 = vmax.f32 %v507_v42, %v508_v36  ;;  %v525_v38 = vsel %vm328_vm0, %v6610_v19, -inf  ;;  %v6662_v3 = vld [vmem:[%s11637_s0 + $0x220] sm:$0xff] }
  0x9b   :  { %5002 = vrcp.f32 %v2369_v13  ;;  %v2379_v46 = vrot.slane %v2378_v21, 4  ;;  %v518_v26 = vmax.f32 %v516_v37, %v6513_v1  ;;  %v526_v14 = vsel %vm328_vm0, %v6617_v40, -inf  ;;  %v6637_v1 = vld [vmem:[%s11637_s0 + $0x218] sm:$0xff] }
  0x9c   :  { %v2391_v15 = vadd.f32 %v2390_v32, %v2389_v9  ;;  %v1345_v55 = vsub.f32 %v6360_v45, %v509_v30  ;;  %v1346_v8 = vsub.f32 %v6371_v7, %v509_v30  ;;  %v1347_v43 = vsub.f32 %v6382_v47, %v509_v30 }
  0x9d   :  { %v2380_v12 = vadd.f32 %v2379_v46, %v2378_v21  ;;  %v1348_v28 = vsub.f32 %v6395_v17, %v509_v30  ;;  %v1349_v23 = vsub.f32 %v6431_v53, %v509_v30  ;;  %v519_v58 = vrot.slane %v518_v26, 4 }
  0x9e   :  { %v6639_v2 = vpop.eup %4990  ;;  %v1720_v16 = vmul.f32 1.442695, %v1345_v55  ;;  %v1722_v35 = vmul.f32 1.442695, %v1346_v8  ;;  %v1724_v45 = vmul.f32 1.442695, %v1347_v43  ;;  %v527_v52 = vmax.f32 %v525_v38, %v526_v14 }
  0x9f   :  { %v6641_v7 = vpop.eup %4992  ;;  %v2381_v47 = vrot.slane %v2380_v12, 2  ;;  %v2392_v17 = vsel %vm336_vm1, %v6639_v2, 0.0  ;;  %v1726_v57 = vmul.f32 1.442695, %v1348_v28  ;;  %v1728_v53 = vmul.f32 1.442695, %v1349_v23 }
  0xa0   :  { %v6645_v59 = vpop.eup %4994  ;;  %v2393_v54 = vadd.f32 %v2392_v17, %v2391_v15  ;;  %v2400_v33 = vsel %vm328_vm0, %v6641_v7, 0.0  ;;  %5004 = vpow2.f32 %v1720_v16  ;;  %v520_v34 = vmax.f32 %v518_v26, %v519_v58 }
  0xa1   :  { %v6649_v42 = vpop.eup %4996  ;;  %v2382_v49 = vadd.f32 %v2381_v47, %v2380_v12  ;;  %v2401_v0 = vsel %vm328_vm0, %v6645_v59, 0.0  ;;  %5006 = vpow2.f32 %v1722_v35  ;;  %v528_v41 = vsel %vm328_vm0, %v6637_v1, -inf }
  0xa2   :  { %v6655_v25 = vpop.eup %4998  ;;  %v2394_v4 = vrot.slane %v2393_v54, 4  ;;  %v2402_v29 = vadd.f32 %v2401_v0, %v2400_v33  ;;  %v2403_v39 = vsel %vm328_vm0, %v6649_v42, 0.0  ;;  %5008 = vpow2.f32 %v1724_v45 }
  0xa3   :  { %v6664_v36 = vpop.eup %5000  ;;  %v2383_v13 = vrot.slane %v2382_v49, 1  ;;  %v2405_v21 = vsel %vm328_vm0, %v6655_v25, 0.0  ;;  %5010 = vpow2.f32 %v1726_v57  ;;  %v521_v37 = vrot.slane %v520_v34, 2 }
  0xa4   :  { %v2395_v9 = vadd.f32 %v2394_v4, %v2393_v54  ;;  %v2404_v32 = vadd.f32 %v2403_v39, %v2402_v29  ;;  %v2407_v30 = vsel %vm336_vm1, %v6664_v36, 0.0  ;;  %5012 = vpow2.f32 %v1728_v53 }
  0xa5   :  { %v5003_v38 = vpop.eup %5002  ;;  %v2384_v46 = vadd.f32 %v2383_v13, %v2382_v49  ;;  %v522_v26 = vmax.f32 %v520_v34, %v521_v37  ;;  %v529_v14 = vmax.f32 %v527_v52, %v528_v41  ;;  %v530_v15 = vsel %vm328_vm0, %v6662_v3, -inf }
  0xa6   :  { %v3309_v55 = vmul.f32 %v5003_v38, %v6505_v48  ;;  %v3310_v8 = vmul.f32 %v5003_v38, %v6507_v61  ;;  %v3311_v43 = vmul.f32 %v5003_v38, %v6515_v6  ;;  %v3312_v12 = vmul.f32 %v5003_v38, %v6521_v11  ;;  %v6680_v48 = vld [vmem:[%s11637_s0 + $0x228] sm:$0x7] }
  0xa7   :  { %v3313_v28 = vmul.f32 %v5003_v38, %v6526_v56  ;;  %5014 = vrcp.f32 %v2384_v46  ;;  %v2396_v23 = vrot.slane %v2395_v9, 2  ;;  %v2406_v58 = vadd.f32 %v2405_v21, %v2404_v32 }
  0xa8   :  { %v4593_v16 = vadd.f32 -192.0, %v3309_v55  ;;  %v4594_v35 = vadd.f32 -192.0, %v3310_v8  ;;  %v4595_v45 = vadd.f32 -192.0, %v3311_v43  ;;  %v4596_v52 = vadd.f32 -192.0, %v3312_v12 }
  0xa9   :  { %v4597_v47 = vadd.f32 -192.0, %v3313_v28  ;;  %v2397_v17 = vadd.f32 %v2396_v23, %v2395_v9  ;;  %v2408_v57 = vadd.f32 %v2407_v30, %v2406_v58  ;;  %v523_v53 = vrot.slane %v522_v26, 1 }
  0xaa   :  { %v6682_v61 = vpop.eup %5004  ;;  %v3949_v6 = vmax.f32 %v4593_v16, 0.0  ;;  %v3950_v11 = vmax.f32 %v4594_v35, 0.0  ;;  %v3951_v56 = vmax.f32 %v4595_v45, 0.0  ;;  %v3952_v54 = vmax.f32 %v4596_v52, 0.0 }
  0xab   :  { %v6684_v33 = vpop.eup %5006  ;;  %v3953_v34 = vmax.f32 %v4597_v47, 0.0  ;;  %v2398_v49 = vrot.slane %v2397_v17, 1  ;;  %v2409_v0 = vrot.slane %v2408_v57, 4  ;;  %v2415_v41 = vsel %vm328_vm0, %v6682_v61, 0.0 }
  0xac   :  { %v6688_v4 = vpop.eup %5008  ;;  %4269 = vst.msk [vmem:[%s11638_s1 + $0x118] sm:$0xff] %vm328_vm0, %v3949_v6  ;;  %4270 = vst.msk [vmem:[%s11638_s1 + $0x120] sm:$0xff] %vm328_vm0, %v3950_v11  ;;  %v2416_v29 = vsel %vm328_vm0, %v6684_v33, 0.0  ;;  %v524_v39 = vmax.f32 %v522_v26, %v523_v53  ;;  %v531_v13 = vmax.f32 %v529_v14, %v530_v15  ;;  %v532_v21 = vsel %vm336_vm1, %v6680_v48, -inf }
  0xad   :  { %4271 = vst.msk [vmem:[%s11638_s1 + $0x128] sm:$0xff] %vm328_vm0, %v3951_v56  ;;  %4272 = vst.msk [vmem:[%s11638_s1 + $0x130] sm:$0xff] %vm328_vm0, %v3952_v54  ;;  %v6710_v37 = vpop.eup %5010  ;;  %v2399_v9 = vadd.f32 %v2398_v49, %v2397_v17  ;;  %v2410_v32 = vadd.f32 %v2409_v0, %v2408_v57  ;;  %v2417_v30 = vadd.f32 %v2416_v29, %v2415_v41  ;;  %v2418_v38 = vsel %vm328_vm0, %v6688_v4, 0.0  ;;  %v6742_v41 = vld [vmem:[%s11637_s0 + $0x238] sm:$0xff]  ;;  %v6747_v29 = vld [vmem:[%s11637_s0 + $0x240] sm:$0xff] }
  0xae   :  { %4273 = vst.msk [vmem:[%s11638_s1 + $0x138] sm:$0x7] %vm336_vm1, %v3953_v34  ;;  %v6718_v46 = vpop.eup %5012  ;;  %v2420_v26 = vsel %vm328_vm0, %v6710_v37, 0.0  ;;  %v1350_v14 = vsub.f32 %v6456_v62, %v524_v39  ;;  %v1351_v15 = vsub.f32 %v6463_v44, %v524_v39  ;;  %v1352_v55 = vsub.f32 %v6468_v60, %v524_v39 }
  0xaf   :  { %5016 = vrcp.f32 %v2399_v9  ;;  %v2411_v8 = vrot.slane %v2410_v32, 2  ;;  %v2419_v43 = vadd.f32 %v2418_v38, %v2417_v30  ;;  %v2422_v12 = vsel %vm336_vm1, %v6718_v46, 0.0 }
  0xb0   :  { %v1353_v28 = vsub.f32 %v6477_v22, %v524_v39  ;;  %v1354_v23 = vsub.f32 %v6501_v51, %v524_v39  ;;  %v1730_v58 = vmul.f32 1.442695, %v1350_v14  ;;  %v1732_v16 = vmul.f32 1.442695, %v1351_v15 }
  0xb1   :  { %v5015_v35 = vpop.eup %5014  ;;  %v2412_v45 = vadd.f32 %v2411_v8, %v2410_v32  ;;  %v2421_v52 = vadd.f32 %v2420_v26, %v2419_v43  ;;  %v1734_v62 = vmul.f32 1.442695, %v1352_v55  ;;  %v533_v47 = vmax.f32 %v531_v13, %v532_v21 }
  0xb2   :  { %v3314_v44 = vmul.f32 %v5015_v35, %v6551_v31  ;;  %v3315_v60 = vmul.f32 %v5015_v35, %v6554_v20  ;;  %v3316_v17 = vmul.f32 %v5015_v35, %v6556_v10  ;;  %v3317_v57 = vmul.f32 %v5015_v35, %v6562_v50  ;;  %v6737_v31 = vld [vmem:[%s11637_s0 + $0x230] sm:$0xff] }
  0xb3   :  { %v3318_v53 = vmul.f32 %v5015_v35, %v6564_v5  ;;  %v2413_v22 = vrot.slane %v2412_v45, 1  ;;  %v2423_v6 = vadd.f32 %v2422_v12, %v2421_v52  ;;  %5018 = vpow2.f32 %v1730_v58 }
  0xb4   :  { %v4598_v51 = vadd.f32 -192.0, %v3314_v44  ;;  %v4599_v11 = vadd.f32 -192.0, %v3315_v60  ;;  %v4600_v56 = vadd.f32 -192.0, %v3316_v17  ;;  %v4601_v54 = vadd.f32 -192.0, %v3317_v57 }
  0xb5   :  { %v4602_v34 = vadd.f32 -192.0, %v3318_v53  ;;  %v2414_v49 = vadd.f32 %v2413_v22, %v2412_v45  ;;  %v2424_v0 = vrot.slane %v2423_v6, 4  ;;  %5020 = vpow2.f32 %v1732_v16  ;;  %v6795_v53 = vld [vmem:[%s11637_s0 + $0x258] sm:$0xff] }
  0xb6   :  { %v3954_v20 = vmax.f32 %v4598_v51, 0.0  ;;  %v3955_v10 = vmax.f32 %v4599_v11, 0.0  ;;  %v3956_v50 = vmax.f32 %v4600_v56, 0.0  ;;  %v3957_v5 = vmax.f32 %v4601_v54, 0.0 }
  0xb7   :  { %v3958_v39 = vmax.f32 %v4602_v34, 0.0  ;;  %5022 = vrcp.f32 %v2414_v49  ;;  %v2425_v13 = vadd.f32 %v2424_v0, %v2423_v6  ;;  %v1736_v21 = vmul.f32 1.442695, %v1353_v28 }
  0xb8   :  { %4274 = vst.msk [vmem:[%s11638_s1 + $0x140] sm:$0xff] %vm328_vm0, %v3954_v20  ;;  %4275 = vst.msk [vmem:[%s11638_s1 + $0x148] sm:$0xff] %vm328_vm0, %v3955_v10  ;;  %5024 = vpow2.f32 %v1734_v62  ;;  %v1738_v9 = vmul.f32 1.442695, %v1354_v23  ;;  %v534_v32 = vrot.slane %v533_v47, 4  ;;  %v540_v30 = vsel %vm328_vm0, %v6737_v31, -inf }
  0xb9   :  { %4276 = vst.msk [vmem:[%s11638_s1 + $0x150] sm:$0xff] %vm328_vm0, %v3956_v50  ;;  %4277 = vst.msk [vmem:[%s11638_s1 + $0x158] sm:$0xff] %vm328_vm0, %v3957_v5  ;;  %v5017_v38 = vpop.eup %5016  ;;  %v2426_v26 = vrot.slane %v2425_v13, 2  ;;  %5026 = vpow2.f32 %v1736_v21  ;;  %v541_v14 = vsel %vm328_vm0, %v6742_v41, -inf  ;;  %v543_v15 = vsel %vm328_vm0, %v6747_v29, -inf }
  0xba   :  { %4278 = vst.msk [vmem:[%s11638_s1 + $0x160] sm:$0x7] %vm336_vm1, %v3958_v39  ;;  %v3319_v55 = vmul.f32 %v5017_v38, %v6586_v27  ;;  %v3320_v8 = vmul.f32 %v5017_v38, %v6593_v63  ;;  %v3321_v43 = vmul.f32 %v5017_v38, %v6603_v18  ;;  %v3322_v12 = vmul.f32 %v5017_v38, %v6619_v24  ;;  %v6785_v63 = vld [vmem:[%s11637_s0 + $0x248] sm:$0xff]  ;;  %v6790_v18 = vld [vmem:[%s11637_s0 + $0x250] sm:$0x7] }
  0xbb   :  { %v3323_v28 = vmul.f32 %v5017_v38, %v6639_v2  ;;  %v2427_v23 = vadd.f32 %v2426_v26, %v2425_v13  ;;  %5028 = vpow2.f32 %v1738_v9  ;;  %v535_v58 = vmax.f32 %v533_v47, %v534_v32 }
  0xbc   :  { %v4603_v16 = vadd.f32 -192.0, %v3319_v55  ;;  %v4604_v35 = vadd.f32 -192.0, %v3320_v8  ;;  %v4605_v45 = vadd.f32 -192.0, %v3321_v43  ;;  %v4606_v52 = vadd.f32 -192.0, %v3322_v12 }
  0xbd   :  { %v6780_v62 = vpop.eup %5018  ;;  %v4607_v44 = vadd.f32 -192.0, %v3323_v28  ;;  %v2428_v60 = vrot.slane %v2427_v23, 1  ;;  %v536_v27 = vrot.slane %v535_v58, 2  ;;  %v542_v24 = vmax.f32 %v540_v30, %v541_v14 }
  0xbe   :  { %v3959_v2 = vmax.f32 %v4603_v16, 0.0  ;;  %v3960_v47 = vmax.f32 %v4604_v35, 0.0  ;;  %v3961_v17 = vmax.f32 %v4605_v45, 0.0  ;;  %v3962_v57 = vmax.f32 %v4606_v52, 0.0  ;;  %v6850_v35 = vld [vmem:[%s11637_s0 + $0x260] sm:$0xff] }
  0xbf   :  { %v6797_v22 = vpop.eup %5020  ;;  %v3963_v6 = vmax.f32 %v4607_v44, 0.0  ;;  %v2429_v51 = vadd.f32 %v2428_v60, %v2427_v23  ;;  %v2430_v11 = vsel %vm328_vm0, %v6780_v62, 0.0  ;;  %v537_v56 = vmax.f32 %v535_v58, %v536_v27 }
  0xc0   :  { %4279 = vst.msk [vmem:[%s11638_s1 + $0x168] sm:$0xff] %vm328_vm0, %v3959_v2  ;;  %4280 = vst.msk [vmem:[%s11638_s1 + $0x170] sm:$0xff] %vm328_vm0, %v3960_v47  ;;  %v2431_v54 = vsel %vm328_vm0, %v6797_v22, 0.0  ;;  %v544_v34 = vmax.f32 %v542_v24, %v543_v15  ;;  %v545_v49 = vsel %vm328_vm0, %v6785_v63, -inf  ;;  %v547_v0 = vsel %vm336_vm1, %v6790_v18, -inf }
  0xc1   :  { %4281 = vst.msk [vmem:[%s11638_s1 + $0x178] sm:$0xff] %vm328_vm0, %v3961_v17  ;;  %4282 = vst.msk [vmem:[%s11638_s1 + $0x180] sm:$0xff] %vm328_vm0, %v3962_v57  ;;  %v5023_v20 = vpop.eup %5022  ;;  %5030 = vrcp.f32 %v2429_v51  ;;  %v2432_v10 = vadd.f32 %v2431_v54, %v2430_v11  ;;  %v538_v50 = vrot.slane %v537_v56, 1  ;;  %v6829_v5 = vsel %vm328_vm0, %v6795_v53, -inf }
  0xc2   :  { %4283 = vst.msk [vmem:[%s11638_s1 + $0x188] sm:$0x7] %vm336_vm1, %v3963_v6  ;;  %v6831_v39 = vpop.eup %5024  ;;  %v3324_v13 = vmul.f32 %v5023_v20, %v6641_v7  ;;  %v3325_v21 = vmul.f32 %v5023_v20, %v6645_v59  ;;  %v3326_v9 = vmul.f32 %v5023_v20, %v6649_v42  ;;  %v3327_v32 = vmul.f32 %v5023_v20, %v6655_v25 }
  0xc3   :  { %v6837_v30 = vpop.eup %5026  ;;  %v3328_v38 = vmul.f32 %v5023_v20, %v6664_v36  ;;  %v2433_v26 = vsel %vm328_vm0, %v6831_v39, 0.0  ;;  %v539_v14 = vmax.f32 %v537_v56, %v538_v50  ;;  %v546_v15 = vmax.f32 %v544_v34, %v545_v49 }
  0xc4   :  { %v4608_v55 = vadd.f32 -192.0, %v3324_v13  ;;  %v4609_v8 = vadd.f32 -192.0, %v3325_v21  ;;  %v4610_v43 = vadd.f32 -192.0, %v3326_v9  ;;  %v4611_v12 = vadd.f32 -192.0, %v3327_v32 }
  0xc5   :  { %v6842_v7 = vpop.eup %5028  ;;  %v4612_v59 = vadd.f32 -192.0, %v3328_v38  ;;  %v2434_v28 = vadd.f32 %v2433_v26, %v2432_v10  ;;  %v2435_v42 = vsel %vm328_vm0, %v6837_v30, 0.0  ;;  %v1355_v25 = vsub.f32 %v6610_v19, %v539_v14  ;;  %v6904_v38 = vld [vmem:[%s11637_s0 + $0x280] sm:$0xff] }
  0xc6   :  { %v3964_v23 = vmax.f32 %v4608_v55, 0.0  ;;  %v3965_v36 = vmax.f32 %v4609_v8, 0.0  ;;  %v3966_v58 = vmax.f32 %v4610_v43, 0.0  ;;  %v3967_v16 = vmax.f32 %v4611_v12, 0.0  ;;  %v6909_v8 = vld [vmem:[%s11637_s0 + $0x288] sm:$0xff] }
  0xc7   :  { %v3968_v45 = vmax.f32 %v4612_v59, 0.0  ;;  %v2436_v52 = vadd.f32 %v2435_v42, %v2434_v28  ;;  %v2437_v44 = vsel %vm336_vm1, %v6842_v7, 0.0  ;;  %v1356_v60 = vsub.f32 %v6617_v40, %v539_v14  ;;  %v6914_v28 = vld [vmem:[%s11637_s0 + $0x290] sm:$0xff]  ;;  %v6919_v42 = vld [vmem:[%s11637_s0 + $0x298] sm:$0xff] }
  0xc8   :  { %4284 = vst.msk [vmem:[%s11638_s1 + $0x190] sm:$0xff] %vm328_vm0, %v3964_v23  ;;  %4285 = vst.msk [vmem:[%s11638_s1 + $0x198] sm:$0xff] %vm328_vm0, %v3965_v36  ;;  %v1357_v19 = vsub.f32 %v6637_v1, %v539_v14  ;;  %v1358_v40 = vsub.f32 %v6662_v3, %v539_v14  ;;  %v1359_v27 = vsub.f32 %v6680_v48, %v539_v14  ;;  %v1740_v24 = vmul.f32 1.442695, %v1355_v25  ;;  %v6924_v25 = vld [vmem:[%s11637_s0 + $0x2a0] sm:$0x7] }
  0xc9   :  { %4286 = vst.msk [vmem:[%s11638_s1 + $0x1a0] sm:$0xff] %vm328_vm0, %v3966_v58  ;;  %4287 = vst.msk [vmem:[%s11638_s1 + $0x1a8] sm:$0xff] %vm328_vm0, %v3967_v16  ;;  %v2438_v2 = vadd.f32 %v2437_v44, %v2436_v52  ;;  %v1742_v47 = vmul.f32 1.442695, %v1356_v60  ;;  %v548_v17 = vmax.f32 %v546_v15, %v547_v0  ;;  %v556_v57 = vsel %vm328_vm0, %v6850_v35, -inf }
  0xca   :  { %4288 = vst.msk [vmem:[%s11638_s1 + $0x1b0] sm:$0x7] %vm336_vm1, %v3968_v45  ;;  %5032 = vpow2.f32 %v1740_v24  ;;  %v1744_v6 = vmul.f32 1.442695, %v1357_v19  ;;  %v1746_v51 = vmul.f32 1.442695, %v1358_v40  ;;  %v557_v56 = vmax.f32 %v6829_v5, %v556_v57 }
  0xcb   :  { %v1748_v1 = vmul.f32 1.442695, %v1359_v27  ;;  %v5031_v11 = vpop.eup %5030  ;;  %v2439_v3 = vrot.slane %v2438_v2, 4  ;;  %5034 = vpow2.f32 %v1742_v47  ;;  %v549_v48 = vrot.slane %v548_v17, 4  ;;  %v6889_v5 = vld [vmem:[%s11637_s0 + $0x268] sm:$0xff]  ;;  %v6964_v40 = vld [vmem:[%s11637_s0 + $0x2b0] sm:$0xff] }
  0xcc   :  { %v3329_v54 = vmul.f32 %v5031_v11, %v6682_v61  ;;  %v3330_v34 = vmul.f32 %v5031_v11, %v6684_v33  ;;  %v3331_v49 = vmul.f32 %v5031_v11, %v6688_v4  ;;  %v3332_v0 = vmul.f32 %v5031_v11, %v6710_v37  ;;  %v6894_v61 = vld [vmem:[%s11637_s0 + $0x270] sm:$0xff]  ;;  %v6959_v19 = vld [vmem:[%s11637_s0 + $0x2a8] sm:$0xff] }
  0xcd   :  { %v3333_v20 = vmul.f32 %v5031_v11, %v6718_v46  ;;  %v2440_v10 = vadd.f32 %v2439_v3, %v2438_v2  ;;  %5036 = vpow2.f32 %v1744_v6  ;;  %v550_v50 = vmax.f32 %v548_v17, %v549_v48  ;;  %v6899_v46 = vld [vmem:[%s11637_s0 + $0x278] sm:$0x7] }
  0xce   :  { %v4613_v13 = vadd.f32 -192.0, %v3329_v54  ;;  %v4614_v21 = vadd.f32 -192.0, %v3330_v34  ;;  %v4615_v9 = vadd.f32 -192.0, %v3331_v49  ;;  %v4616_v32 = vadd.f32 -192.0, %v3332_v0 }
  0xcf   :  { %v4617_v33 = vadd.f32 -192.0, %v3333_v20  ;;  %v2441_v4 = vrot.slane %v2440_v10, 2  ;;  %5038 = vpow2.f32 %v1746_v51  ;;  %v551_v37 = vrot.slane %v550_v50, 2 }
  0xd0   :  { %v3969_v26 = vmax.f32 %v4613_v13, 0.0  ;;  %v3970_v14 = vmax.f32 %v4614_v21, 0.0  ;;  %v3971_v15 = vmax.f32 %v4615_v9, 0.0  ;;  %v3972_v55 = vmax.f32 %v4616_v32, 0.0 }
  0xd1   :  { %v3973_v43 = vmax.f32 %v4617_v33, 0.0  ;;  %v2442_v12 = vadd.f32 %v2441_v4, %v2440_v10  ;;  %5040 = vpow2.f32 %v1748_v1  ;;  %v552_v59 = vmax.f32 %v550_v50, %v551_v37 }
  0xd2   :  { %4289 = vst.msk [vmem:[%s11638_s1 + $0x1b8] sm:$0xff] %vm328_vm0, %v3969_v26  ;;  %4290 = vst.msk [vmem:[%s11638_s1 + $0x1c0] sm:$0xff] %vm328_vm0, %v3970_v14  ;;  %v558_v23 = vsel %vm328_vm0, %v6889_v5, -inf  ;;  %v560_v36 = vsel %vm328_vm0, %v6894_v61, -inf  ;;  %v562_v58 = vsel %vm336_vm1, %v6899_v46, -inf  ;;  %v570_v16 = vsel %vm328_vm0, %v6904_v38, -inf }
  0xd3   :  { %4291 = vst.msk [vmem:[%s11638_s1 + $0x1c8] sm:$0xff] %vm328_vm0, %v3971_v15  ;;  %4292 = vst.msk [vmem:[%s11638_s1 + $0x1d0] sm:$0xff] %vm328_vm0, %v3972_v55  ;;  %v2443_v45 = vrot.slane %v2442_v12, 1  ;;  %v553_v52 = vrot.slane %v552_v59, 1  ;;  %v559_v44 = vmax.f32 %v557_v56, %v558_v23  ;;  %v571_v60 = vsel %vm328_vm0, %v6909_v8, -inf }
  0xd4   :  { %4293 = vst.msk [vmem:[%s11638_s1 + $0x1d8] sm:$0x7] %vm336_vm1, %v3973_v43  ;;  %v6966_v27 = vpop.eup %5032  ;;  %v572_v24 = vmax.f32 %v570_v16, %v571_v60  ;;  %v573_v2 = vsel %vm328_vm0, %v6914_v28, -inf  ;;  %v575_v47 = vsel %vm328_vm0, %v6919_v42, -inf  ;;  %v577_v17 = vsel %vm336_vm1, %v6924_v25, -inf  ;;  %v7007_v43 = vld [vmem:[%s11637_s0 + $0x2c0] sm:$0xff] }
  0xd5   :  { %v6974_v57 = vpop.eup %5034  ;;  %v2444_v6 = vadd.f32 %v2443_v45, %v2442_v12  ;;  %v2445_v51 = vsel %vm328_vm0, %v6966_v27, 0.0  ;;  %v554_v1 = vmax.f32 %v552_v59, %v553_v52  ;;  %v561_v11 = vmax.f32 %v559_v44, %v560_v36  ;;  %v7014_v23 = vld [vmem:[%s11637_s0 + $0x2c8] sm:$0x7]  ;;  %v7021_v52 = vld [vmem:[%s11637_s0 + $0x2d0] sm:$0xff]  ;;  %v7026_v44 = vld [vmem:[%s11637_s0 + $0x2d8] sm:$0xff] }
  0xd6   :  { %v2446_v3 = vsel %vm328_vm0, %v6974_v57, 0.0  ;;  %v574_v48 = vmax.f32 %v572_v24, %v573_v2  ;;  %v585_v56 = vsel %vm328_vm0, %v6959_v19, -inf  ;;  %v586_v54 = vsel %vm328_vm0, %v6964_v40, -inf }
  0xd7   :  { %v6984_v34 = vpop.eup %5036  ;;  %5042 = vrcp.f32 %v2444_v6  ;;  %v2447_v49 = vadd.f32 %v2446_v3, %v2445_v51  ;;  %v1360_v0 = vsub.f32 %v6737_v31, %v554_v1  ;;  %v1361_v20 = vsub.f32 %v6742_v41, %v554_v1 }
  0xd8   :  { %v2448_v10 = vsel %vm328_vm0, %v6984_v34, 0.0  ;;  %v1362_v50 = vsub.f32 %v6747_v29, %v554_v1  ;;  %v1363_v13 = vsub.f32 %v6785_v63, %v554_v1  ;;  %v1364_v21 = vsub.f32 %v6790_v18, %v554_v1  ;;  %v7000_v29 = vld [vmem:[%s11637_s0 + $0x2b8] sm:$0xff] }
  0xd9   :  { %v6993_v9 = vpop.eup %5038  ;;  %v2449_v32 = vadd.f32 %v2448_v10, %v2447_v49  ;;  %v1750_v33 = vmul.f32 1.442695, %v1360_v0  ;;  %v1752_v4 = vmul.f32 1.442695, %v1361_v20  ;;  %v563_v37 = vmax.f32 %v561_v11, %v562_v58 }
  0xda   :  { %v2450_v31 = vsel %vm328_vm0, %v6993_v9, 0.0  ;;  %v1754_v26 = vmul.f32 1.442695, %v1362_v50  ;;  %v1756_v41 = vmul.f32 1.442695, %v1363_v13  ;;  %v576_v14 = vmax.f32 %v574_v48, %v575_v47  ;;  %v7037_v47 = vld [vmem:[%s11637_s0 + $0x2e0] sm:$0xff] }
  0xdb   :  { %v7002_v63 = vpop.eup %5040  ;;  %v2451_v18 = vadd.f32 %v2450_v31, %v2449_v32  ;;  %5044 = vpow2.f32 %v1750_v33  ;;  %v1758_v15 = vmul.f32 1.442695, %v1364_v21  ;;  %v564_v55 = vrot.slane %v563_v37, 4 }
  0xdc   :  { %v2452_v12 = vsel %vm336_vm1, %v7002_v63, 0.0  ;;  %5046 = vpow2.f32 %v1752_v4  ;;  %v578_v59 = vmax.f32 %v576_v14, %v577_v17  ;;  %v587_v36 = vmax.f32 %v585_v56, %v586_v54 }
  0xdd   :  { %v2453_v58 = vadd.f32 %v2452_v12, %v2451_v18  ;;  %5048 = vpow2.f32 %v1754_v26  ;;  %v565_v16 = vmax.f32 %v563_v37, %v564_v55  ;;  %v588_v45 = vsel %vm328_vm0, %v7000_v29, -inf }
  0xde   :  { %5050 = vpow2.f32 %v1756_v41  ;;  %v579_v60 = vrot.slane %v578_v59, 4  ;;  %v7028_v24 = vmax.f32 %v587_v36, %v588_v45  ;;  %v7032_v2 = vsel %vm328_vm0, %v7007_v43, -inf }
  0xdf   :  { %v2454_v17 = vrot.slane %v2453_v58, 4  ;;  %5052 = vpow2.f32 %v1758_v15  ;;  %v566_v6 = vrot.slane %v565_v16, 2  ;;  %v7041_v51 = vsel %vm336_vm1, %v7014_v23, -inf }
  0xe0   :  { %v580_v1 = vmax.f32 %v578_v59, %v579_v60  ;;  %v591_v11 = vmax.f32 %v7028_v24, %v7032_v2  ;;  %v7047_v3 = vsel %vm328_vm0, %v7021_v52, -inf  ;;  %v7051_v48 = vsel %vm328_vm0, %v7026_v44, -inf }
  0xe1   :  { %v5043_v56 = vpop.eup %5042  ;;  %v2455_v54 = vadd.f32 %v2454_v17, %v2453_v58  ;;  %v567_v49 = vmax.f32 %v565_v16, %v566_v6  ;;  %v602_v0 = vmax.f32 %v7047_v3, %v7051_v48  ;;  %v603_v20 = vsel %vm328_vm0, %v7037_v47, -inf }
  0xe2   :  { %v3334_v10 = vmul.f32 %v5043_v56, %v6780_v62  ;;  %v3335_v50 = vmul.f32 %v5043_v56, %v6797_v22  ;;  %v3336_v13 = vmul.f32 %v5043_v56, %v6831_v39  ;;  %v3337_v21 = vmul.f32 %v5043_v56, %v6837_v30 }
  0xe3   :  { %v3338_v32 = vmul.f32 %v5043_v56, %v6842_v7  ;;  %v2456_v33 = vrot.slane %v2455_v54, 2  ;;  %v568_v4 = vrot.slane %v567_v49, 1  ;;  %v581_v37 = vrot.slane %v580_v1, 2 }
  0xe4   :  { %v4618_v31 = vadd.f32 -192.0, %v3334_v10  ;;  %v4619_v26 = vadd.f32 -192.0, %v3335_v50  ;;  %v4620_v41 = vadd.f32 -192.0, %v3336_v13  ;;  %v4621_v14 = vadd.f32 -192.0, %v3337_v21 }
  0xe5   :  { %v7062_v18 = vpop.eup %5044  ;;  %v4622_v15 = vadd.f32 -192.0, %v3338_v32  ;;  %v2457_v55 = vadd.f32 %v2456_v33, %v2455_v54  ;;  %v569_v62 = vmax.f32 %v567_v49, %v568_v4  ;;  %v582_v12 = vmax.f32 %v580_v1, %v581_v37  ;;  %v7110_v32 = vld [vmem:[%s11637_s0 + $0x2e8] sm:$0xff]  ;;  %v7115_v33 = vld [vmem:[%s11637_s0 + $0x2f0] sm:$0x7] }
  0xe6   :  { %v7064_v22 = vpop.eup %5046  ;;  %v3974_v39 = vmax.f32 %v4618_v31, 0.0  ;;  %v3975_v59 = vmax.f32 %v4619_v26, 0.0  ;;  %v3976_v30 = vmax.f32 %v4620_v41, 0.0  ;;  %v3977_v36 = vmax.f32 %v4621_v14, 0.0 }
  0xe7   :  { %v7066_v7 = vpop.eup %5048  ;;  %v3978_v58 = vmax.f32 %v4622_v15, 0.0  ;;  %v2458_v16 = vrot.slane %v2457_v55, 1  ;;  %v2460_v45 = vsel %vm328_vm0, %v7062_v18, 0.0  ;;  %v2461_v60 = vsel %vm328_vm0, %v7064_v22, 0.0 }
  0xe8   :  { %v7072_v17 = vpop.eup %5050  ;;  %4294 = vst.msk [vmem:[%s11638_s1 + $0x1e0] sm:$0xff] %vm328_vm0, %v3974_v39  ;;  %4295 = vst.msk [vmem:[%s11638_s1 + $0x1e8] sm:$0xff] %vm328_vm0, %v3975_v59  ;;  %v2462_v6 = vadd.f32 %v2461_v60, %v2460_v45  ;;  %v2463_v1 = vsel %vm328_vm0, %v7066_v7, 0.0  ;;  %v1365_v3 = vsub.f32 %v6795_v53, %v569_v62  ;;  %v1366_v48 = vsub.f32 %v6850_v35, %v569_v62 }
  0xe9   :  { %4296 = vst.msk [vmem:[%s11638_s1 + $0x1f0] sm:$0xff] %vm328_vm0, %v3976_v30  ;;  %4297 = vst.msk [vmem:[%s11638_s1 + $0x1f8] sm:$0xff] %vm328_vm0, %v3977_v36  ;;  %v7094_v56 = vpop.eup %5052  ;;  %v2459_v54 = vadd.f32 %v2458_v16, %v2457_v55  ;;  %v2465_v49 = vsel %vm328_vm0, %v7072_v17, 0.0  ;;  %v1367_v10 = vsub.f32 %v6889_v5, %v569_v62  ;;  %v1368_v50 = vsub.f32 %v6894_v61, %v569_v62 }
  0xea   :  { %4298 = vst.msk [vmem:[%s11638_s1 + $0x200] sm:$0x7] %vm336_vm1, %v3978_v58  ;;  %v2464_v13 = vadd.f32 %v2463_v1, %v2462_v6  ;;  %v2467_v53 = vsel %vm336_vm1, %v7094_v56, 0.0  ;;  %v1369_v35 = vsub.f32 %v6899_v46, %v569_v62  ;;  %v1760_v21 = vmul.f32 1.442695, %v1365_v3  ;;  %v7120_v46 = vld [vmem:[%s11637_s0 + $0x2f8] sm:$0xff] }
  0xeb   :  { %5054 = vrcp.f32 %v2459_v54  ;;  %v1762_v5 = vmul.f32 1.442695, %v1366_v48  ;;  %v1764_v61 = vmul.f32 1.442695, %v1367_v10  ;;  %v1766_v4 = vmul.f32 1.442695, %v1368_v50 }
  0xec   :  { %v2466_v37 = vadd.f32 %v2465_v49, %v2464_v13  ;;  %5056 = vpow2.f32 %v1760_v21  ;;  %v1768_v31 = vmul.f32 1.442695, %v1369_v35  ;;  %v583_v26 = vrot.slane %v582_v12, 1 }
  0xed   :  { %5058 = vpow2.f32 %v1762_v5  ;;  %v593_v41 = vmax.f32 %v591_v11, %v7041_v51  ;;  %v604_v14 = vmax.f32 %v602_v0, %v603_v20  ;;  %v605_v15 = vsel %vm328_vm0, %v7110_v32, -inf }
  0xee   :  { %v2468_v55 = vadd.f32 %v2467_v53, %v2466_v37  ;;  %5060 = vpow2.f32 %v1764_v61  ;;  %v584_v62 = vmax.f32 %v582_v12, %v583_v26  ;;  %v607_v39 = vsel %vm336_vm1, %v7115_v33, -inf  ;;  %v7142_v12 = vld [vmem:[%s11637_s0 + $0x300] sm:$0xff] }
  0xef   :  { %5062 = vpow2.f32 %v1766_v4  ;;  %v594_v59 = vrot.slane %v593_v41, 4  ;;  %v606_v30 = vmax.f32 %v604_v14, %v605_v15  ;;  %v7132_v36 = vsel %vm328_vm0, %v7120_v46, -inf }
  0xf0   :  { %v2469_v58 = vrot.slane %v2468_v55, 4  ;;  %5064 = vpow2.f32 %v1768_v31  ;;  %v1370_v24 = vsub.f32 %v6904_v38, %v584_v62  ;;  %v1371_v2 = vsub.f32 %v6909_v8, %v584_v62  ;;  %v7147_v38 = vld [vmem:[%s11637_s0 + $0x308] sm:$0xff]  ;;  %v7152_v8 = vld [vmem:[%s11637_s0 + $0x310] sm:$0xff] }
  0xf1   :  { %v1372_v51 = vsub.f32 %v6914_v28, %v584_v62  ;;  %v1373_v11 = vsub.f32 %v6919_v42, %v584_v62  ;;  %v1374_v0 = vsub.f32 %v6924_v25, %v584_v62  ;;  %v595_v20 = vmax.f32 %v593_v41, %v594_v59 }
  0xf2   :  { %v2470_v16 = vadd.f32 %v2469_v58, %v2468_v55  ;;  %v1770_v45 = vmul.f32 1.442695, %v1370_v24  ;;  %v1772_v60 = vmul.f32 1.442695, %v1371_v2  ;;  %v608_v6 = vmax.f32 %v606_v30, %v607_v39  ;;  %v7186_v24 = vld [vmem:[%s11637_s0 + $0x318] sm:$0x7] }
  0xf3   :  { %v1774_v28 = vmul.f32 1.442695, %v1372_v51  ;;  %v1776_v42 = vmul.f32 1.442695, %v1373_v11  ;;  %v1778_v25 = vmul.f32 1.442695, %v1374_v0 }
  0xf4   :  { %v2471_v1 = vrot.slane %v2470_v16, 2  ;;  %5066 = vpow2.f32 %v1770_v45  ;;  %v596_v3 = vrot.slane %v595_v20, 2  ;;  %v609_v48 = vrot.slane %v608_v6, 4 }
  0xf5   :  { %v5055_v54 = vpop.eup %5054  ;;  %5068 = vpow2.f32 %v1772_v60  ;;  %v616_v49 = vsel %vm328_vm0, %v7142_v12, -inf  ;;  %v618_v10 = vsel %vm328_vm0, %v7147_v38, -inf  ;;  %v7160_v50 = vsel %vm328_vm0, %v7152_v8, -inf }
  0xf6   :  { %v7162_v13 = vpop.eup %5056  ;;  %v3339_v53 = vmul.f32 %v5055_v54, %v6966_v27  ;;  %v3340_v35 = vmul.f32 %v5055_v54, %v6974_v57  ;;  %v3341_v21 = vmul.f32 %v5055_v54, %v6984_v34  ;;  %v3342_v5 = vmul.f32 %v5055_v54, %v6993_v9 }
  0xf7   :  { %v7168_v61 = vpop.eup %5058  ;;  %v3343_v4 = vmul.f32 %v5055_v54, %v7002_v63  ;;  %v2472_v37 = vadd.f32 %v2471_v1, %v2470_v16  ;;  %v2475_v31 = vsel %vm328_vm0, %v7162_v13, 0.0  ;;  %5070 = vpow2.f32 %v1774_v28  ;;  %v7193_v16 = vld [vmem:[%s11637_s0 + $0x320] sm:$0xff]  ;;  %v7216_v1 = vld [vmem:[%s11637_s0 + $0x328] sm:$0xff] }
  0xf8   :  { %v7173_v26 = vpop.eup %5060  ;;  %v4623_v41 = vadd.f32 -192.0, %v3339_v53  ;;  %v4624_v14 = vadd.f32 -192.0, %v3340_v35  ;;  %v4625_v27 = vadd.f32 -192.0, %v3341_v21  ;;  %v4626_v15 = vadd.f32 -192.0, %v3342_v5 }
  0xf9   :  { %v7175_v57 = vpop.eup %5062  ;;  %v4627_v34 = vadd.f32 -192.0, %v3343_v4  ;;  %v2473_v55 = vrot.slane %v2472_v37, 1  ;;  %v2476_v9 = vsel %vm328_vm0, %v7168_v61, 0.0  ;;  %v2478_v63 = vsel %vm328_vm0, %v7173_v26, 0.0 }
  0xfa   :  { %v7181_v62 = vpop.eup %5064  ;;  %v3979_v39 = vmax.f32 %v4623_v41, 0.0  ;;  %v3980_v59 = vmax.f32 %v4624_v14, 0.0  ;;  %v3981_v30 = vmax.f32 %v4625_v27, 0.0  ;;  %v3982_v58 = vmax.f32 %v4626_v15, 0.0 }
  0xfb   :  { %v3983_v2 = vmax.f32 %v4627_v34, 0.0  ;;  %v2474_v51 = vadd.f32 %v2473_v55, %v2472_v37  ;;  %v2477_v11 = vadd.f32 %v2476_v9, %v2475_v31  ;;  %v2480_v0 = vsel %vm328_vm0, %v7175_v57, 0.0 }
  0xfc   :  { %4299 = vst.msk [vmem:[%s11638_s1 + $0x208] sm:$0xff] %vm328_vm0, %v3979_v39  ;;  %4300 = vst.msk [vmem:[%s11638_s1 + $0x210] sm:$0xff] %vm328_vm0, %v3980_v59  ;;  %v2482_v45 = vsel %vm336_vm1, %v7181_v62, 0.0  ;;  %5072 = vpow2.f32 %v1776_v42  ;;  %v597_v60 = vmax.f32 %v595_v20, %v596_v3  ;;  %v610_v28 = vmax.f32 %v608_v6, %v609_v48  ;;  %v7230_v3 = vld [vmem:[%s11637_s0 + $0x330] sm:$0xff] }
  0xfd   :  { %4301 = vst.msk [vmem:[%s11638_s1 + $0x218] sm:$0xff] %vm328_vm0, %v3981_v30  ;;  %4302 = vst.msk [vmem:[%s11638_s1 + $0x220] sm:$0xff] %vm328_vm0, %v3982_v58  ;;  %5074 = vrcp.f32 %v2474_v51  ;;  %v2479_v54 = vadd.f32 %v2478_v63, %v2477_v11  ;;  %v617_v53 = vmax.f32 %v7132_v36, %v616_v49  ;;  %v622_v35 = vsel %vm336_vm1, %v7186_v24, -inf }
  0xfe   :  { %4303 = vst.msk [vmem:[%s11638_s1 + $0x228] sm:$0x7] %vm336_vm1, %v3983_v2  ;;  %v7225_v42 = vpop.eup %5066  ;;  %5076 = vpow2.f32 %v1778_v25  ;;  %v598_v20 = vrot.slane %v597_v60, 1  ;;  %v611_v6 = vrot.slane %v610_v28, 2  ;;  %v630_v48 = vsel %vm328_vm0, %v7193_v16, -inf }
  0xff   :  { %v7234_v21 = vpop.eup %5068  ;;  %v2481_v5 = vadd.f32 %v2480_v0, %v2479_v54  ;;  %v2490_v36 = vsel %vm328_vm0, %v7225_v42, 0.0  ;;  %v619_v49 = vmax.f32 %v617_v53, %v618_v10  ;;  %v631_v25 = vsel %vm328_vm0, %v7216_v1, -inf }
 0x100   :  { %v2491_v4 = vsel %vm328_vm0, %v7234_v21, 0.0  ;;  %v599_v37 = vmax.f32 %v597_v60, %v598_v20  ;;  %v612_v31 = vmax.f32 %v610_v28, %v611_v6  ;;  %v632_v41 = vmax.f32 %v630_v48, %v631_v25 }
 0x101   :  { %v7242_v14 = vpop.eup %5070  ;;  %v2483_v27 = vadd.f32 %v2482_v45, %v2481_v5  ;;  %v2492_v15 = vadd.f32 %v2491_v4, %v2490_v36  ;;  %v621_v34 = vmax.f32 %v619_v49, %v7160_v50  ;;  %v633_v55 = vsel %vm328_vm0, %v7230_v3, -inf  ;;  %v7257_v50 = vld [vmem:[%s11637_s0 + $0x338] sm:$0xff] }
 0x102   :  { %v2493_v10 = vsel %vm328_vm0, %v7242_v14, 0.0  ;;  %v1375_v9 = vsub.f32 %v6959_v19, %v599_v37  ;;  %v1376_v63 = vsub.f32 %v6964_v40, %v599_v37  ;;  %v1377_v39 = vsub.f32 %v7000_v29, %v599_v37 }
 0x103   :  { %v2484_v59 = vrot.slane %v2483_v27, 4  ;;  %v2494_v30 = vadd.f32 %v2493_v10, %v2492_v15  ;;  %v1378_v58 = vsub.f32 %v7007_v43, %v599_v37  ;;  %v1379_v2 = vsub.f32 %v7014_v23, %v599_v37 }
 0x104   :  { %v1780_v51 = vmul.f32 1.442695, %v1375_v9  ;;  %v1782_v11 = vmul.f32 1.442695, %v1376_v63  ;;  %v1784_v0 = vmul.f32 1.442695, %v1377_v39  ;;  %v623_v45 = vmax.f32 %v621_v34, %v622_v35 }
 0x105   :  { %v2485_v19 = vadd.f32 %v2484_v59, %v2483_v27  ;;  %v1786_v60 = vmul.f32 1.442695, %v1378_v58  ;;  %v1788_v40 = vmul.f32 1.442695, %v1379_v2  ;;  %v613_v28 = vrot.slane %v612_v31, 1 }
 0x106   :  { %v7259_v29 = vpop.eup %5072  ;;  %5078 = vpow2.f32 %v1780_v51  ;;  %v624_v54 = vrot.slane %v623_v45, 4  ;;  %v7261_v43 = vmax.f32 %v632_v41, %v633_v55  ;;  %v7265_v23 = vsel %vm328_vm0, %v7257_v50, -inf }
 0x107   :  { %v5075_v53 = vpop.eup %5074  ;;  %v2486_v20 = vrot.slane %v2485_v19, 2  ;;  %v2495_v6 = vsel %vm328_vm0, %v7259_v29, 0.0  ;;  %5080 = vpow2.f32 %v1782_v11  ;;  %v614_v35 = vmax.f32 %v612_v31, %v613_v28 }
 0x108   :  { %v7269_v48 = vpop.eup %5076  ;;  %v3344_v5 = vmul.f32 %v5075_v53, %v7062_v18  ;;  %v3345_v36 = vmul.f32 %v5075_v53, %v7064_v22  ;;  %v3346_v49 = vmul.f32 %v5075_v53, %v7066_v7  ;;  %v3347_v25 = vmul.f32 %v5075_v53, %v7072_v17 }
 0x109   :  { %v3348_v4 = vmul.f32 %v5075_v53, %v7094_v56  ;;  %v2487_v37 = vadd.f32 %v2486_v20, %v2485_v19  ;;  %v2496_v41 = vadd.f32 %v2495_v6, %v2494_v30  ;;  %v2497_v27 = vsel %vm336_vm1, %v7269_v48, 0.0  ;;  %v7306_v19 = vld [vmem:[%s11637_s0 + $0x340] sm:$0x7] }
 0x10a   :  { %v4628_v15 = vadd.f32 -192.0, %v3344_v5  ;;  %v4629_v34 = vadd.f32 -192.0, %v3345_v36  ;;  %v4630_v31 = vadd.f32 -192.0, %v3346_v49  ;;  %v4631_v55 = vadd.f32 -192.0, %v3347_v25 }
 0x10b   :  { %v4632_v10 = vadd.f32 -192.0, %v3348_v4  ;;  %v2488_v9 = vrot.slane %v2487_v37, 1  ;;  %v2498_v18 = vadd.f32 %v2497_v27, %v2496_v41  ;;  %5082 = vpow2.f32 %v1784_v0 }
 0x10c   :  { %v3984_v22 = vmax.f32 %v4628_v15, 0.0  ;;  %v3985_v63 = vmax.f32 %v4629_v34, 0.0  ;;  %v3986_v7 = vmax.f32 %v4630_v31, 0.0  ;;  %v3987_v39 = vmax.f32 %v4631_v55, 0.0  ;;  %v7347_v34 = vld [vmem:[%s11637_s0 + $0x368] sm:$0x7] }
 0x10d   :  { %v3988_v17 = vmax.f32 %v4632_v10, 0.0  ;;  %v2489_v59 = vadd.f32 %v2488_v9, %v2487_v37  ;;  %v2499_v56 = vrot.slane %v2498_v18, 4  ;;  %5084 = vpow2.f32 %v1786_v60 }
 0x10e   :  { %4304 = vst.msk [vmem:[%s11638_s1 + $0x230] sm:$0xff] %vm328_vm0, %v3984_v22  ;;  %4305 = vst.msk [vmem:[%s11638_s1 + $0x238] sm:$0xff] %vm328_vm0, %v3985_v63  ;;  %5086 = vpow2.f32 %v1788_v40  ;;  %v1380_v30 = vsub.f32 %v7021_v52, %v614_v35  ;;  %v1381_v58 = vsub.f32 %v7026_v44, %v614_v35  ;;  %v1382_v2 = vsub.f32 %v7037_v47, %v614_v35  ;;  %v7311_v52 = vld [vmem:[%s11637_s0 + $0x348] sm:$0xff] }
 0x10f   :  { %4306 = vst.msk [vmem:[%s11638_s1 + $0x240] sm:$0xff] %vm328_vm0, %v3986_v7  ;;  %4307 = vst.msk [vmem:[%s11638_s1 + $0x248] sm:$0xff] %vm328_vm0, %v3987_v39  ;;  %5088 = vrcp.f32 %v2489_v59  ;;  %v2500_v51 = vadd.f32 %v2499_v56, %v2498_v18  ;;  %v1383_v11 = vsub.f32 %v7110_v32, %v614_v35  ;;  %v1384_v0 = vsub.f32 %v7115_v33, %v614_v35 }
 0x110   :  { %4308 = vst.msk [vmem:[%s11638_s1 + $0x250] sm:$0x7] %vm336_vm1, %v3988_v17  ;;  %v7313_v44 = vpop.eup %5078  ;;  %v1790_v47 = vmul.f32 1.442695, %v1380_v30  ;;  %v1792_v60 = vmul.f32 1.442695, %v1381_v58  ;;  %v625_v28 = vmax.f32 %v623_v45, %v624_v54  ;;  %v636_v36 = vmax.f32 %v7261_v43, %v7265_v23 }
 0x111   :  { %v1794_v40 = vmul.f32 1.442695, %v1382_v2  ;;  %v7315_v53 = vpop.eup %5080  ;;  %v2501_v32 = vrot.slane %v2500_v51, 2  ;;  %v2505_v33 = vsel %vm328_vm0, %v7313_v44, 0.0  ;;  %v1796_v20 = vmul.f32 1.442695, %v1383_v11 }
 0x112   :  { %v1798_v6 = vmul.f32 1.442695, %v1384_v0  ;;  %v2506_v35 = vsel %vm328_vm0, %v7315_v53, 0.0  ;;  %5090 = vpow2.f32 %v1790_v47  ;;  %v626_v5 = vrot.slane %v625_v28, 2  ;;  %v7326_v45 = vld [vmem:[%s11637_s0 + $0x350] sm:$0xff]  ;;  %v7331_v54 = vld [vmem:[%s11637_s0 + $0x358] sm:$0xff] }
 0x113   :  { %v2502_v49 = vadd.f32 %v2501_v32, %v2500_v51  ;;  %v2507_v25 = vadd.f32 %v2506_v35, %v2505_v33  ;;  %5092 = vpow2.f32 %v1792_v60  ;;  %v637_v4 = vsel %vm336_vm1, %v7306_v19, -inf  ;;  %v7338_v43 = vld [vmem:[%s11637_s0 + $0x360] sm:$0xff] }
 0x114   :  { %5094 = vpow2.f32 %v1794_v40  ;;  %v627_v37 = vmax.f32 %v625_v28, %v626_v5  ;;  %v638_v41 = vmax.f32 %v636_v36, %v637_v4  ;;  %v645_v23 = vsel %vm328_vm0, %v7311_v52, -inf }
 0x115   :  { %v7342_v27 = vpop.eup %5082  ;;  %v2503_v15 = vrot.slane %v2502_v49, 1  ;;  %5096 = vpow2.f32 %v1796_v20  ;;  %v646_v31 = vsel %vm328_vm0, %v7326_v45, -inf  ;;  %v648_v55 = vsel %vm328_vm0, %v7331_v54, -inf }
 0x116   :  { %v2508_v10 = vsel %vm328_vm0, %v7342_v27, 0.0  ;;  %5098 = vpow2.f32 %v1798_v6  ;;  %v628_v9 = vrot.slane %v627_v37, 1  ;;  %v639_v18 = vrot.slane %v638_v41, 4 }
 0x117   :  { %v7355_v22 = vpop.eup %5084  ;;  %v2504_v63 = vadd.f32 %v2503_v15, %v2502_v49  ;;  %v2509_v7 = vadd.f32 %v2508_v10, %v2507_v25  ;;  %v647_v39 = vmax.f32 %v645_v23, %v646_v31  ;;  %v7359_v17 = vsel %vm328_vm0, %v7338_v43, -inf }
 0x118   :  { %v7361_v59 = vpop.eup %5086  ;;  %v2510_v56 = vsel %vm328_vm0, %v7355_v22, 0.0  ;;  %v629_v30 = vmax.f32 %v627_v37, %v628_v9  ;;  %v7365_v58 = vmax.f32 %v638_v41, %v639_v18  ;;  %v7369_v2 = vsel %vm336_vm1, %v7347_v34, -inf }
 0x119   :  { %v5089_v51 = vpop.eup %5088  ;;  %5100 = vrcp.f32 %v2504_v63  ;;  %v2511_v11 = vadd.f32 %v2510_v56, %v2509_v7  ;;  %v2512_v0 = vsel %vm336_vm1, %v7361_v59, 0.0  ;;  %v7373_v47 = vmax.f32 %v647_v39, %v648_v55 }
 0x11a   :  { %v3349_v60 = vmul.f32 %v5089_v51, %v7162_v13  ;;  %v3350_v40 = vmul.f32 %v5089_v51, %v7168_v61  ;;  %v3351_v28 = vmul.f32 %v5089_v51, %v7173_v26  ;;  %v3352_v32 = vmul.f32 %v5089_v51, %v7175_v57 }
 0x11b   :  { %v3353_v33 = vmul.f32 %v5089_v51, %v7181_v62  ;;  %v2513_v20 = vadd.f32 %v2512_v0, %v2511_v11  ;;  %v1385_v6 = vsub.f32 %v7120_v46, %v629_v30  ;;  %v1386_v35 = vsub.f32 %v7142_v12, %v629_v30 }
 0x11c   :  { %v7382_v5 = vpop.eup %5090  ;;  %v4633_v36 = vadd.f32 -192.0, %v3349_v60  ;;  %v4634_v49 = vadd.f32 -192.0, %v3350_v40  ;;  %v4635_v25 = vadd.f32 -192.0, %v3351_v28  ;;  %v4636_v4 = vadd.f32 -192.0, %v3352_v32 }
 0x11d   :  { %v7384_v13 = vpop.eup %5092  ;;  %v4637_v61 = vadd.f32 -192.0, %v3353_v33  ;;  %v2514_v37 = vrot.slane %v2513_v20, 4  ;;  %v2520_v26 = vsel %vm328_vm0, %v7382_v5, 0.0  ;;  %v1387_v57 = vsub.f32 %v7147_v38, %v629_v30 }
 0x11e   :  { %v7389_v62 = vpop.eup %5094  ;;  %v3989_v46 = vmax.f32 %v4633_v36, 0.0  ;;  %v3990_v41 = vmax.f32 %v4634_v49, 0.0  ;;  %v3991_v12 = vmax.f32 %v4635_v25, 0.0  ;;  %v3992_v23 = vmax.f32 %v4636_v4, 0.0 }
 0x11f   :  { %v7391_v15 = vpop.eup %5096  ;;  %v3993_v31 = vmax.f32 %v4637_v61, 0.0  ;;  %v2515_v55 = vadd.f32 %v2514_v37, %v2513_v20  ;;  %v2521_v10 = vsel %vm328_vm0, %v7384_v13, 0.0  ;;  %v2523_v9 = vsel %vm328_vm0, %v7389_v62, 0.0 }
 0x120   :  { %v7397_v18 = vpop.eup %5098  ;;  %4309 = vst.msk [vmem:[%s11638_s1 + $0x258] sm:$0xff] %vm328_vm0, %v3989_v46  ;;  %4310 = vst.msk [vmem:[%s11638_s1 + $0x260] sm:$0xff] %vm328_vm0, %v3990_v41  ;;  %v2522_v38 = vadd.f32 %v2521_v10, %v2520_v26  ;;  %v2525_v63 = vsel %vm328_vm0, %v7391_v15, 0.0  ;;  %v1388_v7 = vsub.f32 %v7152_v8, %v629_v30  ;;  %v1389_v39 = vsub.f32 %v7186_v24, %v629_v30  ;;  %v7452_v10 = vld [vmem:[%s11637_s0 + $0x388] sm:$0xff] }
 0x121   :  { %4311 = vst.msk [vmem:[%s11638_s1 + $0x268] sm:$0xff] %vm328_vm0, %v3991_v12  ;;  %4312 = vst.msk [vmem:[%s11638_s1 + $0x270] sm:$0xff] %vm328_vm0, %v3992_v23  ;;  %v2516_v56 = vrot.slane %v2515_v55, 2  ;;  %v2527_v51 = vsel %vm336_vm1, %v7397_v18, 0.0  ;;  %v1800_v11 = vmul.f32 1.442695, %v1385_v6  ;;  %v651_v24 = vmax.f32 %v7373_v47, %v7359_v17 }
 0x122   :  { %4313 = vst.msk [vmem:[%s11638_s1 + $0x278] sm:$0x7] %vm336_vm1, %v3993_v31  ;;  %v1802_v0 = vmul.f32 1.442695, %v1386_v35  ;;  %v2524_v60 = vadd.f32 %v2523_v9, %v2522_v38  ;;  %v1804_v40 = vmul.f32 1.442695, %v1387_v57 }
 0x123   :  { %v1806_v28 = vmul.f32 1.442695, %v1388_v7  ;;  %v1808_v32 = vmul.f32 1.442695, %v1389_v39  ;;  %v5101_v33 = vpop.eup %5100  ;;  %v2517_v20 = vadd.f32 %v2516_v56, %v2515_v55  ;;  %5102 = vpow2.f32 %v1800_v11  ;;  %v7447_v55 = vld [vmem:[%s11637_s0 + $0x380] sm:$0xff]  ;;  %v7483_v7 = vld [vmem:[%s11637_s0 + $0x398] sm:$0xff] }
 0x124   :  { %v641_v8 = vrot.slane %v7365_v58, 2  ;;  %v3354_v30 = vmul.f32 %v5101_v33, %v7225_v42  ;;  %v3355_v36 = vmul.f32 %v5101_v33, %v7234_v21  ;;  %v3356_v49 = vmul.f32 %v5101_v33, %v7242_v14  ;;  %v7436_v42 = vld [vmem:[%s11637_s0 + $0x370] sm:$0xff]  ;;  %v7441_v21 = vld [vmem:[%s11637_s0 + $0x378] sm:$0xff]  ;;  %v7497_v11 = vld [vmem:[%s11637_s0 + $0x3a8] sm:$0xff] }
 0x125   :  { %v3357_v6 = vmul.f32 %v5101_v33, %v7259_v29  ;;  %v3358_v35 = vmul.f32 %v5101_v33, %v7269_v48  ;;  %v2518_v25 = vrot.slane %v2517_v20, 1  ;;  %v2526_v4 = vadd.f32 %v2525_v63, %v2524_v60  ;;  %v7457_v9 = vld [vmem:[%s11637_s0 + $0x390] sm:$0x7] }
 0x126   :  { %5104 = vpow2.f32 %v1802_v0  ;;  %v4638_v61 = vadd.f32 -192.0, %v3354_v30  ;;  %v4639_v37 = vadd.f32 -192.0, %v3355_v36  ;;  %v4640_v26 = vadd.f32 -192.0, %v3356_v49 }
 0x127   :  { %v4641_v57 = vadd.f32 -192.0, %v3357_v6  ;;  %v4642_v46 = vadd.f32 -192.0, %v3358_v35  ;;  %v2519_v41 = vadd.f32 %v2518_v25, %v2517_v20  ;;  %v2528_v17 = vadd.f32 %v2527_v51, %v2526_v4  ;;  %v7492_v51 = vld [vmem:[%s11637_s0 + $0x3a0] sm:$0xff] }
 0x128   :  { %5106 = vpow2.f32 %v1804_v40  ;;  %v3994_v14 = vmax.f32 %v4638_v61, 0.0  ;;  %v3995_v29 = vmax.f32 %v4639_v37, 0.0  ;;  %v3996_v48 = vmax.f32 %v4640_v26, 0.0 }
 0x129   :  { %v3997_v47 = vmax.f32 %v4641_v57, 0.0  ;;  %v3998_v12 = vmax.f32 %v4642_v46, 0.0  ;;  %5108 = vrcp.f32 %v2519_v41  ;;  %v2529_v23 = vrot.slane %v2528_v17, 4 }
 0x12a   :  { %v642_v31 = vmax.f32 %v7365_v58, %v641_v8  ;;  %4314 = vst.msk [vmem:[%s11638_s1 + $0x280] sm:$0xff] %vm328_vm0, %v3994_v14  ;;  %4315 = vst.msk [vmem:[%s11638_s1 + $0x288] sm:$0xff] %vm328_vm0, %v3995_v29  ;;  %5110 = vpow2.f32 %v1806_v28  ;;  %v653_v58 = vmax.f32 %v651_v24, %v7369_v2  ;;  %v660_v38 = vsel %vm328_vm0, %v7436_v42, -inf }
 0x12b   :  { %4316 = vst.msk [vmem:[%s11638_s1 + $0x290] sm:$0xff] %vm328_vm0, %v3996_v48  ;;  %4317 = vst.msk [vmem:[%s11638_s1 + $0x298] sm:$0xff] %vm328_vm0, %v3997_v47  ;;  %v661_v63 = vsel %vm328_vm0, %v7441_v21, -inf  ;;  %v2530_v39 = vadd.f32 %v2529_v23, %v2528_v17  ;;  %5112 = vpow2.f32 %v1808_v32  ;;  %v663_v60 = vsel %vm328_vm0, %v7447_v55, -inf }
 0x12c   :  { %4318 = vst.msk [vmem:[%s11638_s1 + $0x2a0] sm:$0x7] %vm336_vm1, %v3998_v12  ;;  %v643_v56 = vrot.slane %v642_v31, 1  ;;  %v662_v2 = vmax.f32 %v660_v38, %v661_v63  ;;  %v654_v0 = vrot.slane %v653_v58, 4  ;;  %v7503_v40 = vsel %vm328_vm0, %v7452_v10, -inf }
 0x12d   :  { %v7507_v28 = vsel %vm336_vm1, %v7457_v9, -inf  ;;  %v7509_v32 = vpop.eup %5102  ;;  %v2531_v33 = vrot.slane %v2530_v39, 2  ;;  %v7515_v24 = vsel %vm328_vm0, %v7483_v7, -inf  ;;  %v7521_v49 = vsel %vm328_vm0, %v7492_v51, -inf }
 0x12e   :  { %v644_v20 = vmax.f32 %v642_v31, %v643_v56  ;;  %v7511_v8 = vmax.f32 %v662_v2, %v663_v60  ;;  %v2535_v30 = vsel %vm328_vm0, %v7509_v32, 0.0  ;;  %v655_v36 = vmax.f32 %v653_v58, %v654_v0 }
 0x12f   :  { %v7525_v6 = vsel %vm328_vm0, %v7497_v11, -inf  ;;  %v2532_v25 = vadd.f32 %v2531_v33, %v2530_v39 }
 0x130   :  { %v7527_v35 = vpop.eup %5104  ;;  %v1390_v4 = vsub.f32 %v7193_v16, %v644_v20  ;;  %v1391_v61 = vsub.f32 %v7216_v1, %v644_v20  ;;  %v1392_v37 = vsub.f32 %v7230_v3, %v644_v20  ;;  %v1393_v57 = vsub.f32 %v7257_v50, %v644_v20 }
 0x131   :  { %v2536_v26 = vsel %vm328_vm0, %v7527_v35, 0.0  ;;  %v1394_v46 = vsub.f32 %v7306_v19, %v644_v20  ;;  %v656_v41 = vrot.slane %v655_v36, 2  ;;  %v2533_v14 = vrot.slane %v2532_v25, 1 }
 0x132   :  { %v7536_v17 = vpop.eup %5106  ;;  %v2537_v29 = vadd.f32 %v2536_v26, %v2535_v30  ;;  %v1810_v48 = vmul.f32 1.442695, %v1390_v4  ;;  %v1812_v47 = vmul.f32 1.442695, %v1391_v61  ;;  %v1814_v1 = vmul.f32 1.442695, %v1392_v37 }
 0x133   :  { %v2538_v16 = vsel %vm328_vm0, %v7536_v17, 0.0  ;;  %v1816_v12 = vmul.f32 1.442695, %v1393_v57  ;;  %v657_v3 = vmax.f32 %v655_v36, %v656_v41  ;;  %v5109_v23 = vpop.eup %5108  ;;  %v2534_v31 = vadd.f32 %v2533_v14, %v2532_v25 }
 0x134   :  { %v2539_v58 = vadd.f32 %v2538_v16, %v2537_v29  ;;  %5114 = vpow2.f32 %v1810_v48  ;;  %v1818_v50 = vmul.f32 1.442695, %v1394_v46  ;;  %v7540_v38 = vpop.eup %5110  ;;  %v3359_v19 = vmul.f32 %v5109_v23, %v7313_v44 }
 0x135   :  { %v3360_v63 = vmul.f32 %v5109_v23, %v7315_v53  ;;  %v3361_v39 = vmul.f32 %v5109_v23, %v7342_v27  ;;  %v3362_v56 = vmul.f32 %v5109_v23, %v7355_v22  ;;  %v7546_v2 = vpop.eup %5112  ;;  %v3363_v0 = vmul.f32 %v5109_v23, %v7361_v59  ;;  %v7556_v27 = vld [vmem:[%s11637_s0 + $0x3b0] sm:$0xff] }
 0x136   :  { %5116 = vrcp.f32 %v2534_v31  ;;  %v2540_v60 = vsel %vm328_vm0, %v7540_v38, 0.0  ;;  %v658_v33 = vrot.slane %v657_v3, 1  ;;  %v4643_v20 = vadd.f32 -192.0, %v3359_v19 }
 0x137   :  { %v4644_v30 = vadd.f32 -192.0, %v3360_v63  ;;  %v4645_v36 = vadd.f32 -192.0, %v3361_v39  ;;  %v4646_v25 = vadd.f32 -192.0, %v3362_v56  ;;  %v4647_v44 = vadd.f32 -192.0, %v3363_v0 }
 0x138   :  { %v2541_v4 = vadd.f32 %v2540_v60, %v2539_v58  ;;  %v2542_v53 = vsel %vm336_vm1, %v7546_v2, 0.0  ;;  %5118 = vpow2.f32 %v1812_v47  ;;  %v3999_v22 = vmax.f32 %v4643_v20, 0.0 }
 0x139   :  { %v4000_v59 = vmax.f32 %v4644_v30, 0.0  ;;  %v4001_v61 = vmax.f32 %v4645_v36, 0.0  ;;  %v4002_v37 = vmax.f32 %v4646_v25, 0.0  ;;  %v4003_v26 = vmax.f32 %v4647_v44, 0.0 }
 0x13a   :  { %v2543_v57 = vadd.f32 %v2542_v53, %v2541_v4  ;;  %5120 = vpow2.f32 %v1814_v1  ;;  %v659_v46 = vmax.f32 %v657_v3, %v658_v33  ;;  %4319 = vst.msk [vmem:[%s11638_s1 + $0x2a8] sm:$0xff] %vm328_vm0, %v3999_v22  ;;  %v666_v41 = vmax.f32 %v7511_v8, %v7503_v40 }
 0x13b   :  { %4320 = vst.msk [vmem:[%s11638_s1 + $0x2b0] sm:$0xff] %vm328_vm0, %v4000_v59  ;;  %4321 = vst.msk [vmem:[%s11638_s1 + $0x2b8] sm:$0xff] %vm328_vm0, %v4001_v61  ;;  %5122 = vpow2.f32 %v1816_v12  ;;  %v677_v14 = vmax.f32 %v7515_v24, %v7521_v49  ;;  %v7580_v29 = vsel %vm328_vm0, %v7556_v27, -inf  ;;  %v7619_v61 = vld [vmem:[%s11637_s0 + $0x3c0] sm:$0xff] }
 0x13c   :  { %4322 = vst.msk [vmem:[%s11638_s1 + $0x2c0] sm:$0xff] %vm328_vm0, %v4002_v37  ;;  %v2544_v48 = vrot.slane %v2543_v57, 4  ;;  %5124 = vpow2.f32 %v1818_v50  ;;  %v1395_v47 = vsub.f32 %v7311_v52, %v659_v46  ;;  %v1396_v16 = vsub.f32 %v7326_v45, %v659_v46 }
 0x13d   :  { %4323 = vst.msk [vmem:[%s11638_s1 + $0x2c8] sm:$0x7] %vm336_vm1, %v4003_v26  ;;  %v1397_v40 = vsub.f32 %v7331_v54, %v659_v46  ;;  %v1398_v8 = vsub.f32 %v7338_v43, %v659_v46  ;;  %v1399_v24 = vsub.f32 %v7347_v34, %v659_v46  ;;  %v668_v49 = vmax.f32 %v666_v41, %v7507_v28 }
 0x13e   :  { %v7592_v1 = vpop.eup %5114  ;;  %v2545_v12 = vadd.f32 %v2544_v48, %v2543_v57  ;;  %v1820_v3 = vmul.f32 1.442695, %v1395_v47  ;;  %v1822_v23 = vmul.f32 1.442695, %v1396_v16  ;;  %v679_v31 = vmax.f32 %v677_v14, %v7525_v6  ;;  %v7628_v14 = vld [vmem:[%s11637_s0 + $0x3c8] sm:$0xff]  ;;  %v7653_v16 = vld [vmem:[%s11637_s0 + $0x3d0] sm:$0xff] }
 0x13f   :  { %v2550_v52 = vsel %vm328_vm0, %v7592_v1, 0.0  ;;  %v1824_v58 = vmul.f32 1.442695, %v1397_v40  ;;  %v1826_v45 = vmul.f32 1.442695, %v1398_v8  ;;  %v669_v50 = vrot.slane %v668_v49, 4 }
 0x140   :  { %v5117_v54 = vpop.eup %5116  ;;  %v2546_v19 = vrot.slane %v2545_v12, 2  ;;  %5126 = vpow2.f32 %v1820_v3  ;;  %v1828_v43 = vmul.f32 1.442695, %v1399_v24  ;;  %v681_v34 = vmax.f32 %v679_v31, %v7580_v29  ;;  %v7658_v40 = vld [vmem:[%s11637_s0 + $0x3d8] sm:$0xff] }
 0x141   :  { %v3364_v28 = vmul.f32 %v5117_v54, %v7382_v5  ;;  %v3365_v63 = vmul.f32 %v5117_v54, %v7384_v13  ;;  %v3366_v39 = vmul.f32 %v5117_v54, %v7389_v62  ;;  %v3367_v6 = vmul.f32 %v5117_v54, %v7391_v15  ;;  %v7612_v62 = vld [vmem:[%s11637_s0 + $0x3b8] sm:$0x7] }
 0x142   :  { %v7602_v56 = vpop.eup %5118  ;;  %v3368_v0 = vmul.f32 %v5117_v54, %v7397_v18  ;;  %v2547_v60 = vadd.f32 %v2546_v19, %v2545_v12  ;;  %5128 = vpow2.f32 %v1822_v23  ;;  %v670_v33 = vmax.f32 %v668_v49, %v669_v50  ;;  %v7669_v49 = vld [vmem:[%s11637_s0 + $0x3e0] sm:$0x7] }
 0x143   :  { %v4648_v20 = vadd.f32 -192.0, %v3364_v28  ;;  %v4649_v30 = vadd.f32 -192.0, %v3365_v63  ;;  %v4650_v36 = vadd.f32 -192.0, %v3366_v39  ;;  %v4651_v25 = vadd.f32 -192.0, %v3367_v6  ;;  %v7698_v6 = vld [vmem:[%s11637_s0 + $0x3f8] sm:$0xff] }
 0x144   :  { %v7605_v44 = vpop.eup %5120  ;;  %v4652_v5 = vadd.f32 -192.0, %v3368_v0  ;;  %v2548_v4 = vrot.slane %v2547_v60, 1  ;;  %v2551_v13 = vsel %vm328_vm0, %v7602_v56, 0.0  ;;  %5130 = vpow2.f32 %v1824_v58  ;;  %v7683_v58 = vld [vmem:[%s11637_s0 + $0x3f0] sm:$0xff] }
 0x145   :  { %v7614_v15 = vpop.eup %5122  ;;  %v4004_v18 = vmax.f32 %v4648_v20, 0.0  ;;  %v4005_v53 = vmax.f32 %v4649_v30, 0.0  ;;  %v4006_v22 = vmax.f32 %v4650_v36, 0.0  ;;  %v4007_v59 = vmax.f32 %v4651_v25, 0.0 }
 0x146   :  { %v7621_v37 = vpop.eup %5124  ;;  %v4008_v26 = vmax.f32 %v4652_v5, 0.0  ;;  %v2549_v57 = vadd.f32 %v2548_v4, %v2547_v60  ;;  %v2552_v46 = vadd.f32 %v2551_v13, %v2550_v52  ;;  %v2553_v41 = vsel %vm328_vm0, %v7605_v44, 0.0  ;;  %v7678_v52 = vld [vmem:[%s11637_s0 + $0x3e8] sm:$0xff] }
 0x147   :  { %4324 = vst.msk [vmem:[%s11638_s1 + $0x2d0] sm:$0xff] %vm328_vm0, %v4004_v18  ;;  %4325 = vst.msk [vmem:[%s11638_s1 + $0x2d8] sm:$0xff] %vm328_vm0, %v4005_v53  ;;  %v2555_v29 = vsel %vm328_vm0, %v7614_v15, 0.0  ;;  %v2557_v48 = vsel %vm336_vm1, %v7621_v37, 0.0  ;;  %5132 = vpow2.f32 %v1826_v45  ;;  %v671_v47 = vrot.slane %v670_v33, 2 }
 0x148   :  { %4326 = vst.msk [vmem:[%s11638_s1 + $0x2e0] sm:$0xff] %vm328_vm0, %v4006_v22  ;;  %4327 = vst.msk [vmem:[%s11638_s1 + $0x2e8] sm:$0xff] %vm328_vm0, %v4007_v59  ;;  %5134 = vrcp.f32 %v2549_v57  ;;  %v2554_v8 = vadd.f32 %v2553_v41, %v2552_v46  ;;  %v682_v24 = vsel %vm336_vm1, %v7612_v62, -inf  ;;  %v690_v12 = vsel %vm328_vm0, %v7619_v61, -inf }
 0x149   :  { %4328 = vst.msk [vmem:[%s11638_s1 + $0x2f0] sm:$0x7] %vm336_vm1, %v4008_v26  ;;  %5136 = vpow2.f32 %v1828_v43  ;;  %v672_v3 = vmax.f32 %v670_v33, %v671_v47  ;;  %v683_v23 = vmax.f32 %v681_v34, %v682_v24  ;;  %v691_v31 = vsel %vm328_vm0, %v7628_v14, -inf }
 0x14a   :  { %v7685_v45 = vpop.eup %5126  ;;  %v2556_v50 = vadd.f32 %v2555_v29, %v2554_v8  ;;  %v692_v54 = vmax.f32 %v690_v12, %v691_v31  ;;  %v693_v19 = vsel %vm328_vm0, %v7653_v16, -inf  ;;  %v695_v43 = vsel %vm328_vm0, %v7658_v40, -inf }
 0x14b   :  { %v2565_v34 = vsel %vm328_vm0, %v7685_v45, 0.0  ;;  %v673_v28 = vrot.slane %v672_v3, 1  ;;  %v684_v63 = vrot.slane %v683_v23, 4  ;;  %v697_v39 = vsel %vm336_vm1, %v7669_v49, -inf }
 0x14c   :  { %v7700_v0 = vpop.eup %5128  ;;  %v2558_v60 = vadd.f32 %v2557_v48, %v2556_v50  ;;  %v694_v33 = vmax.f32 %v692_v54, %v693_v19  ;;  %v7704_v20 = vsel %vm328_vm0, %v7678_v52, -inf  ;;  %v7708_v30 = vsel %vm328_vm0, %v7683_v58, -inf }
 0x14d   :  { %v2566_v36 = vsel %vm328_vm0, %v7700_v0, 0.0  ;;  %v674_v25 = vmax.f32 %v672_v3, %v673_v28  ;;  %v7712_v5 = vmax.f32 %v683_v23, %v684_v63  ;;  %v707_v4 = vmax.f32 %v7704_v20, %v7708_v30 }
 0x14e   :  { %v7716_v13 = vpop.eup %5130  ;;  %v2559_v18 = vrot.slane %v2558_v60, 4  ;;  %v2567_v53 = vadd.f32 %v2566_v36, %v2565_v34  ;;  %v696_v22 = vmax.f32 %v694_v33, %v695_v43  ;;  %v708_v59 = vsel %vm328_vm0, %v7698_v6, -inf }
 0x14f   :  { %v2568_v26 = vsel %vm328_vm0, %v7716_v13, 0.0  ;;  %v1400_v57 = vsub.f32 %v7436_v42, %v674_v25  ;;  %v1401_v46 = vsub.f32 %v7441_v21, %v674_v25  ;;  %v1402_v41 = vsub.f32 %v7447_v55, %v674_v25 }
 0x150   :  { %v2560_v29 = vadd.f32 %v2559_v18, %v2558_v60  ;;  %v2569_v48 = vadd.f32 %v2568_v26, %v2567_v53  ;;  %v1403_v47 = vsub.f32 %v7452_v10, %v674_v25  ;;  %v1404_v8 = vsub.f32 %v7457_v9, %v674_v25 }
 0x151   :  { %v7727_v24 = vpop.eup %5132  ;;  %v1830_v12 = vmul.f32 1.442695, %v1400_v57  ;;  %v1832_v3 = vmul.f32 1.442695, %v1401_v46  ;;  %v1834_v23 = vmul.f32 1.442695, %v1402_v41  ;;  %v698_v31 = vmax.f32 %v696_v22, %v697_v39 }
 0x152   :  { %v5135_v50 = vpop.eup %5134  ;;  %v2561_v54 = vrot.slane %v2560_v29, 2  ;;  %v2570_v42 = vsel %vm328_vm0, %v7727_v24, 0.0  ;;  %v1836_v21 = vmul.f32 1.442695, %v1403_v47  ;;  %v1838_v19 = vmul.f32 1.442695, %v1404_v8 }
 0x153   :  { %v7731_v55 = vpop.eup %5136  ;;  %v3369_v43 = vmul.f32 %v5135_v50, %v7509_v32  ;;  %v3370_v10 = vmul.f32 %v5135_v50, %v7527_v35  ;;  %v3371_v9 = vmul.f32 %v5135_v50, %v7536_v17  ;;  %v3372_v34 = vmul.f32 %v5135_v50, %v7540_v38  ;;  %v7743_v35 = vld [vmem:[%s11637_s0 + $0x400] sm:$0xff]  ;;  %v7748_v22 = vld [vmem:[%s11637_s0 + $0x408] sm:$0x7]  ;;  %v7770_v47 = vld [vmem:[%s11637_s0 + $0x410] sm:$0xff] }
 0x154   :  { %v3373_v28 = vmul.f32 %v5135_v50, %v7546_v2  ;;  %v2562_v63 = vadd.f32 %v2561_v54, %v2560_v29  ;;  %v2571_v39 = vadd.f32 %v2570_v42, %v2569_v48  ;;  %v2572_v60 = vsel %vm336_vm1, %v7731_v55, 0.0  ;;  %v7775_v8 = vld [vmem:[%s11637_s0 + $0x418] sm:$0xff]  ;;  %v7789_v54 = vld [vmem:[%s11637_s0 + $0x420] sm:$0xff]  ;;  %v7794_v42 = vld [vmem:[%s11637_s0 + $0x428] sm:$0xff] }
 0x155   :  { %v4653_v33 = vadd.f32 -192.0, %v3369_v43  ;;  %v4654_v20 = vadd.f32 -192.0, %v3370_v10  ;;  %v4655_v30 = vadd.f32 -192.0, %v3371_v9  ;;  %v4656_v36 = vadd.f32 -192.0, %v3372_v34  ;;  %v7799_v43 = vld [vmem:[%s11637_s0 + $0x430] sm:$0x7] }
 0x156   :  { %v4657_v25 = vadd.f32 -192.0, %v3373_v28  ;;  %v2563_v18 = vrot.slane %v2562_v63, 1  ;;  %v2573_v32 = vadd.f32 %v2572_v60, %v2571_v39  ;;  %5138 = vpow2.f32 %v1830_v12  ;;  %v7813_v39 = vld [vmem:[%s11637_s0 + $0x440] sm:$0xff] }
 0x157   :  { %v4009_v17 = vmax.f32 %v4653_v33, 0.0  ;;  %v4010_v38 = vmax.f32 %v4654_v20, 0.0  ;;  %v4011_v2 = vmax.f32 %v4655_v30, 0.0  ;;  %v4012_v53 = vmax.f32 %v4656_v36, 0.0 }
 0x158   :  { %v4013_v26 = vmax.f32 %v4657_v25, 0.0  ;;  %v2564_v57 = vadd.f32 %v2563_v18, %v2562_v63  ;;  %v2574_v46 = vrot.slane %v2573_v32, 4  ;;  %5140 = vpow2.f32 %v1832_v3  ;;  %v7808_v63 = vld [vmem:[%s11637_s0 + $0x438] sm:$0xff] }
 0x159   :  { %4329 = vst.msk [vmem:[%s11638_s1 + $0x2f8] sm:$0xff] %vm328_vm0, %v4009_v17  ;;  %4330 = vst.msk [vmem:[%s11638_s1 + $0x300] sm:$0xff] %vm328_vm0, %v4010_v38  ;;  %5142 = vpow2.f32 %v1834_v23  ;;  %v686_v41 = vrot.slane %v7712_v5, 2  ;;  %v699_v29 = vrot.slane %v698_v31, 4  ;;  %v709_v48 = vmax.f32 %v707_v4, %v708_v59 }
 0x15a   :  { %4331 = vst.msk [vmem:[%s11638_s1 + $0x308] sm:$0xff] %vm328_vm0, %v4011_v2  ;;  %4332 = vst.msk [vmem:[%s11638_s1 + $0x310] sm:$0xff] %vm328_vm0, %v4012_v53  ;;  %5144 = vrcp.f32 %v2564_v57  ;;  %v2575_v12 = vadd.f32 %v2574_v46, %v2573_v32  ;;  %v710_v4 = vsel %vm328_vm0, %v7743_v35, -inf  ;;  %v712_v59 = vsel %vm336_vm1, %v7748_v22, -inf }
 0x15b   :  { %4333 = vst.msk [vmem:[%s11638_s1 + $0x318] sm:$0x7] %vm336_vm1, %v4013_v26  ;;  %5146 = vpow2.f32 %v1836_v21  ;;  %v687_v3 = vmax.f32 %v7712_v5, %v686_v41  ;;  %v700_v23 = vmax.f32 %v698_v31, %v699_v29  ;;  %v711_v50 = vmax.f32 %v709_v48, %v710_v4 }
 0x15c   :  { %v2576_v21 = vrot.slane %v2575_v12, 2  ;;  %5148 = vpow2.f32 %v1838_v19  ;;  %v720_v5 = vsel %vm328_vm0, %v7770_v47, -inf  ;;  %v721_v31 = vsel %vm328_vm0, %v7775_v8, -inf  ;;  %v7818_v19 = vld [vmem:[%s11637_s0 + $0x448] sm:$0xff] }
 0x15d   :  { %v688_v10 = vrot.slane %v687_v3, 1  ;;  %v701_v9 = vrot.slane %v700_v23, 2  ;;  %v713_v34 = vmax.f32 %v711_v50, %v712_v59  ;;  %v722_v28 = vmax.f32 %v720_v5, %v721_v31 }
 0x15e   :  { %v2577_v60 = vadd.f32 %v2576_v21, %v2575_v12  ;;  %v723_v33 = vsel %vm328_vm0, %v7789_v54, -inf  ;;  %v7824_v20 = vsel %vm328_vm0, %v7794_v42, -inf  ;;  %v7828_v30 = vsel %vm336_vm1, %v7799_v43, -inf }
 0x15f   :  { %v689_v36 = vmax.f32 %v687_v3, %v688_v10  ;;  %v702_v25 = vmax.f32 %v700_v23, %v701_v9  ;;  %v714_v18 = vrot.slane %v713_v34, 4  ;;  %v7830_v32 = vmax.f32 %v722_v28, %v723_v33 }
 0x160   :  { %v7832_v17 = vpop.eup %5138  ;;  %v2578_v38 = vrot.slane %v2577_v60, 1  ;;  %v7836_v2 = vsel %vm328_vm0, %v7808_v63, -inf  ;;  %v7840_v53 = vsel %vm328_vm0, %v7813_v39, -inf  ;;  %v7844_v26 = vsel %vm328_vm0, %v7818_v19, -inf }
 0x161   :  { %v2580_v57 = vsel %vm328_vm0, %v7832_v17, 0.0  ;;  %v1405_v46 = vsub.f32 %v7483_v7, %v689_v36  ;;  %v1406_v41 = vsub.f32 %v7492_v51, %v689_v36  ;;  %v1407_v29 = vsub.f32 %v7497_v11, %v689_v36 }
 0x162   :  { %v7851_v48 = vpop.eup %5140  ;;  %v2579_v12 = vadd.f32 %v2578_v38, %v2577_v60  ;;  %v1408_v4 = vsub.f32 %v7556_v27, %v689_v36  ;;  %v1409_v59 = vsub.f32 %v7612_v62, %v689_v36  ;;  %v703_v3 = vrot.slane %v702_v25, 1 }
 0x163   :  { %v7855_v23 = vpop.eup %5142  ;;  %v2581_v50 = vsel %vm328_vm0, %v7851_v48, 0.0  ;;  %v1840_v21 = vmul.f32 1.442695, %v1405_v46  ;;  %v1842_v5 = vmul.f32 1.442695, %v1406_v41  ;;  %v715_v7 = vmax.f32 %v713_v34, %v714_v18 }
 0x164   :  { %v5145_v31 = vpop.eup %5144  ;;  %5150 = vrcp.f32 %v2579_v12  ;;  %v2582_v51 = vadd.f32 %v2581_v50, %v2580_v57  ;;  %v2583_v11 = vsel %vm328_vm0, %v7855_v23, 0.0  ;;  %v1844_v10 = vmul.f32 1.442695, %v1407_v29 }
 0x165   :  { %v7861_v9 = vpop.eup %5146  ;;  %v3374_v27 = vmul.f32 %v5145_v31, %v7592_v1  ;;  %v3375_v62 = vmul.f32 %v5145_v31, %v7602_v56  ;;  %v3376_v28 = vmul.f32 %v5145_v31, %v7605_v44  ;;  %v3377_v60 = vmul.f32 %v5145_v31, %v7614_v15 }
 0x166   :  { %v7867_v33 = vpop.eup %5148  ;;  %v3378_v34 = vmul.f32 %v5145_v31, %v7621_v37  ;;  %v2584_v36 = vadd.f32 %v2583_v11, %v2582_v51  ;;  %v2585_v18 = vsel %vm328_vm0, %v7861_v9, 0.0  ;;  %5152 = vpow2.f32 %v1840_v21  ;;  %v7877_v37 = vld [vmem:[%s11637_s0 + $0x450] sm:$0xff] }
 0x167   :  { %v4658_v38 = vadd.f32 -192.0, %v3374_v27  ;;  %v4659_v57 = vadd.f32 -192.0, %v3375_v62  ;;  %v4660_v46 = vadd.f32 -192.0, %v3376_v28  ;;  %v4661_v41 = vadd.f32 -192.0, %v3377_v60 }
 0x168   :  { %v4662_v1 = vadd.f32 -192.0, %v3378_v34  ;;  %v2586_v29 = vadd.f32 %v2585_v18, %v2584_v36  ;;  %v2587_v56 = vsel %vm336_vm1, %v7867_v33, 0.0  ;;  %5154 = vpow2.f32 %v1842_v5 }
 0x169   :  { %v4014_v44 = vmax.f32 %v4658_v38, 0.0  ;;  %v4015_v15 = vmax.f32 %v4659_v57, 0.0  ;;  %v4016_v12 = vmax.f32 %v4660_v46, 0.0  ;;  %v4017_v50 = vmax.f32 %v4661_v41, 0.0 }
 0x16a   :  { %v4018_v21 = vmax.f32 %v4662_v1, 0.0  ;;  %v2588_v31 = vadd.f32 %v2587_v56, %v2586_v29  ;;  %5156 = vpow2.f32 %v1844_v10  ;;  %v1846_v51 = vmul.f32 1.442695, %v1408_v4 }
 0x16b   :  { %4334 = vst.msk [vmem:[%s11638_s1 + $0x320] sm:$0xff] %vm328_vm0, %v4014_v44  ;;  %4335 = vst.msk [vmem:[%s11638_s1 + $0x328] sm:$0xff] %vm328_vm0, %v4015_v15  ;;  %v1848_v4 = vmul.f32 1.442695, %v1409_v59  ;;  %v704_v5 = vmax.f32 %v702_v25, %v703_v3  ;;  %v716_v11 = vrot.slane %v715_v7, 2  ;;  %v726_v10 = vmax.f32 %v7830_v32, %v7824_v20 }
 0x16c   :  { %4336 = vst.msk [vmem:[%s11638_s1 + $0x330] sm:$0xff] %vm328_vm0, %v4016_v12  ;;  %4337 = vst.msk [vmem:[%s11638_s1 + $0x338] sm:$0xff] %vm328_vm0, %v4017_v50  ;;  %v2589_v27 = vrot.slane %v2588_v31, 4  ;;  %5158 = vpow2.f32 %v1846_v51  ;;  %v737_v62 = vmax.f32 %v7836_v2, %v7840_v53  ;;  %v7905_v28 = vsel %vm328_vm0, %v7877_v37, -inf }
 0x16d   :  { %4338 = vst.msk [vmem:[%s11638_s1 + $0x340] sm:$0x7] %vm336_vm1, %v4018_v21  ;;  %5160 = vpow2.f32 %v1848_v4  ;;  %v1410_v25 = vsub.f32 %v7619_v61, %v704_v5  ;;  %v1411_v59 = vsub.f32 %v7628_v14, %v704_v5  ;;  %v1412_v20 = vsub.f32 %v7653_v16, %v704_v5 }
 0x16e   :  { %v5151_v32 = vpop.eup %5150  ;;  %v2590_v3 = vadd.f32 %v2589_v27, %v2588_v31  ;;  %v1413_v60 = vsub.f32 %v7658_v40, %v704_v5  ;;  %v1414_v34 = vsub.f32 %v7669_v49, %v704_v5  ;;  %v717_v36 = vmax.f32 %v715_v7, %v716_v11 }
 0x16f   :  { %v3379_v2 = vmul.f32 %v5151_v32, %v7685_v45  ;;  %v3380_v53 = vmul.f32 %v5151_v32, %v7700_v0  ;;  %v3381_v18 = vmul.f32 %v5151_v32, %v7716_v13  ;;  %v3382_v38 = vmul.f32 %v5151_v32, %v7727_v24 }
 0x170   :  { %v7916_v61 = vpop.eup %5152  ;;  %v3383_v14 = vmul.f32 %v5151_v32, %v7731_v55  ;;  %v2591_v16 = vrot.slane %v2590_v3, 2  ;;  %v1850_v57 = vmul.f32 1.442695, %v1410_v25  ;;  %v1852_v46 = vmul.f32 1.442695, %v1411_v59 }
 0x171   :  { %v4663_v41 = vadd.f32 -192.0, %v3379_v2  ;;  %v4664_v40 = vadd.f32 -192.0, %v3380_v53  ;;  %v4665_v1 = vadd.f32 -192.0, %v3381_v18  ;;  %v4666_v49 = vadd.f32 -192.0, %v3382_v38  ;;  %v7955_v32 = vld [vmem:[%s11637_s0 + $0x458] sm:$0x7] }
 0x172   :  { %v7919_v7 = vpop.eup %5154  ;;  %v4667_v45 = vadd.f32 -192.0, %v3383_v14  ;;  %v2592_v29 = vadd.f32 %v2591_v16, %v2590_v3  ;;  %v2595_v0 = vsel %vm328_vm0, %v7916_v61, 0.0  ;;  %5162 = vpow2.f32 %v1850_v57 }
 0x173   :  { %v4019_v13 = vmax.f32 %v4663_v41, 0.0  ;;  %v4020_v24 = vmax.f32 %v4664_v40, 0.0  ;;  %v4021_v56 = vmax.f32 %v4665_v1, 0.0  ;;  %v4022_v44 = vmax.f32 %v4666_v49, 0.0  ;;  %v7980_v41 = vld [vmem:[%s11637_s0 + $0x468] sm:$0xff] }
 0x174   :  { %v7923_v55 = vpop.eup %5156  ;;  %v4023_v15 = vmax.f32 %v4667_v45, 0.0  ;;  %v2593_v12 = vrot.slane %v2592_v29, 1  ;;  %v2596_v50 = vsel %vm328_vm0, %v7919_v7, 0.0  ;;  %5164 = vpow2.f32 %v1852_v46 }
 0x175   :  { %4339 = vst.msk [vmem:[%s11638_s1 + $0x348] sm:$0xff] %vm328_vm0, %v4019_v13  ;;  %4340 = vst.msk [vmem:[%s11638_s1 + $0x350] sm:$0xff] %vm328_vm0, %v4020_v24  ;;  %v2597_v21 = vadd.f32 %v2596_v50, %v2595_v0  ;;  %v2598_v31 = vsel %vm328_vm0, %v7923_v55, 0.0  ;;  %v1854_v51 = vmul.f32 1.442695, %v1412_v20  ;;  %v718_v25 = vrot.slane %v717_v36, 1 }
 0x176   :  { %4341 = vst.msk [vmem:[%s11638_s1 + $0x358] sm:$0xff] %vm328_vm0, %v4021_v56  ;;  %4342 = vst.msk [vmem:[%s11638_s1 + $0x360] sm:$0xff] %vm328_vm0, %v4022_v44  ;;  %v1856_v4 = vmul.f32 1.442695, %v1413_v60  ;;  %v7945_v5 = vpop.eup %5158  ;;  %v2594_v11 = vadd.f32 %v2593_v12, %v2592_v29  ;;  %v1858_v27 = vmul.f32 1.442695, %v1414_v34  ;;  %v728_v59 = vmax.f32 %v726_v10, %v7828_v30 }
 0x177   :  { %4343 = vst.msk [vmem:[%s11638_s1 + $0x368] sm:$0x7] %vm336_vm1, %v4023_v15  ;;  %v7957_v3 = vpop.eup %5160  ;;  %v2599_v20 = vadd.f32 %v2598_v31, %v2597_v21  ;;  %v2600_v60 = vsel %vm328_vm0, %v7945_v5, 0.0  ;;  %5166 = vpow2.f32 %v1854_v51  ;;  %v739_v2 = vmax.f32 %v737_v62, %v7844_v26  ;;  %v7991_v24 = vld [vmem:[%s11637_s0 + $0x470] sm:$0xff] }
 0x178   :  { %5168 = vrcp.f32 %v2594_v11  ;;  %v2602_v34 = vsel %vm336_vm1, %v7957_v3, 0.0  ;;  %v719_v53 = vmax.f32 %v717_v36, %v718_v25  ;;  %v729_v30 = vrot.slane %v728_v59, 4 }
 0x179   :  { %v2601_v10 = vadd.f32 %v2600_v60, %v2599_v20  ;;  %5170 = vpow2.f32 %v1856_v4  ;;  %v741_v18 = vmax.f32 %v739_v2, %v7905_v28  ;;  %v742_v38 = vsel %vm336_vm1, %v7955_v32, -inf  ;;  %v7975_v28 = vld [vmem:[%s11637_s0 + $0x460] sm:$0xff] }
 0x17a   :  { %5172 = vpow2.f32 %v1858_v27  ;;  %v1415_v14 = vsub.f32 %v7678_v52, %v719_v53  ;;  %v1416_v16 = vsub.f32 %v7683_v58, %v719_v53  ;;  %v1417_v26 = vsub.f32 %v7698_v6, %v719_v53 }
 0x17b   :  { %v2603_v62 = vadd.f32 %v2602_v34, %v2601_v10  ;;  %v1418_v57 = vsub.f32 %v7743_v35, %v719_v53  ;;  %v1419_v36 = vsub.f32 %v7748_v22, %v719_v53  ;;  %v730_v46 = vmax.f32 %v728_v59, %v729_v30 }
 0x17c   :  { %v7982_v52 = vpop.eup %5162  ;;  %v1860_v58 = vmul.f32 1.442695, %v1415_v14  ;;  %v1862_v6 = vmul.f32 1.442695, %v1416_v16  ;;  %v1864_v40 = vmul.f32 1.442695, %v1417_v26  ;;  %v743_v1 = vmax.f32 %v741_v18, %v742_v38 }
 0x17d   :  { %v2604_v35 = vrot.slane %v2603_v62, 4  ;;  %v2610_v22 = vsel %vm328_vm0, %v7982_v52, 0.0  ;;  %v1866_v49 = vmul.f32 1.442695, %v1418_v57  ;;  %v1868_v45 = vmul.f32 1.442695, %v1419_v36 }
 0x17e   :  { %v7986_v29 = vpop.eup %5164  ;;  %5174 = vpow2.f32 %v1860_v58  ;;  %v731_v0 = vrot.slane %v730_v46, 2  ;;  %v744_v13 = vrot.slane %v743_v1, 4  ;;  %v750_v56 = vsel %vm328_vm0, %v7975_v28, -inf }
 0x17f   :  { %v2605_v44 = vadd.f32 %v2604_v35, %v2603_v62  ;;  %v2611_v15 = vsel %vm328_vm0, %v7986_v29, 0.0  ;;  %5176 = vpow2.f32 %v1862_v6  ;;  %v751_v12 = vsel %vm328_vm0, %v7980_v41, -inf }
 0x180   :  { %v2612_v50 = vadd.f32 %v2611_v15, %v2610_v22  ;;  %5178 = vpow2.f32 %v1864_v40  ;;  %v732_v21 = vmax.f32 %v730_v46, %v731_v0  ;;  %v745_v31 = vmax.f32 %v743_v1, %v744_v13 }
 0x181   :  { %v7999_v51 = vpop.eup %5166  ;;  %v2606_v4 = vrot.slane %v2605_v44, 2  ;;  %5180 = vpow2.f32 %v1866_v49  ;;  %v752_v11 = vmax.f32 %v750_v56, %v751_v12  ;;  %v753_v27 = vsel %vm328_vm0, %v7991_v24, -inf }
 0x182   :  { %v5169_v25 = vpop.eup %5168  ;;  %v2613_v59 = vsel %vm328_vm0, %v7999_v51, 0.0  ;;  %5182 = vpow2.f32 %v1868_v45  ;;  %v733_v20 = vrot.slane %v732_v21, 1  ;;  %v746_v60 = vrot.slane %v745_v31, 2 }
 0x183   :  { %v8005_v2 = vpop.eup %5170  ;;  %v3384_v34 = vmul.f32 %v5169_v25, %v7832_v17  ;;  %v3385_v53 = vmul.f32 %v5169_v25, %v7851_v48  ;;  %v3386_v30 = vmul.f32 %v5169_v25, %v7855_v23  ;;  %v3387_v10 = vmul.f32 %v5169_v25, %v7861_v9  ;;  %v8021_v9 = vld [vmem:[%s11637_s0 + $0x478] sm:$0xff] }
 0x184   :  { %v8011_v18 = vpop.eup %5172  ;;  %v3388_v38 = vmul.f32 %v5169_v25, %v7867_v33  ;;  %v2607_v14 = vadd.f32 %v2606_v4, %v2605_v44  ;;  %v2614_v16 = vadd.f32 %v2613_v59, %v2612_v50  ;;  %v2615_v26 = vsel %vm328_vm0, %v8005_v2, 0.0 }
 0x185   :  { %v4668_v62 = vadd.f32 -192.0, %v3384_v34  ;;  %v4669_v57 = vadd.f32 -192.0, %v3385_v53  ;;  %v4670_v36 = vadd.f32 -192.0, %v3386_v30  ;;  %v4671_v46 = vadd.f32 -192.0, %v3387_v10  ;;  %v8071_v10 = vld [vmem:[%s11637_s0 + $0x480] sm:$0x7] }
 0x186   :  { %v4672_v17 = vadd.f32 -192.0, %v3388_v38  ;;  %v2608_v58 = vrot.slane %v2607_v14, 1  ;;  %v2616_v48 = vadd.f32 %v2615_v26, %v2614_v16  ;;  %v2617_v23 = vsel %vm336_vm1, %v8011_v18, 0.0  ;;  %v8078_v16 = vld [vmem:[%s11637_s0 + $0x488] sm:$0xff] }
 0x187   :  { %v4024_v33 = vmax.f32 %v4668_v62, 0.0  ;;  %v4025_v6 = vmax.f32 %v4669_v57, 0.0  ;;  %v4026_v40 = vmax.f32 %v4670_v36, 0.0  ;;  %v4027_v1 = vmax.f32 %v4671_v46, 0.0 }
 0x188   :  { %v8023_v35 = vpop.eup %5174  ;;  %v4028_v22 = vmax.f32 %v4672_v17, 0.0  ;;  %v2609_v49 = vadd.f32 %v2608_v58, %v2607_v14  ;;  %v2618_v45 = vadd.f32 %v2617_v23, %v2616_v48  ;;  %v734_v0 = vmax.f32 %v732_v21, %v733_v20 }
 0x189   :  { %v8025_v13 = vpop.eup %5176  ;;  %4344 = vst.msk [vmem:[%s11638_s1 + $0x370] sm:$0xff] %vm328_vm0, %v4024_v33  ;;  %4345 = vst.msk [vmem:[%s11638_s1 + $0x378] sm:$0xff] %vm328_vm0, %v4025_v6  ;;  %v2625_v56 = vsel %vm328_vm0, %v8023_v35, 0.0  ;;  %v747_v44 = vmax.f32 %v745_v31, %v746_v60  ;;  %v754_v15 = vmax.f32 %v752_v11, %v753_v27  ;;  %v755_v12 = vsel %vm328_vm0, %v8021_v9, -inf }
 0x18a   :  { %4346 = vst.msk [vmem:[%s11638_s1 + $0x380] sm:$0xff] %vm328_vm0, %v4026_v40  ;;  %4347 = vst.msk [vmem:[%s11638_s1 + $0x388] sm:$0xff] %vm328_vm0, %v4027_v1  ;;  %v8047_v50 = vpop.eup %5178  ;;  %5184 = vrcp.f32 %v2609_v49  ;;  %v2619_v21 = vrot.slane %v2618_v45, 4  ;;  %v2626_v4 = vsel %vm328_vm0, %v8025_v13, 0.0  ;;  %v1420_v25 = vsub.f32 %v7770_v47, %v734_v0 }
 0x18b   :  { %4348 = vst.msk [vmem:[%s11638_s1 + $0x390] sm:$0x7] %vm336_vm1, %v4028_v22  ;;  %v8056_v59 = vpop.eup %5180  ;;  %v2627_v31 = vadd.f32 %v2626_v4, %v2625_v56  ;;  %v2628_v11 = vsel %vm328_vm0, %v8047_v50, 0.0  ;;  %v1421_v27 = vsub.f32 %v7775_v8, %v734_v0  ;;  %v1422_v20 = vsub.f32 %v7789_v54, %v734_v0 }
 0x18c   :  { %v8062_v60 = vpop.eup %5182  ;;  %v2620_v34 = vadd.f32 %v2619_v21, %v2618_v45  ;;  %v2630_v53 = vsel %vm328_vm0, %v8056_v59, 0.0  ;;  %v1423_v30 = vsub.f32 %v7794_v42, %v734_v0  ;;  %v1424_v47 = vsub.f32 %v7799_v43, %v734_v0 }
 0x18d   :  { %v2629_v38 = vadd.f32 %v2628_v11, %v2627_v31  ;;  %v2632_v8 = vsel %vm336_vm1, %v8062_v60, 0.0  ;;  %v1870_v54 = vmul.f32 1.442695, %v1420_v25  ;;  %v1872_v14 = vmul.f32 1.442695, %v1421_v27 }
 0x18e   :  { %v2621_v26 = vrot.slane %v2620_v34, 2  ;;  %v1874_v42 = vmul.f32 1.442695, %v1422_v20  ;;  %v1876_v62 = vmul.f32 1.442695, %v1423_v30  ;;  %v748_v43 = vrot.slane %v747_v44, 1 }
 0x18f   :  { %v2631_v57 = vadd.f32 %v2630_v53, %v2629_v38  ;;  %5186 = vpow2.f32 %v1870_v54  ;;  %v1878_v36 = vmul.f32 1.442695, %v1424_v47  ;;  %v756_v46 = vmax.f32 %v754_v15, %v755_v12 }
 0x190   :  { %v2622_v17 = vadd.f32 %v2621_v26, %v2620_v34  ;;  %5188 = vpow2.f32 %v1872_v14  ;;  %v749_v58 = vmax.f32 %v747_v44, %v748_v43  ;;  %v757_v48 = vsel %vm336_vm1, %v8071_v10, -inf  ;;  %v8107_v14 = vld [vmem:[%s11637_s0 + $0x490] sm:$0xff] }
 0x191   :  { %v2633_v23 = vadd.f32 %v2632_v8, %v2631_v57  ;;  %5190 = vpow2.f32 %v1874_v42  ;;  %v8082_v33 = vmax.f32 %v756_v46, %v757_v48  ;;  %v8086_v6 = vsel %vm328_vm0, %v8078_v16, -inf  ;;  %v8146_v48 = vld [vmem:[%s11637_s0 + $0x4a0] sm:$0xff] }
 0x192   :  { %v2623_v40 = vrot.slane %v2622_v17, 1  ;;  %5192 = vpow2.f32 %v1876_v62  ;;  %v1425_v1 = vsub.f32 %v7808_v63, %v749_v58  ;;  %v1426_v22 = vsub.f32 %v7813_v39, %v749_v58 }
 0x193   :  { %v2634_v49 = vrot.slane %v2633_v23, 4  ;;  %5194 = vpow2.f32 %v1878_v36  ;;  %v1427_v45 = vsub.f32 %v7818_v19, %v749_v58  ;;  %v1428_v0 = vsub.f32 %v7877_v37, %v749_v58 }
 0x194   :  { %v5185_v56 = vpop.eup %5184  ;;  %v2624_v44 = vadd.f32 %v2623_v40, %v2622_v17  ;;  %v1429_v15 = vsub.f32 %v7955_v32, %v749_v58  ;;  %v1880_v12 = vmul.f32 1.442695, %v1425_v1  ;;  %v1882_v21 = vmul.f32 1.442695, %v1426_v22  ;;  %v8141_v58 = vld [vmem:[%s11637_s0 + $0x498] sm:$0xff] }
 0x195   :  { %v3389_v4 = vmul.f32 %v5185_v56, %v7916_v61  ;;  %v3390_v25 = vmul.f32 %v5185_v56, %v7919_v7  ;;  %v3391_v63 = vmul.f32 %v5185_v56, %v7923_v55  ;;  %v3392_v39 = vmul.f32 %v5185_v56, %v7945_v5 }
 0x196   :  { %v3393_v31 = vmul.f32 %v5185_v56, %v7957_v3  ;;  %5196 = vrcp.f32 %v2624_v44  ;;  %v2635_v19 = vadd.f32 %v2634_v49, %v2633_v23  ;;  %v1884_v11 = vmul.f32 1.442695, %v1427_v45  ;;  %v8151_v23 = vld [vmem:[%s11637_s0 + $0x4a8] sm:$0x7]  ;;  %v8163_v45 = vld [vmem:[%s11637_s0 + $0x4b0] sm:$0xff] }
 0x197   :  { %v4673_v37 = vadd.f32 -192.0, %v3389_v4  ;;  %v4674_v27 = vadd.f32 -192.0, %v3390_v25  ;;  %v4675_v20 = vadd.f32 -192.0, %v3391_v63  ;;  %v4676_v34 = vadd.f32 -192.0, %v3392_v39 }
 0x198   :  { %v4677_v32 = vadd.f32 -192.0, %v3393_v31  ;;  %v2636_v53 = vrot.slane %v2635_v19, 2  ;;  %5198 = vpow2.f32 %v1880_v12  ;;  %v1886_v30 = vmul.f32 1.442695, %v1428_v0 }
 0x199   :  { %v8098_v61 = vpop.eup %5186  ;;  %v4029_v7 = vmax.f32 %v4673_v37, 0.0  ;;  %v4030_v47 = vmax.f32 %v4674_v27, 0.0  ;;  %v4031_v55 = vmax.f32 %v4675_v20, 0.0  ;;  %v4032_v38 = vmax.f32 %v4676_v34, 0.0 }
 0x19a   :  { %v8100_v5 = vpop.eup %5188  ;;  %v4033_v3 = vmax.f32 %v4677_v32, 0.0  ;;  %v2637_v8 = vadd.f32 %v2636_v53, %v2635_v19  ;;  %v2640_v54 = vsel %vm328_vm0, %v8098_v61, 0.0  ;;  %5200 = vpow2.f32 %v1882_v21 }
 0x19b   :  { %v8109_v26 = vpop.eup %5190  ;;  %4349 = vst.msk [vmem:[%s11638_s1 + $0x398] sm:$0xff] %vm328_vm0, %v4029_v7  ;;  %4350 = vst.msk [vmem:[%s11638_s1 + $0x3a0] sm:$0xff] %vm328_vm0, %v4030_v47  ;;  %v2641_v42 = vsel %vm328_vm0, %v8100_v5, 0.0  ;;  %5202 = vpow2.f32 %v1884_v11  ;;  %v1888_v62 = vmul.f32 1.442695, %v1429_v15  ;;  %v759_v43 = vrot.slane %v8082_v33, 4 }
 0x19c   :  { %4351 = vst.msk [vmem:[%s11638_s1 + $0x3a8] sm:$0xff] %vm328_vm0, %v4031_v55  ;;  %4352 = vst.msk [vmem:[%s11638_s1 + $0x3b0] sm:$0xff] %vm328_vm0, %v4032_v38  ;;  %v8130_v57 = vpop.eup %5192  ;;  %v2638_v36 = vrot.slane %v2637_v8, 1  ;;  %v2642_v46 = vadd.f32 %v2641_v42, %v2640_v54  ;;  %v2643_v17 = vsel %vm328_vm0, %v8109_v26, 0.0  ;;  %5204 = vpow2.f32 %v1886_v30 }
 0x19d   :  { %4353 = vst.msk [vmem:[%s11638_s1 + $0x3b8] sm:$0x7] %vm336_vm1, %v4033_v3  ;;  %v8153_v40 = vpop.eup %5194  ;;  %v2645_v1 = vsel %vm328_vm0, %v8130_v57, 0.0  ;;  %5206 = vpow2.f32 %v1888_v62  ;;  %v760_v22 = vmax.f32 %v8082_v33, %v759_v43  ;;  %v766_v49 = vsel %vm328_vm0, %v8107_v14, -inf  ;;  %v8194_v62 = vld [vmem:[%s11637_s0 + $0x4b8] sm:$0xff]  ;;  %v8199_v43 = vld [vmem:[%s11637_s0 + $0x4c0] sm:$0xff] }
 0x19e   :  { %v2639_v0 = vadd.f32 %v2638_v36, %v2637_v8  ;;  %v2644_v56 = vadd.f32 %v2643_v17, %v2642_v46  ;;  %v2647_v44 = vsel %vm336_vm1, %v8153_v40, 0.0  ;;  %v767_v15 = vmax.f32 %v8086_v6, %v766_v49 }
 0x19f   :  { %v761_v12 = vrot.slane %v760_v22, 2  ;;  %v768_v21 = vsel %vm328_vm0, %v8141_v58, -inf  ;;  %v770_v33 = vsel %vm328_vm0, %v8146_v48, -inf  ;;  %v772_v4 = vsel %vm336_vm1, %v8151_v23, -inf }
 0x1a0   :  { %v5197_v25 = vpop.eup %5196  ;;  %5208 = vrcp.f32 %v2639_v0  ;;  %v2646_v63 = vadd.f32 %v2645_v1, %v2644_v56  ;;  %v769_v39 = vmax.f32 %v767_v15, %v768_v21  ;;  %v8176_v31 = vsel %vm328_vm0, %v8163_v45, -inf }
 0x1a1   :  { %v3394_v6 = vmul.f32 %v5197_v25, %v7982_v52  ;;  %v3395_v19 = vmul.f32 %v5197_v25, %v7986_v29  ;;  %v3396_v11 = vmul.f32 %v5197_v25, %v7999_v51  ;;  %v3397_v37 = vmul.f32 %v5197_v25, %v8005_v2 }
 0x1a2   :  { %v8182_v27 = vpop.eup %5198  ;;  %v3398_v20 = vmul.f32 %v5197_v25, %v8011_v18  ;;  %v2648_v34 = vadd.f32 %v2647_v44, %v2646_v63  ;;  %v762_v32 = vmax.f32 %v760_v22, %v761_v12  ;;  %v771_v53 = vmax.f32 %v769_v39, %v770_v33 }
 0x1a3   :  { %v4678_v30 = vadd.f32 -192.0, %v3394_v6  ;;  %v4679_v7 = vadd.f32 -192.0, %v3395_v19  ;;  %v4680_v47 = vadd.f32 -192.0, %v3396_v11  ;;  %v4681_v55 = vadd.f32 -192.0, %v3397_v37 }
 0x1a4   :  { %v8185_v38 = vpop.eup %5200  ;;  %v4682_v52 = vadd.f32 -192.0, %v3398_v20  ;;  %v2649_v3 = vrot.slane %v2648_v34, 4  ;;  %v2655_v29 = vsel %vm328_vm0, %v8182_v27, 0.0  ;;  %v763_v51 = vrot.slane %v762_v32, 1 }
 0x1a5   :  { %v8189_v2 = vpop.eup %5202  ;;  %v4034_v8 = vmax.f32 %v4678_v30, 0.0  ;;  %v4035_v54 = vmax.f32 %v4679_v7, 0.0  ;;  %v4036_v18 = vmax.f32 %v4680_v47, 0.0  ;;  %v4037_v42 = vmax.f32 %v4681_v55, 0.0 }
 0x1a6   :  { %v8201_v36 = vpop.eup %5204  ;;  %v4038_v46 = vmax.f32 %v4682_v52, 0.0  ;;  %v2650_v17 = vadd.f32 %v2649_v3, %v2648_v34  ;;  %v2656_v1 = vsel %vm328_vm0, %v8185_v38, 0.0  ;;  %v2658_v22 = vsel %vm328_vm0, %v8189_v2, 0.0 }
 0x1a7   :  { %v8207_v49 = vpop.eup %5206  ;;  %4354 = vst.msk [vmem:[%s11638_s1 + $0x3c0] sm:$0xff] %vm328_vm0, %v4034_v8  ;;  %4355 = vst.msk [vmem:[%s11638_s1 + $0x3c8] sm:$0xff] %vm328_vm0, %v4035_v54  ;;  %v2657_v0 = vadd.f32 %v2656_v1, %v2655_v29  ;;  %v2660_v56 = vsel %vm328_vm0, %v8201_v36, 0.0  ;;  %v764_v44 = vmax.f32 %v762_v32, %v763_v51  ;;  %v773_v15 = vmax.f32 %v771_v53, %v772_v4  ;;  %v8255_v8 = vld [vmem:[%s11637_s0 + $0x4d0] sm:$0x7] }
 0x1a8   :  { %4356 = vst.msk [vmem:[%s11638_s1 + $0x3d0] sm:$0xff] %vm328_vm0, %v4036_v18  ;;  %4357 = vst.msk [vmem:[%s11638_s1 + $0x3d8] sm:$0xff] %vm328_vm0, %v4037_v42  ;;  %v2651_v12 = vrot.slane %v2650_v17, 2  ;;  %v2662_v21 = vsel %vm336_vm1, %v8207_v49, 0.0  ;;  %v781_v33 = vsel %vm328_vm0, %v8194_v62, -inf  ;;  %v783_v25 = vsel %vm328_vm0, %v8199_v43, -inf }
 0x1a9   :  { %4358 = vst.msk [vmem:[%s11638_s1 + $0x3e0] sm:$0x7] %vm336_vm1, %v4038_v46  ;;  %v2659_v63 = vadd.f32 %v2658_v22, %v2657_v0  ;;  %v1430_v39 = vsub.f32 %v7975_v28, %v764_v44  ;;  %v1431_v4 = vsub.f32 %v7980_v41, %v764_v44  ;;  %v1432_v6 = vsub.f32 %v7991_v24, %v764_v44  ;;  %v8260_v46 = vld [vmem:[%s11637_s0 + $0x4d8] sm:$0xff] }
 0x1aa   :  { %v5209_v19 = vpop.eup %5208  ;;  %v2652_v11 = vadd.f32 %v2651_v12, %v2650_v17  ;;  %v1433_v37 = vsub.f32 %v8021_v9, %v764_v44  ;;  %v1434_v20 = vsub.f32 %v8071_v10, %v764_v44  ;;  %v774_v34 = vrot.slane %v773_v15, 4  ;;  %v8265_v17 = vld [vmem:[%s11637_s0 + $0x4e0] sm:$0xff] }
 0x1ab   :  { %v3399_v32 = vmul.f32 %v5209_v19, %v8023_v35  ;;  %v3400_v53 = vmul.f32 %v5209_v19, %v8025_v13  ;;  %v3401_v30 = vmul.f32 %v5209_v19, %v8047_v50  ;;  %v3402_v7 = vmul.f32 %v5209_v19, %v8056_v59  ;;  %v8250_v35 = vld [vmem:[%s11637_s0 + $0x4c8] sm:$0xff] }
 0x1ac   :  { %v3403_v28 = vmul.f32 %v5209_v19, %v8062_v60  ;;  %v2653_v41 = vrot.slane %v2652_v11, 1  ;;  %v2661_v47 = vadd.f32 %v2660_v56, %v2659_v63  ;;  %v1890_v24 = vmul.f32 1.442695, %v1430_v39  ;;  %v8293_v63 = vld [vmem:[%s11637_s0 + $0x4e8] sm:$0xff] }
 0x1ad   :  { %v4683_v55 = vadd.f32 -192.0, %v3399_v32  ;;  %v4684_v52 = vadd.f32 -192.0, %v3400_v53  ;;  %v4685_v3 = vadd.f32 -192.0, %v3401_v30  ;;  %v4686_v9 = vadd.f32 -192.0, %v3402_v7 }
 0x1ae   :  { %v4687_v29 = vadd.f32 -192.0, %v3403_v28  ;;  %v2654_v10 = vadd.f32 %v2653_v41, %v2652_v11  ;;  %v2663_v51 = vadd.f32 %v2662_v21, %v2661_v47  ;;  %5210 = vpow2.f32 %v1890_v24  ;;  %v8337_v47 = vld [vmem:[%s11637_s0 + $0x518] sm:$0xff] }
 0x1af   :  { %v4039_v13 = vmax.f32 %v4683_v55, 0.0  ;;  %v4040_v50 = vmax.f32 %v4684_v52, 0.0  ;;  %v4041_v59 = vmax.f32 %v4685_v3, 0.0  ;;  %v4042_v60 = vmax.f32 %v4686_v9, 0.0  ;;  %v8342_v52 = vld [vmem:[%s11637_s0 + $0x520] sm:$0x7] }
 0x1b0   :  { %v4043_v54 = vmax.f32 %v4687_v29, 0.0  ;;  %5212 = vrcp.f32 %v2654_v10  ;;  %v2664_v18 = vrot.slane %v2663_v51, 4  ;;  %v1892_v42 = vmul.f32 1.442695, %v1431_v4  ;;  %v8300_v4 = vld [vmem:[%s11637_s0 + $0x4f0] sm:$0xff] }
 0x1b1   :  { %4359 = vst.msk [vmem:[%s11638_s1 + $0x3e8] sm:$0xff] %vm328_vm0, %v4039_v13  ;;  %4360 = vst.msk [vmem:[%s11638_s1 + $0x3f0] sm:$0xff] %vm328_vm0, %v4040_v50  ;;  %v1894_v1 = vmul.f32 1.442695, %v1432_v6  ;;  %v1896_v22 = vmul.f32 1.442695, %v1433_v37  ;;  %v775_v56 = vmax.f32 %v773_v15, %v774_v34  ;;  %v782_v12 = vmax.f32 %v8176_v31, %v781_v33 }
 0x1b2   :  { %4361 = vst.msk [vmem:[%s11638_s1 + $0x3f8] sm:$0xff] %vm328_vm0, %v4041_v59  ;;  %4362 = vst.msk [vmem:[%s11638_s1 + $0x400] sm:$0xff] %vm328_vm0, %v4042_v60  ;;  %v1898_v0 = vmul.f32 1.442695, %v1434_v20  ;;  %v2665_v44 = vadd.f32 %v2664_v18, %v2663_v51  ;;  %5214 = vpow2.f32 %v1892_v42  ;;  %v785_v21 = vsel %vm328_vm0, %v8250_v35, -inf  ;;  %v8314_v37 = vld [vmem:[%s11637_s0 + $0x500] sm:$0xff] }
 0x1b3   :  { %4363 = vst.msk [vmem:[%s11638_s1 + $0x408] sm:$0x7] %vm336_vm1, %v4043_v54  ;;  %5216 = vpow2.f32 %v1894_v1  ;;  %v776_v39 = vrot.slane %v775_v56, 2  ;;  %v787_v15 = vsel %vm336_vm1, %v8255_v8, -inf  ;;  %v8305_v31 = vld [vmem:[%s11637_s0 + $0x4f8] sm:$0x7]  ;;  %v784_v19 = vmax.f32 %v782_v12, %v783_v25 }
 0x1b4   :  { %v795_v33 = vsel %vm328_vm0, %v8260_v46, -inf  ;;  %v2666_v6 = vrot.slane %v2665_v44, 2  ;;  %5218 = vpow2.f32 %v1896_v22  ;;  %v796_v11 = vsel %vm328_vm0, %v8265_v17, -inf  ;;  %v8319_v20 = vld [vmem:[%s11637_s0 + $0x508] sm:$0xff]  ;;  %v8326_v25 = vld [vmem:[%s11637_s0 + $0x510] sm:$0xff] }
 0x1b5   :  { %5220 = vpow2.f32 %v1898_v0  ;;  %v777_v34 = vmax.f32 %v775_v56, %v776_v39  ;;  %v797_v32 = vmax.f32 %v795_v33, %v796_v11  ;;  %v798_v53 = vsel %vm328_vm0, %v8293_v63, -inf }
 0x1b6   :  { %v2667_v30 = vadd.f32 %v2666_v6, %v2665_v44  ;;  %v786_v7 = vmax.f32 %v784_v19, %v785_v21  ;;  %v8330_v28 = vsel %vm328_vm0, %v8300_v4, -inf  ;;  %v802_v41 = vsel %vm336_vm1, %v8305_v31, -inf }
 0x1b7   :  { %v778_v24 = vrot.slane %v777_v34, 1  ;;  %v799_v55 = vmax.f32 %v797_v32, %v798_v53  ;;  %v810_v3 = vsel %vm328_vm0, %v8314_v37, -inf  ;;  %v811_v9 = vsel %vm328_vm0, %v8319_v20, -inf }
 0x1b8   :  { %v8348_v29 = vpop.eup %5210  ;;  %v2668_v10 = vrot.slane %v2667_v30, 1  ;;  %v788_v51 = vmax.f32 %v786_v7, %v787_v15  ;;  %v812_v13 = vmax.f32 %v810_v3, %v811_v9  ;;  %v813_v50 = vsel %vm328_vm0, %v8326_v25, -inf }
 0x1b9   :  { %v2670_v59 = vsel %vm328_vm0, %v8348_v29, 0.0  ;;  %v779_v60 = vmax.f32 %v777_v34, %v778_v24  ;;  %v801_v54 = vmax.f32 %v799_v55, %v8330_v28  ;;  %v815_v18 = vsel %vm328_vm0, %v8337_v47, -inf }
 0x1ba   :  { %v5213_v42 = vpop.eup %5212  ;;  %v2669_v1 = vadd.f32 %v2668_v10, %v2667_v30  ;;  %v789_v22 = vrot.slane %v788_v51, 4  ;;  %v814_v0 = vmax.f32 %v812_v13, %v813_v50  ;;  %v817_v56 = vsel %vm336_vm1, %v8342_v52, -inf }
 0x1bb   :  { %v3404_v44 = vmul.f32 %v5213_v42, %v8098_v61  ;;  %v3405_v12 = vmul.f32 %v5213_v42, %v8100_v5  ;;  %v3406_v21 = vmul.f32 %v5213_v42, %v8109_v26  ;;  %v3407_v39 = vmul.f32 %v5213_v42, %v8130_v57 }
 0x1bc   :  { %v8363_v15 = vpop.eup %5214  ;;  %v3408_v33 = vmul.f32 %v5213_v42, %v8153_v40  ;;  %5222 = vrcp.f32 %v2669_v1  ;;  %v1435_v6 = vsub.f32 %v8078_v16, %v779_v60  ;;  %v1436_v19 = vsub.f32 %v8107_v14, %v779_v60 }
 0x1bd   :  { %v8368_v11 = vpop.eup %5216  ;;  %v4688_v34 = vadd.f32 -192.0, %v3404_v44  ;;  %v4689_v32 = vadd.f32 -192.0, %v3405_v12  ;;  %v4690_v61 = vadd.f32 -192.0, %v3406_v21  ;;  %v4691_v53 = vadd.f32 -192.0, %v3407_v39  ;;  %v8408_v21 = vld [vmem:[%s11637_s0 + $0x528] sm:$0xff] }
 0x1be   :  { %v8370_v5 = vpop.eup %5218  ;;  %v4692_v26 = vadd.f32 -192.0, %v3408_v33  ;;  %v2671_v57 = vsel %vm328_vm0, %v8363_v15, 0.0  ;;  %v2673_v40 = vsel %vm328_vm0, %v8368_v11, 0.0  ;;  %v1437_v30 = vsub.f32 %v8141_v58, %v779_v60 }
 0x1bf   :  { %v8377_v16 = vpop.eup %5220  ;;  %v4044_v14 = vmax.f32 %v4688_v34, 0.0  ;;  %v4045_v7 = vmax.f32 %v4689_v32, 0.0  ;;  %v4046_v28 = vmax.f32 %v4690_v61, 0.0  ;;  %v4047_v24 = vmax.f32 %v4691_v53, 0.0 }
 0x1c0   :  { %v4048_v55 = vmax.f32 %v4692_v26, 0.0  ;;  %v2672_v3 = vadd.f32 %v2671_v57, %v2670_v59  ;;  %v2675_v9 = vsel %vm328_vm0, %v8370_v5, 0.0  ;;  %v2677_v10 = vsel %vm336_vm1, %v8377_v16, 0.0 }
 0x1c1   :  { %4364 = vst.msk [vmem:[%s11638_s1 + $0x410] sm:$0xff] %vm328_vm0, %v4044_v14  ;;  %4365 = vst.msk [vmem:[%s11638_s1 + $0x418] sm:$0xff] %vm328_vm0, %v4045_v7  ;;  %v1438_v58 = vsub.f32 %v8146_v48, %v779_v60  ;;  %v1439_v13 = vsub.f32 %v8151_v23, %v779_v60  ;;  %v1900_v50 = vmul.f32 1.442695, %v1435_v6  ;;  %v1902_v59 = vmul.f32 1.442695, %v1436_v19 }
 0x1c2   :  { %4366 = vst.msk [vmem:[%s11638_s1 + $0x420] sm:$0xff] %vm328_vm0, %v4046_v28  ;;  %4367 = vst.msk [vmem:[%s11638_s1 + $0x428] sm:$0xff] %vm328_vm0, %v4047_v24  ;;  %v2674_v42 = vadd.f32 %v2673_v40, %v2672_v3  ;;  %v1904_v1 = vmul.f32 1.442695, %v1437_v30  ;;  %v790_v44 = vmax.f32 %v788_v51, %v789_v22  ;;  %v803_v12 = vmax.f32 %v801_v54, %v802_v41  ;;  %v8413_v48 = vld [vmem:[%s11637_s0 + $0x530] sm:$0xff] }
 0x1c3   :  { %4368 = vst.msk [vmem:[%s11638_s1 + $0x430] sm:$0x7] %vm336_vm1, %v4048_v55  ;;  %5224 = vpow2.f32 %v1900_v50  ;;  %v1906_v23 = vmul.f32 1.442695, %v1438_v58  ;;  %v1908_v60 = vmul.f32 1.442695, %v1439_v13  ;;  %v816_v39 = vmax.f32 %v814_v0, %v815_v18 }
 0x1c4   :  { %v2676_v33 = vadd.f32 %v2675_v9, %v2674_v42  ;;  %5226 = vpow2.f32 %v1902_v59  ;;  %v791_v6 = vrot.slane %v790_v44, 2  ;;  %v804_v19 = vrot.slane %v803_v12, 4 }
 0x1c5   :  { %5228 = vpow2.f32 %v1904_v1  ;;  %v8415_v41 = vmax.f32 %v816_v39, %v817_v56  ;;  %v8419_v51 = vsel %vm328_vm0, %v8408_v21, -inf  ;;  %v8423_v54 = vsel %vm328_vm0, %v8413_v48, -inf }
 0x1c6   :  { %v5223_v22 = vpop.eup %5222  ;;  %v2678_v34 = vadd.f32 %v2677_v10, %v2676_v33  ;;  %5230 = vpow2.f32 %v1906_v23  ;;  %v792_v32 = vmax.f32 %v790_v44, %v791_v6  ;;  %v805_v18 = vmax.f32 %v803_v12, %v804_v19 }
 0x1c7   :  { %v3409_v0 = vmul.f32 %v5223_v22, %v8182_v27  ;;  %v3410_v61 = vmul.f32 %v5223_v22, %v8185_v38  ;;  %v3411_v56 = vmul.f32 %v5223_v22, %v8189_v2  ;;  %v3412_v53 = vmul.f32 %v5223_v22, %v8201_v36 }
 0x1c8   :  { %v3413_v26 = vmul.f32 %v5223_v22, %v8207_v49  ;;  %v2679_v57 = vrot.slane %v2678_v34, 4  ;;  %5232 = vpow2.f32 %v1908_v60  ;;  %v793_v40 = vrot.slane %v792_v32, 1 }
 0x1c9   :  { %v4693_v30 = vadd.f32 -192.0, %v3409_v0  ;;  %v4694_v14 = vadd.f32 -192.0, %v3410_v61  ;;  %v4695_v7 = vadd.f32 -192.0, %v3411_v56  ;;  %v4696_v28 = vadd.f32 -192.0, %v3412_v53 }
 0x1ca   :  { %v4697_v24 = vadd.f32 -192.0, %v3413_v26  ;;  %v2680_v55 = vadd.f32 %v2679_v57, %v2678_v34  ;;  %v794_v3 = vmax.f32 %v792_v32, %v793_v40  ;;  %v806_v9 = vrot.slane %v805_v18, 2 }
 0x1cb   :  { %v4049_v27 = vmax.f32 %v4693_v30, 0.0  ;;  %v4050_v10 = vmax.f32 %v4694_v14, 0.0  ;;  %v4051_v38 = vmax.f32 %v4695_v7, 0.0  ;;  %v4052_v58 = vmax.f32 %v4696_v28, 0.0 }
 0x1cc   :  { %v4053_v2 = vmax.f32 %v4697_v24, 0.0  ;;  %v2681_v13 = vrot.slane %v2680_v55, 2  ;;  %v1440_v36 = vsub.f32 %v8163_v45, %v794_v3  ;;  %v1441_v49 = vsub.f32 %v8194_v62, %v794_v3  ;;  %v8483_v24 = vld [vmem:[%s11637_s0 + $0x538] sm:$0xff] }
 0x1cd   :  { %v8432_v50 = vpop.eup %5224  ;;  %4369 = vst.msk [vmem:[%s11638_s1 + $0x438] sm:$0xff] %vm328_vm0, %v4049_v27  ;;  %4370 = vst.msk [vmem:[%s11638_s1 + $0x440] sm:$0xff] %vm328_vm0, %v4050_v10  ;;  %v1442_v45 = vsub.f32 %v8199_v43, %v794_v3  ;;  %v1443_v62 = vsub.f32 %v8250_v35, %v794_v3  ;;  %v1444_v59 = vsub.f32 %v8255_v8, %v794_v3  ;;  %v819_v26 = vrot.slane %v8415_v41, 4 }
 0x1ce   :  { %4371 = vst.msk [vmem:[%s11638_s1 + $0x448] sm:$0xff] %vm328_vm0, %v4051_v38  ;;  %4372 = vst.msk [vmem:[%s11638_s1 + $0x450] sm:$0xff] %vm328_vm0, %v4052_v58  ;;  %v807_v42 = vmax.f32 %v805_v18, %v806_v9  ;;  %v8453_v1 = vpop.eup %5226  ;;  %v2682_v44 = vadd.f32 %v2681_v13, %v2680_v55  ;;  %v2685_v12 = vsel %vm328_vm0, %v8432_v50, 0.0  ;;  %v1910_v23 = vmul.f32 1.442695, %v1440_v36  ;;  %v8488_v55 = vld [vmem:[%s11637_s0 + $0x540] sm:$0xff] }
 0x1cf   :  { %4373 = vst.msk [vmem:[%s11638_s1 + $0x458] sm:$0x7] %vm336_vm1, %v4053_v2  ;;  %v1912_v60 = vmul.f32 1.442695, %v1441_v49  ;;  %v8461_v39 = vpop.eup %5228  ;;  %v2686_v43 = vsel %vm328_vm0, %v8453_v1, 0.0  ;;  %v820_v10 = vmax.f32 %v8415_v41, %v819_v26  ;;  %v8500_v38 = vld [vmem:[%s11637_s0 + $0x550] sm:$0xff] }
 0x1d0   :  { %v1914_v35 = vmul.f32 1.442695, %v1442_v45  ;;  %v1916_v8 = vmul.f32 1.442695, %v1443_v62  ;;  %v808_v33 = vrot.slane %v807_v42, 1  ;;  %v8465_v6 = vpop.eup %5230  ;;  %v2683_v19 = vrot.slane %v2682_v44, 1 }
 0x1d1   :  { %v2687_v22 = vadd.f32 %v2686_v43, %v2685_v12  ;;  %v2688_v34 = vsel %vm328_vm0, %v8461_v39, 0.0  ;;  %5234 = vpow2.f32 %v1910_v23  ;;  %v2690_v32 = vsel %vm328_vm0, %v8465_v6, 0.0  ;;  %v8509_v13 = vld [vmem:[%s11637_s0 + $0x558] sm:$0xff] }
 0x1d2   :  { %5236 = vpow2.f32 %v1912_v60  ;;  %v1918_v18 = vmul.f32 1.442695, %v1444_v59  ;;  %v809_v0 = vmax.f32 %v807_v42, %v808_v33  ;;  %v8471_v61 = vpop.eup %5232  ;;  %v2684_v56 = vadd.f32 %v2683_v19, %v2682_v44 }
 0x1d3   :  { %v2689_v53 = vadd.f32 %v2688_v34, %v2687_v22  ;;  %5238 = vpow2.f32 %v1914_v35  ;;  %v2692_v57 = vsel %vm336_vm1, %v8471_v61, 0.0  ;;  %v828_v2 = vsel %vm328_vm0, %v8483_v24, -inf  ;;  %v8533_v35 = vld [vmem:[%s11637_s0 + $0x568] sm:$0xff] }
 0x1d4   :  { %5240 = vpow2.f32 %v1916_v8  ;;  %v1445_v40 = vsub.f32 %v8260_v46, %v809_v0  ;;  %v1446_v30 = vsub.f32 %v8265_v17, %v809_v0  ;;  %v1447_v7 = vsub.f32 %v8293_v63, %v809_v0  ;;  %v8494_v63 = vld [vmem:[%s11637_s0 + $0x548] sm:$0x7] }
 0x1d5   :  { %5242 = vrcp.f32 %v2684_v56  ;;  %v2691_v14 = vadd.f32 %v2690_v32, %v2689_v53  ;;  %v1448_v28 = vsub.f32 %v8300_v4, %v809_v0  ;;  %v1449_v46 = vsub.f32 %v8305_v31, %v809_v0 }
 0x1d6   :  { %5244 = vpow2.f32 %v1918_v18  ;;  %v1920_v17 = vmul.f32 1.442695, %v1445_v40  ;;  %v1922_v3 = vmul.f32 1.442695, %v1446_v30  ;;  %v1924_v9 = vmul.f32 1.442695, %v1447_v7 }
 0x1d7   :  { %v2693_v4 = vadd.f32 %v2692_v57, %v2691_v14  ;;  %v1926_v27 = vmul.f32 1.442695, %v1448_v28  ;;  %v1928_v58 = vmul.f32 1.442695, %v1449_v46  ;;  %v827_v31 = vmax.f32 %v8419_v51, %v8423_v54  ;;  %v8518_v51 = vld [vmem:[%s11637_s0 + $0x560] sm:$0xff] }
 0x1d8   :  { %5246 = vpow2.f32 %v1920_v17  ;;  %v821_v41 = vrot.slane %v820_v10, 2  ;;  %v830_v49 = vsel %vm328_vm0, %v8488_v55, -inf  ;;  %v832_v62 = vsel %vm336_vm1, %v8494_v63, -inf }
 0x1d9   :  { %v2694_v36 = vrot.slane %v2693_v4, 4  ;;  %5248 = vpow2.f32 %v1922_v3  ;;  %v829_v45 = vmax.f32 %v827_v31, %v828_v2  ;;  %v840_v54 = vsel %vm328_vm0, %v8500_v38, -inf }
 0x1da   :  { %5250 = vpow2.f32 %v1924_v9  ;;  %v822_v44 = vmax.f32 %v820_v10, %v821_v41  ;;  %v841_v12 = vsel %vm328_vm0, %v8509_v13, -inf  ;;  %v843_v32 = vsel %vm328_vm0, %v8518_v51, -inf }
 0x1db   :  { %v8522_v59 = vpop.eup %5234  ;;  %v2695_v42 = vadd.f32 %v2694_v36, %v2693_v4  ;;  %5252 = vpow2.f32 %v1926_v27  ;;  %v831_v43 = vmax.f32 %v829_v45, %v830_v49  ;;  %v842_v8 = vmax.f32 %v840_v54, %v841_v12 }
 0x1dc   :  { %v8526_v23 = vpop.eup %5236  ;;  %v2700_v60 = vsel %vm328_vm0, %v8522_v59, 0.0  ;;  %5254 = vpow2.f32 %v1928_v58  ;;  %v823_v34 = vrot.slane %v822_v44, 1  ;;  %v8553_v7 = vsel %vm328_vm0, %v8533_v35, -inf }
 0x1dd   :  { %v8535_v33 = vpop.eup %5238  ;;  %v2696_v19 = vrot.slane %v2695_v42, 2  ;;  %v2701_v22 = vsel %vm328_vm0, %v8526_v23, 0.0  ;;  %v8545_v53 = vmax.f32 %v831_v43, %v832_v62  ;;  %v8547_v26 = vmax.f32 %v842_v8, %v843_v32 }
 0x1de   :  { %v8541_v18 = vpop.eup %5240  ;;  %v2702_v0 = vadd.f32 %v2701_v22, %v2700_v60  ;;  %v2703_v56 = vsel %vm328_vm0, %v8535_v33, 0.0  ;;  %v824_v14 = vmax.f32 %v822_v44, %v823_v34 }
 0x1df   :  { %v5243_v57 = vpop.eup %5242  ;;  %v2697_v40 = vadd.f32 %v2696_v19, %v2695_v42  ;;  %v2705_v30 = vsel %vm328_vm0, %v8541_v18, 0.0 }
 0x1e0   :  { %v8555_v28 = vpop.eup %5244  ;;  %v3414_v46 = vmul.f32 %v5243_v57, %v8348_v29  ;;  %v3415_v17 = vmul.f32 %v5243_v57, %v8363_v15  ;;  %v3416_v3 = vmul.f32 %v5243_v57, %v8368_v11  ;;  %v3417_v4 = vmul.f32 %v5243_v57, %v8370_v5 }
 0x1e1   :  { %v3418_v9 = vmul.f32 %v5243_v57, %v8377_v16  ;;  %v2698_v27 = vrot.slane %v2697_v40, 1  ;;  %v2704_v10 = vadd.f32 %v2703_v56, %v2702_v0  ;;  %v2707_v58 = vsel %vm336_vm1, %v8555_v28, 0.0 }
 0x1e2   :  { %v8564_v31 = vpop.eup %5246  ;;  %v4698_v2 = vadd.f32 -192.0, %v3414_v46  ;;  %v4699_v36 = vadd.f32 -192.0, %v3415_v17  ;;  %v4700_v41 = vadd.f32 -192.0, %v3416_v3  ;;  %v4701_v49 = vadd.f32 -192.0, %v3417_v4 }
 0x1e3   :  { %v8566_v29 = vpop.eup %5248  ;;  %v4702_v15 = vadd.f32 -192.0, %v3418_v9  ;;  %v2699_v45 = vadd.f32 %v2698_v27, %v2697_v40  ;;  %v2706_v11 = vadd.f32 %v2705_v30, %v2704_v10  ;;  %v2715_v5 = vsel %vm328_vm0, %v8564_v31, 0.0 }
 0x1e4   :  { %v8570_v16 = vpop.eup %5250  ;;  %v4054_v62 = vmax.f32 %v4698_v2, 0.0  ;;  %v4055_v54 = vmax.f32 %v4699_v36, 0.0  ;;  %v4056_v42 = vmax.f32 %v4700_v41, 0.0  ;;  %v4057_v44 = vmax.f32 %v4701_v49, 0.0  ;;  %v8626_v41 = vld [vmem:[%s11637_s0 + $0x580] sm:$0xff]  ;;  %v8631_v49 = vld [vmem:[%s11637_s0 + $0x588] sm:$0xff] }
 0x1e5   :  { %v8572_v12 = vpop.eup %5252  ;;  %v4058_v60 = vmax.f32 %v4702_v15, 0.0  ;;  %5256 = vrcp.f32 %v2699_v45  ;;  %v2708_v43 = vadd.f32 %v2707_v58, %v2706_v11  ;;  %v2716_v8 = vsel %vm328_vm0, %v8566_v29, 0.0 }
 0x1e6   :  { %v8576_v19 = vpop.eup %5254  ;;  %4374 = vst.msk [vmem:[%s11638_s1 + $0x460] sm:$0xff] %vm328_vm0, %v4054_v62  ;;  %4375 = vst.msk [vmem:[%s11638_s1 + $0x468] sm:$0xff] %vm328_vm0, %v4055_v54  ;;  %v2717_v22 = vadd.f32 %v2716_v8, %v2715_v5  ;;  %v2718_v34 = vsel %vm328_vm0, %v8570_v16, 0.0  ;;  %v2720_v32 = vsel %vm328_vm0, %v8572_v12, 0.0  ;;  %v1450_v0 = vsub.f32 %v8314_v37, %v824_v14  ;;  %v8612_v37 = vld [vmem:[%s11637_s0 + $0x570] sm:$0x7] }
 0x1e7   :  { %4376 = vst.msk [vmem:[%s11638_s1 + $0x470] sm:$0xff] %vm328_vm0, %v4056_v42  ;;  %4377 = vst.msk [vmem:[%s11638_s1 + $0x478] sm:$0xff] %vm328_vm0, %v4057_v44  ;;  %v2709_v56 = vrot.slane %v2708_v43, 4  ;;  %v2722_v57 = vsel %vm336_vm1, %v8576_v19, 0.0  ;;  %v1451_v40 = vsub.f32 %v8319_v20, %v824_v14  ;;  %v1452_v30 = vsub.f32 %v8326_v25, %v824_v14  ;;  %v8618_v20 = vld [vmem:[%s11637_s0 + $0x578] sm:$0xff] }
 0x1e8   :  { %4378 = vst.msk [vmem:[%s11638_s1 + $0x480] sm:$0x7] %vm336_vm1, %v4058_v60  ;;  %v2719_v46 = vadd.f32 %v2718_v34, %v2717_v22  ;;  %v1453_v17 = vsub.f32 %v8337_v47, %v824_v14  ;;  %v1454_v3 = vsub.f32 %v8342_v52, %v824_v14  ;;  %v1930_v4 = vmul.f32 1.442695, %v1450_v0 }
 0x1e9   :  { %v2710_v9 = vadd.f32 %v2709_v56, %v2708_v43  ;;  %v1932_v27 = vmul.f32 1.442695, %v1451_v40  ;;  %v1934_v10 = vmul.f32 1.442695, %v1452_v30  ;;  %v834_v58 = vrot.slane %v8545_v53, 4 }
 0x1ea   :  { %v2721_v25 = vadd.f32 %v2720_v32, %v2719_v46  ;;  %5258 = vpow2.f32 %v1930_v4  ;;  %v1936_v47 = vmul.f32 1.442695, %v1453_v17  ;;  %v1938_v52 = vmul.f32 1.442695, %v1454_v3 }
 0x1eb   :  { %v2711_v14 = vrot.slane %v2710_v9, 2  ;;  %5260 = vpow2.f32 %v1932_v27  ;;  %v835_v2 = vmax.f32 %v8545_v53, %v834_v58  ;;  %v846_v36 = vmax.f32 %v8547_v26, %v8553_v7 }
 0x1ec   :  { %v2723_v15 = vadd.f32 %v2722_v57, %v2721_v25  ;;  %5262 = vpow2.f32 %v1934_v10  ;;  %v847_v45 = vsel %vm336_vm1, %v8612_v37, -inf  ;;  %v8637_v53 = vsel %vm328_vm0, %v8618_v20, -inf }
 0x1ed   :  { %v2712_v26 = vadd.f32 %v2711_v14, %v2710_v9  ;;  %5264 = vpow2.f32 %v1936_v47  ;;  %v836_v7 = vrot.slane %v835_v2, 2  ;;  %v848_v11 = vmax.f32 %v846_v36, %v847_v45 }
 0x1ee   :  { %v2724_v5 = vrot.slane %v2723_v15, 4  ;;  %5266 = vpow2.f32 %v1938_v52  ;;  %v8641_v62 = vsel %vm328_vm0, %v8626_v41, -inf  ;;  %v8645_v54 = vsel %vm328_vm0, %v8631_v49, -inf }
 0x1ef   :  { %v5257_v42 = vpop.eup %5256  ;;  %v2713_v44 = vrot.slane %v2712_v26, 1  ;;  %v837_v60 = vmax.f32 %v835_v2, %v836_v7  ;;  %v849_v43 = vrot.slane %v848_v11, 4  ;;  %v857_v8 = vmax.f32 %v8637_v53, %v8641_v62 }
 0x1f0   :  { %v3419_v22 = vmul.f32 %v5257_v42, %v8432_v50  ;;  %v3420_v34 = vmul.f32 %v5257_v42, %v8453_v1  ;;  %v3421_v32 = vmul.f32 %v5257_v42, %v8461_v39  ;;  %v3422_v0 = vmul.f32 %v5257_v42, %v8465_v6 }
 0x1f1   :  { %v3423_v56 = vmul.f32 %v5257_v42, %v8471_v61  ;;  %v2714_v57 = vadd.f32 %v2713_v44, %v2712_v26  ;;  %v2725_v40 = vadd.f32 %v2724_v5, %v2723_v15  ;;  %v838_v30 = vrot.slane %v837_v60, 1 }
 0x1f2   :  { %v4703_v46 = vadd.f32 -192.0, %v3419_v22  ;;  %v4704_v17 = vadd.f32 -192.0, %v3420_v34  ;;  %v4705_v3 = vadd.f32 -192.0, %v3421_v32  ;;  %v4706_v4 = vadd.f32 -192.0, %v3422_v0 }
 0x1f3   :  { %v4707_v9 = vadd.f32 -192.0, %v3423_v56  ;;  %5268 = vrcp.f32 %v2714_v57  ;;  %v2726_v27 = vrot.slane %v2725_v40, 2  ;;  %v839_v10 = vmax.f32 %v837_v60, %v838_v30  ;;  %v8700_v60 = vld [vmem:[%s11637_s0 + $0x590] sm:$0xff] }
 0x1f4   :  { %v8654_v50 = vpop.eup %5258  ;;  %v4059_v1 = vmax.f32 %v4703_v46, 0.0  ;;  %v4060_v58 = vmax.f32 %v4704_v17, 0.0  ;;  %v4061_v39 = vmax.f32 %v4705_v3, 0.0  ;;  %v4062_v25 = vmax.f32 %v4706_v4, 0.0 }
 0x1f5   :  { %v8656_v6 = vpop.eup %5260  ;;  %v4063_v61 = vmax.f32 %v4707_v9, 0.0  ;;  %v2727_v47 = vadd.f32 %v2726_v27, %v2725_v40  ;;  %v2730_v52 = vsel %vm328_vm0, %v8654_v50, 0.0  ;;  %v1455_v14 = vsub.f32 %v8408_v21, %v839_v10  ;;  %v8717_v40 = vld [vmem:[%s11637_s0 + $0x5a8] sm:$0xff] }
 0x1f6   :  { %v8661_v2 = vpop.eup %5262  ;;  %4379 = vst.msk [vmem:[%s11638_s1 + $0x488] sm:$0xff] %vm328_vm0, %v4059_v1  ;;  %4380 = vst.msk [vmem:[%s11638_s1 + $0x490] sm:$0xff] %vm328_vm0, %v4060_v58  ;;  %v2731_v21 = vsel %vm328_vm0, %v8656_v6, 0.0  ;;  %v1456_v36 = vsub.f32 %v8413_v48, %v839_v10  ;;  %v1457_v15 = vsub.f32 %v8483_v24, %v839_v10  ;;  %v1458_v45 = vsub.f32 %v8488_v55, %v839_v10 }
 0x1f7   :  { %4381 = vst.msk [vmem:[%s11638_s1 + $0x498] sm:$0xff] %vm328_vm0, %v4061_v39  ;;  %4382 = vst.msk [vmem:[%s11638_s1 + $0x4a0] sm:$0xff] %vm328_vm0, %v4062_v25  ;;  %v8684_v53 = vpop.eup %5264  ;;  %v2728_v26 = vrot.slane %v2727_v47, 1  ;;  %v2732_v7 = vadd.f32 %v2731_v21, %v2730_v52  ;;  %v2733_v5 = vsel %vm328_vm0, %v8661_v2, 0.0  ;;  %v1459_v62 = vsub.f32 %v8494_v63, %v839_v10  ;;  %v8707_v63 = vld [vmem:[%s11637_s0 + $0x598] sm:$0x7] }
 0x1f8   :  { %4383 = vst.msk [vmem:[%s11638_s1 + $0x4a8] sm:$0x7] %vm336_vm1, %v4063_v61  ;;  %v8693_v42 = vpop.eup %5266  ;;  %v2735_v48 = vsel %vm328_vm0, %v8684_v53, 0.0  ;;  %v1940_v24 = vmul.f32 1.442695, %v1455_v14  ;;  %v850_v44 = vmax.f32 %v848_v11, %v849_v43  ;;  %v8712_v11 = vld [vmem:[%s11637_s0 + $0x5a0] sm:$0xff]  ;;  %v859_v46 = vmax.f32 %v857_v8, %v8645_v54 }
 0x1f9   :  { %v1942_v55 = vmul.f32 1.442695, %v1456_v36  ;;  %v2729_v22 = vadd.f32 %v2728_v26, %v2727_v47  ;;  %v2734_v34 = vadd.f32 %v2733_v5, %v2732_v7  ;;  %v2737_v32 = vsel %vm336_vm1, %v8693_v42, 0.0 }
 0x1fa   :  { %v1944_v0 = vmul.f32 1.442695, %v1457_v15  ;;  %5270 = vpow2.f32 %v1940_v24  ;;  %v1946_v43 = vmul.f32 1.442695, %v1458_v45  ;;  %v1948_v56 = vmul.f32 1.442695, %v1459_v62 }
 0x1fb   :  { %v851_v57 = vrot.slane %v850_v44, 2  ;;  %5272 = vrcp.f32 %v2729_v22  ;;  %v2736_v30 = vadd.f32 %v2735_v48, %v2734_v34  ;;  %v860_v17 = vsel %vm328_vm0, %v8700_v60, -inf }
 0x1fc   :  { %5274 = vpow2.f32 %v1942_v55  ;;  %v862_v4 = vsel %vm336_vm1, %v8707_v63, -inf  ;;  %v8726_v9 = vsel %vm328_vm0, %v8712_v11, -inf  ;;  %v861_v1 = vmax.f32 %v859_v46, %v860_v17 }
 0x1fd   :  { %v852_v3 = vmax.f32 %v850_v44, %v851_v57  ;;  %v5269_v27 = vpop.eup %5268  ;;  %v2738_v10 = vadd.f32 %v2737_v32, %v2736_v30  ;;  %5276 = vpow2.f32 %v1944_v0  ;;  %v8730_v58 = vsel %vm328_vm0, %v8717_v40, -inf }
 0x1fe   :  { %v3424_v54 = vmul.f32 %v5269_v27, %v8522_v59  ;;  %v3425_v8 = vmul.f32 %v5269_v27, %v8526_v23  ;;  %v3426_v39 = vmul.f32 %v5269_v27, %v8535_v33  ;;  %v3427_v25 = vmul.f32 %v5269_v27, %v8541_v18 }
 0x1ff   :  { %v3428_v61 = vmul.f32 %v5269_v27, %v8555_v28  ;;  %v2739_v47 = vrot.slane %v2738_v10, 4  ;;  %5278 = vpow2.f32 %v1946_v43  ;;  %v853_v52 = vrot.slane %v852_v3, 1 }
 0x200   :  { %v4708_v14 = vadd.f32 -192.0, %v3424_v54  ;;  %v4709_v21 = vadd.f32 -192.0, %v3425_v8  ;;  %v4710_v36 = vadd.f32 -192.0, %v3426_v39  ;;  %v4711_v15 = vadd.f32 -192.0, %v3427_v25 }
 0x201   :  { %v4712_v45 = vadd.f32 -192.0, %v3428_v61  ;;  %v2740_v26 = vadd.f32 %v2739_v47, %v2738_v10  ;;  %5280 = vpow2.f32 %v1948_v56  ;;  %v8737_v7 = vmax.f32 %v852_v3, %v853_v52 }
 0x202   :  { %v4064_v59 = vmax.f32 %v4708_v14, 0.0  ;;  %v4065_v23 = vmax.f32 %v4709_v21, 0.0  ;;  %v4066_v5 = vmax.f32 %v4710_v36, 0.0  ;;  %v4067_v33 = vmax.f32 %v4711_v15, 0.0  ;;  %v8795_v21 = vld [vmem:[%s11637_s0 + $0x5b0] sm:$0xff]  ;;  %v8800_v36 = vld [vmem:[%s11637_s0 + $0x5b8] sm:$0xff] }
 0x203   :  { %v4068_v62 = vmax.f32 %v4712_v45, 0.0  ;;  %v2741_v18 = vrot.slane %v2740_v26, 2  ;;  %v1460_v28 = vsub.f32 %v8500_v38, %v8737_v7  ;;  %v1461_v48 = vsub.f32 %v8509_v13, %v8737_v7  ;;  %v8805_v15 = vld [vmem:[%s11637_s0 + $0x5c0] sm:$0x7] }
 0x204   :  { %v8743_v24 = vpop.eup %5270  ;;  %4384 = vst.msk [vmem:[%s11638_s1 + $0x4b0] sm:$0xff] %vm328_vm0, %v4064_v59  ;;  %4385 = vst.msk [vmem:[%s11638_s1 + $0x4b8] sm:$0xff] %vm328_vm0, %v4065_v23  ;;  %v1462_v38 = vsub.f32 %v8518_v51, %v8737_v7  ;;  %v1463_v13 = vsub.f32 %v8533_v35, %v8737_v7  ;;  %v1464_v55 = vsub.f32 %v8612_v37, %v8737_v7 }
 0x205   :  { %4386 = vst.msk [vmem:[%s11638_s1 + $0x4c0] sm:$0xff] %vm328_vm0, %v4066_v5  ;;  %4387 = vst.msk [vmem:[%s11638_s1 + $0x4c8] sm:$0xff] %vm328_vm0, %v4067_v33  ;;  %v863_v44 = vmax.f32 %v861_v1, %v862_v4  ;;  %v5273_v22 = vpop.eup %5272  ;;  %v2742_v34 = vadd.f32 %v2741_v18, %v2740_v26  ;;  %v2745_v32 = vsel %vm328_vm0, %v8743_v24, 0.0  ;;  %v1950_v0 = vmul.f32 1.442695, %v1460_v28  ;;  %v8839_v18 = vld [vmem:[%s11637_s0 + $0x5d0] sm:$0xff] }
 0x206   :  { %4388 = vst.msk [vmem:[%s11638_s1 + $0x4d0] sm:$0x7] %vm336_vm1, %v4068_v62  ;;  %v1952_v43 = vmul.f32 1.442695, %v1461_v48  ;;  %v8773_v51 = vpop.eup %5274  ;;  %v3429_v35 = vmul.f32 %v5273_v22, %v8564_v31  ;;  %v3430_v56 = vmul.f32 %v5273_v22, %v8566_v29  ;;  %v3431_v37 = vmul.f32 %v5273_v22, %v8570_v16  ;;  %v8834_v62 = vld [vmem:[%s11637_s0 + $0x5c8] sm:$0xff]  ;;  %v8844_v28 = vld [vmem:[%s11637_s0 + $0x5d8] sm:$0xff] }
 0x207   :  { %v3432_v57 = vmul.f32 %v5273_v22, %v8572_v12  ;;  %v8779_v30 = vpop.eup %5276  ;;  %v3433_v46 = vmul.f32 %v5273_v22, %v8576_v19  ;;  %v2743_v17 = vrot.slane %v2742_v34, 1  ;;  %v2746_v3 = vsel %vm328_vm0, %v8773_v51, 0.0  ;;  %v8855_v22 = vld [vmem:[%s11637_s0 + $0x5e0] sm:$0xff] }
 0x208   :  { %5282 = vpow2.f32 %v1950_v0  ;;  %v4713_v4 = vadd.f32 -192.0, %v3429_v35  ;;  %v4714_v27 = vadd.f32 -192.0, %v3430_v56  ;;  %v4715_v10 = vadd.f32 -192.0, %v3431_v37  ;;  %v8876_v35 = vld [vmem:[%s11637_s0 + $0x5f8] sm:$0xff] }
 0x209   :  { %v4716_v1 = vadd.f32 -192.0, %v3432_v57  ;;  %v8784_v31 = vpop.eup %5278  ;;  %v4717_v29 = vadd.f32 -192.0, %v3433_v46  ;;  %v2744_v54 = vadd.f32 %v2743_v17, %v2742_v34  ;;  %v2747_v16 = vadd.f32 %v2746_v3, %v2745_v32  ;;  %v8860_v34 = vld [vmem:[%s11637_s0 + $0x5e8] sm:$0x7]  ;;  %v8865_v32 = vld [vmem:[%s11637_s0 + $0x5f0] sm:$0xff]  ;;  %v8883_v3 = vld [vmem:[%s11637_s0 + $0x600] sm:$0xff] }
 0x20a   :  { %v2748_v12 = vsel %vm328_vm0, %v8779_v30, 0.0  ;;  %v4069_v8 = vmax.f32 %v4713_v4, 0.0  ;;  %v4070_v39 = vmax.f32 %v4714_v27, 0.0  ;;  %v4071_v19 = vmax.f32 %v4715_v10, 0.0  ;;  %v8888_v4 = vld [vmem:[%s11637_s0 + $0x608] sm:$0xff] }
 0x20b   :  { %v4072_v25 = vmax.f32 %v4716_v1, 0.0  ;;  %v8788_v61 = vpop.eup %5280  ;;  %v4073_v47 = vmax.f32 %v4717_v29, 0.0  ;;  %5284 = vrcp.f32 %v2744_v54  ;;  %v2749_v52 = vadd.f32 %v2748_v12, %v2747_v16  ;;  %v8893_v27 = vld [vmem:[%s11637_s0 + $0x610] sm:$0x7] }
 0x20c   :  { %v2750_v14 = vsel %vm328_vm0, %v8784_v31, 0.0  ;;  %4389 = vst.msk [vmem:[%s11638_s1 + $0x4d8] sm:$0xff] %vm328_vm0, %v4069_v8  ;;  %4390 = vst.msk [vmem:[%s11638_s1 + $0x4e0] sm:$0xff] %vm328_vm0, %v4070_v39  ;;  %v2752_v45 = vsel %vm336_vm1, %v8788_v61, 0.0  ;;  %5286 = vpow2.f32 %v1952_v43  ;;  %v1954_v26 = vmul.f32 1.442695, %v1462_v38 }
 0x20d   :  { %4391 = vst.msk [vmem:[%s11638_s1 + $0x4e8] sm:$0xff] %vm328_vm0, %v4071_v19  ;;  %4392 = vst.msk [vmem:[%s11638_s1 + $0x4f0] sm:$0xff] %vm328_vm0, %v4072_v25  ;;  %v1956_v7 = vmul.f32 1.442695, %v1463_v13  ;;  %v2751_v59 = vadd.f32 %v2750_v14, %v2749_v52  ;;  %v1958_v23 = vmul.f32 1.442695, %v1464_v55  ;;  %v872_v33 = vmax.f32 %v8726_v9, %v8730_v58 }
 0x20e   :  { %4393 = vst.msk [vmem:[%s11638_s1 + $0x4f8] sm:$0x7] %vm336_vm1, %v4073_v47  ;;  %v864_v5 = vrot.slane %v863_v44, 4  ;;  %5288 = vpow2.f32 %v1954_v26  ;;  %v873_v48 = vsel %vm328_vm0, %v8795_v21, -inf  ;;  %v875_v9 = vsel %vm328_vm0, %v8800_v36, -inf }
 0x20f   :  { %v877_v58 = vsel %vm336_vm1, %v8805_v15, -inf  ;;  %v2753_v38 = vadd.f32 %v2752_v45, %v2751_v59  ;;  %5290 = vpow2.f32 %v1956_v7  ;;  %v874_v55 = vmax.f32 %v872_v33, %v873_v48 }
 0x210   :  { %v865_v13 = vmax.f32 %v863_v44, %v864_v5  ;;  %5292 = vpow2.f32 %v1958_v23  ;;  %v885_v44 = vsel %vm328_vm0, %v8834_v62, -inf  ;;  %v886_v0 = vsel %vm328_vm0, %v8839_v18, -inf }
 0x211   :  { %v888_v43 = vsel %vm328_vm0, %v8844_v28, -inf  ;;  %v2754_v37 = vrot.slane %v2753_v38, 4  ;;  %v876_v46 = vmax.f32 %v874_v55, %v875_v9  ;;  %v887_v17 = vmax.f32 %v885_v44, %v886_v0 }
 0x212   :  { %v8878_v56 = vpop.eup %5282  ;;  %v866_v57 = vrot.slane %v865_v13, 2  ;;  %v8899_v1 = vsel %vm328_vm0, %v8855_v22, -inf  ;;  %v8903_v29 = vsel %vm336_vm1, %v8860_v34, -inf  ;;  %v8907_v54 = vsel %vm328_vm0, %v8865_v32, -inf }
 0x213   :  { %v2760_v10 = vsel %vm328_vm0, %v8878_v56, 0.0  ;;  %v2755_v16 = vadd.f32 %v2754_v37, %v2753_v38  ;;  %v878_v8 = vmax.f32 %v876_v46, %v877_v58  ;;  %v889_v39 = vmax.f32 %v887_v17, %v888_v43 }
 0x214   :  { %v867_v12 = vmax.f32 %v865_v13, %v866_v57  ;;  %v8911_v19 = vsel %vm328_vm0, %v8876_v35, -inf  ;;  %v8915_v25 = vsel %vm328_vm0, %v8883_v3, -inf  ;;  %v8919_v47 = vsel %vm328_vm0, %v8888_v4, -inf }
 0x215   :  { %v8923_v52 = vsel %vm336_vm1, %v8893_v27, -inf  ;;  %v5285_v14 = vpop.eup %5284  ;;  %v2756_v45 = vrot.slane %v2755_v16, 2  ;;  %v879_v7 = vrot.slane %v878_v8, 4  ;;  %v891_v59 = vmax.f32 %v889_v39, %v8899_v1 }
 0x216   :  { %v868_v26 = vrot.slane %v867_v12, 1  ;;  %v8926_v23 = vpop.eup %5286  ;;  %v3434_v5 = vmul.f32 %v5285_v14, %v8654_v50  ;;  %v3435_v33 = vmul.f32 %v5285_v14, %v8656_v6  ;;  %v3436_v48 = vmul.f32 %v5285_v14, %v8661_v2 }
 0x217   :  { %v3437_v9 = vmul.f32 %v5285_v14, %v8684_v53  ;;  %v3438_v58 = vmul.f32 %v5285_v14, %v8693_v42  ;;  %v2757_v38 = vadd.f32 %v2756_v45, %v2755_v16  ;;  %v2761_v13 = vsel %vm328_vm0, %v8926_v23, 0.0 }
 0x218   :  { %v869_v55 = vmax.f32 %v867_v12, %v868_v26  ;;  %v8935_v44 = vpop.eup %5288  ;;  %v4718_v0 = vadd.f32 -192.0, %v3434_v5  ;;  %v4719_v43 = vadd.f32 -192.0, %v3435_v33  ;;  %v4720_v37 = vadd.f32 -192.0, %v3436_v48 }
 0x219   :  { %v4721_v57 = vadd.f32 -192.0, %v3437_v9  ;;  %v8937_v50 = vpop.eup %5290  ;;  %v4722_v6 = vadd.f32 -192.0, %v3438_v58  ;;  %v2758_v46 = vrot.slane %v2757_v38, 1  ;;  %v2762_v2 = vadd.f32 %v2761_v13, %v2760_v10  ;;  %v8975_v13 = vld [vmem:[%s11637_s0 + $0x618] sm:$0xff] }
 0x21a   :  { %v2763_v53 = vsel %vm328_vm0, %v8935_v44, 0.0  ;;  %v8941_v42 = vpop.eup %5292  ;;  %v4074_v17 = vmax.f32 %v4718_v0, 0.0  ;;  %v4075_v1 = vmax.f32 %v4719_v43, 0.0  ;;  %v4076_v16 = vmax.f32 %v4720_v37, 0.0 }
 0x21b   :  { %v4077_v12 = vmax.f32 %v4721_v57, 0.0  ;;  %v4078_v39 = vmax.f32 %v4722_v6, 0.0  ;;  %v2759_v14 = vadd.f32 %v2758_v46, %v2757_v38  ;;  %v2764_v45 = vadd.f32 %v2763_v53, %v2762_v2  ;;  %v8988_v46 = vld [vmem:[%s11637_s0 + $0x628] sm:$0xff] }
 0x21c   :  { %v2765_v26 = vsel %vm328_vm0, %v8937_v50, 0.0  ;;  %4394 = vst.msk [vmem:[%s11638_s1 + $0x500] sm:$0xff] %vm328_vm0, %v4074_v17  ;;  %4395 = vst.msk [vmem:[%s11638_s1 + $0x508] sm:$0xff] %vm328_vm0, %v4075_v1  ;;  %v2767_v10 = vsel %vm336_vm1, %v8941_v42, 0.0  ;;  %v1465_v5 = vsub.f32 %v8618_v20, %v869_v55  ;;  %v1466_v33 = vsub.f32 %v8626_v41, %v869_v55  ;;  %v8980_v20 = vld [vmem:[%s11637_s0 + $0x620] sm:$0xff] }
 0x21d   :  { %4396 = vst.msk [vmem:[%s11638_s1 + $0x510] sm:$0xff] %vm328_vm0, %v4076_v16  ;;  %4397 = vst.msk [vmem:[%s11638_s1 + $0x518] sm:$0xff] %vm328_vm0, %v4077_v12  ;;  %v1467_v48 = vsub.f32 %v8631_v49, %v869_v55  ;;  %5294 = vrcp.f32 %v2759_v14  ;;  %v2766_v9 = vadd.f32 %v2765_v26, %v2764_v45  ;;  %v1468_v58 = vsub.f32 %v8700_v60, %v869_v55  ;;  %v9018_v26 = vld [vmem:[%s11637_s0 + $0x648] sm:$0xff] }
 0x21e   :  { %4398 = vst.msk [vmem:[%s11638_s1 + $0x520] sm:$0x7] %vm336_vm1, %v4078_v39  ;;  %v1469_v38 = vsub.f32 %v8707_v63, %v869_v55  ;;  %v1960_v41 = vmul.f32 1.442695, %v1465_v5  ;;  %v1962_v49 = vmul.f32 1.442695, %v1466_v33  ;;  %v880_v43 = vmax.f32 %v878_v8, %v879_v7 }
 0x21f   :  { %v1964_v0 = vmul.f32 1.442695, %v1467_v48  ;;  %v2768_v37 = vadd.f32 %v2767_v10, %v2766_v9  ;;  %v1966_v57 = vmul.f32 1.442695, %v1468_v58  ;;  %v893_v60 = vmax.f32 %v891_v59, %v8903_v29  ;;  %v9023_v10 = vld [vmem:[%s11637_s0 + $0x650] sm:$0xff] }
 0x220   :  { %v1968_v6 = vmul.f32 1.442695, %v1469_v38  ;;  %5296 = vpow2.f32 %v1960_v41  ;;  %v881_v63 = vrot.slane %v880_v43, 2  ;;  %v902_v55 = vmax.f32 %v8907_v54, %v8911_v19  ;;  %v8998_v54 = vld [vmem:[%s11637_s0 + $0x630] sm:$0xff]  ;;  %v9003_v19 = vld [vmem:[%s11637_s0 + $0x638] sm:$0x7] }
 0x221   :  { %v915_v2 = vsel %vm328_vm0, %v8975_v13, -inf  ;;  %v2769_v53 = vrot.slane %v2768_v37, 4  ;;  %5298 = vpow2.f32 %v1962_v49  ;;  %v894_v8 = vrot.slane %v893_v60, 4 }
 0x222   :  { %v916_v7 = vsel %vm328_vm0, %v8980_v20, -inf  ;;  %5300 = vpow2.f32 %v1964_v0  ;;  %v882_v29 = vmax.f32 %v880_v43, %v881_v63  ;;  %v904_v59 = vmax.f32 %v902_v55, %v8915_v25  ;;  %v9010_v25 = vld [vmem:[%s11637_s0 + $0x640] sm:$0xff] }
 0x223   :  { %v917_v17 = vmax.f32 %v915_v2, %v916_v7  ;;  %v2770_v1 = vadd.f32 %v2769_v53, %v2768_v37  ;;  %5302 = vpow2.f32 %v1966_v57  ;;  %v895_v16 = vmax.f32 %v893_v60, %v894_v8 }
 0x224   :  { %v918_v12 = vsel %vm328_vm0, %v8988_v46, -inf  ;;  %5304 = vpow2.f32 %v1968_v6  ;;  %v883_v39 = vrot.slane %v882_v29, 1  ;;  %v906_v14 = vmax.f32 %v904_v59, %v8919_v47 }
 0x225   :  { %v9013_v45 = vmax.f32 %v917_v17, %v918_v12  ;;  %v2771_v5 = vrot.slane %v2770_v1, 2  ;;  %v896_v33 = vrot.slane %v895_v16, 2  ;;  %v920_v48 = vsel %vm328_vm0, %v8998_v54, -inf }
 0x226   :  { %v922_v47 = vsel %vm336_vm1, %v9003_v19, -inf  ;;  %v884_v9 = vmax.f32 %v882_v29, %v883_v39  ;;  %v9030_v58 = vmax.f32 %v906_v14, %v8923_v52  ;;  %v9035_v41 = vsel %vm328_vm0, %v9010_v25, -inf }
 0x227   :  { %v921_v38 = vmax.f32 %v9013_v45, %v920_v48  ;;  %v5295_v49 = vpop.eup %5294  ;;  %v2772_v0 = vadd.f32 %v2771_v5, %v2770_v1  ;;  %v897_v43 = vmax.f32 %v895_v16, %v896_v33  ;;  %v9039_v37 = vsel %vm328_vm0, %v9018_v26, -inf }
 0x228   :  { %v9043_v57 = vsel %vm328_vm0, %v9023_v10, -inf  ;;  %v3439_v52 = vmul.f32 %v5295_v49, %v8743_v24  ;;  %v3440_v6 = vmul.f32 %v5295_v49, %v8773_v51  ;;  %v3441_v60 = vmul.f32 %v5295_v49, %v8779_v30 }
 0x229   :  { %v3442_v63 = vmul.f32 %v5295_v49, %v8784_v31  ;;  %v3443_v55 = vmul.f32 %v5295_v49, %v8788_v61  ;;  %v2773_v2 = vrot.slane %v2772_v0, 1  ;;  %v1470_v53 = vsub.f32 %v8712_v11, %v884_v9 }
 0x22a   :  { %v1471_v8 = vsub.f32 %v8717_v40, %v884_v9  ;;  %v9052_v7 = vpop.eup %5296  ;;  %v4723_v29 = vadd.f32 -192.0, %v3439_v52  ;;  %v4724_v59 = vadd.f32 -192.0, %v3440_v6  ;;  %v4725_v17 = vadd.f32 -192.0, %v3441_v60  ;;  %v9092_v6 = vld [vmem:[%s11637_s0 + $0x658] sm:$0xff] }
 0x22b   :  { %v4726_v1 = vadd.f32 -192.0, %v3442_v63  ;;  %v9054_v24 = vpop.eup %5298  ;;  %v4727_v51 = vadd.f32 -192.0, %v3443_v55  ;;  %v2774_v16 = vadd.f32 %v2773_v2, %v2772_v0  ;;  %v2775_v30 = vsel %vm328_vm0, %v9052_v7, 0.0 }
 0x22c   :  { %v1472_v31 = vsub.f32 %v8795_v21, %v884_v9  ;;  %v9059_v61 = vpop.eup %5300  ;;  %v4079_v11 = vmax.f32 %v4723_v29, 0.0  ;;  %v4080_v12 = vmax.f32 %v4724_v59, 0.0  ;;  %v4081_v40 = vmax.f32 %v4725_v17, 0.0 }
 0x22d   :  { %v4082_v39 = vmax.f32 %v4726_v1, 0.0  ;;  %v9061_v14 = vpop.eup %5302  ;;  %v4083_v45 = vmax.f32 %v4727_v51, 0.0  ;;  %5306 = vrcp.f32 %v2774_v16  ;;  %v2776_v5 = vsel %vm328_vm0, %v9054_v24, 0.0 }
 0x22e   :  { %v2778_v33 = vsel %vm328_vm0, %v9059_v61, 0.0  ;;  %v9067_v48 = vpop.eup %5304  ;;  %4399 = vst.msk [vmem:[%s11638_s1 + $0x528] sm:$0xff] %vm328_vm0, %v4079_v11  ;;  %4400 = vst.msk [vmem:[%s11638_s1 + $0x530] sm:$0xff] %vm328_vm0, %v4080_v12  ;;  %v2777_v21 = vadd.f32 %v2776_v5, %v2775_v30  ;;  %v2780_v49 = vsel %vm328_vm0, %v9061_v14, 0.0  ;;  %v1473_v0 = vsub.f32 %v8800_v36, %v884_v9 }
 0x22f   :  { %4401 = vst.msk [vmem:[%s11638_s1 + $0x538] sm:$0xff] %vm328_vm0, %v4081_v40  ;;  %4402 = vst.msk [vmem:[%s11638_s1 + $0x540] sm:$0xff] %vm328_vm0, %v4082_v39  ;;  %v1474_v52 = vsub.f32 %v8805_v15, %v884_v9  ;;  %v2782_v60 = vsel %vm336_vm1, %v9067_v48, 0.0  ;;  %v1970_v63 = vmul.f32 1.442695, %v1470_v53  ;;  %v898_v2 = vrot.slane %v897_v43, 1 }
 0x230   :  { %4403 = vst.msk [vmem:[%s11638_s1 + $0x548] sm:$0x7] %vm336_vm1, %v4083_v45  ;;  %v1972_v55 = vmul.f32 1.442695, %v1471_v8  ;;  %v2779_v29 = vadd.f32 %v2778_v33, %v2777_v21  ;;  %v1974_v36 = vmul.f32 1.442695, %v1472_v31  ;;  %v9101_v1 = vmax.f32 %v921_v38, %v922_v47 }
 0x231   :  { %v1976_v59 = vmul.f32 1.442695, %v1473_v0  ;;  %v1978_v15 = vmul.f32 1.442695, %v1474_v52  ;;  %5308 = vpow2.f32 %v1970_v63  ;;  %v899_v9 = vmax.f32 %v897_v43, %v898_v2 }
 0x232   :  { %v909_v17 = vrot.slane %v9030_v58, 4  ;;  %v2781_v51 = vadd.f32 %v2780_v49, %v2779_v29  ;;  %5310 = vpow2.f32 %v1972_v55  ;;  %v932_v16 = vmax.f32 %v9035_v41, %v9039_v37  ;;  %v9117_v41 = vld [vmem:[%s11637_s0 + $0x660] sm:$0x7] }
 0x233   :  { %v9107_v53 = vsel %vm328_vm0, %v9092_v6, -inf  ;;  %5312 = vpow2.f32 %v1974_v36  ;;  %v1475_v8 = vsub.f32 %v8834_v62, %v899_v9  ;;  %v1476_v30 = vsub.f32 %v8839_v18, %v899_v9 }
 0x234   :  { %v1477_v43 = vsub.f32 %v8844_v28, %v899_v9  ;;  %v2783_v31 = vadd.f32 %v2782_v60, %v2781_v51  ;;  %5314 = vpow2.f32 %v1976_v59  ;;  %v1478_v47 = vsub.f32 %v8855_v22, %v899_v9 }
 0x235   :  { %v1479_v38 = vsub.f32 %v8860_v34, %v899_v9  ;;  %5316 = vpow2.f32 %v1978_v15  ;;  %v1980_v37 = vmul.f32 1.442695, %v1475_v8  ;;  %v1982_v11 = vmul.f32 1.442695, %v1476_v30 }
 0x236   :  { %v1984_v12 = vmul.f32 1.442695, %v1477_v43  ;;  %v2784_v62 = vrot.slane %v2783_v31, 4  ;;  %v1986_v40 = vmul.f32 1.442695, %v1478_v47  ;;  %v910_v28 = vmax.f32 %v9030_v58, %v909_v17  ;;  %v9166_v47 = vld [vmem:[%s11637_s0 + $0x668] sm:$0xff] }
 0x237   :  { %v1988_v18 = vmul.f32 1.442695, %v1479_v38  ;;  %v5307_v39 = vpop.eup %5306  ;;  %5318 = vpow2.f32 %v1980_v37  ;;  %v924_v22 = vrot.slane %v9101_v1, 4  ;;  %v9122_v34 = vmax.f32 %v932_v16, %v9043_v57  ;;  %v9171_v38 = vld [vmem:[%s11637_s0 + $0x670] sm:$0xff] }
 0x238   :  { %v9126_v45 = vsel %vm336_vm1, %v9117_v41, -inf  ;;  %v3444_v5 = vmul.f32 %v5307_v39, %v8878_v56  ;;  %v3445_v33 = vmul.f32 %v5307_v39, %v8926_v23  ;;  %v3446_v21 = vmul.f32 %v5307_v39, %v8935_v44 }
 0x239   :  { %v3447_v49 = vmul.f32 %v5307_v39, %v8937_v50  ;;  %v3448_v58 = vmul.f32 %v5307_v39, %v8941_v42  ;;  %v2785_v0 = vadd.f32 %v2784_v62, %v2783_v31  ;;  %5320 = vpow2.f32 %v1982_v11 }
 0x23a   :  { %v911_v52 = vrot.slane %v910_v28, 2  ;;  %v4728_v60 = vadd.f32 -192.0, %v3444_v5  ;;  %v4729_v57 = vadd.f32 -192.0, %v3445_v33  ;;  %v4730_v63 = vadd.f32 -192.0, %v3446_v21 }
 0x23b   :  { %v4731_v55 = vadd.f32 -192.0, %v3447_v49  ;;  %v9133_v2 = vpop.eup %5308  ;;  %v4732_v29 = vadd.f32 -192.0, %v3448_v58  ;;  %v2786_v36 = vrot.slane %v2785_v0, 2  ;;  %5322 = vpow2.f32 %v1984_v12 }
 0x23c   :  { %v912_v56 = vmax.f32 %v910_v28, %v911_v52  ;;  %v9135_v23 = vpop.eup %5310  ;;  %v4084_v44 = vmax.f32 %v4728_v60, 0.0  ;;  %v4085_v59 = vmax.f32 %v4729_v57, 0.0  ;;  %v4086_v50 = vmax.f32 %v4730_v63, 0.0 }
 0x23d   :  { %v4087_v15 = vmax.f32 %v4731_v55, 0.0  ;;  %v9137_v42 = vpop.eup %5312  ;;  %v4088_v9 = vmax.f32 %v4732_v29, 0.0  ;;  %v2787_v17 = vadd.f32 %v2786_v36, %v2785_v0  ;;  %v2790_v51 = vsel %vm328_vm0, %v9133_v2, 0.0 }
 0x23e   :  { %v2791_v16 = vsel %vm328_vm0, %v9135_v23, 0.0  ;;  %v9143_v8 = vpop.eup %5314  ;;  %4404 = vst.msk [vmem:[%s11638_s1 + $0x550] sm:$0xff] %vm328_vm0, %v4084_v44  ;;  %4405 = vst.msk [vmem:[%s11638_s1 + $0x558] sm:$0xff] %vm328_vm0, %v4085_v59  ;;  %v2793_v43 = vsel %vm328_vm0, %v9137_v42, 0.0  ;;  %5324 = vpow2.f32 %v1986_v40  ;;  %v913_v31 = vrot.slane %v912_v56, 1 }
 0x23f   :  { %4406 = vst.msk [vmem:[%s11638_s1 + $0x560] sm:$0xff] %vm328_vm0, %v4086_v50  ;;  %4407 = vst.msk [vmem:[%s11638_s1 + $0x568] sm:$0xff] %vm328_vm0, %v4087_v15  ;;  %v2792_v30 = vadd.f32 %v2791_v16, %v2790_v51  ;;  %v9173_v37 = vpop.eup %5316  ;;  %v2788_v11 = vrot.slane %v2787_v17, 1  ;;  %v2795_v12 = vsel %vm328_vm0, %v9143_v8, 0.0  ;;  %5326 = vpow2.f32 %v1988_v18 }
 0x240   :  { %4408 = vst.msk [vmem:[%s11638_s1 + $0x570] sm:$0x7] %vm336_vm1, %v4088_v9  ;;  %v925_v62 = vmax.f32 %v9101_v1, %v924_v22  ;;  %v2797_v28 = vsel %vm336_vm1, %v9173_v37, 0.0  ;;  %v914_v39 = vmax.f32 %v912_v56, %v913_v31  ;;  %v936_v5 = vmax.f32 %v9122_v34, %v9107_v53  ;;  %v9223_v31 = vld [vmem:[%s11637_s0 + $0x688] sm:$0x7] }
 0x241   :  { %v2794_v40 = vadd.f32 %v2793_v43, %v2792_v30  ;;  %v9186_v33 = vpop.eup %5318  ;;  %v2789_v21 = vadd.f32 %v2788_v11, %v2787_v17  ;;  %v945_v58 = vsel %vm328_vm0, %v9166_v47, -inf  ;;  %v946_v18 = vsel %vm328_vm0, %v9171_v38, -inf  ;;  %v9218_v43 = vld [vmem:[%s11637_s0 + $0x680] sm:$0xff] }
 0x242   :  { %v926_v49 = vrot.slane %v925_v62, 2  ;;  %v2805_v1 = vsel %vm328_vm0, %v9186_v33, 0.0  ;;  %v1480_v22 = vsub.f32 %v8865_v32, %v914_v39  ;;  %v1481_v52 = vsub.f32 %v8876_v35, %v914_v39  ;;  %v9206_v32 = vld [vmem:[%s11637_s0 + $0x678] sm:$0xff] }
 0x243   :  { %v2796_v0 = vadd.f32 %v2795_v12, %v2794_v40  ;;  %v9196_v60 = vpop.eup %5320  ;;  %5328 = vrcp.f32 %v2789_v21  ;;  %v1482_v53 = vsub.f32 %v8883_v3, %v914_v39  ;;  %v1483_v34 = vsub.f32 %v8888_v4, %v914_v39 }
 0x244   :  { %v1484_v57 = vsub.f32 %v8893_v27, %v914_v39  ;;  %v2806_v55 = vsel %vm328_vm0, %v9196_v60, 0.0  ;;  %v1990_v29 = vmul.f32 1.442695, %v1480_v22  ;;  %v1992_v36 = vmul.f32 1.442695, %v1481_v52 }
 0x245   :  { %v2798_v63 = vadd.f32 %v2797_v28, %v2796_v0  ;;  %v9208_v35 = vpop.eup %5322  ;;  %v2807_v56 = vadd.f32 %v2806_v55, %v2805_v1  ;;  %v1994_v44 = vmul.f32 1.442695, %v1482_v53  ;;  %v1996_v3 = vmul.f32 1.442695, %v1483_v34  ;;  %v9236_v28 = vld [vmem:[%s11637_s0 + $0x690] sm:$0xff] }
 0x246   :  { %v1998_v59 = vmul.f32 1.442695, %v1484_v57  ;;  %v2808_v27 = vsel %vm328_vm0, %v9208_v35, 0.0  ;;  %5330 = vpow2.f32 %v1990_v29  ;;  %v927_v50 = vmax.f32 %v925_v62, %v926_v49 }
 0x247   :  { %v2799_v4 = vrot.slane %v2798_v63, 4  ;;  %v2809_v15 = vadd.f32 %v2808_v27, %v2807_v56  ;;  %5332 = vpow2.f32 %v1992_v36  ;;  %v938_v9 = vmax.f32 %v936_v5, %v9126_v45 }
 0x248   :  { %v947_v17 = vmax.f32 %v945_v58, %v946_v18  ;;  %v9213_v51 = vpop.eup %5324  ;;  %5334 = vpow2.f32 %v1994_v44  ;;  %v928_v30 = vrot.slane %v927_v50, 1  ;;  %v948_v11 = vsel %vm328_vm0, %v9206_v32, -inf }
 0x249   :  { %v2800_v16 = vadd.f32 %v2799_v4, %v2798_v63  ;;  %v9227_v45 = vpop.eup %5326  ;;  %v2810_v12 = vsel %vm328_vm0, %v9213_v51, 0.0  ;;  %5336 = vpow2.f32 %v1996_v3  ;;  %v939_v62 = vrot.slane %v938_v9, 4 }
 0x24a   :  { %v9231_v40 = vmax.f32 %v947_v17, %v948_v11  ;;  %v2811_v5 = vadd.f32 %v2810_v12, %v2809_v15  ;;  %v2812_v21 = vsel %vm336_vm1, %v9227_v45, 0.0  ;;  %5338 = vpow2.f32 %v1998_v59 }
 0x24b   :  { %v2801_v39 = vrot.slane %v2800_v16, 2  ;;  %v929_v49 = vmax.f32 %v927_v50, %v928_v30  ;;  %v9240_v58 = vmax.f32 %v938_v9, %v939_v62  ;;  %v9244_v18 = vsel %vm328_vm0, %v9218_v43, -inf }
 0x24c   :  { %v952_v0 = vsel %vm336_vm1, %v9223_v31, -inf  ;;  %v2813_v22 = vadd.f32 %v2812_v21, %v2811_v5  ;;  %v951_v52 = vmax.f32 %v9231_v40, %v9244_v18  ;;  %v9252_v53 = vsel %vm328_vm0, %v9236_v28, -inf }
 0x24d   :  { %v2802_v1 = vadd.f32 %v2801_v39, %v2800_v16  ;;  %v5329_v34 = vpop.eup %5328  ;;  %v1485_v57 = vsub.f32 %v8975_v13, %v929_v49  ;;  %v1486_v63 = vsub.f32 %v8980_v20, %v929_v49  ;;  %v1487_v55 = vsub.f32 %v8988_v46, %v929_v49 }
 0x24e   :  { %v1488_v29 = vsub.f32 %v8998_v54, %v929_v49  ;;  %v3449_v36 = vmul.f32 %v5329_v34, %v9052_v7  ;;  %v3450_v56 = vmul.f32 %v5329_v34, %v9054_v24  ;;  %v3451_v44 = vmul.f32 %v5329_v34, %v9059_v61 }
 0x24f   :  { %v3452_v3 = vmul.f32 %v5329_v34, %v9061_v14  ;;  %v3453_v59 = vmul.f32 %v5329_v34, %v9067_v48  ;;  %v2803_v4 = vrot.slane %v2802_v1, 1  ;;  %v2814_v27 = vrot.slane %v2813_v22, 4 }
 0x250   :  { %v1489_v13 = vsub.f32 %v9003_v19, %v929_v49  ;;  %v9264_v50 = vpop.eup %5330  ;;  %v4733_v20 = vadd.f32 -192.0, %v3449_v36  ;;  %v4734_v46 = vadd.f32 -192.0, %v3450_v56  ;;  %v4735_v15 = vadd.f32 -192.0, %v3451_v44 }
 0x251   :  { %v4736_v54 = vadd.f32 -192.0, %v3452_v3  ;;  %v9266_v9 = vpop.eup %5332  ;;  %v4737_v7 = vadd.f32 -192.0, %v3453_v59  ;;  %v2804_v24 = vadd.f32 %v2803_v4, %v2802_v1  ;;  %v2815_v17 = vadd.f32 %v2814_v27, %v2813_v22  ;;  %v9301_v1 = vld [vmem:[%s11637_s0 + $0x698] sm:$0xff] }
 0x252   :  { %v2820_v61 = vsel %vm328_vm0, %v9264_v50, 0.0  ;;  %v9270_v14 = vpop.eup %5334  ;;  %v4089_v48 = vmax.f32 %v4733_v20, 0.0  ;;  %v4090_v16 = vmax.f32 %v4734_v46, 0.0  ;;  %v4091_v30 = vmax.f32 %v4735_v15, 0.0  ;;  %v9318_v46 = vld [vmem:[%s11637_s0 + $0x6a8] sm:$0xff] }
 0x253   :  { %v4092_v19 = vmax.f32 %v4736_v54, 0.0  ;;  %v9272_v11 = vpop.eup %5336  ;;  %v4093_v12 = vmax.f32 %v4737_v7, 0.0  ;;  %5340 = vrcp.f32 %v2804_v24  ;;  %v2816_v62 = vrot.slane %v2815_v17, 2  ;;  %v9333_v54 = vld [vmem:[%s11637_s0 + $0x6b8] sm:$0xff]  ;;  %v9338_v7 = vld [vmem:[%s11637_s0 + $0x6c0] sm:$0xff] }
 0x254   :  { %v2821_v40 = vsel %vm328_vm0, %v9266_v9, 0.0  ;;  %v9276_v39 = vpop.eup %5338  ;;  %4409 = vst.msk [vmem:[%s11638_s1 + $0x578] sm:$0xff] %vm328_vm0, %v4089_v48  ;;  %4410 = vst.msk [vmem:[%s11638_s1 + $0x580] sm:$0xff] %vm328_vm0, %v4090_v16  ;;  %v2823_v21 = vsel %vm328_vm0, %v9270_v14, 0.0  ;;  %v2825_v49 = vsel %vm328_vm0, %v9272_v11, 0.0  ;;  %v941_v27 = vrot.slane %v9240_v58, 2 }
 0x255   :  { %4411 = vst.msk [vmem:[%s11638_s1 + $0x588] sm:$0xff] %vm328_vm0, %v4091_v30  ;;  %4412 = vst.msk [vmem:[%s11638_s1 + $0x590] sm:$0xff] %vm328_vm0, %v4092_v19  ;;  %v2822_v5 = vadd.f32 %v2821_v40, %v2820_v61  ;;  %v2000_v18 = vmul.f32 1.442695, %v1485_v57  ;;  %v2817_v22 = vadd.f32 %v2816_v62, %v2815_v17  ;;  %v2827_v34 = vsel %vm336_vm1, %v9276_v39, 0.0  ;;  %v9312_v57 = vld [vmem:[%s11637_s0 + $0x6a0] sm:$0xff] }
 0x256   :  { %4413 = vst.msk [vmem:[%s11638_s1 + $0x598] sm:$0x7] %vm336_vm1, %v4093_v12  ;;  %v2002_v36 = vmul.f32 1.442695, %v1486_v63  ;;  %v2004_v56 = vmul.f32 1.442695, %v1487_v55  ;;  %v953_v20 = vmax.f32 %v951_v52, %v952_v0  ;;  %v942_v0 = vmax.f32 %v9240_v58, %v941_v27 }
 0x257   :  { %v2824_v44 = vadd.f32 %v2823_v21, %v2822_v5  ;;  %5342 = vpow2.f32 %v2000_v18  ;;  %v2006_v3 = vmul.f32 1.442695, %v1488_v29  ;;  %v2008_v59 = vmul.f32 1.442695, %v1489_v13  ;;  %v9323_v55 = vld [vmem:[%s11637_s0 + $0x6b0] sm:$0x7] }
 0x258   :  { %v2818_v4 = vrot.slane %v2817_v22, 1  ;;  %5344 = vpow2.f32 %v2002_v36  ;;  %v961_v29 = vsel %vm328_vm0, %v9301_v1, -inf  ;;  %v963_v13 = vsel %vm328_vm0, %v9312_v57, -inf  ;;  %v9348_v58 = vld [vmem:[%s11637_s0 + $0x6c8] sm:$0xff] }
 0x259   :  { %v2826_v63 = vadd.f32 %v2825_v49, %v2824_v44  ;;  %5346 = vpow2.f32 %v2004_v56  ;;  %v954_v52 = vrot.slane %v953_v20, 4  ;;  %v962_v17 = vmax.f32 %v9252_v53, %v961_v29 }
 0x25a   :  { %v2819_v15 = vadd.f32 %v2818_v4, %v2817_v22  ;;  %5348 = vpow2.f32 %v2006_v3  ;;  %v9343_v61 = vsel %vm328_vm0, %v9318_v46, -inf  ;;  %v943_v48 = vrot.slane %v942_v0, 1 }
 0x25b   :  { %v2828_v24 = vadd.f32 %v2827_v34, %v2826_v63  ;;  %5350 = vpow2.f32 %v2008_v59  ;;  %v9350_v16 = vmax.f32 %v953_v20, %v954_v52  ;;  %v9354_v30 = vsel %vm336_vm1, %v9323_v55, -inf }
 0x25c   :  { %5352 = vrcp.f32 %v2819_v15  ;;  %v9356_v12 = vmax.f32 %v962_v17, %v963_v13  ;;  %v9360_v53 = vsel %vm328_vm0, %v9333_v54, -inf  ;;  %v9364_v62 = vsel %vm328_vm0, %v9338_v7, -inf }
 0x25d   :  { %v2829_v19 = vrot.slane %v2828_v24, 4  ;;  %v5341_v40 = vpop.eup %5340  ;;  %v9366_v5 = vmax.f32 %v942_v0, %v943_v48  ;;  %v956_v21 = vrot.slane %v9350_v16, 2  ;;  %v9373_v18 = vsel %vm328_vm0, %v9348_v58, -inf }
 0x25e   :  { %v3454_v22 = vmul.f32 %v5341_v40, %v9133_v2  ;;  %v3455_v34 = vmul.f32 %v5341_v40, %v9135_v23  ;;  %v3456_v36 = vmul.f32 %v5341_v40, %v9137_v42  ;;  %v3457_v56 = vmul.f32 %v5341_v40, %v9143_v8 }
 0x25f   :  { %v3458_v44 = vmul.f32 %v5341_v40, %v9173_v37  ;;  %v2830_v3 = vadd.f32 %v2829_v19, %v2828_v24  ;;  %v1490_v59 = vsub.f32 %v9010_v25, %v9366_v5  ;;  %v1491_v4 = vsub.f32 %v9018_v26, %v9366_v5 }
 0x260   :  { %v4738_v20 = vadd.f32 -192.0, %v3454_v22  ;;  %v4739_v63 = vadd.f32 -192.0, %v3455_v34  ;;  %v4740_v2 = vadd.f32 -192.0, %v3456_v36  ;;  %v4741_v29 = vadd.f32 -192.0, %v3457_v56 }
 0x261   :  { %v9384_v27 = vpop.eup %5342  ;;  %v4742_v42 = vadd.f32 -192.0, %v3458_v44  ;;  %v2831_v13 = vrot.slane %v2830_v3, 2  ;;  %v1492_v37 = vsub.f32 %v9023_v10, %v9366_v5  ;;  %v1493_v36 = vsub.f32 %v9092_v6, %v9366_v5 }
 0x262   :  { %v9386_v23 = vpop.eup %5344  ;;  %v2835_v8 = vsel %vm328_vm0, %v9384_v27, 0.0  ;;  %v4094_v15 = vmax.f32 %v4738_v20, 0.0  ;;  %v4095_v26 = vmax.f32 %v4739_v63, 0.0  ;;  %v4096_v0 = vmax.f32 %v4740_v2, 0.0 }
 0x263   :  { %v9392_v25 = vpop.eup %5346  ;;  %v4097_v52 = vmax.f32 %v4741_v29, 0.0  ;;  %v4098_v17 = vmax.f32 %v4742_v42, 0.0  ;;  %v2832_v48 = vadd.f32 %v2831_v13, %v2830_v3  ;;  %v2836_v19 = vsel %vm328_vm0, %v9386_v23, 0.0 }
 0x264   :  { %v9394_v24 = vpop.eup %5348  ;;  %v2838_v40 = vsel %vm328_vm0, %v9392_v25, 0.0  ;;  %4414 = vst.msk [vmem:[%s11638_s1 + $0x5a0] sm:$0xff] %vm328_vm0, %v4094_v15  ;;  %4415 = vst.msk [vmem:[%s11638_s1 + $0x5a8] sm:$0xff] %vm328_vm0, %v4095_v26  ;;  %v2837_v10 = vadd.f32 %v2836_v19, %v2835_v8  ;;  %v1494_v56 = vsub.f32 %v9117_v41, %v9366_v5  ;;  %v2010_v63 = vmul.f32 1.442695, %v1490_v59 }
 0x265   :  { %v9400_v22 = vpop.eup %5350  ;;  %4416 = vst.msk [vmem:[%s11638_s1 + $0x5b0] sm:$0xff] %vm328_vm0, %v4096_v0  ;;  %4417 = vst.msk [vmem:[%s11638_s1 + $0x5b8] sm:$0xff] %vm328_vm0, %v4097_v52  ;;  %v2840_v34 = vsel %vm328_vm0, %v9394_v24, 0.0  ;;  %v2833_v3 = vrot.slane %v2832_v48, 1  ;;  %v2012_v2 = vmul.f32 1.442695, %v1491_v4 }
 0x266   :  { %v5353_v44 = vpop.eup %5352  ;;  %4418 = vst.msk [vmem:[%s11638_s1 + $0x5c0] sm:$0x7] %vm336_vm1, %v4098_v17  ;;  %v2842_v20 = vsel %vm336_vm1, %v9400_v22, 0.0  ;;  %v2839_v8 = vadd.f32 %v2838_v40, %v2837_v10  ;;  %5354 = vpow2.f32 %v2010_v63  ;;  %v2014_v4 = vmul.f32 1.442695, %v1492_v37 }
 0x267   :  { %v3459_v29 = vmul.f32 %v5353_v44, %v9186_v33  ;;  %v3460_v42 = vmul.f32 %v5353_v44, %v9196_v60  ;;  %v3461_v6 = vmul.f32 %v5353_v44, %v9208_v35  ;;  %v3462_v41 = vmul.f32 %v5353_v44, %v9213_v51  ;;  %v9438_v35 = vld [vmem:[%s11637_s0 + $0x6d0] sm:$0xff]  ;;  %v9443_v40 = vld [vmem:[%s11637_s0 + $0x6d8] sm:$0x7] }
 0x268   :  { %v3463_v5 = vmul.f32 %v5353_v44, %v9227_v45  ;;  %v2834_v13 = vadd.f32 %v2833_v3, %v2832_v48  ;;  %v2841_v59 = vadd.f32 %v2840_v34, %v2839_v8  ;;  %v2016_v48 = vmul.f32 1.442695, %v1493_v36  ;;  %v9469_v36 = vld [vmem:[%s11637_s0 + $0x6e0] sm:$0xff]  ;;  %v9474_v44 = vld [vmem:[%s11637_s0 + $0x6e8] sm:$0xff] }
 0x269   :  { %v4743_v15 = vadd.f32 -192.0, %v3459_v29  ;;  %v4744_v26 = vadd.f32 -192.0, %v3460_v42  ;;  %v4745_v0 = vadd.f32 -192.0, %v3461_v6  ;;  %v4746_v52 = vadd.f32 -192.0, %v3462_v41 }
 0x26a   :  { %v4747_v17 = vadd.f32 -192.0, %v3463_v5  ;;  %5356 = vrcp.f32 %v2834_v13  ;;  %v2843_v45 = vadd.f32 %v2842_v20, %v2841_v59  ;;  %v2018_v37 = vmul.f32 1.442695, %v1494_v56 }
 0x26b   :  { %v4099_v33 = vmax.f32 %v4743_v15, 0.0  ;;  %v4100_v19 = vmax.f32 %v4744_v26, 0.0  ;;  %v4101_v60 = vmax.f32 %v4745_v0, 0.0  ;;  %v4102_v49 = vmax.f32 %v4746_v52, 0.0 }
 0x26c   :  { %v4103_v51 = vmax.f32 %v4747_v17, 0.0  ;;  %5358 = vpow2.f32 %v2012_v2  ;;  %v957_v10 = vmax.f32 %v9350_v16, %v956_v21  ;;  %v966_v34 = vmax.f32 %v9356_v12, %v9343_v61  ;;  %v9489_v21 = vld [vmem:[%s11637_s0 + $0x6f0] sm:$0xff] }
 0x26d   :  { %4419 = vst.msk [vmem:[%s11638_s1 + $0x5c8] sm:$0xff] %vm328_vm0, %v4099_v33  ;;  %4420 = vst.msk [vmem:[%s11638_s1 + $0x5d0] sm:$0xff] %vm328_vm0, %v4100_v19  ;;  %5360 = vpow2.f32 %v2014_v4  ;;  %v11643_v61 = vmax.f32 %v9360_v53, %v9364_v62  ;;  %v980_v12 = vsel %vm328_vm0, %v9438_v35, -inf  ;;  %v982_v20 = vsel %vm336_vm1, %v9443_v40, -inf  ;;  %v9497_v53 = vld [vmem:[%s11637_s0 + $0x6f8] sm:$0xff] }
 0x26e   :  { %4421 = vst.msk [vmem:[%s11638_s1 + $0x5d8] sm:$0xff] %vm328_vm0, %v4101_v60  ;;  %4422 = vst.msk [vmem:[%s11638_s1 + $0x5e0] sm:$0xff] %vm328_vm0, %v4102_v49  ;;  %v2844_v49 = vrot.slane %v2843_v45, 4  ;;  %5362 = vpow2.f32 %v2016_v48  ;;  %v958_v56 = vrot.slane %v957_v10, 1  ;;  %v968_v3 = vmax.f32 %v966_v34, %v9354_v30  ;;  %v9502_v62 = vld [vmem:[%s11637_s0 + $0x700] sm:$0x7] }
 0x26f   :  { %4423 = vst.msk [vmem:[%s11638_s1 + $0x5e8] sm:$0x7] %vm336_vm1, %v4103_v51  ;;  %v979_v16 = vmax.f32 %v11643_v61, %v9373_v18  ;;  %5364 = vpow2.f32 %v2018_v37  ;;  %v9506_v2 = vsel %vm328_vm0, %v9469_v36, -inf  ;;  %v9510_v30 = vsel %vm328_vm0, %v9474_v44, -inf }
 0x270   :  { %v2845_v18 = vadd.f32 %v2844_v49, %v2843_v45  ;;  %v959_v29 = vmax.f32 %v957_v10, %v958_v56  ;;  %v969_v42 = vrot.slane %v968_v3, 4  ;;  %v992_v6 = vmax.f32 %v9506_v2, %v9510_v30  ;;  %v9516_v5 = vpop.eup %5354 }
 0x271   :  { %v981_v63 = vmax.f32 %v979_v16, %v980_v12  ;;  %v993_v41 = vsel %vm328_vm0, %v9489_v21, -inf  ;;  %v9522_v15 = vsel %vm328_vm0, %v9497_v53, -inf  ;;  %v9526_v26 = vsel %vm336_vm1, %v9502_v62, -inf }
 0x272   :  { %v2846_v13 = vrot.slane %v2845_v18, 2  ;;  %v2850_v0 = vsel %vm328_vm0, %v9516_v5, 0.0  ;;  %v1495_v52 = vsub.f32 %v9166_v47, %v959_v29  ;;  %v1496_v17 = vsub.f32 %v9171_v38, %v959_v29 }
 0x273   :  { %v9518_v8 = vmax.f32 %v981_v63, %v982_v20  ;;  %v1497_v59 = vsub.f32 %v9206_v32, %v959_v29  ;;  %v1498_v19 = vsub.f32 %v9218_v43, %v959_v29  ;;  %v1499_v60 = vsub.f32 %v9223_v31, %v959_v29 }
 0x274   :  { %v5357_v4 = vpop.eup %5356  ;;  %v2847_v33 = vadd.f32 %v2846_v13, %v2845_v18  ;;  %v970_v51 = vmax.f32 %v968_v3, %v969_v42  ;;  %v2020_v34 = vmul.f32 1.442695, %v1495_v52  ;;  %v2022_v49 = vmul.f32 1.442695, %v1496_v17  ;;  %v9557_v42 = vld [vmem:[%s11637_s0 + $0x708] sm:$0xff]  ;;  %v9580_v17 = vld [vmem:[%s11637_s0 + $0x710] sm:$0xff] }
 0x275   :  { %v3464_v45 = vmul.f32 %v5357_v4, %v9264_v50  ;;  %v3465_v48 = vmul.f32 %v5357_v4, %v9266_v9  ;;  %v3466_v37 = vmul.f32 %v5357_v4, %v9270_v14  ;;  %v3467_v10 = vmul.f32 %v5357_v4, %v9272_v11 }
 0x276   :  { %v9539_v47 = vpop.eup %5358  ;;  %v3468_v38 = vmul.f32 %v5357_v4, %v9276_v39  ;;  %v2848_v32 = vrot.slane %v2847_v33, 1  ;;  %v2026_v52 = vmul.f32 1.442695, %v1498_v19  ;;  %v9595_v19 = vld [vmem:[%s11637_s0 + $0x720] sm:$0xff] }
 0x277   :  { %v9542_v61 = vpop.eup %5360  ;;  %v4748_v43 = vadd.f32 -192.0, %v3464_v45  ;;  %v4749_v31 = vadd.f32 -192.0, %v3465_v48  ;;  %v4750_v16 = vadd.f32 -192.0, %v3466_v37  ;;  %v4751_v12 = vadd.f32 -192.0, %v3467_v10 }
 0x278   :  { %v9544_v50 = vpop.eup %5362  ;;  %v4752_v9 = vadd.f32 -192.0, %v3468_v38  ;;  %v2849_v56 = vadd.f32 %v2848_v32, %v2847_v33  ;;  %v2851_v14 = vsel %vm328_vm0, %v9539_v47, 0.0  ;;  %v2853_v11 = vsel %vm328_vm0, %v9542_v61, 0.0 }
 0x279   :  { %v9550_v39 = vpop.eup %5364  ;;  %v4104_v3 = vmax.f32 %v4748_v43, 0.0  ;;  %v4105_v20 = vmax.f32 %v4749_v31, 0.0  ;;  %v4106_v18 = vmax.f32 %v4750_v16, 0.0  ;;  %v4107_v63 = vmax.f32 %v4751_v12, 0.0  ;;  %v9611_v43 = vld [vmem:[%s11637_s0 + $0x730] sm:$0xff] }
 0x27a   :  { %v4108_v2 = vmax.f32 %v4752_v9, 0.0  ;;  %5366 = vrcp.f32 %v2849_v56  ;;  %v2852_v30 = vadd.f32 %v2851_v14, %v2850_v0  ;;  %v2855_v29 = vsel %vm328_vm0, %v9544_v50, 0.0 }
 0x27b   :  { %4424 = vst.msk [vmem:[%s11638_s1 + $0x5f0] sm:$0xff] %vm328_vm0, %v4104_v3  ;;  %4425 = vst.msk [vmem:[%s11638_s1 + $0x5f8] sm:$0xff] %vm328_vm0, %v4105_v20  ;;  %v2857_v13 = vsel %vm336_vm1, %v9550_v39, 0.0  ;;  %5368 = vpow2.f32 %v2020_v34  ;;  %v2024_v0 = vmul.f32 1.442695, %v1497_v59  ;;  %v971_v45 = vrot.slane %v970_v51, 2 }
 0x27c   :  { %4426 = vst.msk [vmem:[%s11638_s1 + $0x600] sm:$0xff] %vm328_vm0, %v4106_v18  ;;  %4427 = vst.msk [vmem:[%s11638_s1 + $0x608] sm:$0xff] %vm328_vm0, %v4107_v63  ;;  %v2854_v4 = vadd.f32 %v2853_v11, %v2852_v30  ;;  %5370 = vpow2.f32 %v2022_v49  ;;  %v2028_v33 = vmul.f32 1.442695, %v1499_v60  ;;  %v984_v48 = vrot.slane %v9518_v8, 4  ;;  %v9590_v59 = vld [vmem:[%s11637_s0 + $0x718] sm:$0xff] }
 0x27d   :  { %4428 = vst.msk [vmem:[%s11638_s1 + $0x610] sm:$0x7] %vm336_vm1, %v4108_v2  ;;  %5372 = vpow2.f32 %v2024_v0  ;;  %v994_v37 = vmax.f32 %v992_v6, %v993_v41  ;;  %v1005_v10 = vsel %vm328_vm0, %v9557_v42, -inf  ;;  %v972_v60 = vmax.f32 %v970_v51, %v971_v45  ;;  %v9602_v6 = vld [vmem:[%s11637_s0 + $0x728] sm:$0x7]  ;;  %v9616_v51 = vld [vmem:[%s11637_s0 + $0x738] sm:$0xff] }
 0x27e   :  { %v2856_v38 = vadd.f32 %v2855_v29, %v2854_v4  ;;  %5374 = vpow2.f32 %v2026_v52  ;;  %v1006_v41 = vsel %vm328_vm0, %v9580_v17, -inf  ;;  %v985_v32 = vmax.f32 %v9518_v8, %v984_v48 }
 0x27f   :  { %5376 = vpow2.f32 %v2028_v33  ;;  %v996_v34 = vmax.f32 %v994_v37, %v9522_v15  ;;  %v1007_v49 = vmax.f32 %v1005_v10, %v1006_v41  ;;  %v973_v16 = vrot.slane %v972_v60, 1 }
 0x280   :  { %v2858_v31 = vadd.f32 %v2857_v13, %v2856_v38  ;;  %v1008_v12 = vsel %vm328_vm0, %v9590_v59, -inf  ;;  %v9622_v8 = vsel %vm328_vm0, %v9595_v19, -inf  ;;  %v986_v15 = vrot.slane %v985_v32, 2 }
 0x281   :  { %v998_v9 = vmax.f32 %v996_v34, %v9526_v26  ;;  %v9625_v56 = vmax.f32 %v1007_v49, %v1008_v12  ;;  %v9629_v14 = vsel %vm336_vm1, %v9602_v6, -inf  ;;  %v974_v3 = vmax.f32 %v972_v60, %v973_v16 }
 0x282   :  { %v2859_v11 = vrot.slane %v2858_v31, 4  ;;  %v9633_v20 = vsel %vm328_vm0, %v9611_v43, -inf  ;;  %v9637_v18 = vsel %vm328_vm0, %v9616_v51, -inf  ;;  %v987_v63 = vmax.f32 %v985_v32, %v986_v15 }
 0x283   :  { %v999_v2 = vrot.slane %v998_v9, 4  ;;  %v1011_v26 = vmax.f32 %v9625_v56, %v9622_v8  ;;  %v1022_v30 = vmax.f32 %v9633_v20, %v9637_v18  ;;  %v1500_v0 = vsub.f32 %v9236_v28, %v974_v3 }
 0x284   :  { %v5367_v29 = vpop.eup %5366  ;;  %v2860_v13 = vadd.f32 %v2859_v11, %v2858_v31  ;;  %v1501_v52 = vsub.f32 %v9301_v1, %v974_v3  ;;  %v1502_v4 = vsub.f32 %v9312_v57, %v974_v3  ;;  %v1503_v1 = vsub.f32 %v9318_v46, %v974_v3 }
 0x285   :  { %v9646_v33 = vpop.eup %5368  ;;  %v3469_v45 = vmul.f32 %v5367_v29, %v9384_v27  ;;  %v3470_v48 = vmul.f32 %v5367_v29, %v9386_v23  ;;  %v3471_v37 = vmul.f32 %v5367_v29, %v9392_v25  ;;  %v3472_v10 = vmul.f32 %v5367_v29, %v9394_v24 }
 0x286   :  { %v9652_v38 = vpop.eup %5370  ;;  %v3473_v60 = vmul.f32 %v5367_v29, %v9400_v22  ;;  %v2861_v41 = vrot.slane %v2860_v13, 2  ;;  %v2865_v28 = vsel %vm328_vm0, %v9646_v33, 0.0 }
 0x287   :  { %v9658_v57 = vpop.eup %5372  ;;  %v4753_v32 = vadd.f32 -192.0, %v3469_v45  ;;  %v4754_v27 = vadd.f32 -192.0, %v3470_v48  ;;  %v4755_v34 = vadd.f32 -192.0, %v3471_v37  ;;  %v4756_v23 = vadd.f32 -192.0, %v3472_v10  ;;  %v9692_v37 = vld [vmem:[%s11637_s0 + $0x740] sm:$0xff] }
 0x288   :  { %v9660_v49 = vpop.eup %5374  ;;  %v4757_v25 = vadd.f32 -192.0, %v3473_v60  ;;  %v2862_v24 = vadd.f32 %v2861_v41, %v2860_v13  ;;  %v2866_v31 = vsel %vm328_vm0, %v9652_v38, 0.0  ;;  %v2868_v22 = vsel %vm328_vm0, %v9658_v57, 0.0 }
 0x289   :  { %v9666_v16 = vpop.eup %5376  ;;  %v4109_v12 = vmax.f32 %v4753_v32, 0.0  ;;  %v4110_v46 = vmax.f32 %v4754_v27, 0.0  ;;  %v4111_v8 = vmax.f32 %v4755_v34, 0.0  ;;  %v4112_v15 = vmax.f32 %v4756_v23, 0.0 }
 0x28a   :  { %v4113_v56 = vmax.f32 %v4757_v25, 0.0  ;;  %v2863_v11 = vrot.slane %v2862_v24, 1  ;;  %v2867_v20 = vadd.f32 %v2866_v31, %v2865_v28  ;;  %v2870_v18 = vsel %vm328_vm0, %v9660_v49, 0.0 }
 0x28b   :  { %4429 = vst.msk [vmem:[%s11638_s1 + $0x618] sm:$0xff] %vm328_vm0, %v4109_v12  ;;  %4430 = vst.msk [vmem:[%s11638_s1 + $0x620] sm:$0xff] %vm328_vm0, %v4110_v46  ;;  %v2872_v29 = vsel %vm336_vm1, %v9666_v16, 0.0  ;;  %v1504_v13 = vsub.f32 %v9323_v55, %v974_v3  ;;  %v2030_v45 = vmul.f32 1.442695, %v1500_v0  ;;  %v988_v27 = vrot.slane %v987_v63, 1 }
 0x28c   :  { %4431 = vst.msk [vmem:[%s11638_s1 + $0x628] sm:$0xff] %vm328_vm0, %v4111_v8  ;;  %4432 = vst.msk [vmem:[%s11638_s1 + $0x630] sm:$0xff] %vm328_vm0, %v4112_v15  ;;  %v2032_v48 = vmul.f32 1.442695, %v1501_v52  ;;  %v2864_v10 = vadd.f32 %v2863_v11, %v2862_v24  ;;  %v2869_v60 = vadd.f32 %v2868_v22, %v2867_v20  ;;  %v2034_v41 = vmul.f32 1.442695, %v1502_v4 }
 0x28d   :  { %4433 = vst.msk [vmem:[%s11638_s1 + $0x638] sm:$0x7] %vm336_vm1, %v4113_v56  ;;  %v2036_v28 = vmul.f32 1.442695, %v1503_v1  ;;  %5378 = vpow2.f32 %v2030_v45  ;;  %v2038_v32 = vmul.f32 1.442695, %v1504_v13  ;;  %v1000_v55 = vmax.f32 %v998_v9, %v999_v2 }
 0x28e   :  { %v9701_v3 = vld [vmem:[%s11637_s0 + $0x748] sm:$0xff]  ;;  %5380 = vrcp.f32 %v2864_v10  ;;  %v2871_v0 = vadd.f32 %v2870_v18, %v2869_v60  ;;  %v1013_v52 = vmax.f32 %v1011_v26, %v9629_v14  ;;  %v1023_v34 = vsel %vm328_vm0, %v9692_v37, -inf  ;;  %v9721_v12 = vld [vmem:[%s11637_s0 + $0x758] sm:$0xff] }
 0x28f   :  { %5382 = vpow2.f32 %v2032_v48  ;;  %v989_v23 = vmax.f32 %v987_v63, %v988_v27  ;;  %v1001_v4 = vrot.slane %v1000_v55, 2  ;;  %v1024_v1 = vmax.f32 %v1022_v30, %v1023_v34  ;;  %v9716_v30 = vld [vmem:[%s11637_s0 + $0x750] sm:$0x7] }
 0x290   :  { %v2873_v25 = vadd.f32 %v2872_v29, %v2871_v0  ;;  %5384 = vpow2.f32 %v2034_v41  ;;  %v1014_v24 = vrot.slane %v1013_v52, 4  ;;  %v1025_v9 = vsel %vm328_vm0, %v9701_v3, -inf }
 0x291   :  { %5386 = vpow2.f32 %v2036_v28  ;;  %v1505_v2 = vsub.f32 %v9333_v54, %v989_v23  ;;  %v1506_v31 = vsub.f32 %v9338_v7, %v989_v23  ;;  %v1507_v14 = vsub.f32 %v9348_v58, %v989_v23 }
 0x292   :  { %v2874_v26 = vrot.slane %v2873_v25, 4  ;;  %5388 = vpow2.f32 %v2038_v32  ;;  %v1508_v22 = vsub.f32 %v9438_v35, %v989_v23  ;;  %v1509_v63 = vsub.f32 %v9443_v40, %v989_v23  ;;  %v9726_v40 = vld [vmem:[%s11637_s0 + $0x760] sm:$0xff] }
 0x293   :  { %v2040_v54 = vmul.f32 1.442695, %v1505_v2  ;;  %v2042_v7 = vmul.f32 1.442695, %v1506_v31  ;;  %v2044_v46 = vmul.f32 1.442695, %v1507_v14  ;;  %v1002_v58 = vmax.f32 %v1000_v55, %v1001_v4 }
 0x294   :  { %v2875_v8 = vadd.f32 %v2874_v26, %v2873_v25  ;;  %v2046_v15 = vmul.f32 1.442695, %v1508_v22  ;;  %v2048_v56 = vmul.f32 1.442695, %v1509_v63  ;;  %v1015_v35 = vmax.f32 %v1013_v52, %v1014_v24 }
 0x295   :  { %5390 = vpow2.f32 %v2040_v54  ;;  %v1003_v11 = vrot.slane %v1002_v58, 1  ;;  %v1026_v20 = vmax.f32 %v1024_v1, %v1025_v9  ;;  %v1027_v18 = vsel %vm336_vm1, %v9716_v30, -inf }
 0x296   :  { %v2876_v29 = vrot.slane %v2875_v8, 2  ;;  %5392 = vpow2.f32 %v2042_v7  ;;  %v1016_v13 = vrot.slane %v1015_v35, 2  ;;  %v9732_v45 = vsel %vm328_vm0, %v9721_v12, -inf }
 0x297   :  { %v9734_v48 = vpop.eup %5378  ;;  %5394 = vpow2.f32 %v2044_v46  ;;  %v9736_v10 = vmax.f32 %v1002_v58, %v1003_v11  ;;  %v9738_v60 = vmax.f32 %v1026_v20, %v1027_v18  ;;  %v9742_v41 = vsel %vm328_vm0, %v9726_v40, -inf }
 0x298   :  { %v5381_v28 = vpop.eup %5380  ;;  %v2877_v32 = vadd.f32 %v2876_v29, %v2875_v8  ;;  %v2880_v27 = vsel %vm328_vm0, %v9734_v48, 0.0  ;;  %5396 = vpow2.f32 %v2046_v15  ;;  %v1017_v55 = vmax.f32 %v1015_v35, %v1016_v13 }
 0x299   :  { %v9746_v0 = vpop.eup %5382  ;;  %v3474_v52 = vmul.f32 %v5381_v28, %v9516_v5  ;;  %v3475_v34 = vmul.f32 %v5381_v28, %v9539_v47  ;;  %v3476_v23 = vmul.f32 %v5381_v28, %v9542_v61  ;;  %v3477_v4 = vmul.f32 %v5381_v28, %v9544_v50 }
 0x29a   :  { %v9752_v1 = vpop.eup %5384  ;;  %v3478_v25 = vmul.f32 %v5381_v28, %v9550_v39  ;;  %v2878_v24 = vrot.slane %v2877_v32, 1  ;;  %v2881_v9 = vsel %vm328_vm0, %v9746_v0, 0.0  ;;  %5398 = vpow2.f32 %v2048_v56 }
 0x29b   :  { %v9757_v2 = vpop.eup %5386  ;;  %v4758_v31 = vadd.f32 -192.0, %v3474_v52  ;;  %v4759_v14 = vadd.f32 -192.0, %v3475_v34  ;;  %v4760_v5 = vadd.f32 -192.0, %v3476_v23  ;;  %v4761_v26 = vadd.f32 -192.0, %v3477_v4 }
 0x29c   :  { %v9759_v47 = vpop.eup %5388  ;;  %v4762_v61 = vadd.f32 -192.0, %v3478_v25  ;;  %v2879_v22 = vadd.f32 %v2878_v24, %v2877_v32  ;;  %v2882_v50 = vadd.f32 %v2881_v9, %v2880_v27  ;;  %v2883_v63 = vsel %vm328_vm0, %v9752_v1, 0.0 }
 0x29d   :  { %v4114_v39 = vmax.f32 %v4758_v31, 0.0  ;;  %v4115_v54 = vmax.f32 %v4759_v14, 0.0  ;;  %v4116_v7 = vmax.f32 %v4760_v5, 0.0  ;;  %v4117_v46 = vmax.f32 %v4761_v26, 0.0 }
 0x29e   :  { %v4118_v58 = vmax.f32 %v4762_v61, 0.0  ;;  %5400 = vrcp.f32 %v2879_v22  ;;  %v2884_v8 = vadd.f32 %v2883_v63, %v2882_v50  ;;  %v2885_v15 = vsel %vm328_vm0, %v9757_v2, 0.0 }
 0x29f   :  { %v9765_v56 = vpop.eup %5390  ;;  %4434 = vst.msk [vmem:[%s11638_s1 + $0x640] sm:$0xff] %vm328_vm0, %v4114_v39  ;;  %4435 = vst.msk [vmem:[%s11638_s1 + $0x648] sm:$0xff] %vm328_vm0, %v4115_v54  ;;  %v2887_v35 = vsel %vm336_vm1, %v9759_v47, 0.0  ;;  %v1510_v11 = vsub.f32 %v9469_v36, %v9736_v10  ;;  %v1511_v20 = vsub.f32 %v9474_v44, %v9736_v10  ;;  %v1512_v18 = vsub.f32 %v9489_v21, %v9736_v10 }
 0x2a0   :  { %4436 = vst.msk [vmem:[%s11638_s1 + $0x650] sm:$0xff] %vm328_vm0, %v4116_v7  ;;  %4437 = vst.msk [vmem:[%s11638_s1 + $0x658] sm:$0xff] %vm328_vm0, %v4117_v46  ;;  %v9791_v29 = vpop.eup %5392  ;;  %v2886_v13 = vadd.f32 %v2885_v15, %v2884_v8  ;;  %v2895_v28 = vsel %vm328_vm0, %v9765_v56, 0.0  ;;  %v1513_v36 = vsub.f32 %v9497_v53, %v9736_v10  ;;  %v1514_v44 = vsub.f32 %v9502_v62, %v9736_v10 }
 0x2a1   :  { %4438 = vst.msk [vmem:[%s11638_s1 + $0x660] sm:$0x7] %vm336_vm1, %v4118_v58  ;;  %v9803_v32 = vpop.eup %5394  ;;  %v2896_v21 = vsel %vm328_vm0, %v9791_v29, 0.0  ;;  %v2050_v27 = vmul.f32 1.442695, %v1510_v11  ;;  %v1018_v34 = vrot.slane %v1017_v55, 1  ;;  %v1037_v50 = vmax.f32 %v9732_v45, %v9742_v41 }
 0x2a2   :  { %v2052_v52 = vmul.f32 1.442695, %v1511_v20  ;;  %v9807_v23 = vpop.eup %5396  ;;  %v2888_v4 = vadd.f32 %v2887_v35, %v2886_v13  ;;  %v2897_v25 = vadd.f32 %v2896_v21, %v2895_v28  ;;  %v2898_v24 = vsel %vm328_vm0, %v9803_v32, 0.0 }
 0x2a3   :  { %v2054_v9 = vmul.f32 1.442695, %v1512_v18  ;;  %v2900_v53 = vsel %vm328_vm0, %v9807_v23, 0.0  ;;  %5402 = vpow2.f32 %v2050_v27  ;;  %v2056_v62 = vmul.f32 1.442695, %v1513_v36 }
 0x2a4   :  { %v2058_v10 = vmul.f32 1.442695, %v1514_v44  ;;  %v9813_v31 = vpop.eup %5398  ;;  %v2889_v14 = vrot.slane %v2888_v4, 4  ;;  %v2899_v5 = vadd.f32 %v2898_v24, %v2897_v25  ;;  %5404 = vpow2.f32 %v2052_v52 }
 0x2a5   :  { %v9815_v26 = vmax.f32 %v1017_v55, %v1018_v34  ;;  %v2902_v61 = vsel %vm336_vm1, %v9813_v31, 0.0  ;;  %5406 = vpow2.f32 %v2054_v9  ;;  %v1029_v22 = vrot.slane %v9738_v60, 4 }
 0x2a6   :  { %v2890_v63 = vadd.f32 %v2889_v14, %v2888_v4  ;;  %v2901_v39 = vadd.f32 %v2900_v53, %v2899_v5  ;;  %5408 = vpow2.f32 %v2056_v62 }
 0x2a7   :  { %v1515_v54 = vsub.f32 %v9557_v42, %v9815_v26  ;;  %5410 = vpow2.f32 %v2058_v10  ;;  %v1516_v55 = vsub.f32 %v9580_v17, %v9815_v26  ;;  %v1517_v7 = vsub.f32 %v9590_v59, %v9815_v26 }
 0x2a8   :  { %v1518_v46 = vsub.f32 %v9595_v19, %v9815_v26  ;;  %v5401_v58 = vpop.eup %5400  ;;  %v2891_v8 = vrot.slane %v2890_v63, 2  ;;  %v2903_v15 = vadd.f32 %v2902_v61, %v2901_v39  ;;  %v1519_v35 = vsub.f32 %v9602_v6, %v9815_v26 }
 0x2a9   :  { %v2060_v11 = vmul.f32 1.442695, %v1515_v54  ;;  %v3479_v20 = vmul.f32 %v5401_v58, %v9646_v33  ;;  %v3480_v42 = vmul.f32 %v5401_v58, %v9652_v38  ;;  %v3481_v18 = vmul.f32 %v5401_v58, %v9658_v57  ;;  %v9874_v54 = vld [vmem:[%s11637_s0 + $0x768] sm:$0xff] }
 0x2aa   :  { %v3482_v17 = vmul.f32 %v5401_v58, %v9660_v49  ;;  %v3483_v59 = vmul.f32 %v5401_v58, %v9666_v16  ;;  %v2892_v13 = vadd.f32 %v2891_v8, %v2890_v63  ;;  %v2904_v28 = vrot.slane %v2903_v15, 4 }
 0x2ab   :  { %5412 = vpow2.f32 %v2060_v11  ;;  %v4763_v19 = vadd.f32 -192.0, %v3479_v20  ;;  %v4764_v36 = vadd.f32 -192.0, %v3480_v42  ;;  %v4765_v44 = vadd.f32 -192.0, %v3481_v18  ;;  %v9896_v18 = vld [vmem:[%s11637_s0 + $0x780] sm:$0xff] }
 0x2ac   :  { %v4766_v21 = vadd.f32 -192.0, %v3482_v17  ;;  %v4767_v27 = vadd.f32 -192.0, %v3483_v59  ;;  %v2893_v6 = vrot.slane %v2892_v13, 1  ;;  %v2905_v52 = vadd.f32 %v2904_v28, %v2903_v15  ;;  %v9889_v15 = vld [vmem:[%s11637_s0 + $0x778] sm:$0x7] }
 0x2ad   :  { %v2062_v34 = vmul.f32 1.442695, %v1516_v55  ;;  %v9837_v33 = vpop.eup %5402  ;;  %v4119_v38 = vmax.f32 %v4763_v19, 0.0  ;;  %v4120_v4 = vmax.f32 %v4764_v36, 0.0  ;;  %v4121_v57 = vmax.f32 %v4765_v44, 0.0  ;;  %v9879_v55 = vld [vmem:[%s11637_s0 + $0x770] sm:$0xff] }
 0x2ae   :  { %v4122_v25 = vmax.f32 %v4766_v21, 0.0  ;;  %v9839_v49 = vpop.eup %5404  ;;  %v4123_v16 = vmax.f32 %v4767_v27, 0.0  ;;  %v2894_v24 = vadd.f32 %v2893_v6, %v2892_v13  ;;  %v2906_v9 = vrot.slane %v2905_v52, 2  ;;  %v9917_v44 = vld [vmem:[%s11637_s0 + $0x790] sm:$0xff]  ;;  %v9922_v21 = vld [vmem:[%s11637_s0 + $0x798] sm:$0xff] }
 0x2af   :  { %v2910_v53 = vsel %vm328_vm0, %v9837_v33, 0.0  ;;  %v9843_v62 = vpop.eup %5406  ;;  %4439 = vst.msk [vmem:[%s11638_s1 + $0x668] sm:$0xff] %vm328_vm0, %v4119_v38  ;;  %4440 = vst.msk [vmem:[%s11638_s1 + $0x670] sm:$0xff] %vm328_vm0, %v4120_v4  ;;  %v2911_v10 = vsel %vm328_vm0, %v9839_v49, 0.0  ;;  %5414 = vpow2.f32 %v2062_v34  ;;  %v2064_v14 = vmul.f32 1.442695, %v1517_v7 }
 0x2b0   :  { %4441 = vst.msk [vmem:[%s11638_s1 + $0x678] sm:$0xff] %vm328_vm0, %v4121_v57  ;;  %4442 = vst.msk [vmem:[%s11638_s1 + $0x680] sm:$0xff] %vm328_vm0, %v4122_v25  ;;  %v2066_v5 = vmul.f32 1.442695, %v1518_v46  ;;  %v9863_v26 = vpop.eup %5408  ;;  %5416 = vrcp.f32 %v2894_v24  ;;  %v2907_v61 = vadd.f32 %v2906_v9, %v2905_v52  ;;  %v2912_v63 = vadd.f32 %v2911_v10, %v2910_v53  ;;  %v9927_v27 = vld [vmem:[%s11637_s0 + $0x7a0] sm:$0x7] }
 0x2b1   :  { %4443 = vst.msk [vmem:[%s11638_s1 + $0x688] sm:$0x7] %vm336_vm1, %v4123_v16  ;;  %v2913_v39 = vsel %vm328_vm0, %v9843_v62, 0.0  ;;  %v9881_v7 = vpop.eup %5410  ;;  %v2915_v46 = vsel %vm328_vm0, %v9863_v26, 0.0  ;;  %5418 = vpow2.f32 %v2064_v14  ;;  %v2068_v58 = vmul.f32 1.442695, %v1519_v35 }
 0x2b2   :  { %v1030_v8 = vmax.f32 %v9738_v60, %v1029_v22  ;;  %v2908_v11 = vrot.slane %v2907_v61, 1  ;;  %v2914_v20 = vadd.f32 %v2913_v39, %v2912_v63  ;;  %v2917_v42 = vsel %vm336_vm1, %v9881_v7, 0.0  ;;  %v9901_v60 = vld [vmem:[%s11637_s0 + $0x788] sm:$0xff]  ;;  %v9943_v57 = vld [vmem:[%s11637_s0 + $0x7b0] sm:$0xff]  ;;  %v9948_v25 = vld [vmem:[%s11637_s0 + $0x7b8] sm:$0xff] }
 0x2b3   :  { %5420 = vpow2.f32 %v2066_v5  ;;  %v1038_v35 = vsel %vm328_vm0, %v9874_v54, -inf  ;;  %v1040_v17 = vsel %vm328_vm0, %v9879_v55, -inf  ;;  %v1042_v36 = vsel %vm336_vm1, %v9889_v15, -inf  ;;  %v9938_v52 = vld [vmem:[%s11637_s0 + $0x7a8] sm:$0xff]  ;;  %11645 = vst [vmem:[#allocation3_spill] sm:$0xff] %v9943_v57  ;;  %11646 = vst [vmem:[#allocation4_spill] sm:$0xff] %v9948_v25 }
 0x2b4   :  { %5422 = vpow2.f32 %v2068_v58  ;;  %v1031_v22 = vrot.slane %v1030_v8, 2  ;;  %v2909_v13 = vadd.f32 %v2908_v11, %v2907_v61  ;;  %v2916_v28 = vadd.f32 %v2915_v46, %v2914_v20  ;;  %11644 = vst [vmem:[#allocation2_spill] sm:$0xff] %v9938_v52  ;;  %v9953_v16 = vld [vmem:[%s11637_s0 + $0x7c0] sm:$0xff] }
 0x2b5   :  { %v9907_v59 = vpop.eup %5412  ;;  %v1039_v19 = vmax.f32 %v1037_v50, %v1038_v35  ;;  %v1050_v50 = vsel %vm328_vm0, %v9896_v18, -inf  ;;  %v1051_v6 = vsel %vm328_vm0, %v9901_v60, -inf  ;;  %11647 = vst [vmem:[#allocation5_spill] sm:$0xff] %v9953_v16  ;;  %v1053_v9 = vsel %vm328_vm0, %v9917_v44, -inf }
 0x2b6   :  { %v2925_v45 = vsel %vm328_vm0, %v9907_v59, 0.0  ;;  %v1032_v41 = vmax.f32 %v1030_v8, %v1031_v22  ;;  %5424 = vrcp.f32 %v2909_v13  ;;  %v2918_v34 = vadd.f32 %v2917_v42, %v2916_v28 }
 0x2b7   :  { %v1041_v38 = vmax.f32 %v1039_v19, %v1040_v17  ;;  %v1052_v4 = vmax.f32 %v1050_v50, %v1051_v6  ;;  %v9959_v53 = vsel %vm328_vm0, %v9922_v21, -inf  ;;  %v9963_v10 = vsel %vm336_vm1, %v9927_v27, -inf }
 0x2b8   :  { %v1033_v24 = vrot.slane %v1032_v41, 1  ;;  %v2919_v14 = vrot.slane %v2918_v34, 4  ;;  %v9971_v63 = vsel %vm328_vm0, %v9938_v52, -inf  ;;  %v9979_v58 = vsel %vm328_vm0, %v9943_v57, -inf }
 0x2b9   :  { %v9965_v5 = vmax.f32 %v1041_v38, %v1042_v36  ;;  %v9967_v61 = vmax.f32 %v1052_v4, %v1053_v9  ;;  %v9973_v39 = vpop.eup %5414  ;;  %v9983_v8 = vsel %vm328_vm0, %v9948_v25, -inf  ;;  %v9987_v11 = vsel %vm328_vm0, %v9953_v16, -inf }
 0x2ba   :  { %v9975_v46 = vmax.f32 %v1032_v41, %v1033_v24  ;;  %v5417_v20 = vpop.eup %5416  ;;  %v2920_v42 = vadd.f32 %v2919_v14, %v2918_v34  ;;  %v2926_v22 = vsel %vm328_vm0, %v9973_v39, 0.0 }
 0x2bb   :  { %v9994_v13 = vpop.eup %5418  ;;  %v3484_v28 = vmul.f32 %v5417_v20, %v9734_v48  ;;  %v3485_v19 = vmul.f32 %v5417_v20, %v9746_v0  ;;  %v3486_v36 = vmul.f32 %v5417_v20, %v9752_v1  ;;  %v3487_v41 = vmul.f32 %v5417_v20, %v9757_v2 }
 0x2bc   :  { %v3488_v6 = vmul.f32 %v5417_v20, %v9759_v47  ;;  %v2921_v34 = vrot.slane %v2920_v42, 2  ;;  %v2927_v38 = vadd.f32 %v2926_v22, %v2925_v45  ;;  %v2928_v4 = vsel %vm328_vm0, %v9994_v13, 0.0 }
 0x2bd   :  { %v10000_v50 = vpop.eup %5420  ;;  %v4768_v9 = vadd.f32 -192.0, %v3484_v28  ;;  %v4769_v14 = vadd.f32 -192.0, %v3485_v19  ;;  %v4770_v48 = vadd.f32 -192.0, %v3486_v36  ;;  %v4771_v17 = vadd.f32 -192.0, %v3487_v41 }
 0x2be   :  { %v10005_v24 = vpop.eup %5422  ;;  %v4772_v0 = vadd.f32 -192.0, %v3488_v6  ;;  %v2922_v35 = vadd.f32 %v2921_v34, %v2920_v42  ;;  %v2929_v1 = vadd.f32 %v2928_v4, %v2927_v38  ;;  %v2930_v2 = vsel %vm328_vm0, %v10000_v50, 0.0 }
 0x2bf   :  { %v4124_v16 = vmax.f32 %v4768_v9, 0.0  ;;  %v4125_v25 = vmax.f32 %v4769_v14, 0.0  ;;  %v4126_v47 = vmax.f32 %v4770_v48, 0.0  ;;  %v4127_v20 = vmax.f32 %v4771_v17, 0.0 }
 0x2c0   :  { %v5425_v45 = vpop.eup %5424  ;;  %v4128_v22 = vmax.f32 %v4772_v0, 0.0  ;;  %v2923_v57 = vrot.slane %v2922_v35, 1  ;;  %v2931_v52 = vadd.f32 %v2930_v2, %v2929_v1  ;;  %v2932_v28 = vsel %vm336_vm1, %v10005_v24, 0.0  ;;  %v10068_v2 = vld [vmem:[%s11637_s0 + $0x7c8] sm:$0x7] }
 0x2c1   :  { %4444 = vst.msk [vmem:[%s11638_s1 + $0x690] sm:$0xff] %vm328_vm0, %v4124_v16  ;;  %4445 = vst.msk [vmem:[%s11638_s1 + $0x698] sm:$0xff] %vm328_vm0, %v4125_v25  ;;  %v3489_v42 = vmul.f32 %v5425_v45, %v9765_v56  ;;  %v3490_v17 = vmul.f32 %v5425_v45, %v9791_v29  ;;  %v3491_v16 = vmul.f32 %v5425_v45, %v9803_v32 }
 0x2c2   :  { %4446 = vst.msk [vmem:[%s11638_s1 + $0x6a0] sm:$0xff] %vm328_vm0, %v4126_v47  ;;  %4447 = vst.msk [vmem:[%s11638_s1 + $0x6a8] sm:$0xff] %vm328_vm0, %v4127_v20  ;;  %v3492_v19 = vmul.f32 %v5425_v45, %v9807_v23  ;;  %v3493_v25 = vmul.f32 %v5425_v45, %v9813_v31  ;;  %v2924_v36 = vadd.f32 %v2923_v57, %v2922_v35  ;;  %v11648_v35 = vrot.slane %v9965_v5, 4 }
 0x2c3   :  { %4448 = vst.msk [vmem:[%s11638_s1 + $0x6b0] sm:$0x7] %vm336_vm1, %v4128_v22  ;;  %v2933_v41 = vadd.f32 %v2932_v28, %v2931_v52  ;;  %v1520_v6 = vsub.f32 %v9611_v43, %v9975_v46  ;;  %v4773_v34 = vadd.f32 -192.0, %v3489_v42  ;;  %v4774_v56 = vadd.f32 -192.0, %v3490_v17  ;;  %v10088_v17 = vld [vmem:[%s11637_s0 + $0x7d8] sm:$0xff] }
 0x2c4   :  { %v4775_v38 = vadd.f32 -192.0, %v3491_v16  ;;  %v4776_v29 = vadd.f32 -192.0, %v3492_v19  ;;  %v4777_v4 = vadd.f32 -192.0, %v3493_v25  ;;  %5426 = vrcp.f32 %v2924_v36 }
 0x2c5   :  { %v2934_v32 = vrot.slane %v2933_v41, 4  ;;  %v1521_v23 = vsub.f32 %v9616_v51, %v9975_v46  ;;  %v4129_v9 = vmax.f32 %v4773_v34, 0.0  ;;  %v4130_v14 = vmax.f32 %v4774_v56, 0.0 }
 0x2c6   :  { %v4131_v48 = vmax.f32 %v4775_v38, 0.0  ;;  %v4132_v0 = vmax.f32 %v4776_v29, 0.0  ;;  %v4133_v31 = vmax.f32 %v4777_v4, 0.0  ;;  %v1522_v52 = vsub.f32 %v9692_v37, %v9975_v46 }
 0x2c7   :  { %v2935_v57 = vadd.f32 %v2934_v32, %v2933_v41  ;;  %v1523_v43 = vsub.f32 %v9701_v3, %v9975_v46  ;;  %4449 = vst.msk [vmem:[%s11638_s1 + $0x6b8] sm:$0xff] %vm328_vm0, %v4129_v9  ;;  %4450 = vst.msk [vmem:[%s11638_s1 + $0x6c0] sm:$0xff] %vm328_vm0, %v4130_v14  ;;  %v1524_v51 = vsub.f32 %v9716_v30, %v9975_v46  ;;  %v2070_v37 = vmul.f32 1.442695, %v1520_v6 }
 0x2c8   :  { %4451 = vst.msk [vmem:[%s11638_s1 + $0x6c8] sm:$0xff] %vm328_vm0, %v4131_v48  ;;  %4452 = vst.msk [vmem:[%s11638_s1 + $0x6d0] sm:$0xff] %vm328_vm0, %v4132_v0  ;;  %v2072_v3 = vmul.f32 1.442695, %v1521_v23  ;;  %v1045_v1 = vmax.f32 %v9965_v5, %v11648_v35  ;;  %v2074_v20 = vmul.f32 1.442695, %v1522_v52  ;;  %v11649_v30 = vmax.f32 %v9967_v61, %v9959_v53 }
 0x2c9   :  { %4453 = vst.msk [vmem:[%s11638_s1 + $0x6d8] sm:$0x7] %vm336_vm1, %v4133_v31  ;;  %v2936_v47 = vrot.slane %v2935_v57, 2  ;;  %v2076_v45 = vmul.f32 1.442695, %v1523_v43  ;;  %v10081_v5 = vld [vmem:[%s11637_s0 + $0x7d0] sm:$0xff]  ;;  %5428 = vpow2.f32 %v2070_v37  ;;  %v1067_v42 = vmax.f32 %v9971_v63, %v9979_v58 }
 0x2ca   :  { %v1058_v46 = vmax.f32 %v11649_v30, %v9963_v10  ;;  %v2078_v22 = vmul.f32 1.442695, %v1524_v51  ;;  %v1046_v28 = vrot.slane %v1045_v1, 2  ;;  %5430 = vpow2.f32 %v2072_v3  ;;  %v10100_v63 = vld [vmem:[%s11637_s0 + $0x7e0] sm:$0xff]  ;;  %v10105_v58 = vld [vmem:[%s11637_s0 + $0x7e8] sm:$0xff] }
 0x2cb   :  { %v2937_v16 = vadd.f32 %v2936_v47, %v2935_v57  ;;  %v10092_v10 = vsel %vm336_vm1, %v10068_v2, -inf  ;;  %5432 = vpow2.f32 %v2074_v20  ;;  %v10095_v19 = vmax.f32 %v1067_v42, %v9983_v8 }
 0x2cc   :  { %v1059_v53 = vrot.slane %v1058_v46, 4  ;;  %v1047_v61 = vmax.f32 %v1045_v1, %v1046_v28  ;;  %v10109_v25 = vsel %vm328_vm0, %v10081_v5, -inf  ;;  %5434 = vpow2.f32 %v2076_v45 }
 0x2cd   :  { %v2938_v36 = vrot.slane %v2937_v16, 1  ;;  %v10113_v8 = vsel %vm328_vm0, %v10088_v17, -inf  ;;  %5436 = vpow2.f32 %v2078_v22  ;;  %v1071_v34 = vmax.f32 %v10095_v19, %v9987_v11 }
 0x2ce   :  { %v1060_v41 = vmax.f32 %v1058_v46, %v1059_v53  ;;  %v1048_v6 = vrot.slane %v1047_v61, 1  ;;  %v1082_v56 = vmax.f32 %v10109_v25, %v10113_v8  ;;  %v5427_v38 = vpop.eup %5426  ;;  %v10121_v32 = vsel %vm328_vm0, %v10100_v63, -inf  ;;  %v10228_v25 = vld [vmem:[%s11637_s0 + $0x7f8] sm:$0xff] }
 0x2cf   :  { %v2939_v29 = vadd.f32 %v2938_v36, %v2937_v16  ;;  %v10125_v23 = vsel %vm328_vm0, %v10105_v58, -inf  ;;  %v3494_v9 = vmul.f32 %v5427_v38, %v9837_v33  ;;  %v3495_v14 = vmul.f32 %v5427_v38, %v9839_v49 }
 0x2d0   :  { %v1061_v4 = vrot.slane %v1060_v41, 2  ;;  %v3496_v11 = vmul.f32 %v5427_v38, %v9843_v62  ;;  %v3497_v48 = vmul.f32 %v5427_v38, %v9863_v26  ;;  %v3498_v0 = vmul.f32 %v5427_v38, %v9881_v7 }
 0x2d1   :  { %5438 = vrcp.f32 %v2939_v29  ;;  %v1049_v31 = vmax.f32 %v1047_v61, %v1048_v6  ;;  %v4778_v52 = vadd.f32 -192.0, %v3494_v9  ;;  %v4779_v43 = vadd.f32 -192.0, %v3495_v14 }
 0x2d2   :  { %v1062_v57 = vmax.f32 %v1060_v41, %v1061_v4  ;;  %v4780_v51 = vadd.f32 -192.0, %v3496_v11  ;;  %v4781_v37 = vadd.f32 -192.0, %v3497_v48  ;;  %v4782_v3 = vadd.f32 -192.0, %v3498_v0 }
 0x2d3   :  { %v1525_v35 = vsub.f32 %v9721_v12, %v1049_v31  ;;  %v1526_v33 = vsub.f32 %v9726_v40, %v1049_v31  ;;  %v1527_v49 = vsub.f32 %v9874_v54, %v1049_v31  ;;  %v10135_v1 = vpop.eup %5428  ;;  %v4134_v62 = vmax.f32 %v4778_v52, 0.0 }
 0x2d4   :  { %v4135_v26 = vmax.f32 %v4779_v43, 0.0  ;;  %v4136_v47 = vmax.f32 %v4780_v51, 0.0  ;;  %v4137_v7 = vmax.f32 %v4781_v37, 0.0  ;;  %v10137_v20 = vpop.eup %5430  ;;  %v4138_v45 = vmax.f32 %v4782_v3, 0.0 }
 0x2d5   :  { %v2940_v30 = vsel %vm328_vm0, %v10135_v1, 0.0  ;;  %v1528_v46 = vsub.f32 %v9879_v55, %v1049_v31  ;;  %v1529_v12 = vsub.f32 %v9889_v15, %v1049_v31  ;;  %v10143_v22 = vpop.eup %5432  ;;  %4454 = vst.msk [vmem:[%s11638_s1 + $0x6e0] sm:$0xff] %vm328_vm0, %v4134_v62  ;;  %v2941_v40 = vsel %vm328_vm0, %v10137_v20, 0.0 }
 0x2d6   :  { %4455 = vst.msk [vmem:[%s11638_s1 + $0x6e8] sm:$0xff] %vm328_vm0, %v4135_v26  ;;  %4456 = vst.msk [vmem:[%s11638_s1 + $0x6f0] sm:$0xff] %vm328_vm0, %v4136_v47  ;;  %v2080_v54 = vmul.f32 1.442695, %v1525_v35  ;;  %v2082_v55 = vmul.f32 1.442695, %v1526_v33  ;;  %v10163_v28 = vpop.eup %5434  ;;  %v2942_v42 = vadd.f32 %v2941_v40, %v2940_v30  ;;  %v1073_v4 = vmax.f32 %v1071_v34, %v10092_v10 }
 0x2d7   :  { %4457 = vst.msk [vmem:[%s11638_s1 + $0x6f8] sm:$0xff] %vm328_vm0, %v4137_v7  ;;  %v1063_v15 = vrot.slane %v1062_v57, 1  ;;  %v2943_v16 = vsel %vm328_vm0, %v10143_v22, 0.0  ;;  %v2084_v53 = vmul.f32 1.442695, %v1527_v49  ;;  %v10171_v19 = vpop.eup %5436  ;;  %v2945_v36 = vsel %vm328_vm0, %v10163_v28, 0.0 }
 0x2d8   :  { %4458 = vst.msk [vmem:[%s11638_s1 + $0x700] sm:$0x7] %vm336_vm1, %v4138_v45  ;;  %v2086_v61 = vmul.f32 1.442695, %v1528_v46  ;;  %5440 = vpow2.f32 %v2080_v54  ;;  %v2088_v41 = vmul.f32 1.442695, %v1529_v12  ;;  %v2944_v38 = vadd.f32 %v2943_v16, %v2942_v42 }
 0x2d9   :  { %v1064_v6 = vmax.f32 %v1062_v57, %v1063_v15  ;;  %v2947_v29 = vsel %vm336_vm1, %v10171_v19, 0.0  ;;  %5442 = vpow2.f32 %v2082_v55  ;;  %v1074_v30 = vrot.slane %v1073_v4, 4  ;;  %v10238_v42 = vld [vmem:[%s11637_s0 + $0x800] sm:$0xff]  ;;  %v10243_v16 = vld [vmem:[%s11637_s0 + $0x808] sm:$0xff] }
 0x2da   :  { %5444 = vpow2.f32 %v2084_v53  ;;  %v2946_v0 = vadd.f32 %v2945_v36, %v2944_v38  ;;  %v1084_v46 = vmax.f32 %v1082_v56, %v10121_v32 }
 0x2db   :  { %v1530_v9 = vsub.f32 %v9896_v18, %v1064_v6  ;;  %v1531_v14 = vsub.f32 %v9901_v60, %v1064_v6  ;;  %v1532_v11 = vsub.f32 %v9917_v44, %v1064_v6  ;;  %v5439_v48 = vpop.eup %5438  ;;  %5446 = vpow2.f32 %v2086_v61 }
 0x2dc   :  { %v1533_v31 = vsub.f32 %v9922_v21, %v1064_v6  ;;  %v1534_v57 = vsub.f32 %v9927_v27, %v1064_v6  ;;  %v3499_v52 = vmul.f32 %v5439_v48, %v9907_v59  ;;  %v3500_v43 = vmul.f32 %v5439_v48, %v9973_v39 }
 0x2dd   :  { %v3501_v10 = vmul.f32 %v5439_v48, %v9994_v13  ;;  %v3502_v34 = vmul.f32 %v5439_v48, %v10000_v50  ;;  %v3503_v18 = vmul.f32 %v5439_v48, %v10005_v24  ;;  %v2948_v60 = vadd.f32 %v2947_v29, %v2946_v0  ;;  %v10191_v13 = vld [vmem:[%s11637_s0 + $0x7f0] sm:$0x7] }
 0x2de   :  { %5448 = vpow2.f32 %v2088_v41  ;;  %v2090_v44 = vmul.f32 1.442695, %v1530_v9  ;;  %v4783_v51 = vadd.f32 -192.0, %v3499_v52  ;;  %v4784_v37 = vadd.f32 -192.0, %v3500_v43  ;;  %v10254_v29 = vld [vmem:[%s11637_s0 + $0x810] sm:$0xff] }
 0x2df   :  { %v4785_v3 = vadd.f32 -192.0, %v3501_v10  ;;  %v4786_v35 = vadd.f32 -192.0, %v3502_v34  ;;  %v4787_v21 = vadd.f32 -192.0, %v3503_v18  ;;  %v2949_v33 = vrot.slane %v2948_v60, 4  ;;  %v10274_v34 = vld [vmem:[%s11637_s0 + $0x820] sm:$0xff]  ;;  %v10279_v18 = vld [vmem:[%s11637_s0 + $0x828] sm:$0xff] }
 0x2e0   :  { %5450 = vpow2.f32 %v2090_v44  ;;  %v2092_v27 = vmul.f32 1.442695, %v1531_v14  ;;  %v4139_v59 = vmax.f32 %v4783_v51, 0.0  ;;  %v4140_v49 = vmax.f32 %v4784_v37, 0.0 }
 0x2e1   :  { %v4141_v39 = vmax.f32 %v4785_v3, 0.0  ;;  %v4142_v62 = vmax.f32 %v4786_v35, 0.0  ;;  %v4143_v50 = vmax.f32 %v4787_v21, 0.0  ;;  %v2950_v24 = vadd.f32 %v2949_v33, %v2948_v60 }
 0x2e2   :  { %5452 = vpow2.f32 %v2092_v27  ;;  %v2094_v26 = vmul.f32 1.442695, %v1532_v11  ;;  %v10193_v47 = vpop.eup %5440  ;;  %4459 = vst.msk [vmem:[%s11638_s1 + $0x708] sm:$0xff] %vm328_vm0, %v4139_v59  ;;  %4460 = vst.msk [vmem:[%s11638_s1 + $0x710] sm:$0xff] %vm328_vm0, %v4140_v49  ;;  %v2096_v7 = vmul.f32 1.442695, %v1533_v31  ;;  %v1075_v32 = vmax.f32 %v1073_v4, %v1074_v30 }
 0x2e3   :  { %4461 = vst.msk [vmem:[%s11638_s1 + $0x718] sm:$0xff] %vm328_vm0, %v4141_v39  ;;  %4462 = vst.msk [vmem:[%s11638_s1 + $0x720] sm:$0xff] %vm328_vm0, %v4142_v62  ;;  %v2098_v45 = vmul.f32 1.442695, %v1534_v57  ;;  %v10215_v12 = vpop.eup %5442  ;;  %v2951_v40 = vrot.slane %v2950_v24, 2  ;;  %v2955_v54 = vsel %vm328_vm0, %v10193_v47, 0.0  ;;  %v1086_v15 = vmax.f32 %v1084_v46, %v10125_v23 }
 0x2e4   :  { %4463 = vst.msk [vmem:[%s11638_s1 + $0x728] sm:$0x7] %vm336_vm1, %v4143_v50  ;;  %5454 = vpow2.f32 %v2094_v26  ;;  %v1087_v55 = vsel %vm336_vm1, %v10191_v13, -inf  ;;  %v10230_v8 = vpop.eup %5444  ;;  %v2956_v56 = vsel %vm328_vm0, %v10215_v12, 0.0  ;;  %v1076_v6 = vrot.slane %v1075_v32, 2  ;;  %v10292_v59 = vld [vmem:[%s11637_s0 + $0x830] sm:$0xff] }
 0x2e5   :  { %5456 = vpow2.f32 %v2096_v7  ;;  %v10245_v53 = vpop.eup %5446  ;;  %v2952_v61 = vadd.f32 %v2951_v40, %v2950_v24  ;;  %v2957_v36 = vadd.f32 %v2956_v56, %v2955_v54  ;;  %v2958_v41 = vsel %vm328_vm0, %v10230_v8, 0.0  ;;  %v10259_v4 = vld [vmem:[%s11637_s0 + $0x818] sm:$0x7] }
 0x2e6   :  { %5458 = vpow2.f32 %v2098_v45  ;;  %v2960_v23 = vsel %vm328_vm0, %v10245_v53, 0.0  ;;  %v1088_v38 = vmax.f32 %v1086_v15, %v1087_v55  ;;  %v1095_v9 = vsel %vm328_vm0, %v10228_v25, -inf  ;;  %v11650_v15 = vld [vmem:[#allocation2_spill] sm:$0xff] }
 0x2e7   :  { %v2953_v11 = vrot.slane %v2952_v61, 1  ;;  %v2959_v48 = vadd.f32 %v2958_v41, %v2957_v36  ;;  %v1096_v0 = vsel %vm328_vm0, %v10238_v42, -inf  ;;  %v1098_v31 = vsel %vm328_vm0, %v10243_v16, -inf  ;;  %v11651_v36 = vld [vmem:[#allocation3_spill] sm:$0xff] }
 0x2e8   :  { %v10263_v14 = vpop.eup %5448  ;;  %v1077_v52 = vmax.f32 %v1075_v32, %v1076_v6  ;;  %v1089_v43 = vrot.slane %v1088_v38, 4  ;;  %v1097_v10 = vmax.f32 %v1095_v9, %v1096_v0  ;;  %v1100_v37 = vsel %vm328_vm0, %v10254_v29, -inf  ;;  %v11653_v0 = vld [vmem:[#allocation5_spill] sm:$0xff] }
 0x2e9   :  { %v2962_v57 = vsel %vm336_vm1, %v10263_v14, 0.0  ;;  %v2954_v44 = vadd.f32 %v2953_v11, %v2952_v61  ;;  %v2961_v51 = vadd.f32 %v2960_v23, %v2959_v48  ;;  %v1102_v3 = vsel %vm336_vm1, %v10259_v4, -inf  ;;  %v11652_v23 = vld [vmem:[#allocation4_spill] sm:$0xff] }
 0x2ea   :  { %v10281_v60 = vpop.eup %5450  ;;  %v1078_v21 = vrot.slane %v1077_v52, 1  ;;  %v1090_v33 = vmax.f32 %v1088_v38, %v1089_v43  ;;  %v1099_v27 = vmax.f32 %v1097_v10, %v1098_v31  ;;  %v1110_v62 = vsel %vm328_vm0, %v10274_v34, -inf }
 0x2eb   :  { %v2970_v35 = vsel %vm328_vm0, %v10281_v60, 0.0  ;;  %5460 = vrcp.f32 %v2954_v44  ;;  %v2963_v39 = vadd.f32 %v2962_v57, %v2961_v51  ;;  %v1111_v50 = vsel %vm328_vm0, %v10279_v18, -inf }
 0x2ec   :  { %v10294_v49 = vpop.eup %5452  ;;  %v1079_v26 = vmax.f32 %v1077_v52, %v1078_v21  ;;  %v1091_v7 = vrot.slane %v1090_v33, 2  ;;  %v1101_v45 = vmax.f32 %v1099_v27, %v1100_v37  ;;  %v1112_v54 = vmax.f32 %v1110_v62, %v1111_v50  ;;  %v10324_v21 = vld [vmem:[%s11637_s0 + $0x838] sm:$0xff] }
 0x2ed   :  { %v2971_v24 = vsel %vm328_vm0, %v10294_v49, 0.0  ;;  %v2964_v46 = vrot.slane %v2963_v39, 4  ;;  %v1113_v55 = vsel %vm328_vm0, %v10292_v59, -inf }
 0x2ee   :  { %v10302_v30 = vpop.eup %5454  ;;  %v2972_v40 = vadd.f32 %v2971_v24, %v2970_v35  ;;  %v1535_v61 = vsub.f32 %v11650_v15, %v1079_v26  ;;  %v1536_v41 = vsub.f32 %v11651_v36, %v1079_v26  ;;  %v1537_v6 = vsub.f32 %v11652_v23, %v1079_v26 }
 0x2ef   :  { %v10306_v56 = vpop.eup %5456  ;;  %v2973_v32 = vsel %vm328_vm0, %v10302_v30, 0.0  ;;  %v2965_v9 = vadd.f32 %v2964_v46, %v2963_v39  ;;  %v1538_v31 = vsub.f32 %v11653_v0, %v1079_v26  ;;  %v1539_v52 = vsub.f32 %v10068_v2, %v1079_v26 }
 0x2f0   :  { %v10313_v38 = vpop.eup %5458  ;;  %v2974_v11 = vadd.f32 %v2973_v32, %v2972_v40  ;;  %v2975_v48 = vsel %vm328_vm0, %v10306_v56, 0.0  ;;  %v2100_v43 = vmul.f32 1.442695, %v1535_v61  ;;  %v2102_v10 = vmul.f32 1.442695, %v1536_v41 }
 0x2f1   :  { %v2977_v57 = vsel %vm336_vm1, %v10313_v38, 0.0  ;;  %v2966_v44 = vrot.slane %v2965_v9, 2  ;;  %v2104_v37 = vmul.f32 1.442695, %v1537_v6  ;;  %v2106_v35 = vmul.f32 1.442695, %v1538_v31 }
 0x2f2   :  { %v2976_v51 = vadd.f32 %v2975_v48, %v2974_v11  ;;  %5462 = vpow2.f32 %v2100_v43  ;;  %v2108_v27 = vmul.f32 1.442695, %v1539_v52  ;;  %v1092_v39 = vmax.f32 %v1090_v33, %v1091_v7 }
 0x2f3   :  { %v1103_v62 = vmax.f32 %v1101_v45, %v1102_v3  ;;  %v2967_v50 = vadd.f32 %v2966_v44, %v2965_v9  ;;  %5464 = vpow2.f32 %v2102_v10  ;;  %v10326_v46 = vmax.f32 %v1112_v54, %v1113_v55 }
 0x2f4   :  { %v2978_v24 = vadd.f32 %v2977_v57, %v2976_v51  ;;  %5466 = vpow2.f32 %v2104_v37  ;;  %v1093_v2 = vrot.slane %v1092_v39, 1  ;;  %v10330_v40 = vsel %vm328_vm0, %v10324_v21, -inf  ;;  %v10365_v37 = vld [vmem:[%s11637_s0 + $0x840] sm:$0x7] }
 0x2f5   :  { %v1104_v26 = vrot.slane %v1103_v62, 4  ;;  %v5461_v32 = vpop.eup %5460  ;;  %v2968_v15 = vrot.slane %v2967_v50, 1  ;;  %5468 = vpow2.f32 %v2106_v35  ;;  %v1116_v33 = vmax.f32 %v10326_v46, %v10330_v40  ;;  %v10370_v35 = vld [vmem:[%s11637_s0 + $0x848] sm:$0xff] }
 0x2f6   :  { %v2979_v61 = vrot.slane %v2978_v24, 4  ;;  %v3504_v3 = vmul.f32 %v5461_v32, %v10135_v1  ;;  %v3505_v7 = vmul.f32 %v5461_v32, %v10137_v20  ;;  %v3506_v45 = vmul.f32 %v5461_v32, %v10143_v22 }
 0x2f7   :  { %v3507_v54 = vmul.f32 %v5461_v32, %v10163_v28  ;;  %v3508_v55 = vmul.f32 %v5461_v32, %v10171_v19  ;;  %v2969_v36 = vadd.f32 %v2968_v15, %v2967_v50  ;;  %5470 = vpow2.f32 %v2108_v27 }
 0x2f8   :  { %v2980_v41 = vadd.f32 %v2979_v61, %v2978_v24  ;;  %v4788_v23 = vadd.f32 -192.0, %v3504_v3  ;;  %v4789_v6 = vadd.f32 -192.0, %v3505_v7  ;;  %v4790_v9 = vadd.f32 -192.0, %v3506_v45 }
 0x2f9   :  { %v4791_v11 = vadd.f32 -192.0, %v3507_v54  ;;  %v4792_v48 = vadd.f32 -192.0, %v3508_v55  ;;  %5472 = vrcp.f32 %v2969_v36  ;;  %v1094_v31 = vmax.f32 %v1092_v39, %v1093_v2  ;;  %v10393_v55 = vld [vmem:[%s11637_s0 + $0x850] sm:$0xff]  ;;  %v10398_v36 = vld [vmem:[%s11637_s0 + $0x858] sm:$0xff] }
 0x2fa   :  { %v2981_v0 = vrot.slane %v2980_v41, 2  ;;  %v4144_v1 = vmax.f32 %v4788_v23, 0.0  ;;  %v4145_v57 = vmax.f32 %v4789_v6, 0.0  ;;  %v4146_v20 = vmax.f32 %v4790_v9, 0.0 }
 0x2fb   :  { %v4147_v52 = vmax.f32 %v4791_v11, 0.0  ;;  %v4148_v22 = vmax.f32 %v4792_v48, 0.0  ;;  %v1540_v28 = vsub.f32 %v10081_v5, %v1094_v31  ;;  %v1541_v19 = vsub.f32 %v10088_v17, %v1094_v31 }
 0x2fc   :  { %v2982_v43 = vadd.f32 %v2981_v0, %v2980_v41  ;;  %v10341_v10 = vpop.eup %5462  ;;  %4464 = vst.msk [vmem:[%s11638_s1 + $0x730] sm:$0xff] %vm328_vm0, %v4144_v1  ;;  %4465 = vst.msk [vmem:[%s11638_s1 + $0x738] sm:$0xff] %vm328_vm0, %v4145_v57  ;;  %v1542_v5 = vsub.f32 %v10100_v63, %v1094_v31  ;;  %v1543_v17 = vsub.f32 %v10105_v58, %v1094_v31  ;;  %v1117_v6 = vsel %vm336_vm1, %v10365_v37, -inf }
 0x2fd   :  { %4466 = vst.msk [vmem:[%s11638_s1 + $0x740] sm:$0xff] %vm328_vm0, %v4146_v20  ;;  %4467 = vst.msk [vmem:[%s11638_s1 + $0x748] sm:$0xff] %vm328_vm0, %v4147_v52  ;;  %v1544_v44 = vsub.f32 %v10191_v13, %v1094_v31  ;;  %v1105_v51 = vmax.f32 %v1103_v62, %v1104_v26  ;;  %v10372_v27 = vpop.eup %5464  ;;  %v2985_v58 = vsel %vm328_vm0, %v10341_v10, 0.0  ;;  %v2110_v13 = vmul.f32 1.442695, %v1540_v28 }
 0x2fe   :  { %4468 = vst.msk [vmem:[%s11638_s1 + $0x750] sm:$0x7] %vm336_vm1, %v4148_v22  ;;  %v2983_v63 = vrot.slane %v2982_v43, 1  ;;  %v2112_v39 = vmul.f32 1.442695, %v1541_v19  ;;  %v10380_v62 = vpop.eup %5466  ;;  %v2986_v50 = vsel %vm328_vm0, %v10372_v27, 0.0  ;;  %v10413_v0 = vmax.f32 %v1116_v33, %v1117_v6 }
 0x2ff   :  { %v2114_v24 = vmul.f32 1.442695, %v1542_v5  ;;  %v2116_v2 = vmul.f32 1.442695, %v1543_v17  ;;  %v1106_v26 = vrot.slane %v1105_v51, 2  ;;  %v10384_v32 = vpop.eup %5468  ;;  %v2987_v61 = vadd.f32 %v2986_v50, %v2985_v58 }
 0x300   :  { %v2984_v15 = vadd.f32 %v2983_v63, %v2982_v43  ;;  %v2988_v3 = vsel %vm328_vm0, %v10380_v62, 0.0  ;;  %5474 = vpow2.f32 %v2110_v13  ;;  %v2990_v7 = vsel %vm328_vm0, %v10384_v32, 0.0 }
 0x301   :  { %5476 = vpow2.f32 %v2112_v39  ;;  %v2118_v45 = vmul.f32 1.442695, %v1544_v44  ;;  %v1107_v54 = vmax.f32 %v1105_v51, %v1106_v26  ;;  %v10400_v41 = vpop.eup %5470  ;;  %v2989_v23 = vadd.f32 %v2988_v3, %v2987_v61 }
 0x302   :  { %5478 = vrcp.f32 %v2984_v15  ;;  %v10406_v9 = vsel %vm328_vm0, %v10370_v35, -inf  ;;  %v2992_v11 = vsel %vm336_vm1, %v10400_v41, 0.0  ;;  %v10417_v57 = vsel %vm328_vm0, %v10393_v55, -inf }
 0x303   :  { %5480 = vpow2.f32 %v2114_v24  ;;  %v1108_v48 = vrot.slane %v1107_v54, 1  ;;  %v5473_v31 = vpop.eup %5472  ;;  %v2991_v1 = vadd.f32 %v2990_v7, %v2989_v23  ;;  %v10421_v20 = vsel %vm328_vm0, %v10398_v36, -inf }
 0x304   :  { %5482 = vpow2.f32 %v2116_v2  ;;  %v3509_v52 = vmul.f32 %v5473_v31, %v10193_v47  ;;  %v3510_v22 = vmul.f32 %v5473_v31, %v10215_v12  ;;  %v3511_v43 = vmul.f32 %v5473_v31, %v10230_v8 }
 0x305   :  { %v3512_v46 = vmul.f32 %v5473_v31, %v10245_v53  ;;  %v3513_v40 = vmul.f32 %v5473_v31, %v10263_v14  ;;  %v2993_v33 = vadd.f32 %v2992_v11, %v2991_v1  ;;  %5484 = vpow2.f32 %v2118_v45 }
 0x306   :  { %v10428_v28 = vmax.f32 %v1107_v54, %v1108_v48  ;;  %v4793_v19 = vadd.f32 -192.0, %v3509_v52  ;;  %v4794_v5 = vadd.f32 -192.0, %v3510_v22  ;;  %v4795_v17 = vadd.f32 -192.0, %v3511_v43 }
 0x307   :  { %v4796_v44 = vadd.f32 -192.0, %v3512_v46  ;;  %v4797_v51 = vadd.f32 -192.0, %v3513_v40  ;;  %v2994_v63 = vrot.slane %v2993_v33, 4 }
 0x308   :  { %v1545_v47 = vsub.f32 %v10228_v25, %v10428_v28  ;;  %v1546_v12 = vsub.f32 %v10238_v42, %v10428_v28  ;;  %v4149_v8 = vmax.f32 %v4793_v19, 0.0  ;;  %v4150_v53 = vmax.f32 %v4794_v5, 0.0 }
 0x309   :  { %v4151_v58 = vmax.f32 %v4795_v17, 0.0  ;;  %v4152_v14 = vmax.f32 %v4796_v44, 0.0  ;;  %v4153_v39 = vmax.f32 %v4797_v51, 0.0  ;;  %v2995_v50 = vadd.f32 %v2994_v63, %v2993_v33  ;;  %v10491_v51 = vld [vmem:[%s11637_s0 + $0x868] sm:$0x7] }
 0x30a   :  { %v10434_v13 = vpop.eup %5474  ;;  %v1547_v24 = vsub.f32 %v10243_v16, %v10428_v28  ;;  %v1548_v2 = vsub.f32 %v10254_v29, %v10428_v28  ;;  %4469 = vst.msk [vmem:[%s11638_s1 + $0x758] sm:$0xff] %vm328_vm0, %v4149_v8  ;;  %4470 = vst.msk [vmem:[%s11638_s1 + $0x760] sm:$0xff] %vm328_vm0, %v4150_v53  ;;  %v1549_v42 = vsub.f32 %v10259_v4, %v10428_v28  ;;  %v2120_v16 = vmul.f32 1.442695, %v1545_v47  ;;  %v10498_v53 = vld [vmem:[%s11637_s0 + $0x870] sm:$0xff] }
 0x30b   :  { %v10440_v26 = vpop.eup %5476  ;;  %4471 = vst.msk [vmem:[%s11638_s1 + $0x768] sm:$0xff] %vm328_vm0, %v4151_v58  ;;  %4472 = vst.msk [vmem:[%s11638_s1 + $0x770] sm:$0xff] %vm328_vm0, %v4152_v14  ;;  %v3000_v25 = vsel %vm328_vm0, %v10434_v13, 0.0  ;;  %v2122_v29 = vmul.f32 1.442695, %v1546_v12  ;;  %v2996_v61 = vrot.slane %v2995_v50, 2 }
 0x30c   :  { %v5479_v15 = vpop.eup %5478  ;;  %4473 = vst.msk [vmem:[%s11638_s1 + $0x778] sm:$0x7] %vm336_vm1, %v4153_v39  ;;  %v3001_v3 = vsel %vm328_vm0, %v10440_v26, 0.0  ;;  %v2124_v7 = vmul.f32 1.442695, %v1547_v24  ;;  %5486 = vpow2.f32 %v2120_v16  ;;  %v1119_v14 = vrot.slane %v10413_v0, 4 }
 0x30d   :  { %v2126_v45 = vmul.f32 1.442695, %v1548_v2  ;;  %v10468_v54 = vpop.eup %5480  ;;  %v3514_v23 = vmul.f32 %v5479_v15, %v10281_v60  ;;  %v3515_v4 = vmul.f32 %v5479_v15, %v10294_v49  ;;  %v3516_v6 = vmul.f32 %v5479_v15, %v10302_v30  ;;  %v10527_v24 = vld [vmem:[%s11637_s0 + $0x880] sm:$0xff]  ;;  %v10542_v16 = vld [vmem:[%s11637_s0 + $0x888] sm:$0xff] }
 0x30e   :  { %v3517_v11 = vmul.f32 %v5479_v15, %v10306_v56  ;;  %v10474_v48 = vpop.eup %5482  ;;  %v3518_v31 = vmul.f32 %v5479_v15, %v10313_v38  ;;  %v2997_v1 = vadd.f32 %v2996_v61, %v2995_v50  ;;  %v3002_v52 = vadd.f32 %v3001_v3, %v3000_v25  ;;  %v10486_v38 = vld [vmem:[%s11637_s0 + $0x860] sm:$0xff]  ;;  %v10522_v50 = vld [vmem:[%s11637_s0 + $0x878] sm:$0xff]  ;;  %v10547_v15 = vld [vmem:[%s11637_s0 + $0x890] sm:$0x7] }
 0x30f   :  { %v3003_v22 = vsel %vm328_vm0, %v10468_v54, 0.0  ;;  %v4798_v43 = vadd.f32 -192.0, %v3514_v23  ;;  %v4799_v46 = vadd.f32 -192.0, %v3515_v4  ;;  %v4800_v40 = vadd.f32 -192.0, %v3516_v6  ;;  %v10479_v60 = vpop.eup %5484 }
 0x310   :  { %v4801_v33 = vadd.f32 -192.0, %v3517_v11  ;;  %v4802_v49 = vadd.f32 -192.0, %v3518_v31  ;;  %v2998_v28 = vrot.slane %v2997_v1, 1  ;;  %v3004_v30 = vadd.f32 %v3003_v22, %v3002_v52  ;;  %v10563_v11 = vld [vmem:[%s11637_s0 + $0x8a0] sm:$0xff]  ;;  %v10573_v31 = vld [vmem:[%s11637_s0 + $0x8b0] sm:$0xff] }
 0x311   :  { %v3005_v56 = vsel %vm328_vm0, %v10474_v48, 0.0  ;;  %v4154_v19 = vmax.f32 %v4798_v43, 0.0  ;;  %v4155_v5 = vmax.f32 %v4799_v46, 0.0  ;;  %v4156_v17 = vmax.f32 %v4800_v40, 0.0  ;;  %v10582_v40 = vld [vmem:[%s11637_s0 + $0x8b8] sm:$0x7] }
 0x312   :  { %v4157_v44 = vmax.f32 %v4801_v33, 0.0  ;;  %v4158_v63 = vmax.f32 %v4802_v49, 0.0  ;;  %v2999_v47 = vadd.f32 %v2998_v28, %v2997_v1  ;;  %v3006_v12 = vadd.f32 %v3005_v56, %v3004_v30  ;;  %v10589_v49 = vld [vmem:[%s11637_s0 + $0x8c0] sm:$0xff]  ;;  %v10594_v28 = vld [vmem:[%s11637_s0 + $0x8c8] sm:$0xff] }
 0x313   :  { %v3007_v8 = vsel %vm336_vm1, %v10479_v60, 0.0  ;;  %4474 = vst.msk [vmem:[%s11638_s1 + $0x780] sm:$0xff] %vm328_vm0, %v4154_v19  ;;  %4475 = vst.msk [vmem:[%s11638_s1 + $0x788] sm:$0xff] %vm328_vm0, %v4155_v5  ;;  %v2128_v58 = vmul.f32 1.442695, %v1549_v42  ;;  %v1127_v39 = vmax.f32 %v10406_v9, %v10417_v57  ;;  %v1130_v9 = vsel %vm328_vm0, %v10486_v38, -inf }
 0x314   :  { %4476 = vst.msk [vmem:[%s11638_s1 + $0x790] sm:$0xff] %vm328_vm0, %v4156_v17  ;;  %4477 = vst.msk [vmem:[%s11638_s1 + $0x798] sm:$0xff] %vm328_vm0, %v4157_v44  ;;  %5488 = vrcp.f32 %v2999_v47  ;;  %v3008_v2 = vadd.f32 %v3007_v8, %v3006_v12  ;;  %v1132_v57 = vsel %vm336_vm1, %v10491_v51, -inf  ;;  %v1120_v25 = vmax.f32 %v10413_v0, %v1119_v14  ;;  %v10607_v12 = vld [vmem:[%s11637_s0 + $0x8d0] sm:$0xff] }
 0x315   :  { %4478 = vst.msk [vmem:[%s11638_s1 + $0x7a0] sm:$0x7] %vm336_vm1, %v4158_v63  ;;  %5490 = vpow2.f32 %v2122_v29  ;;  %v1129_v42 = vmax.f32 %v1127_v39, %v10421_v20  ;;  %v1140_v61 = vsel %vm328_vm0, %v10498_v53, -inf  ;;  %v1141_v0 = vsel %vm328_vm0, %v10522_v50, -inf  ;;  %v10558_v29 = vld [vmem:[%s11637_s0 + $0x898] sm:$0xff] }
 0x316   :  { %v3009_v3 = vrot.slane %v3008_v2, 4  ;;  %5492 = vpow2.f32 %v2124_v7  ;;  %v1143_v20 = vsel %vm328_vm0, %v10527_v24, -inf  ;;  %v1121_v23 = vrot.slane %v1120_v25, 2  ;;  %v10568_v7 = vld [vmem:[%s11637_s0 + $0x8a8] sm:$0xff] }
 0x317   :  { %5494 = vpow2.f32 %v2126_v45  ;;  %v1131_v4 = vmax.f32 %v1129_v42, %v1130_v9  ;;  %v1142_v6 = vmax.f32 %v1140_v61, %v1141_v0  ;;  %v1145_v45 = vsel %vm328_vm0, %v10542_v16, -inf }
 0x318   :  { %v3010_v1 = vadd.f32 %v3009_v3, %v3008_v2  ;;  %5496 = vpow2.f32 %v2128_v58  ;;  %v1147_v52 = vsel %vm336_vm1, %v10547_v15, -inf  ;;  %v1122_v22 = vmax.f32 %v1120_v25, %v1121_v23  ;;  %v10621_v2 = vpop.eup %5486 }
 0x319   :  { %v1133_v43 = vmax.f32 %v1131_v4, %v1132_v57  ;;  %v1144_v46 = vmax.f32 %v1142_v6, %v1143_v20  ;;  %v1155_v33 = vsel %vm328_vm0, %v10558_v29, -inf  ;;  %v1156_v56 = vsel %vm328_vm0, %v10563_v11, -inf }
 0x31a   :  { %v3011_v30 = vrot.slane %v3010_v1, 2  ;;  %v1158_v19 = vsel %vm328_vm0, %v10568_v7, -inf  ;;  %v10602_v5 = vsel %vm328_vm0, %v10573_v31, -inf  ;;  %v1123_v17 = vrot.slane %v1122_v22, 1 }
 0x31b   :  { %v1134_v44 = vrot.slane %v1133_v43, 4  ;;  %v1146_v63 = vmax.f32 %v1144_v46, %v1145_v45  ;;  %v1157_v47 = vmax.f32 %v1155_v33, %v1156_v56  ;;  %v10611_v58 = vsel %vm336_vm1, %v10582_v40, -inf }
 0x31c   :  { %v3012_v8 = vadd.f32 %v3011_v30, %v3010_v1  ;;  %v10615_v14 = vsel %vm328_vm0, %v10589_v49, -inf  ;;  %v10619_v39 = vsel %vm328_vm0, %v10594_v28, -inf  ;;  %v1124_v9 = vmax.f32 %v1122_v22, %v1123_v17 }
 0x31d   :  { %v1135_v57 = vmax.f32 %v1133_v43, %v1134_v44  ;;  %v1148_v25 = vmax.f32 %v1146_v63, %v1147_v52  ;;  %v1159_v42 = vmax.f32 %v1157_v47, %v1158_v19  ;;  %v3015_v0 = vsel %vm328_vm0, %v10621_v2, 0.0 }
 0x31e   :  { %v5489_v61 = vpop.eup %5488  ;;  %v3013_v3 = vrot.slane %v3012_v8, 1  ;;  %v1172_v20 = vmax.f32 %v10615_v14, %v10619_v39  ;;  %v1173_v23 = vsel %vm328_vm0, %v10607_v12, -inf  ;;  %v1550_v30 = vsub.f32 %v10274_v34, %v1124_v9 }
 0x31f   :  { %v10629_v4 = vpop.eup %5490  ;;  %v3519_v6 = vmul.f32 %v5489_v61, %v10341_v10  ;;  %v3520_v1 = vmul.f32 %v5489_v61, %v10372_v27  ;;  %v3521_v45 = vmul.f32 %v5489_v61, %v10380_v62  ;;  %v3522_v52 = vmul.f32 %v5489_v61, %v10384_v32 }
 0x320   :  { %v10635_v22 = vpop.eup %5492  ;;  %v3523_v43 = vmul.f32 %v5489_v61, %v10400_v41  ;;  %v3014_v46 = vadd.f32 %v3013_v3, %v3012_v8  ;;  %v3016_v33 = vsel %vm328_vm0, %v10629_v4, 0.0 }
 0x321   :  { %v10641_v56 = vpop.eup %5494  ;;  %v4803_v19 = vadd.f32 -192.0, %v3519_v6  ;;  %v4804_v10 = vadd.f32 -192.0, %v3520_v1  ;;  %v4805_v17 = vadd.f32 -192.0, %v3521_v45  ;;  %v4806_v27 = vadd.f32 -192.0, %v3522_v52 }
 0x322   :  { %v10643_v44 = vpop.eup %5496  ;;  %v4807_v62 = vadd.f32 -192.0, %v3523_v43  ;;  %5498 = vrcp.f32 %v3014_v46  ;;  %v3017_v32 = vadd.f32 %v3016_v33, %v3015_v0  ;;  %v3018_v41 = vsel %vm328_vm0, %v10635_v22, 0.0 }
 0x323   :  { %v4159_v63 = vmax.f32 %v4803_v19, 0.0  ;;  %v4160_v47 = vmax.f32 %v4804_v10, 0.0  ;;  %v4161_v8 = vmax.f32 %v4805_v17, 0.0  ;;  %v4162_v14 = vmax.f32 %v4806_v27, 0.0  ;;  %v10678_v19 = vld [vmem:[%s11637_s0 + $0x8d8] sm:$0xff] }
 0x324   :  { %v4163_v39 = vmax.f32 %v4807_v62, 0.0  ;;  %v3019_v34 = vadd.f32 %v3018_v41, %v3017_v32  ;;  %v3020_v61 = vsel %vm328_vm0, %v10641_v56, 0.0  ;;  %v3022_v3 = vsel %vm336_vm1, %v10643_v44, 0.0  ;;  %v10687_v62 = vld [vmem:[%s11637_s0 + $0x8e0] sm:$0x7] }
 0x325   :  { %4479 = vst.msk [vmem:[%s11638_s1 + $0x7a8] sm:$0xff] %vm328_vm0, %v4159_v63  ;;  %4480 = vst.msk [vmem:[%s11638_s1 + $0x7b0] sm:$0xff] %vm328_vm0, %v4160_v47  ;;  %v1551_v0 = vsub.f32 %v10279_v18, %v1124_v9  ;;  %v1552_v6 = vsub.f32 %v10292_v59, %v1124_v9  ;;  %v1553_v1 = vsub.f32 %v10324_v21, %v1124_v9  ;;  %v2130_v43 = vmul.f32 1.442695, %v1550_v30 }
 0x326   :  { %4481 = vst.msk [vmem:[%s11638_s1 + $0x7b8] sm:$0xff] %vm328_vm0, %v4161_v8  ;;  %4482 = vst.msk [vmem:[%s11638_s1 + $0x7c0] sm:$0xff] %vm328_vm0, %v4162_v14  ;;  %v1554_v45 = vsub.f32 %v10365_v37, %v1124_v9  ;;  %v3021_v52 = vadd.f32 %v3020_v61, %v3019_v34  ;;  %v1136_v46 = vrot.slane %v1135_v57, 2  ;;  %v1149_v33 = vrot.slane %v1148_v25, 4 }
 0x327   :  { %4483 = vst.msk [vmem:[%s11638_s1 + $0x7c8] sm:$0x7] %vm336_vm1, %v4163_v39  ;;  %v2132_v18 = vmul.f32 1.442695, %v1551_v0  ;;  %v2134_v59 = vmul.f32 1.442695, %v1552_v6  ;;  %v1161_v21 = vmax.f32 %v1159_v42, %v10602_v5  ;;  %5500 = vpow2.f32 %v2130_v43 }
 0x328   :  { %v2136_v10 = vmul.f32 1.442695, %v1553_v1  ;;  %v3023_v37 = vadd.f32 %v3022_v3, %v3021_v52  ;;  %v2138_v9 = vmul.f32 1.442695, %v1554_v45  ;;  %v1137_v17 = vmax.f32 %v1135_v57, %v1136_v46 }
 0x329   :  { %5502 = vpow2.f32 %v2132_v18  ;;  %v1150_v27 = vmax.f32 %v1148_v25, %v1149_v33  ;;  %v10682_v30 = vmax.f32 %v1161_v21, %v10611_v58  ;;  %v10689_v32 = vmax.f32 %v1172_v20, %v1173_v23 }
 0x32a   :  { %v3024_v41 = vrot.slane %v3023_v37, 4  ;;  %5504 = vpow2.f32 %v2134_v59  ;;  %v1138_v63 = vrot.slane %v1137_v17, 1  ;;  %v10693_v5 = vsel %vm328_vm0, %v10678_v19, -inf }
 0x32b   :  { %5506 = vpow2.f32 %v2136_v10  ;;  %v1151_v57 = vrot.slane %v1150_v27, 2  ;;  %v1164_v25 = vrot.slane %v10682_v30, 4  ;;  %v1176_v58 = vmax.f32 %v10689_v32, %v10693_v5 }
 0x32c   :  { %v5499_v42 = vpop.eup %5498  ;;  %v3025_v47 = vadd.f32 %v3024_v41, %v3023_v37  ;;  %5508 = vpow2.f32 %v2138_v9  ;;  %v1139_v8 = vmax.f32 %v1137_v17, %v1138_v63  ;;  %v1177_v20 = vsel %vm336_vm1, %v10687_v62, -inf }
 0x32d   :  { %v3524_v23 = vmul.f32 %v5499_v42, %v10434_v13  ;;  %v3525_v14 = vmul.f32 %v5499_v42, %v10440_v26  ;;  %v3526_v39 = vmul.f32 %v5499_v42, %v10468_v54  ;;  %v3527_v34 = vmul.f32 %v5499_v42, %v10474_v48 }
 0x32e   :  { %v3528_v61 = vmul.f32 %v5499_v42, %v10479_v60  ;;  %v3026_v3 = vrot.slane %v3025_v47, 2  ;;  %v1555_v0 = vsub.f32 %v10370_v35, %v1139_v8  ;;  %v1556_v6 = vsub.f32 %v10393_v55, %v1139_v8 }
 0x32f   :  { %v4808_v1 = vadd.f32 -192.0, %v3524_v23  ;;  %v4809_v45 = vadd.f32 -192.0, %v3525_v14  ;;  %v4810_v52 = vadd.f32 -192.0, %v3526_v39  ;;  %v4811_v43 = vadd.f32 -192.0, %v3527_v34  ;;  %v10757_v34 = vld [vmem:[%s11637_s0 + $0x8f0] sm:$0xff] }
 0x330   :  { %v4812_v46 = vadd.f32 -192.0, %v3528_v61  ;;  %v3027_v33 = vadd.f32 %v3026_v3, %v3025_v47  ;;  %v1557_v13 = vsub.f32 %v10398_v36, %v1139_v8  ;;  %v1558_v26 = vsub.f32 %v10486_v38, %v1139_v8 }
 0x331   :  { %v4164_v54 = vmax.f32 %v4808_v1, 0.0  ;;  %v4165_v18 = vmax.f32 %v4809_v45, 0.0  ;;  %v4166_v48 = vmax.f32 %v4810_v52, 0.0  ;;  %v4167_v59 = vmax.f32 %v4811_v43, 0.0  ;;  %v10709_v60 = vpop.eup %5500 }
 0x332   :  { %v4168_v10 = vmax.f32 %v4812_v46, 0.0  ;;  %v3028_v35 = vrot.slane %v3027_v33, 1  ;;  %v1559_v55 = vsub.f32 %v10491_v51, %v1139_v8  ;;  %v2140_v21 = vmul.f32 1.442695, %v1555_v0 }
 0x333   :  { %v10712_v37 = vpop.eup %5502  ;;  %4484 = vst.msk [vmem:[%s11638_s1 + $0x7d0] sm:$0xff] %vm328_vm0, %v4164_v54  ;;  %4485 = vst.msk [vmem:[%s11638_s1 + $0x7d8] sm:$0xff] %vm328_vm0, %v4165_v18  ;;  %v3030_v36 = vsel %vm328_vm0, %v10709_v60, 0.0  ;;  %v2142_v38 = vmul.f32 1.442695, %v1556_v6  ;;  %v1152_v9 = vmax.f32 %v1150_v27, %v1151_v57  ;;  %v10747_v57 = vld [vmem:[%s11637_s0 + $0x8e8] sm:$0xff]  ;;  %v1165_v39 = vmax.f32 %v10682_v30, %v1164_v25 }
 0x334   :  { %4486 = vst.msk [vmem:[%s11638_s1 + $0x7e0] sm:$0xff] %vm328_vm0, %v4166_v48  ;;  %4487 = vst.msk [vmem:[%s11638_s1 + $0x7e8] sm:$0xff] %vm328_vm0, %v4167_v59  ;;  %v2144_v51 = vmul.f32 1.442695, %v1557_v13  ;;  %v10732_v17 = vpop.eup %5504  ;;  %v3029_v32 = vadd.f32 %v3028_v35, %v3027_v33  ;;  %v3031_v41 = vsel %vm328_vm0, %v10712_v37, 0.0  ;;  %5510 = vpow2.f32 %v2140_v21  ;;  %v10773_v18 = vld [vmem:[%s11637_s0 + $0x8f8] sm:$0xff] }
 0x335   :  { %4488 = vst.msk [vmem:[%s11638_s1 + $0x7f0] sm:$0x7] %vm336_vm1, %v4168_v10  ;;  %v2146_v63 = vmul.f32 1.442695, %v1558_v26  ;;  %v10740_v5 = vpop.eup %5506  ;;  %v3032_v42 = vadd.f32 %v3031_v41, %v3030_v36  ;;  %v3033_v47 = vsel %vm328_vm0, %v10732_v17, 0.0  ;;  %5512 = vpow2.f32 %v2142_v38 }
 0x336   :  { %v2148_v27 = vmul.f32 1.442695, %v1559_v55  ;;  %v10749_v8 = vpop.eup %5508  ;;  %5514 = vrcp.f32 %v3029_v32  ;;  %v3035_v23 = vsel %vm328_vm0, %v10740_v5, 0.0  ;;  %v1153_v14 = vrot.slane %v1152_v9, 1 }
 0x337   :  { %v3034_v61 = vadd.f32 %v3033_v47, %v3032_v42  ;;  %v3037_v3 = vsel %vm336_vm1, %v10749_v8, 0.0  ;;  %5516 = vpow2.f32 %v2144_v51  ;;  %v1178_v0 = vmax.f32 %v1176_v58, %v1177_v20 }
 0x338   :  { %5518 = vpow2.f32 %v2146_v63  ;;  %v1154_v6 = vmax.f32 %v1152_v9, %v1153_v14  ;;  %v1166_v1 = vrot.slane %v1165_v39, 2  ;;  %v1185_v45 = vsel %vm328_vm0, %v10747_v57, -inf }
 0x339   :  { %v3036_v52 = vadd.f32 %v3035_v23, %v3034_v61  ;;  %5520 = vpow2.f32 %v2148_v27  ;;  %v1179_v30 = vrot.slane %v1178_v0, 4  ;;  %v1186_v25 = vsel %vm328_vm0, %v10757_v34, -inf }
 0x33a   :  { %v1560_v43 = vsub.f32 %v10498_v53, %v1154_v6  ;;  %v1561_v46 = vsub.f32 %v10522_v50, %v1154_v6  ;;  %v1562_v33 = vsub.f32 %v10527_v24, %v1154_v6  ;;  %v1563_v58 = vsub.f32 %v10542_v16, %v1154_v6  ;;  %v10778_v53 = vld [vmem:[%s11637_s0 + $0x900] sm:$0xff] }
 0x33b   :  { %v3038_v20 = vadd.f32 %v3037_v3, %v3036_v52  ;;  %v1564_v13 = vsub.f32 %v10547_v15, %v1154_v6  ;;  %v1167_v26 = vmax.f32 %v1165_v39, %v1166_v1  ;;  %v1180_v54 = vmax.f32 %v1178_v0, %v1179_v30 }
 0x33c   :  { %v2150_v50 = vmul.f32 1.442695, %v1560_v43  ;;  %v2152_v48 = vmul.f32 1.442695, %v1561_v46  ;;  %v2154_v24 = vmul.f32 1.442695, %v1562_v33  ;;  %v1187_v59 = vmax.f32 %v1185_v45, %v1186_v25 }
 0x33d   :  { %v3039_v16 = vrot.slane %v3038_v20, 4  ;;  %v2156_v10 = vmul.f32 1.442695, %v1563_v58  ;;  %v2158_v35 = vmul.f32 1.442695, %v1564_v13  ;;  %v1168_v15 = vrot.slane %v1167_v26, 1 }
 0x33e   :  { %v10780_v55 = vpop.eup %5510  ;;  %5522 = vpow2.f32 %v2150_v50  ;;  %v1181_v21 = vrot.slane %v1180_v54, 2  ;;  %v1188_v36 = vsel %vm328_vm0, %v10773_v18, -inf  ;;  %v10786_v38 = vsel %vm328_vm0, %v10778_v53, -inf }
 0x33f   :  { %v10788_v51 = vpop.eup %5512  ;;  %v3040_v9 = vadd.f32 %v3039_v16, %v3038_v20  ;;  %v3045_v32 = vsel %vm328_vm0, %v10780_v55, 0.0  ;;  %5524 = vpow2.f32 %v2152_v48  ;;  %v10792_v41 = vmax.f32 %v1167_v26, %v1168_v15 }
 0x340   :  { %v5515_v63 = vpop.eup %5514  ;;  %v3046_v42 = vsel %vm328_vm0, %v10788_v51, 0.0  ;;  %5526 = vpow2.f32 %v2154_v24  ;;  %v10796_v47 = vmax.f32 %v1180_v54, %v1181_v21  ;;  %v10798_v27 = vmax.f32 %v1187_v59, %v1188_v36 }
 0x341   :  { %v10800_v23 = vpop.eup %5516  ;;  %v3529_v14 = vmul.f32 %v5515_v63, %v10621_v2  ;;  %v3530_v39 = vmul.f32 %v5515_v63, %v10629_v4  ;;  %v3531_v61 = vmul.f32 %v5515_v63, %v10635_v22  ;;  %v3532_v3 = vmul.f32 %v5515_v63, %v10641_v56 }
 0x342   :  { %v10806_v0 = vpop.eup %5518  ;;  %v3533_v6 = vmul.f32 %v5515_v63, %v10643_v44  ;;  %v3041_v1 = vrot.slane %v3040_v9, 2  ;;  %v3047_v45 = vadd.f32 %v3046_v42, %v3045_v32  ;;  %v3048_v52 = vsel %vm328_vm0, %v10800_v23, 0.0 }
 0x343   :  { %v10811_v30 = vpop.eup %5520  ;;  %v4813_v25 = vadd.f32 -192.0, %v3529_v14  ;;  %v4814_v43 = vadd.f32 -192.0, %v3530_v39  ;;  %v4815_v2 = vadd.f32 -192.0, %v3531_v61  ;;  %v4816_v46 = vadd.f32 -192.0, %v3532_v3 }
 0x344   :  { %v4817_v4 = vadd.f32 -192.0, %v3533_v6  ;;  %v3042_v33 = vadd.f32 %v3041_v1, %v3040_v9  ;;  %v3049_v22 = vadd.f32 %v3048_v52, %v3047_v45  ;;  %v3050_v56 = vsel %vm328_vm0, %v10806_v0, 0.0  ;;  %v10873_v45 = vld [vmem:[%s11637_s0 + $0x918] sm:$0xff]  ;;  %v10878_v52 = vld [vmem:[%s11637_s0 + $0x920] sm:$0xff] }
 0x345   :  { %v4169_v58 = vmax.f32 %v4813_v25, 0.0  ;;  %v4170_v20 = vmax.f32 %v4814_v43, 0.0  ;;  %v4171_v44 = vmax.f32 %v4815_v2, 0.0  ;;  %v4172_v13 = vmax.f32 %v4816_v46, 0.0 }
 0x346   :  { %v4173_v26 = vmax.f32 %v4817_v4, 0.0  ;;  %v3043_v54 = vrot.slane %v3042_v33, 1  ;;  %v3051_v50 = vadd.f32 %v3050_v56, %v3049_v22  ;;  %v3052_v48 = vsel %vm336_vm1, %v10811_v30, 0.0 }
 0x347   :  { %4489 = vst.msk [vmem:[%s11638_s1 + $0x7f8] sm:$0xff] %vm328_vm0, %v4169_v58  ;;  %4490 = vst.msk [vmem:[%s11638_s1 + $0x800] sm:$0xff] %vm328_vm0, %v4170_v20  ;;  %5528 = vpow2.f32 %v2156_v10  ;;  %v1565_v24 = vsub.f32 %v10558_v29, %v10792_v41  ;;  %v1566_v59 = vsub.f32 %v10563_v11, %v10792_v41  ;;  %v1567_v16 = vsub.f32 %v10568_v7, %v10792_v41 }
 0x348   :  { %4491 = vst.msk [vmem:[%s11638_s1 + $0x808] sm:$0xff] %vm328_vm0, %v4171_v44  ;;  %4492 = vst.msk [vmem:[%s11638_s1 + $0x810] sm:$0xff] %vm328_vm0, %v4172_v13  ;;  %v10839_v15 = vpop.eup %5522  ;;  %v3044_v21 = vadd.f32 %v3043_v54, %v3042_v33  ;;  %v3053_v36 = vadd.f32 %v3052_v48, %v3051_v50  ;;  %5530 = vpow2.f32 %v2158_v35  ;;  %v1568_v10 = vsub.f32 %v10573_v31, %v10792_v41  ;;  %v10860_v31 = vld [vmem:[%s11637_s0 + $0x908] sm:$0x7] }
 0x349   :  { %4493 = vst.msk [vmem:[%s11638_s1 + $0x818] sm:$0x7] %vm336_vm1, %v4173_v26  ;;  %v10847_v29 = vpop.eup %5524  ;;  %v3060_v11 = vsel %vm328_vm0, %v10839_v15, 0.0  ;;  %v1569_v7 = vsub.f32 %v10582_v40, %v10792_v41  ;;  %v2160_v9 = vmul.f32 1.442695, %v1565_v24  ;;  %v10867_v41 = vld [vmem:[%s11637_s0 + $0x910] sm:$0xff]  ;;  %v1191_v43 = vmax.f32 %v10798_v27, %v10786_v38 }
 0x34a   :  { %v2162_v32 = vmul.f32 1.442695, %v1566_v59  ;;  %v10853_v63 = vpop.eup %5526  ;;  %5532 = vrcp.f32 %v3044_v21  ;;  %v3054_v42 = vrot.slane %v3053_v36, 4  ;;  %v3061_v35 = vsel %vm328_vm0, %v10847_v29, 0.0 }
 0x34b   :  { %v2164_v14 = vmul.f32 1.442695, %v1567_v16  ;;  %v3062_v39 = vadd.f32 %v3061_v35, %v3060_v11  ;;  %v3063_v61 = vsel %vm328_vm0, %v10853_v63, 0.0  ;;  %5534 = vpow2.f32 %v2160_v9 }
 0x34c   :  { %v2166_v40 = vmul.f32 1.442695, %v1568_v10  ;;  %v3055_v3 = vadd.f32 %v3054_v42, %v3053_v36  ;;  %5536 = vpow2.f32 %v2162_v32  ;;  %v2168_v6 = vmul.f32 1.442695, %v1569_v7 }
 0x34d   :  { %v1183_v1 = vrot.slane %v10796_v47, 1  ;;  %v3064_v25 = vadd.f32 %v3063_v61, %v3062_v39  ;;  %5538 = vpow2.f32 %v2164_v14  ;;  %v1192_v2 = vsel %vm336_vm1, %v10860_v31, -inf }
 0x34e   :  { %v3056_v46 = vrot.slane %v3055_v3, 2  ;;  %5540 = vpow2.f32 %v2166_v40  ;;  %v10887_v33 = vsel %vm328_vm0, %v10867_v41, -inf  ;;  %v1193_v22 = vmax.f32 %v1191_v43, %v1192_v2 }
 0x34f   :  { %v1184_v4 = vmax.f32 %v10796_v47, %v1183_v1  ;;  %5542 = vpow2.f32 %v2168_v6  ;;  %v10891_v56 = vsel %vm328_vm0, %v10873_v45, -inf  ;;  %v1203_v38 = vsel %vm328_vm0, %v10878_v52, -inf }
 0x350   :  { %v3057_v27 = vadd.f32 %v3056_v46, %v3055_v3  ;;  %v1194_v54 = vrot.slane %v1193_v22, 4  ;;  %v1202_v50 = vmax.f32 %v10887_v33, %v10891_v56  ;;  %v10934_v56 = vld [vmem:[%s11637_s0 + $0x928] sm:$0xff] }
 0x351   :  { %v1570_v58 = vsub.f32 %v10589_v49, %v1184_v4  ;;  %v1571_v20 = vsub.f32 %v10594_v28, %v1184_v4  ;;  %v1572_v47 = vsub.f32 %v10607_v12, %v1184_v4  ;;  %v10898_v44 = vpop.eup %5528  ;;  %v1573_v13 = vsub.f32 %v10678_v19, %v1184_v4 }
 0x352   :  { %v1574_v26 = vsub.f32 %v10687_v62, %v1184_v4  ;;  %v10904_v48 = vpop.eup %5530  ;;  %v3058_v24 = vrot.slane %v3057_v27, 1  ;;  %v3065_v49 = vsel %vm328_vm0, %v10898_v44, 0.0  ;;  %v1195_v11 = vmax.f32 %v1193_v22, %v1194_v54 }
 0x353   :  { %v2170_v59 = vmul.f32 1.442695, %v1570_v58  ;;  %v2172_v28 = vmul.f32 1.442695, %v1571_v20  ;;  %v3066_v16 = vadd.f32 %v3065_v49, %v3064_v25  ;;  %v3067_v12 = vsel %vm336_vm1, %v10904_v48, 0.0  ;;  %v10964_v49 = vld [vmem:[%s11637_s0 + $0x938] sm:$0xff] }
 0x354   :  { %v2174_v21 = vmul.f32 1.442695, %v1572_v47  ;;  %v2176_v19 = vmul.f32 1.442695, %v1573_v13  ;;  %v5533_v36 = vpop.eup %5532  ;;  %v3059_v62 = vadd.f32 %v3058_v24, %v3057_v27  ;;  %v2178_v10 = vmul.f32 1.442695, %v1574_v26 }
 0x355   :  { %5544 = vpow2.f32 %v2170_v59  ;;  %v10910_v7 = vpop.eup %5534  ;;  %v3534_v9 = vmul.f32 %v5533_v36, %v10709_v60  ;;  %v3535_v32 = vmul.f32 %v5533_v36, %v10712_v37  ;;  %v3536_v42 = vmul.f32 %v5533_v36, %v10732_v17  ;;  %v10941_v13 = vld [vmem:[%s11637_s0 + $0x930] sm:$0x7] }
 0x356   :  { %v3537_v35 = vmul.f32 %v5533_v36, %v10740_v5  ;;  %v10916_v14 = vpop.eup %5536  ;;  %v3538_v39 = vmul.f32 %v5533_v36, %v10749_v8  ;;  %5546 = vrcp.f32 %v3059_v62  ;;  %v3068_v61 = vadd.f32 %v3067_v12, %v3066_v16  ;;  %v10982_v62 = vld [vmem:[%s11637_s0 + $0x948] sm:$0xff] }
 0x357   :  { %v3075_v40 = vsel %vm328_vm0, %v10910_v7, 0.0  ;;  %v10921_v3 = vpop.eup %5538  ;;  %v4818_v6 = vadd.f32 -192.0, %v3534_v9  ;;  %v4819_v1 = vadd.f32 -192.0, %v3535_v32  ;;  %v4820_v60 = vadd.f32 -192.0, %v3536_v42 }
 0x358   :  { %v4821_v25 = vadd.f32 -192.0, %v3537_v35  ;;  %v10923_v37 = vpop.eup %5540  ;;  %v4822_v17 = vadd.f32 -192.0, %v3538_v39  ;;  %v3069_v43 = vrot.slane %v3068_v61, 4  ;;  %v3076_v5 = vsel %vm328_vm0, %v10916_v14, 0.0 }
 0x359   :  { %v3078_v8 = vsel %vm328_vm0, %v10921_v3, 0.0  ;;  %v10929_v2 = vpop.eup %5542  ;;  %v4174_v46 = vmax.f32 %v4818_v6, 0.0  ;;  %v4175_v4 = vmax.f32 %v4819_v1, 0.0  ;;  %v4176_v33 = vmax.f32 %v4820_v60, 0.0 }
 0x35a   :  { %v4177_v22 = vmax.f32 %v4821_v25, 0.0  ;;  %v4178_v27 = vmax.f32 %v4822_v17, 0.0  ;;  %v3070_v58 = vadd.f32 %v3069_v43, %v3068_v61  ;;  %v3077_v20 = vadd.f32 %v3076_v5, %v3075_v40 }
 0x35b   :  { %v3080_v47 = vsel %vm328_vm0, %v10923_v37, 0.0  ;;  %4494 = vst.msk [vmem:[%s11638_s1 + $0x820] sm:$0xff] %vm328_vm0, %v4174_v46  ;;  %4495 = vst.msk [vmem:[%s11638_s1 + $0x828] sm:$0xff] %vm328_vm0, %v4175_v4  ;;  %v3082_v26 = vsel %vm336_vm1, %v10929_v2, 0.0  ;;  %5548 = vpow2.f32 %v2172_v28  ;;  %v1196_v54 = vrot.slane %v1195_v11, 2 }
 0x35c   :  { %4496 = vst.msk [vmem:[%s11638_s1 + $0x830] sm:$0xff] %vm328_vm0, %v4176_v33  ;;  %4497 = vst.msk [vmem:[%s11638_s1 + $0x838] sm:$0xff] %vm328_vm0, %v4177_v22  ;;  %v1204_v24 = vmax.f32 %v1202_v50, %v1203_v38  ;;  %v3071_v59 = vrot.slane %v3070_v58, 2  ;;  %v3079_v16 = vadd.f32 %v3078_v8, %v3077_v20  ;;  %5550 = vpow2.f32 %v2174_v21  ;;  %v10975_v38 = vld [vmem:[%s11637_s0 + $0x940] sm:$0xff] }
 0x35d   :  { %4498 = vst.msk [vmem:[%s11638_s1 + $0x840] sm:$0x7] %vm336_vm1, %v4178_v27  ;;  %v1205_v12 = vsel %vm328_vm0, %v10934_v56, -inf  ;;  %5552 = vpow2.f32 %v2176_v19  ;;  %v1197_v50 = vmax.f32 %v1195_v11, %v1196_v54  ;;  %v1207_v36 = vsel %vm336_vm1, %v10941_v13, -inf }
 0x35e   :  { %v1206_v28 = vmax.f32 %v1204_v24, %v1205_v12  ;;  %v3072_v9 = vadd.f32 %v3071_v59, %v3070_v58  ;;  %v3081_v32 = vadd.f32 %v3080_v47, %v3079_v16  ;;  %5554 = vpow2.f32 %v2178_v10 }
 0x35f   :  { %v10984_v21 = vpop.eup %5544  ;;  %v10988_v42 = vsel %vm328_vm0, %v10964_v49, -inf  ;;  %v1198_v11 = vrot.slane %v1197_v50, 1  ;;  %v1216_v39 = vsel %vm328_vm0, %v10975_v38, -inf  ;;  %v1218_v10 = vsel %vm328_vm0, %v10982_v62, -inf }
 0x360   :  { %v3090_v19 = vsel %vm328_vm0, %v10984_v21, 0.0  ;;  %v10992_v35 = vmax.f32 %v1206_v28, %v1207_v36  ;;  %v5547_v61 = vpop.eup %5546  ;;  %v3073_v40 = vrot.slane %v3072_v9, 1  ;;  %v3083_v6 = vadd.f32 %v3082_v26, %v3081_v32 }
 0x361   :  { %v1217_v1 = vmax.f32 %v10988_v42, %v1216_v39  ;;  %v3539_v60 = vmul.f32 %v5547_v61, %v10780_v55  ;;  %v3540_v25 = vmul.f32 %v5547_v61, %v10788_v51  ;;  %v3541_v17 = vmul.f32 %v5547_v61, %v10800_v23 }
 0x362   :  { %v3542_v43 = vmul.f32 %v5547_v61, %v10806_v0  ;;  %v3543_v5 = vmul.f32 %v5547_v61, %v10811_v30  ;;  %v3074_v8 = vadd.f32 %v3073_v40, %v3072_v9  ;;  %v3084_v46 = vrot.slane %v3083_v6, 4 }
 0x363   :  { %v1199_v4 = vmax.f32 %v1197_v50, %v1198_v11  ;;  %v4823_v33 = vadd.f32 -192.0, %v3539_v60  ;;  %v4824_v22 = vadd.f32 -192.0, %v3540_v25  ;;  %v4825_v27 = vadd.f32 -192.0, %v3541_v17 }
 0x364   :  { %v4826_v58 = vadd.f32 -192.0, %v3542_v43  ;;  %v4827_v20 = vadd.f32 -192.0, %v3543_v5  ;;  %5556 = vrcp.f32 %v3074_v8  ;;  %v3085_v47 = vadd.f32 %v3084_v46, %v3083_v6  ;;  %v11053_v6 = vld [vmem:[%s11637_s0 + $0x950] sm:$0xff]  ;;  %v11059_v8 = vld [vmem:[%s11637_s0 + $0x960] sm:$0xff]  ;;  %v11064_v46 = vld [vmem:[%s11637_s0 + $0x968] sm:$0xff] }
 0x365   :  { %v1575_v55 = vsub.f32 %v10747_v57, %v1199_v4  ;;  %v11005_v26 = vpop.eup %5548  ;;  %v4179_v51 = vmax.f32 %v4823_v33, 0.0  ;;  %v4180_v23 = vmax.f32 %v4824_v22, 0.0  ;;  %v4181_v54 = vmax.f32 %v4825_v27, 0.0 }
 0x366   :  { %v4182_v0 = vmax.f32 %v4826_v58, 0.0  ;;  %v11007_v24 = vpop.eup %5550  ;;  %v4183_v30 = vmax.f32 %v4827_v20, 0.0  ;;  %v3086_v59 = vrot.slane %v3085_v47, 2  ;;  %v3091_v16 = vsel %vm328_vm0, %v11005_v26, 0.0 }
 0x367   :  { %v1576_v12 = vsub.f32 %v10757_v34, %v1199_v4  ;;  %v11012_v50 = vpop.eup %5552  ;;  %4499 = vst.msk [vmem:[%s11638_s1 + $0x848] sm:$0xff] %vm328_vm0, %v4179_v51  ;;  %4500 = vst.msk [vmem:[%s11638_s1 + $0x850] sm:$0xff] %vm328_vm0, %v4180_v23  ;;  %v3092_v57 = vadd.f32 %v3091_v16, %v3090_v19  ;;  %v3093_v34 = vsel %vm328_vm0, %v11007_v24, 0.0  ;;  %v1577_v28 = vsub.f32 %v10773_v18, %v1199_v4  ;;  %v11046_v18 = vld [vmem:[%s11637_s0 + $0x958] sm:$0x7] }
 0x368   :  { %4501 = vst.msk [vmem:[%s11638_s1 + $0x858] sm:$0xff] %vm328_vm0, %v4181_v54  ;;  %4502 = vst.msk [vmem:[%s11638_s1 + $0x860] sm:$0xff] %vm328_vm0, %v4182_v0  ;;  %v1578_v36 = vsub.f32 %v10778_v53, %v1199_v4  ;;  %v11034_v9 = vpop.eup %5554  ;;  %v3087_v32 = vadd.f32 %v3086_v59, %v3085_v47  ;;  %v3095_v42 = vsel %vm328_vm0, %v11012_v50, 0.0  ;;  %v1579_v19 = vsub.f32 %v10860_v31, %v1199_v4  ;;  %v11069_v4 = vld [vmem:[%s11637_s0 + $0x970] sm:$0xff] }
 0x369   :  { %4503 = vst.msk [vmem:[%s11638_s1 + $0x868] sm:$0x7] %vm336_vm1, %v4183_v30  ;;  %v2180_v11 = vmul.f32 1.442695, %v1575_v55  ;;  %v3094_v53 = vadd.f32 %v3093_v34, %v3092_v57  ;;  %v3097_v39 = vsel %vm336_vm1, %v11034_v9, 0.0  ;;  %v1209_v43 = vrot.slane %v10992_v35, 4 }
 0x36a   :  { %v2182_v61 = vmul.f32 1.442695, %v1576_v12  ;;  %v2184_v40 = vmul.f32 1.442695, %v1577_v28  ;;  %v3088_v60 = vrot.slane %v3087_v32, 1  ;;  %v1219_v5 = vmax.f32 %v1217_v1, %v1218_v10 }
 0x36b   :  { %5558 = vpow2.f32 %v2180_v11  ;;  %v2186_v31 = vmul.f32 1.442695, %v1578_v36  ;;  %v2188_v25 = vmul.f32 1.442695, %v1579_v19  ;;  %v3096_v17 = vadd.f32 %v3095_v42, %v3094_v53 }
 0x36c   :  { %5560 = vpow2.f32 %v2182_v61  ;;  %v3089_v33 = vadd.f32 %v3088_v60, %v3087_v32  ;;  %v1220_v1 = vsel %vm328_vm0, %v11053_v6, -inf  ;;  %v1222_v10 = vsel %vm336_vm1, %v11046_v18, -inf }
 0x36d   :  { %5562 = vpow2.f32 %v2184_v40  ;;  %v3098_v22 = vadd.f32 %v3097_v39, %v3096_v17  ;;  %v1210_v27 = vmax.f32 %v10992_v35, %v1209_v43  ;;  %v1221_v58 = vmax.f32 %v1219_v5, %v1220_v1 }
 0x36e   :  { %5564 = vpow2.f32 %v2186_v31  ;;  %v5557_v20 = vpop.eup %5556  ;;  %v1230_v47 = vsel %vm328_vm0, %v11059_v8, -inf  ;;  %v1231_v55 = vsel %vm328_vm0, %v11064_v46, -inf  ;;  %v1233_v51 = vsel %vm328_vm0, %v11069_v4, -inf  ;;  %v11102_v31 = vld [vmem:[%s11637_s0 + $0x988] sm:$0xff] }
 0x36f   :  { %5566 = vrcp.f32 %v3089_v33  ;;  %v3544_v23 = vmul.f32 %v5557_v20, %v10839_v15  ;;  %v3545_v54 = vmul.f32 %v5557_v20, %v10847_v29  ;;  %v3546_v0 = vmul.f32 %v5557_v20, %v10853_v63  ;;  %v11090_v15 = vld [vmem:[%s11637_s0 + $0x978] sm:$0xff]  ;;  %v11095_v29 = vld [vmem:[%s11637_s0 + $0x980] sm:$0x7] }
 0x370   :  { %v3547_v35 = vmul.f32 %v5557_v20, %v10898_v44  ;;  %v3548_v30 = vmul.f32 %v5557_v20, %v10904_v48  ;;  %v3099_v59 = vrot.slane %v3098_v22, 4  ;;  %5568 = vpow2.f32 %v2188_v25 }
 0x371   :  { %v1211_v16 = vrot.slane %v1210_v27, 2  ;;  %v4828_v12 = vadd.f32 -192.0, %v3544_v23  ;;  %v4829_v57 = vadd.f32 -192.0, %v3545_v54  ;;  %v4830_v34 = vadd.f32 -192.0, %v3546_v0 }
 0x372   :  { %v4831_v28 = vadd.f32 -192.0, %v3547_v35  ;;  %v4832_v36 = vadd.f32 -192.0, %v3548_v30  ;;  %v3100_v32 = vadd.f32 %v3099_v59, %v3098_v22  ;;  %v1223_v19 = vmax.f32 %v1221_v58, %v1222_v10 }
 0x373   :  { %v1212_v42 = vmax.f32 %v1210_v27, %v1211_v16  ;;  %v4184_v63 = vmax.f32 %v4828_v12, 0.0  ;;  %v4185_v44 = vmax.f32 %v4829_v57, 0.0  ;;  %v4186_v48 = vmax.f32 %v4830_v34, 0.0 }
 0x374   :  { %v4187_v11 = vmax.f32 %v4831_v28, 0.0  ;;  %v4188_v39 = vmax.f32 %v4832_v36, 0.0  ;;  %v3101_v61 = vrot.slane %v3100_v32, 2  ;;  %v1224_v60 = vrot.slane %v1223_v19, 4 }
 0x375   :  { %v11097_v53 = vpop.eup %5558  ;;  %v1213_v40 = vrot.slane %v1212_v42, 1  ;;  %4504 = vst.msk [vmem:[%s11638_s1 + $0x870] sm:$0xff] %vm328_vm0, %v4184_v63  ;;  %4505 = vst.msk [vmem:[%s11638_s1 + $0x878] sm:$0xff] %vm328_vm0, %v4185_v44  ;;  %v1232_v43 = vmax.f32 %v1230_v47, %v1231_v55  ;;  %v1235_v5 = vsel %vm328_vm0, %v11090_v15, -inf  ;;  %v1237_v33 = vsel %vm336_vm1, %v11095_v29, -inf }
 0x376   :  { %v11104_v25 = vpop.eup %5560  ;;  %4506 = vst.msk [vmem:[%s11638_s1 + $0x880] sm:$0xff] %vm328_vm0, %v4186_v48  ;;  %4507 = vst.msk [vmem:[%s11638_s1 + $0x888] sm:$0xff] %vm328_vm0, %v4187_v11  ;;  %v3105_v17 = vsel %vm328_vm0, %v11097_v53, 0.0  ;;  %v3102_v10 = vadd.f32 %v3101_v61, %v3100_v32  ;;  %v1225_v58 = vmax.f32 %v1223_v19, %v1224_v60  ;;  %v11142_v54 = vsel %vm328_vm0, %v11102_v31, -inf }
 0x377   :  { %v11128_v1 = vpop.eup %5562  ;;  %4508 = vst.msk [vmem:[%s11638_s1 + $0x890] sm:$0x7] %vm336_vm1, %v4188_v39  ;;  %v3106_v22 = vsel %vm328_vm0, %v11104_v25, 0.0  ;;  %v1214_v27 = vmax.f32 %v1212_v42, %v1213_v40  ;;  %v1234_v23 = vmax.f32 %v1232_v43, %v1233_v51  ;;  %v11173_v43 = vld [vmem:[%s11637_s0 + $0x9a0] sm:$0xff] }
 0x378   :  { %v11136_v20 = vpop.eup %5564  ;;  %v3107_v47 = vadd.f32 %v3106_v22, %v3105_v17  ;;  %v3108_v55 = vsel %vm328_vm0, %v11128_v1, 0.0  ;;  %v3103_v35 = vrot.slane %v3102_v10, 1  ;;  %v11168_v17 = vld [vmem:[%s11637_s0 + $0x998] sm:$0xff] }
 0x379   :  { %v5567_v0 = vpop.eup %5566  ;;  %v3110_v30 = vsel %vm328_vm0, %v11136_v20, 0.0  ;;  %v1580_v59 = vsub.f32 %v10867_v41, %v1214_v27  ;;  %v1581_v16 = vsub.f32 %v10873_v45, %v1214_v27  ;;  %v1582_v19 = vsub.f32 %v10878_v52, %v1214_v27 }
 0x37a   :  { %v3549_v12 = vmul.f32 %v5567_v0, %v10910_v7  ;;  %v3550_v57 = vmul.f32 %v5567_v0, %v10916_v14  ;;  %v3551_v34 = vmul.f32 %v5567_v0, %v10921_v3  ;;  %v3552_v51 = vmul.f32 %v5567_v0, %v10923_v37  ;;  %v11152_v28 = vpop.eup %5568 }
 0x37b   :  { %v3553_v36 = vmul.f32 %v5567_v0, %v10929_v2  ;;  %v3104_v32 = vadd.f32 %v3103_v35, %v3102_v10  ;;  %v3109_v42 = vadd.f32 %v3108_v55, %v3107_v47  ;;  %v3112_v14 = vsel %vm336_vm1, %v11152_v28, 0.0  ;;  %v11161_v2 = vld [vmem:[%s11637_s0 + $0x990] sm:$0xff]  ;;  %v11178_v10 = vld [vmem:[%s11637_s0 + $0x9a8] sm:$0x7] }
 0x37c   :  { %v4833_v63 = vadd.f32 -192.0, %v3549_v12  ;;  %v4834_v41 = vadd.f32 -192.0, %v3550_v57  ;;  %v4835_v44 = vadd.f32 -192.0, %v3551_v34  ;;  %v4836_v45 = vadd.f32 -192.0, %v3552_v51  ;;  %v11208_v57 = vld [vmem:[%s11637_s0 + $0x9b0] sm:$0xff] }
 0x37d   :  { %v4837_v48 = vadd.f32 -192.0, %v3553_v36  ;;  %5570 = vrcp.f32 %v3104_v32  ;;  %v3111_v7 = vadd.f32 %v3110_v30, %v3109_v42  ;;  %v1583_v40 = vsub.f32 %v10934_v56, %v1214_v27 }
 0x37e   :  { %v4189_v3 = vmax.f32 %v4833_v63, 0.0  ;;  %v4190_v37 = vmax.f32 %v4834_v41, 0.0  ;;  %v4191_v11 = vmax.f32 %v4835_v44, 0.0  ;;  %v4192_v39 = vmax.f32 %v4836_v45, 0.0 }
 0x37f   :  { %v4193_v52 = vmax.f32 %v4837_v48, 0.0  ;;  %v3113_v61 = vadd.f32 %v3112_v14, %v3111_v7  ;;  %v1584_v60 = vsub.f32 %v10941_v13, %v1214_v27  ;;  %v2190_v56 = vmul.f32 1.442695, %v1580_v59 }
 0x380   :  { %4509 = vst.msk [vmem:[%s11638_s1 + $0x898] sm:$0xff] %vm328_vm0, %v4189_v3  ;;  %4510 = vst.msk [vmem:[%s11638_s1 + $0x8a0] sm:$0xff] %vm328_vm0, %v4190_v37  ;;  %v2192_v13 = vmul.f32 1.442695, %v1581_v16  ;;  %v2194_v22 = vmul.f32 1.442695, %v1582_v19  ;;  %v1236_v27 = vmax.f32 %v1234_v23, %v1235_v5 }
 0x381   :  { %4511 = vst.msk [vmem:[%s11638_s1 + $0x8a8] sm:$0xff] %vm328_vm0, %v4191_v11  ;;  %4512 = vst.msk [vmem:[%s11638_s1 + $0x8b0] sm:$0xff] %vm328_vm0, %v4192_v39  ;;  %v3114_v47 = vrot.slane %v3113_v61, 4  ;;  %v2196_v55 = vmul.f32 1.442695, %v1583_v40  ;;  %v1226_v35 = vrot.slane %v1225_v58, 2  ;;  %5572 = vpow2.f32 %v2190_v56 }
 0x382   :  { %4513 = vst.msk [vmem:[%s11638_s1 + $0x8b8] sm:$0x7] %vm336_vm1, %v4193_v52  ;;  %v2198_v0 = vmul.f32 1.442695, %v1584_v60  ;;  %v1238_v30 = vmax.f32 %v1236_v27, %v1237_v33  ;;  %v1246_v12 = vsel %vm328_vm0, %v11161_v2, -inf  ;;  %v1248_v59 = vsel %vm328_vm0, %v11168_v17, -inf }
 0x383   :  { %v3115_v16 = vadd.f32 %v3114_v47, %v3113_v61  ;;  %5574 = vpow2.f32 %v2192_v13  ;;  %v1227_v5 = vmax.f32 %v1225_v58, %v1226_v35  ;;  %v1247_v23 = vmax.f32 %v11142_v54, %v1246_v12  ;;  %v11213_v33 = vld [vmem:[%s11637_s0 + $0x9b8] sm:$0xff] }
 0x384   :  { %5576 = vpow2.f32 %v2194_v22  ;;  %v1239_v34 = vrot.slane %v1238_v30, 4  ;;  %v11217_v51 = vsel %vm328_vm0, %v11173_v43, -inf  ;;  %v11221_v58 = vsel %vm336_vm1, %v11178_v10, -inf }
 0x385   :  { %v3116_v54 = vrot.slane %v3115_v16, 2  ;;  %5578 = vpow2.f32 %v2196_v55  ;;  %v1228_v36 = vrot.slane %v1227_v5, 1  ;;  %v1249_v32 = vmax.f32 %v1247_v23, %v1248_v59 }
 0x386   :  { %5580 = vpow2.f32 %v2198_v0  ;;  %v1240_v42 = vmax.f32 %v1238_v30, %v1239_v34  ;;  %v11225_v19 = vsel %vm328_vm0, %v11208_v57, -inf  ;;  %v11229_v63 = vsel %vm328_vm0, %v11213_v33, -inf }
 0x387   :  { %v5571_v41 = vpop.eup %5570  ;;  %v3117_v44 = vadd.f32 %v3116_v54, %v3115_v16  ;;  %v1229_v45 = vmax.f32 %v1227_v5, %v1228_v36  ;;  %v1251_v48 = vmax.f32 %v1249_v32, %v11217_v51  ;;  %v1262_v7 = vmax.f32 %v11225_v19, %v11229_v63  ;;  %v11286_v36 = vld [vmem:[%s11637_s0 + $0x9c8] sm:$0xff] }
 0x388   :  { %v3554_v14 = vmul.f32 %v5571_v41, %v10984_v21  ;;  %v3555_v3 = vmul.f32 %v5571_v41, %v11005_v26  ;;  %v3556_v37 = vmul.f32 %v5571_v41, %v11007_v24  ;;  %v3557_v11 = vmul.f32 %v5571_v41, %v11012_v50 }
 0x389   :  { %v3558_v39 = vmul.f32 %v5571_v41, %v11034_v9  ;;  %v3118_v52 = vrot.slane %v3117_v44, 1  ;;  %v1585_v61 = vsub.f32 %v10964_v49, %v1229_v45  ;;  %v1586_v40 = vsub.f32 %v10975_v38, %v1229_v45 }
 0x38a   :  { %v4838_v60 = vadd.f32 -192.0, %v3554_v14  ;;  %v4839_v56 = vadd.f32 -192.0, %v3555_v3  ;;  %v4840_v13 = vadd.f32 -192.0, %v3556_v37  ;;  %v4841_v22 = vadd.f32 -192.0, %v3557_v11  ;;  %v11298_v11 = vld [vmem:[%s11637_s0 + $0x9d0] sm:$0x7] }
 0x38b   :  { %v4842_v27 = vadd.f32 -192.0, %v3558_v39  ;;  %v3119_v47 = vadd.f32 %v3118_v52, %v3117_v44  ;;  %v1587_v21 = vsub.f32 %v10982_v62, %v1229_v45  ;;  %v1588_v26 = vsub.f32 %v11053_v6, %v1229_v45  ;;  %v11243_v24 = vpop.eup %5572  ;;  %v11253_v62 = vld [vmem:[%s11637_s0 + $0x9c0] sm:$0xff]  ;;  %v11303_v39 = vld [vmem:[%s11637_s0 + $0x9d8] sm:$0xff] }
 0x38c   :  { %v4194_v50 = vmax.f32 %v4838_v60, 0.0  ;;  %v4195_v55 = vmax.f32 %v4839_v56, 0.0  ;;  %v4196_v9 = vmax.f32 %v4840_v13, 0.0  ;;  %v4197_v0 = vmax.f32 %v4841_v22, 0.0 }
 0x38d   :  { %v11245_v35 = vpop.eup %5574  ;;  %v4198_v49 = vmax.f32 %v4842_v27, 0.0  ;;  %5582 = vrcp.f32 %v3119_v47  ;;  %v3120_v38 = vsel %vm328_vm0, %v11243_v24, 0.0  ;;  %v1589_v30 = vsub.f32 %v11046_v18, %v1229_v45 }
 0x38e   :  { %v11255_v6 = vpop.eup %5576  ;;  %4514 = vst.msk [vmem:[%s11638_s1 + $0x8c0] sm:$0xff] %vm328_vm0, %v4194_v50  ;;  %4515 = vst.msk [vmem:[%s11638_s1 + $0x8c8] sm:$0xff] %vm328_vm0, %v4195_v55  ;;  %v3121_v18 = vsel %vm328_vm0, %v11245_v35, 0.0  ;;  %v2200_v12 = vmul.f32 1.442695, %v1585_v61  ;;  %v1241_v16 = vrot.slane %v1240_v42, 2  ;;  %v1253_v37 = vmax.f32 %v1251_v48, %v11221_v58 }
 0x38f   :  { %4516 = vst.msk [vmem:[%s11638_s1 + $0x8d0] sm:$0xff] %vm328_vm0, %v4196_v9  ;;  %4517 = vst.msk [vmem:[%s11638_s1 + $0x8d8] sm:$0xff] %vm328_vm0, %v4197_v0  ;;  %v2202_v59 = vmul.f32 1.442695, %v1586_v40  ;;  %v11275_v5 = vpop.eup %5578  ;;  %v3122_v23 = vadd.f32 %v3121_v18, %v3120_v38  ;;  %v3123_v34 = vsel %vm328_vm0, %v11255_v6, 0.0  ;;  %v1265_v61 = vsel %vm328_vm0, %v11286_v36, -inf }
 0x390   :  { %4518 = vst.msk [vmem:[%s11638_s1 + $0x8e0] sm:$0x7] %vm336_vm1, %v4198_v49  ;;  %v2204_v51 = vmul.f32 1.442695, %v1587_v21  ;;  %v2206_v54 = vmul.f32 1.442695, %v1588_v26  ;;  %v11288_v32 = vpop.eup %5580  ;;  %5584 = vpow2.f32 %v2200_v12  ;;  %v1242_v45 = vmax.f32 %v1240_v42, %v1241_v16 }
 0x391   :  { %v3125_v41 = vsel %vm328_vm0, %v11275_v5, 0.0  ;;  %v2208_v44 = vmul.f32 1.442695, %v1589_v30  ;;  %v3124_v14 = vadd.f32 %v3123_v34, %v3122_v23  ;;  %v3127_v3 = vsel %vm336_vm1, %v11288_v32, 0.0  ;;  %v11312_v58 = vld [vmem:[%s11637_s0 + $0x9e0] sm:$0xff] }
 0x392   :  { %5586 = vpow2.f32 %v2202_v59  ;;  %v1243_v52 = vrot.slane %v1242_v45, 1  ;;  %v1263_v42 = vsel %vm328_vm0, %v11253_v62, -inf  ;;  %v1254_v40 = vrot.slane %v1253_v37, 4 }
 0x393   :  { %5588 = vpow2.f32 %v2204_v51  ;;  %v3126_v48 = vadd.f32 %v3125_v41, %v3124_v14  ;;  %v1264_v60 = vmax.f32 %v1262_v7, %v1263_v42  ;;  %v1267_v13 = vsel %vm336_vm1, %v11298_v11, -inf }
 0x394   :  { %5590 = vpow2.f32 %v2206_v54  ;;  %v1244_v56 = vmax.f32 %v1242_v45, %v1243_v52  ;;  %v11321_v22 = vsel %vm328_vm0, %v11303_v39, -inf  ;;  %v1255_v47 = vmax.f32 %v1253_v37, %v1254_v40 }
 0x395   :  { %5592 = vpow2.f32 %v2208_v44  ;;  %v3128_v27 = vadd.f32 %v3127_v3, %v3126_v48  ;;  %v1266_v21 = vmax.f32 %v1264_v60, %v1265_v61  ;;  %v11325_v26 = vsel %vm328_vm0, %v11312_v58, -inf }
 0x396   :  { %v1590_v50 = vsub.f32 %v11059_v8, %v1244_v56  ;;  %v1591_v19 = vsub.f32 %v11064_v46, %v1244_v56  ;;  %v1592_v63 = vsub.f32 %v11069_v4, %v1244_v56  ;;  %v1593_v7 = vsub.f32 %v11090_v15, %v1244_v56 }
 0x397   :  { %v5583_v55 = vpop.eup %5582  ;;  %v3129_v9 = vrot.slane %v3128_v27, 4  ;;  %v1594_v0 = vsub.f32 %v11095_v29, %v1244_v56  ;;  %v1256_v49 = vrot.slane %v1255_v47, 2  ;;  %v1268_v38 = vmax.f32 %v1266_v21, %v1267_v13  ;;  %v11374_v56 = vld [vmem:[%s11637_s0 + $0x9e8] sm:$0xff] }
 0x398   :  { %v3559_v30 = vmul.f32 %v5583_v55, %v11097_v53  ;;  %v3560_v18 = vmul.f32 %v5583_v55, %v11104_v25  ;;  %v3561_v12 = vmul.f32 %v5583_v55, %v11128_v1  ;;  %v3562_v8 = vmul.f32 %v5583_v55, %v11136_v20 }
 0x399   :  { %v3563_v46 = vmul.f32 %v5583_v55, %v11152_v28  ;;  %v3130_v59 = vadd.f32 %v3129_v9, %v3128_v27  ;;  %v2210_v4 = vmul.f32 1.442695, %v1590_v50  ;;  %v2212_v16 = vmul.f32 1.442695, %v1591_v19  ;;  %v11385_v9 = vld [vmem:[%s11637_s0 + $0x9f0] sm:$0xff] }
 0x39a   :  { %v11337_v15 = vpop.eup %5584  ;;  %v4843_v23 = vadd.f32 -192.0, %v3559_v30  ;;  %v4844_v34 = vadd.f32 -192.0, %v3560_v18  ;;  %v4845_v29 = vadd.f32 -192.0, %v3561_v12  ;;  %v4846_v51 = vadd.f32 -192.0, %v3562_v8 }
 0x39b   :  { %v4847_v53 = vadd.f32 -192.0, %v3563_v46  ;;  %v3131_v41 = vrot.slane %v3130_v59, 2  ;;  %v3135_v25 = vsel %vm328_vm0, %v11337_v15, 0.0  ;;  %5594 = vpow2.f32 %v2210_v4 }
 0x39c   :  { %v11339_v54 = vpop.eup %5586  ;;  %v4199_v20 = vmax.f32 %v4843_v23, 0.0  ;;  %v4200_v28 = vmax.f32 %v4844_v34, 0.0  ;;  %v4201_v44 = vmax.f32 %v4845_v29, 0.0  ;;  %v4202_v45 = vmax.f32 %v4846_v51, 0.0 }
 0x39d   :  { %v11343_v1 = vpop.eup %5588  ;;  %v4203_v3 = vmax.f32 %v4847_v53, 0.0  ;;  %v3132_v37 = vadd.f32 %v3131_v41, %v3130_v59  ;;  %v3136_v52 = vsel %vm328_vm0, %v11339_v54, 0.0  ;;  %5596 = vpow2.f32 %v2212_v16 }
 0x39e   :  { %v11345_v14 = vpop.eup %5590  ;;  %v3138_v42 = vsel %vm328_vm0, %v11343_v1, 0.0  ;;  %4519 = vst.msk [vmem:[%s11638_s1 + $0x8e8] sm:$0xff] %vm328_vm0, %v4199_v20  ;;  %4520 = vst.msk [vmem:[%s11638_s1 + $0x8f0] sm:$0xff] %vm328_vm0, %v4200_v28  ;;  %v3137_v48 = vadd.f32 %v3136_v52, %v3135_v25  ;;  %v2214_v60 = vmul.f32 1.442695, %v1592_v63  ;;  %v1257_v55 = vmax.f32 %v1255_v47, %v1256_v49 }
 0x39f   :  { %v11351_v61 = vpop.eup %5592  ;;  %4521 = vst.msk [vmem:[%s11638_s1 + $0x8f8] sm:$0xff] %vm328_vm0, %v4201_v44  ;;  %4522 = vst.msk [vmem:[%s11638_s1 + $0x900] sm:$0xff] %vm328_vm0, %v4202_v45  ;;  %v3140_v40 = vsel %vm328_vm0, %v11345_v14, 0.0  ;;  %v3133_v13 = vrot.slane %v3132_v37, 1  ;;  %v2216_v21 = vmul.f32 1.442695, %v1593_v7  ;;  %v1277_v18 = vmax.f32 %v11321_v22, %v11325_v26 }
 0x3a0   :  { %4523 = vst.msk [vmem:[%s11638_s1 + $0x908] sm:$0x7] %vm336_vm1, %v4203_v3  ;;  %v3142_v27 = vsel %vm336_vm1, %v11351_v61, 0.0  ;;  %v2218_v50 = vmul.f32 1.442695, %v1594_v0  ;;  %v3139_v19 = vadd.f32 %v3138_v42, %v3137_v48  ;;  %5598 = vpow2.f32 %v2214_v60 }
 0x3a1   :  { %v1269_v63 = vrot.slane %v1268_v38, 4  ;;  %v3134_v30 = vadd.f32 %v3133_v13, %v3132_v37  ;;  %5600 = vpow2.f32 %v2216_v21  ;;  %v1278_v12 = vsel %vm328_vm0, %v11374_v56, -inf  ;;  %v11394_v47 = vld [vmem:[%s11637_s0 + $0x9f8] sm:$0x7] }
 0x3a2   :  { %v3141_v8 = vadd.f32 %v3140_v40, %v3139_v19  ;;  %5602 = vpow2.f32 %v2218_v50  ;;  %v1258_v7 = vrot.slane %v1257_v55, 1  ;;  %v1279_v49 = vmax.f32 %v1277_v18, %v1278_v12 }
 0x3a3   :  { %v1270_v0 = vmax.f32 %v1268_v38, %v1269_v63  ;;  %5604 = vrcp.f32 %v3134_v30  ;;  %v1280_v46 = vsel %vm328_vm0, %v11385_v9, -inf  ;;  %v1282_v23 = vsel %vm336_vm1, %v11394_v47, -inf }
 0x3a4   :  { %v3143_v59 = vadd.f32 %v3142_v27, %v3141_v8  ;;  %v1259_v4 = vmax.f32 %v1257_v55, %v1258_v7  ;;  %v1281_v16 = vmax.f32 %v1279_v49, %v1280_v46 }
 0x3a5   :  { %v1271_v22 = vrot.slane %v1270_v0, 2  ;;  %v11398_v26 = vpop.eup %5594 }
 0x3a6   :  { %v3144_v38 = vrot.slane %v3143_v59, 4  ;;  %v3150_v34 = vsel %vm328_vm0, %v11398_v26, 0.0  ;;  %v1595_v29 = vsub.f32 %v11102_v31, %v1259_v4  ;;  %v1596_v51 = vsub.f32 %v11161_v2, %v1259_v4 }
 0x3a7   :  { %v1597_v53 = vsub.f32 %v11168_v17, %v1259_v4  ;;  %v1598_v41 = vsub.f32 %v11173_v43, %v1259_v4  ;;  %v1599_v25 = vsub.f32 %v11178_v10, %v1259_v4  ;;  %v1272_v20 = vmax.f32 %v1270_v0, %v1271_v22  ;;  %v11409_v28 = vpop.eup %5596 }
 0x3a8   :  { %v3145_v44 = vadd.f32 %v3144_v38, %v3143_v59  ;;  %v2220_v45 = vmul.f32 1.442695, %v1595_v29  ;;  %v2222_v3 = vmul.f32 1.442695, %v1596_v51  ;;  %v11411_v37 = vmax.f32 %v1281_v16, %v1282_v23 }
 0x3a9   :  { %v3151_v52 = vsel %vm328_vm0, %v11409_v28, 0.0  ;;  %v2224_v31 = vmul.f32 1.442695, %v1597_v53  ;;  %v2226_v42 = vmul.f32 1.442695, %v1598_v41  ;;  %v1273_v2 = vrot.slane %v1272_v20, 1 }
 0x3aa   :  { %v11415_v48 = vpop.eup %5598  ;;  %v3146_v17 = vrot.slane %v3145_v44, 2  ;;  %v3152_v43 = vadd.f32 %v3151_v52, %v3150_v34  ;;  %5606 = vpow2.f32 %v2220_v45  ;;  %v2228_v10 = vmul.f32 1.442695, %v1599_v25 }
 0x3ab   :  { %v11417_v40 = vpop.eup %5600  ;;  %v3153_v60 = vsel %vm328_vm0, %v11415_v48, 0.0  ;;  %5608 = vpow2.f32 %v2222_v3  ;;  %v1274_v13 = vmax.f32 %v1272_v20, %v1273_v2  ;;  %v1284_v27 = vrot.slane %v11411_v37, 4 }
 0x3ac   :  { %v11422_v21 = vpop.eup %5602  ;;  %v3147_v50 = vadd.f32 %v3146_v17, %v3145_v44  ;;  %v3154_v19 = vadd.f32 %v3153_v60, %v3152_v43  ;;  %v3155_v55 = vsel %vm328_vm0, %v11417_v40, 0.0  ;;  %5610 = vpow2.f32 %v2224_v31 }
 0x3ad   :  { %v5605_v63 = vpop.eup %5604  ;;  %v3157_v30 = vsel %vm336_vm1, %v11422_v21, 0.0  ;;  %5612 = vpow2.f32 %v2226_v42  ;;  %v1600_v18 = vsub.f32 %v11208_v57, %v1274_v13  ;;  %v1601_v12 = vsub.f32 %v11213_v33, %v1274_v13 }
 0x3ae   :  { %v3564_v8 = vmul.f32 %v5605_v63, %v11243_v24  ;;  %v3565_v7 = vmul.f32 %v5605_v63, %v11245_v35  ;;  %v3566_v0 = vmul.f32 %v5605_v63, %v11255_v6  ;;  %v3567_v49 = vmul.f32 %v5605_v63, %v11275_v5 }
 0x3af   :  { %v3568_v46 = vmul.f32 %v5605_v63, %v11288_v32  ;;  %v3148_v59 = vrot.slane %v3147_v50, 1  ;;  %v3156_v4 = vadd.f32 %v3155_v55, %v3154_v19  ;;  %5614 = vpow2.f32 %v2228_v10 }
 0x3b0   :  { %v4848_v22 = vadd.f32 -192.0, %v3564_v8  ;;  %v4849_v16 = vadd.f32 -192.0, %v3565_v7  ;;  %v4850_v23 = vadd.f32 -192.0, %v3566_v0  ;;  %v4851_v38 = vadd.f32 -192.0, %v3567_v49 }
 0x3b1   :  { %v4852_v57 = vadd.f32 -192.0, %v3568_v46  ;;  %v3149_v34 = vadd.f32 %v3148_v59, %v3147_v50  ;;  %v3158_v33 = vadd.f32 %v3157_v30, %v3156_v4  ;;  %v1602_v24 = vsub.f32 %v11253_v62, %v1274_v13 }
 0x3b2   :  { %v4204_v29 = vmax.f32 %v4848_v22, 0.0  ;;  %v4205_v35 = vmax.f32 %v4849_v16, 0.0  ;;  %v4206_v51 = vmax.f32 %v4850_v23, 0.0  ;;  %v4207_v6 = vmax.f32 %v4851_v38, 0.0 }
 0x3b3   :  { %v4208_v53 = vmax.f32 %v4852_v57, 0.0  ;;  %5616 = vrcp.f32 %v3149_v34  ;;  %v3159_v5 = vrot.slane %v3158_v33, 4  ;;  %v1603_v32 = vsub.f32 %v11286_v36, %v1274_v13 }
 0x3b4   :  { %v11437_v41 = vpop.eup %5606  ;;  %4524 = vst.msk [vmem:[%s11638_s1 + $0x910] sm:$0xff] %vm328_vm0, %v4204_v29  ;;  %4525 = vst.msk [vmem:[%s11638_s1 + $0x918] sm:$0xff] %vm328_vm0, %v4205_v35  ;;  %v1604_v62 = vsub.f32 %v11298_v11, %v1274_v13  ;;  %v2230_v36 = vmul.f32 1.442695, %v1600_v18  ;;  %v2232_v25 = vmul.f32 1.442695, %v1601_v12  ;;  %v1285_v31 = vmax.f32 %v11411_v37, %v1284_v27 }
 0x3b5   :  { %4526 = vst.msk [vmem:[%s11638_s1 + $0x920] sm:$0xff] %vm328_vm0, %v4206_v51  ;;  %4527 = vst.msk [vmem:[%s11638_s1 + $0x928] sm:$0xff] %vm328_vm0, %v4207_v6  ;;  %v2234_v20 = vmul.f32 1.442695, %v1602_v24  ;;  %v11456_v44 = vpop.eup %5608  ;;  %v3160_v45 = vadd.f32 %v3159_v5, %v3158_v33  ;;  %v3165_v3 = vsel %vm328_vm0, %v11437_v41, 0.0 }
 0x3b6   :  { %4528 = vst.msk [vmem:[%s11638_s1 + $0x930] sm:$0x7] %vm336_vm1, %v4208_v53  ;;  %v2236_v52 = vmul.f32 1.442695, %v1603_v32  ;;  %v11465_v42 = vpop.eup %5610  ;;  %v3166_v11 = vsel %vm328_vm0, %v11456_v44, 0.0  ;;  %5618 = vpow2.f32 %v2230_v36  ;;  %v1286_v37 = vrot.slane %v1285_v31, 2 }
 0x3b7   :  { %v2238_v2 = vmul.f32 1.442695, %v1604_v62  ;;  %v11469_v17 = vpop.eup %5612  ;;  %v3161_v43 = vrot.slane %v3160_v45, 2  ;;  %v3167_v10 = vadd.f32 %v3166_v11, %v3165_v3  ;;  %v3168_v60 = vsel %vm328_vm0, %v11465_v42, 0.0 }
 0x3b8   :  { %5620 = vpow2.f32 %v2232_v25  ;;  %v3170_v13 = vsel %vm328_vm0, %v11469_v17, 0.0  ;;  %v1287_v63 = vmax.f32 %v1285_v31, %v1286_v37 }
 0x3b9   :  { %5622 = vpow2.f32 %v2234_v20  ;;  %v11475_v27 = vpop.eup %5614  ;;  %v3162_v50 = vadd.f32 %v3161_v43, %v3160_v45  ;;  %v3169_v19 = vadd.f32 %v3168_v60, %v3167_v10 }
 0x3ba   :  { %5624 = vpow2.f32 %v2236_v52  ;;  %v3172_v55 = vsel %vm336_vm1, %v11475_v27, 0.0  ;;  %v1288_v12 = vrot.slane %v1287_v63, 1 }
 0x3bb   :  { %v3163_v30 = vrot.slane %v3162_v50, 1  ;;  %v3171_v18 = vadd.f32 %v3170_v13, %v3169_v19  ;;  %5626 = vpow2.f32 %v2238_v2 }
 0x3bc   :  { %v1289_v23 = vmax.f32 %v1287_v63, %v1288_v12 }
 0x3bd   :  { %v5617_v8 = vpop.eup %5616  ;;  %v3164_v7 = vadd.f32 %v3163_v30, %v3162_v50  ;;  %v3173_v0 = vadd.f32 %v3172_v55, %v3171_v18 }
 0x3be   :  { %v3569_v49 = vmul.f32 %v5617_v8, %v11337_v15  ;;  %v3570_v46 = vmul.f32 %v5617_v8, %v11339_v54  ;;  %v3571_v59 = vmul.f32 %v5617_v8, %v11343_v1  ;;  %v3572_v4 = vmul.f32 %v5617_v8, %v11345_v14 }
 0x3bf   :  { %v3573_v22 = vmul.f32 %v5617_v8, %v11351_v61  ;;  %5628 = vrcp.f32 %v3164_v7  ;;  %v3174_v16 = vrot.slane %v3173_v0, 4  ;;  %v1605_v1 = vsub.f32 %v11303_v39, %v1289_v23 }
 0x3c0   :  { %v11484_v38 = vpop.eup %5618  ;;  %v4853_v57 = vadd.f32 -192.0, %v3569_v49  ;;  %v4854_v34 = vadd.f32 -192.0, %v3570_v46  ;;  %v4855_v33 = vadd.f32 -192.0, %v3571_v59  ;;  %v4856_v24 = vadd.f32 -192.0, %v3572_v4 }
 0x3c1   :  { %v4857_v15 = vadd.f32 -192.0, %v3573_v22  ;;  %v3175_v35 = vadd.f32 %v3174_v16, %v3173_v0  ;;  %v3180_v54 = vsel %vm328_vm0, %v11484_v38, 0.0  ;;  %v1606_v20 = vsub.f32 %v11312_v58, %v1289_v23 }
 0x3c2   :  { %v11486_v29 = vpop.eup %5620  ;;  %v4209_v61 = vmax.f32 %v4853_v57, 0.0  ;;  %v4210_v51 = vmax.f32 %v4854_v34, 0.0  ;;  %v4211_v6 = vmax.f32 %v4855_v33, 0.0  ;;  %v4212_v53 = vmax.f32 %v4856_v24, 0.0 }
 0x3c3   :  { %v11491_v14 = vpop.eup %5622  ;;  %v4213_v32 = vmax.f32 %v4857_v15, 0.0  ;;  %v3176_v62 = vrot.slane %v3175_v35, 2  ;;  %v3181_v36 = vsel %vm328_vm0, %v11486_v29, 0.0  ;;  %v1607_v31 = vsub.f32 %v11374_v56, %v1289_v23 }
 0x3c4   :  { %v11493_v5 = vpop.eup %5624  ;;  %v3183_v25 = vsel %vm328_vm0, %v11491_v14, 0.0  ;;  %4529 = vst.msk [vmem:[%s11638_s1 + $0x938] sm:$0xff] %vm328_vm0, %v4209_v61  ;;  %4530 = vst.msk [vmem:[%s11638_s1 + $0x940] sm:$0xff] %vm328_vm0, %v4210_v51  ;;  %v3182_v39 = vadd.f32 %v3181_v36, %v3180_v54  ;;  %v1608_v11 = vsub.f32 %v11385_v9, %v1289_v23  ;;  %v2240_v43 = vmul.f32 1.442695, %v1605_v1 }
 0x3c5   :  { %4531 = vst.msk [vmem:[%s11638_s1 + $0x948] sm:$0xff] %vm328_vm0, %v4211_v6  ;;  %4532 = vst.msk [vmem:[%s11638_s1 + $0x950] sm:$0xff] %vm328_vm0, %v4212_v53  ;;  %v11516_v45 = vpop.eup %5626  ;;  %v3177_v3 = vadd.f32 %v3176_v62, %v3175_v35  ;;  %v3185_v52 = vsel %vm328_vm0, %v11493_v5, 0.0  ;;  %v2242_v10 = vmul.f32 1.442695, %v1606_v20  ;;  %v1609_v58 = vsub.f32 %v11394_v47, %v1289_v23 }
 0x3c6   :  { %4533 = vst.msk [vmem:[%s11638_s1 + $0x958] sm:$0x7] %vm336_vm1, %v4213_v32  ;;  %v3184_v2 = vadd.f32 %v3183_v25, %v3182_v39  ;;  %v3187_v37 = vsel %vm336_vm1, %v11516_v45, 0.0  ;;  %5630 = vpow2.f32 %v2240_v43  ;;  %v2244_v55 = vmul.f32 1.442695, %v1607_v31 }
 0x3c7   :  { %v3178_v60 = vrot.slane %v3177_v3, 1  ;;  %5632 = vpow2.f32 %v2242_v10  ;;  %v2246_v63 = vmul.f32 1.442695, %v1608_v11  ;;  %v2248_v8 = vmul.f32 1.442695, %v1609_v58 }
 0x3c8   :  { %v3186_v13 = vadd.f32 %v3185_v52, %v3184_v2 }
 0x3c9   :  { %v5629_v50 = vpop.eup %5628  ;;  %v3179_v19 = vadd.f32 %v3178_v60, %v3177_v3 }
 0x3ca   :  { %v3574_v56 = vmul.f32 %v5629_v50, %v11398_v26  ;;  %v3575_v9 = vmul.f32 %v5629_v50, %v11409_v28  ;;  %v3576_v30 = vmul.f32 %v5629_v50, %v11415_v48  ;;  %v3577_v18 = vmul.f32 %v5629_v50, %v11417_v40 }
 0x3cb   :  { %v3578_v47 = vmul.f32 %v5629_v50, %v11422_v21  ;;  %5634 = vrcp.f32 %v3179_v19  ;;  %v3188_v12 = vadd.f32 %v3187_v37, %v3186_v13 }
 0x3cc   :  { %v4858_v7 = vadd.f32 -192.0, %v3574_v56  ;;  %v4859_v0 = vadd.f32 -192.0, %v3575_v9  ;;  %v4860_v49 = vadd.f32 -192.0, %v3576_v30  ;;  %v4861_v46 = vadd.f32 -192.0, %v3577_v18 }
 0x3cd   :  { %v4862_v59 = vadd.f32 -192.0, %v3578_v47  ;;  %v3189_v4 = vrot.slane %v3188_v12, 4  ;;  %5636 = vpow2.f32 %v2244_v55 }
 0x3ce   :  { %v4214_v22 = vmax.f32 %v4858_v7, 0.0  ;;  %v4215_v26 = vmax.f32 %v4859_v0, 0.0  ;;  %v4216_v16 = vmax.f32 %v4860_v49, 0.0  ;;  %v4217_v28 = vmax.f32 %v4861_v46, 0.0 }
 0x3cf   :  { %v4218_v23 = vmax.f32 %v4862_v59, 0.0  ;;  %v3190_v48 = vadd.f32 %v3189_v4, %v3188_v12  ;;  %5638 = vpow2.f32 %v2246_v63 }
 0x3d0   :  { %4534 = vst.msk [vmem:[%s11638_s1 + $0x960] sm:$0xff] %vm328_vm0, %v4214_v22  ;;  %4535 = vst.msk [vmem:[%s11638_s1 + $0x968] sm:$0xff] %vm328_vm0, %v4215_v26  ;;  %5640 = vpow2.f32 %v2248_v8  ;;  %v11554_v21 = vpop.eup %5630 }
 0x3d1   :  { %4536 = vst.msk [vmem:[%s11638_s1 + $0x970] sm:$0xff] %vm328_vm0, %v4216_v16  ;;  %4537 = vst.msk [vmem:[%s11638_s1 + $0x978] sm:$0xff] %vm328_vm0, %v4217_v28  ;;  %v3191_v40 = vrot.slane %v3190_v48, 2  ;;  %v11556_v57 = vpop.eup %5632  ;;  %v3195_v33 = vsel %vm328_vm0, %v11554_v21, 0.0 }
 0x3d2   :  { %4538 = vst.msk [vmem:[%s11638_s1 + $0x980] sm:$0x7] %vm336_vm1, %v4218_v23  ;;  %v3196_v24 = vsel %vm328_vm0, %v11556_v57, 0.0 }
 0x3d3   :  { %v3192_v34 = vadd.f32 %v3191_v40, %v3190_v48  ;;  %v3197_v62 = vadd.f32 %v3196_v24, %v3195_v33 }
 0x3d5   :  { %v5635_v15 = vpop.eup %5634  ;;  %v3193_v35 = vrot.slane %v3192_v34, 1 }
 0x3d6   :  { %v3579_v54 = vmul.f32 %v5635_v15, %v11437_v41  ;;  %v3580_v1 = vmul.f32 %v5635_v15, %v11456_v44  ;;  %v3581_v61 = vmul.f32 %v5635_v15, %v11465_v42  ;;  %v3582_v51 = vmul.f32 %v5635_v15, %v11469_v17 }
 0x3d7   :  { %v5637_v6 = vpop.eup %5636  ;;  %v3583_v53 = vmul.f32 %v5635_v15, %v11475_v27  ;;  %v3194_v32 = vadd.f32 %v3193_v35, %v3192_v34 }
 0x3d8   :  { %v4863_v36 = vadd.f32 -192.0, %v3579_v54  ;;  %v4864_v25 = vadd.f32 -192.0, %v3580_v1  ;;  %v4865_v39 = vadd.f32 -192.0, %v3581_v61  ;;  %v4866_v20 = vadd.f32 -192.0, %v3582_v51 }
 0x3d9   :  { %v5639_v3 = vpop.eup %5638  ;;  %v4867_v52 = vadd.f32 -192.0, %v3583_v53  ;;  %5642 = vrcp.f32 %v3194_v32  ;;  %v3198_v41 = vsel %vm328_vm0, %v5637_v6, 0.0 }
 0x3da   :  { %v5641_v31 = vpop.eup %5640  ;;  %v4219_v44 = vmax.f32 %v4863_v36, 0.0  ;;  %v4220_v11 = vmax.f32 %v4864_v25, 0.0  ;;  %v4221_v42 = vmax.f32 %v4865_v39, 0.0  ;;  %v4222_v2 = vmax.f32 %v4866_v20, 0.0 }
 0x3db   :  { %v4223_v17 = vmax.f32 %v4867_v52, 0.0  ;;  %v3199_v43 = vadd.f32 %v3198_v41, %v3197_v62  ;;  %v3200_v27 = vsel %vm328_vm0, %v5639_v3, 0.0  ;;  %v3202_v10 = vsel %vm336_vm1, %v5641_v31, 0.0 }
 0x3dc   :  { %4539 = vst.msk [vmem:[%s11638_s1 + $0x988] sm:$0xff] %vm328_vm0, %v4219_v44  ;;  %4540 = vst.msk [vmem:[%s11638_s1 + $0x990] sm:$0xff] %vm328_vm0, %v4220_v11 }
 0x3dd   :  { %4541 = vst.msk [vmem:[%s11638_s1 + $0x998] sm:$0xff] %vm328_vm0, %v4221_v42  ;;  %4542 = vst.msk [vmem:[%s11638_s1 + $0x9a0] sm:$0xff] %vm328_vm0, %v4222_v2  ;;  %v3201_v60 = vadd.f32 %v3200_v27, %v3199_v43 }
 0x3de   :  { %4543 = vst.msk [vmem:[%s11638_s1 + $0x9a8] sm:$0x7] %vm336_vm1, %v4223_v17 }
 0x3df   :  { %v3203_v58 = vadd.f32 %v3202_v10, %v3201_v60 }
 0x3e1   :  { %v3204_v13 = vrot.slane %v3203_v58, 4 }
 0x3e3   :  { %v5643_v37 = vpop.eup %5642  ;;  %v3205_v50 = vadd.f32 %v3204_v13, %v3203_v58 }
 0x3e4   :  { %v3584_v19 = vmul.f32 %v5643_v37, %v11484_v38  ;;  %v3585_v55 = vmul.f32 %v5643_v37, %v11486_v29  ;;  %v3586_v63 = vmul.f32 %v5643_v37, %v11491_v14  ;;  %v3587_v56 = vmul.f32 %v5643_v37, %v11493_v5 }
 0x3e5   :  { %v3588_v9 = vmul.f32 %v5643_v37, %v11516_v45  ;;  %v3206_v30 = vrot.slane %v3205_v50, 2 }
 0x3e6   :  { %v4868_v18 = vadd.f32 -192.0, %v3584_v19  ;;  %v4869_v47 = vadd.f32 -192.0, %v3585_v55  ;;  %v4870_v12 = vadd.f32 -192.0, %v3586_v63  ;;  %v4871_v8 = vadd.f32 -192.0, %v3587_v56 }
 0x3e7   :  { %v4872_v7 = vadd.f32 -192.0, %v3588_v9  ;;  %v3207_v0 = vadd.f32 %v3206_v30, %v3205_v50 }
 0x3e8   :  { %v4224_v49 = vmax.f32 %v4868_v18, 0.0  ;;  %v4225_v46 = vmax.f32 %v4869_v47, 0.0  ;;  %v4226_v59 = vmax.f32 %v4870_v12, 0.0  ;;  %v4227_v4 = vmax.f32 %v4871_v8, 0.0 }
 0x3e9   :  { %v4228_v38 = vmax.f32 %v4872_v7, 0.0  ;;  %v3208_v22 = vrot.slane %v3207_v0, 1 }
 0x3ea   :  { %4544 = vst.msk [vmem:[%s11638_s1 + $0x9b0] sm:$0xff] %vm328_vm0, %v4224_v49  ;;  %4545 = vst.msk [vmem:[%s11638_s1 + $0x9b8] sm:$0xff] %vm328_vm0, %v4225_v46 }
 0x3eb   :  { %4546 = vst.msk [vmem:[%s11638_s1 + $0x9c0] sm:$0xff] %vm328_vm0, %v4226_v59  ;;  %4547 = vst.msk [vmem:[%s11638_s1 + $0x9c8] sm:$0xff] %vm328_vm0, %v4227_v4  ;;  %v3209_v29 = vadd.f32 %v3208_v22, %v3207_v0 }
 0x3ec   :  { %4548 = vst.msk [vmem:[%s11638_s1 + $0x9d0] sm:$0x7] %vm336_vm1, %v4228_v38 }
 0x3ed   :  { %5644 = vrcp.f32 %v3209_v29 }
 0x3f7   :  { %v5645_v14 = vpop.eup %5644 }
 0x3f8   :  { %v3589_v5 = vmul.f32 %v5645_v14, %v11554_v21  ;;  %v3590_v45 = vmul.f32 %v5645_v14, %v11556_v57  ;;  %v3591_v26 = vmul.f32 %v5645_v14, %v5637_v6  ;;  %v3592_v16 = vmul.f32 %v5645_v14, %v5639_v3 }
 0x3f9   :  { %v3593_v28 = vmul.f32 %v5645_v14, %v5641_v31 }
 0x3fa   :  { %v4873_v23 = vadd.f32 -192.0, %v3589_v5  ;;  %v4874_v48 = vadd.f32 -192.0, %v3590_v45  ;;  %v4875_v40 = vadd.f32 -192.0, %v3591_v26  ;;  %v4876_v34 = vadd.f32 -192.0, %v3592_v16 }
 0x3fb   :  { %v4877_v33 = vadd.f32 -192.0, %v3593_v28 }
 0x3fc   :  { %v4229_v24 = vmax.f32 %v4873_v23, 0.0  ;;  %v4230_v15 = vmax.f32 %v4874_v48, 0.0  ;;  %v4231_v35 = vmax.f32 %v4875_v40, 0.0  ;;  %v4232_v54 = vmax.f32 %v4876_v34, 0.0 }
 0x3fd   :  { %v4233_v1 = vmax.f32 %v4877_v33, 0.0 }
 0x3fe   :  { %4549 = vst.msk [vmem:[%s11638_s1 + $0x9d8] sm:$0xff] %vm328_vm0, %v4229_v24  ;;  %4550 = vst.msk [vmem:[%s11638_s1 + $0x9e0] sm:$0xff] %vm328_vm0, %v4230_v15 }
 0x3ff   :  { %4551 = vst.msk [vmem:[%s11638_s1 + $0x9e8] sm:$0xff] %vm328_vm0, %v4231_v35  ;;  %4552 = vst.msk [vmem:[%s11638_s1 + $0x9f0] sm:$0xff] %vm328_vm0, %v4232_v54 }
 0x400   :  { %4553 = vst.msk [vmem:[%s11638_s1 + $0x9f8] sm:$0x7] %vm336_vm1, %v4233_v1 }

</bundles_post_ra>
